<compile_context>
chip_gen: v7x
topology: tpu7x:2x2x1
jax: 0.10.0
libtpu: 0.0.40
codegen_flags: <defaults>
</compile_context>

<pallas_src>
import functools

import jax
import jax.numpy as jnp
from jax.experimental import pallas as pl
from jax.experimental.pallas import tpu as pltpu

BN_EPS = 1e-5
_VMEM_LIMIT = 48 * 1024 * 1024  # stays well inside v7x's 64 MiB/TC; fine on v5e/v6e


def _cparams(sem):
    return pltpu.CompilerParams(dimension_semantics=sem, vmem_limit_bytes=_VMEM_LIMIT)


def _pick_tile(m, cap=512):
    """Largest row tile <= cap that divides m (multiple of 8), else the full extent."""
    if m <= cap:
        return m
    t = cap - (cap % 8)
    while t >= 8:
        if m % t == 0:
            return t
        t -= 8
    return m


# ----------------------------- Pallas kernels ------------------------------


def _matmul_bias_kernel(x_ref, w_ref, b_ref, o_ref, *, relu):
    # (tm, K) @ (K, N) on the MXU; BN scale is pre-folded into w, so epilogue is bias(+ReLU).
    acc = jnp.dot(x_ref[...], w_ref[...], preferred_element_type=jnp.float32)
    y = acc + b_ref[...]
    if relu:
        y = jnp.maximum(y, 0.0)
    o_ref[...] = y.astype(o_ref.dtype)


def matmul_bias(x, w, bias, relu):
    M, K = x.shape
    N = w.shape[1]
    tm = _pick_tile(M)
    kern = functools.partial(_matmul_bias_kernel, relu=relu)
    return pl.pallas_call(
        kern,
        out_shape=jax.ShapeDtypeStruct((M, N), jnp.float32),
        grid=(M // tm,),
        in_specs=[
            pl.BlockSpec((tm, K), lambda i: (i, 0)),
            pl.BlockSpec((K, N), lambda i: (0, 0)),
            pl.BlockSpec((1, N), lambda i: (0, 0)),
        ],
        out_specs=pl.BlockSpec((tm, N), lambda i: (i, 0)),
        compiler_params=_cparams(("parallel",)),
    )(x, w, bias.reshape(1, N))


def _dwconv_kernel(xp_ref, w_ref, b_ref, o_ref, *, H, W):
    # Depthwise 3x3 (stride 1) on one padded image slab; 9 taps generated in-kernel.
    v = xp_ref[0]                                    # (H+2, W+2, C)
    acc = v[0:H, 0:W, :] * w_ref[0]                  # tap (0, 0)
    for k in range(1, 9):
        dy, dx = divmod(k, 3)
        acc = acc + v[dy:dy + H, dx:dx + W, :] * w_ref[k]
    o_ref[0] = (acc + b_ref[...]).astype(o_ref.dtype)


def _maxpool_kernel(xp_ref, o_ref, *, H, W):
    v = xp_ref[0]                                    # (H+2, W+2, C)
    m = v[0:H, 0:W, :]
    for k in range(1, 9):
        dy, dx = divmod(k, 3)
        m = jnp.maximum(m, v[dy:dy + H, dx:dx + W, :])
    o_ref[0] = m


def _head_kernel(x_ref, w5_ref, b5_ref, wf_ref, fb_ref, o_ref, *, inv_hw):
    # Fused conv5 (1x1, BN folded, ReLU) + global mean over spatial + fc, per image.
    y = jnp.dot(x_ref[0], w5_ref[...], preferred_element_type=jnp.float32) + b5_ref[...]
    y = jnp.maximum(y, 0.0)                          # (HW, C5)
    pooled = jnp.sum(y, axis=0, keepdims=True) * inv_hw      # (1, C5)
    logits = jnp.dot(pooled, wf_ref[...], preferred_element_type=jnp.float32) + fb_ref[...]
    o_ref[0] = logits.astype(o_ref.dtype)


# ------------------------------ layer wrappers -------------------------------


def fold_bn(bn):
    scale = bn["gamma"] / jnp.sqrt(bn["var"] + BN_EPS)
    bias = bn["beta"] - bn["mean"] * scale
    return scale, bias


def conv1x1_bn(x, w, bn, relu=True):
    # w: (cout, cin, 1, 1) PyTorch layout; BN scale folded into the weight columns.
    N, H, W, C = x.shape
    cout = w.shape[0]
    scale, bias = fold_bn(bn)
    wm = w.reshape(cout, C).T * scale[None, :]
    y = matmul_bias(x.reshape(N * H * W, C), wm, bias, relu)
    return y.reshape(N, H, W, cout)


def conv3x3_bn_relu(x, w, bn):
    # Full 3x3 conv (stride 1, pad 1) via im2col + MXU matmul; w: (cout, cin, 3, 3).
    # cin is tiny (input channels), so the im2col glue is cheap; K = cin*9.
    N, H, W, C = x.shape
    cout = w.shape[0]
    scale, bias = fold_bn(bn)
    xp = jnp.pad(x, ((0, 0), (1, 1), (1, 1), (0, 0)))
    cols = []
    for dy in range(3):
        for dx in range(3):
            cols.append(xp[:, dy:dy + H, dx:dx + W, :])
    p = jnp.stack(cols, axis=-1).reshape(N * H * W, C * 9)   # flat order c*9 + (dy*3+dx)
    wm = w.reshape(cout, C * 9).T * scale[None, :]
    y = matmul_bias(p, wm, bias, relu=True)
    return y.reshape(N, H, W, cout)


def dwconv3x3_bn(x, w, bn, stride):
    # Depthwise conv, w: (C, 1, 3, 3), BN (no ReLU).  BN scale folded into tap weights.
    N, H, W, C = x.shape
    scale, bias = fold_bn(bn)
    w_taps = (w.reshape(C, 9).T * scale[None, :]).reshape(9, 1, C)
    xp = jnp.pad(x, ((0, 0), (1, 1), (1, 1), (0, 0)))
    y = pl.pallas_call(
        functools.partial(_dwconv_kernel, H=H, W=W),
        out_shape=jax.ShapeDtypeStruct((N, H, W, C), jnp.float32),
        grid=(N,),
        in_specs=[
            pl.BlockSpec((1, H + 2, W + 2, C), lambda n: (n, 0, 0, 0)),
            pl.BlockSpec((9, 1, C), lambda n: (0, 0, 0)),
            pl.BlockSpec((1, C), lambda n: (0, 0)),
        ],
        out_specs=pl.BlockSpec((1, H, W, C), lambda n: (n, 0, 0, 0)),
        compiler_params=_cparams(("parallel",)),
    )(xp, w_taps, bias.reshape(1, C))
    if stride == 2:
        # TODO(synk): subsample in glue (stride-1 result == stride-2 at even offsets);
        #             an in-kernel strided store would avoid writing the skipped rows.
        y = y[:, ::2, ::2, :]
    return y


def maxpool3x3_s2(x):
    N, H, W, C = x.shape
    neg = jnp.finfo(jnp.float32).min
    xp = jnp.pad(x, ((0, 0), (1, 1), (1, 1), (0, 0)), constant_values=neg)
    y = pl.pallas_call(
        functools.partial(_maxpool_kernel, H=H, W=W),
        out_shape=jax.ShapeDtypeStruct((N, H, W, C), jnp.float32),
        grid=(N,),
        in_specs=[pl.BlockSpec((1, H + 2, W + 2, C), lambda n: (n, 0, 0, 0))],
        out_specs=pl.BlockSpec((1, H, W, C), lambda n: (n, 0, 0, 0)),
        compiler_params=_cparams(("parallel",)),
    )(xp)
    return y[:, ::2, ::2, :]


def head_conv5_pool_fc(x, w5, bn5, fc_w, fc_b):
    # conv5 (1x1 + BN + ReLU) + global average pool + fc fused into one kernel.
    N, H, W, C = x.shape
    c5 = w5.shape[0]
    nc = fc_w.shape[0]
    scale, bias = fold_bn(bn5)
    w5m = w5.reshape(c5, C).T * scale[None, :]
    wf = fc_w.T
    xr = x.reshape(N, H * W, C)
    out = pl.pallas_call(
        functools.partial(_head_kernel, inv_hw=1.0 / (H * W)),
        out_shape=jax.ShapeDtypeStruct((N, 1, nc), jnp.float32),
        grid=(N,),
        in_specs=[
            pl.BlockSpec((1, H * W, C), lambda n: (n, 0, 0)),
            pl.BlockSpec((C, c5), lambda n: (0, 0)),
            pl.BlockSpec((1, c5), lambda n: (0, 0)),
            pl.BlockSpec((c5, nc), lambda n: (0, 0)),
            pl.BlockSpec((1, nc), lambda n: (0, 0)),
        ],
        out_specs=pl.BlockSpec((1, 1, nc), lambda n: (n, 0, 0)),
        compiler_params=_cparams(("parallel",)),
    )(xr, w5m, bias.reshape(1, c5), wf, fc_b.reshape(1, nc))
    return out.reshape(N, nc)


# ------------------------------ network glue ---------------------------------


def channel_shuffle_nhwc(x, groups):
    # equivalent to torchvision channel_shuffle (permutation of the channel axis)
    N, H, W, C = x.shape
    x = x.reshape(N, H, W, groups, C // groups)
    x = jnp.swapaxes(x, 3, 4)
    return x.reshape(N, H, W, C)


def branch1_fwd(x, p, stride):
    y = dwconv3x3_bn(x, p["dw_w"], p["dw_bn"], stride)
    y = conv1x1_bn(y, p["pw_w"], p["pw_bn"], relu=True)
    return y


def branch2_fwd(x, p, stride):
    y = conv1x1_bn(x, p["pw1_w"], p["pw1_bn"], relu=True)
    y = dwconv3x3_bn(y, p["dw_w"], p["dw_bn"], stride)
    y = conv1x1_bn(y, p["pw2_w"], p["pw2_bn"], relu=True)
    return y


def inverted_residual(x, p):
    stride = p["stride"]
    if stride == 1:
        c = x.shape[-1]
        x1 = x[..., : c // 2]
        x2 = x[..., c // 2:]
        out = jnp.concatenate([x1, branch2_fwd(x2, p["branch2"], stride)], axis=-1)
    else:
        b1 = branch1_fwd(x, p["branch1"], stride)
        b2 = branch2_fwd(x, p["branch2"], stride)
        out = jnp.concatenate([b1, b2], axis=-1)
    return channel_shuffle_nhwc(out, 2)


def shufflenet_forward(params, x_nchw):
    x = jnp.transpose(x_nchw, (0, 2, 3, 1))  # NCHW -> NHWC
    x = conv3x3_bn_relu(x, params["conv1_w"], params["conv1_bn"])
    x = maxpool3x3_s2(x)
    for blk in params["stage2"] + params["stage3"] + params["stage4"]:
        x = inverted_residual(x, blk)
    return head_conv5_pool_fc(
        x, params["conv5_w"], params["conv5_bn"], params["fc_w"], params["fc_b"]
    )


# --------------------------- deterministic params ---------------------------


def conv_w(key, cout, cin, kh, kw):
    return jax.random.normal(key, (cout, cin, kh, kw), jnp.float32) * 0.05


def init_bn(key, c):
    k1, k2 = jax.random.split(key)
    return dict(
        gamma=jax.random.uniform(k1, (c,), jnp.float32, 0.5, 1.5),
        beta=jax.random.normal(k2, (c,), jnp.float32) * 0.1,
        mean=jnp.zeros((c,), jnp.float32),
        var=jnp.ones((c,), jnp.float32),
    )


def init_block(key, inp, outp, stride):
    bf = outp // 2  # branch_features
    ks = jax.random.split(key, 10)
    p = {"stride": stride}
    if stride > 1:
        p["branch1"] = dict(
            dw_w=conv_w(ks[0], inp, 1, 3, 3),
            dw_bn=init_bn(ks[1], inp),
            pw_w=conv_w(ks[2], bf, inp, 1, 1),
            pw_bn=init_bn(ks[3], bf),
        )
        b2_in = inp
    else:
        b2_in = bf  # inp == outp, branch2 sees inp // 2
    p["branch2"] = dict(
        pw1_w=conv_w(ks[4], bf, b2_in, 1, 1),
        pw1_bn=init_bn(ks[5], bf),
        dw_w=conv_w(ks[6], bf, 1, 3, 3),
        dw_bn=init_bn(ks[7], bf),
        pw2_w=conv_w(ks[8], bf, bf, 1, 1),
        pw2_bn=init_bn(ks[9], bf),
    )
    return p


def init_stage(key, inp, outp, repeats):
    keys = jax.random.split(key, repeats)
    blocks = [init_block(keys[0], inp, outp, stride=2)]
    for i in range(1, repeats):
        blocks.append(init_block(keys[i], outp, outp, stride=1))
    return blocks


def init_params(key, num_channels, num_classes):
    stages_repeats = [4, 8, 4]
    stages_out = [24, 116, 232, 464, 1024]
    keys = jax.random.split(key, 8)
    params = {}
    params["conv1_w"] = conv_w(keys[0], stages_out[0], num_channels, 3, 3)
    params["conv1_bn"] = init_bn(keys[1], stages_out[0])
    inp = stages_out[0]
    for i, (name, reps, outp) in enumerate(
        zip(["stage2", "stage3", "stage4"], stages_repeats, stages_out[1:4])
    ):
        params[name] = init_stage(keys[2 + i], inp, outp, reps)
        inp = outp
    params["conv5_w"] = conv_w(keys[5], stages_out[4], inp, 1, 1)
    params["conv5_bn"] = init_bn(keys[6], stages_out[4])
    kf1, kf2 = jax.random.split(keys[7])
    params["fc_w"] = jax.random.normal(kf1, (num_classes, stages_out[4]), jnp.float32) * 0.02
    params["fc_b"] = jax.random.normal(kf2, (num_classes,), jnp.float32) * 0.01
    return params


# ---------------------------------- main -------------------------------------

if __name__ == "__main__":
    key = jax.random.PRNGKey(0)
    kp, kx = jax.random.split(key)
    num_channels, num_classes = 3, 10
    params = init_params(kp, num_channels, num_classes)
    x = jax.random.normal(kx, (2, num_channels, 16, 16), jnp.float32)  # NCHW like PyTorch

    fwd = jax.jit(functools.partial(shufflenet_forward, params))
    out = jax.block_until_ready(fwd(x))

    assert out.shape == (2, num_classes), out.shape
    assert bool(jnp.all(jnp.isfinite(out)))
    print("KERNEL_OK")
</pallas_src>

<mosaic_0001>
module attributes {stable_mosaic.version = 11 : i64} {
  func.func @_matmul_bias_kernel(%arg0: i32, %arg1: memref<512x27xf32, #tpu.memory_space<vmem>>, %arg2: memref<27x24xf32, #tpu.memory_space<vmem>>, %arg3: memref<1x24xf32, #tpu.memory_space<vmem>>, %arg4: memref<512x24xf32, #tpu.memory_space<vmem>>) attributes {dimension_semantics = [#tpu.dimension_semantics<parallel>], iteration_bounds = array<i64: 1>, scalar_prefetch = 0 : i64, scratch_operands = 0 : i64, tpu.core_type = #tpu.core_type<tc>, window_params = [{transform_indices = @transform_0, window_bounds = array<i64: 512, 27>}, {pipeline_mode = #tpu.pipeline_mode<synchronous>, transform_indices = @transform_1, window_bounds = array<i64: 27, 24>}, {pipeline_mode = #tpu.pipeline_mode<synchronous>, transform_indices = @transform_2, window_bounds = array<i64: 1, 24>}, {transform_indices = @transform_3, window_bounds = array<i64: 512, 24>}]} {
    %c0 = arith.constant 0 : index
    %c0_0 = arith.constant 0 : index
    %0 = vector.load %arg1[%c0, %c0_0] : memref<512x27xf32, #tpu.memory_space<vmem>>, vector<512x27xf32>
    %c0_1 = arith.constant 0 : index
    %c0_2 = arith.constant 0 : index
    %1 = vector.load %arg2[%c0_1, %c0_2] : memref<27x24xf32, #tpu.memory_space<vmem>>, vector<27x24xf32>
    %cst = arith.constant dense<0.000000e+00> : vector<512x24xf32>
    %2 = tpu.matmul %0, %1, %cst {dimension_numbers = #tpu.dot_dimension_numbers<[1], [0], [0], [1], [0, 0, 1, 1], [], []>} : vector<512x27xf32>, vector<27x24xf32>, vector<512x24xf32> -> vector<512x24xf32>
    %c0_3 = arith.constant 0 : index
    %c0_4 = arith.constant 0 : index
    %3 = vector.load %arg3[%c0_3, %c0_4] : memref<1x24xf32, #tpu.memory_space<vmem>>, vector<1x24xf32>
    %4 = vector.broadcast %3 : vector<1x24xf32> to vector<512x24xf32>
    %5 = arith.addf %2, %4 : vector<512x24xf32>
    %cst_5 = arith.constant 0.000000e+00 : f32
    %6 = vector.broadcast %cst_5 : f32 to vector<512x24xf32>
    %7 = arith.maximumf %5, %6 : vector<512x24xf32>
    %c0_6 = arith.constant 0 : index
    %c0_7 = arith.constant 0 : index
    %8 = vector.load %arg4[%c0_6, %c0_7] : memref<512x24xf32, #tpu.memory_space<vmem>>, vector<512x24xf32>
    tpu.vector_store %arg4[%c0_6, %c0_7], %7 {strides = array<i32>} : memref<512x24xf32, #tpu.memory_space<vmem>>, vector<512x24xf32>,
    return
  }
  func.func @transform_0(%arg0: i32) -> (i32, i32) {
    %c0_i32 = arith.constant 0 : i32
    %c0_i32_0 = arith.constant 0 : i32
    return %arg0, %c0_i32 : i32, i32
  }
  func.func @transform_1(%arg0: i32) -> (i32, i32) {
    %c0_i32 = arith.constant 0 : i32
    %c0_i32_0 = arith.constant 0 : i32
    %c0_i32_1 = arith.constant 0 : i32
    return %c0_i32, %c0_i32_0 : i32, i32
  }
  func.func @transform_2(%arg0: i32) -> (i32, i32) {
    %c0_i32 = arith.constant 0 : i32
    %c0_i32_0 = arith.constant 0 : i32
    %c0_i32_1 = arith.constant 0 : i32
    return %c0_i32, %c0_i32_0 : i32, i32
  }
  func.func @transform_3(%arg0: i32) -> (i32, i32) {
    %c0_i32 = arith.constant 0 : i32
    %c0_i32_0 = arith.constant 0 : i32
    return %arg0, %c0_i32 : i32, i32
  }
}

module attributes {stable_mosaic.version = 11 : i64} {
  func.func @_maxpool_kernel(%arg0: i32, %arg1: memref<1x18x18x24xf32, #tpu.memory_space<vmem>>, %arg2: memref<1x16x16x24xf32, #tpu.memory_space<vmem>>) attributes {dimension_semantics = [#tpu.dimension_semantics<parallel>], iteration_bounds = array<i64: 2>, scalar_prefetch = 0 : i64, scratch_operands = 0 : i64, tpu.core_type = #tpu.core_type<tc>, window_params = [{transform_indices = @transform_0, window_bounds = array<i64: 1, 18, 18, 24>}, {transform_indices = @transform_1, window_bounds = array<i64: 1, 16, 16, 24>}]} {
    %c0 = arith.constant 0 : index
    %c0_0 = arith.constant 0 : index
    %c0_1 = arith.constant 0 : index
    %c0_2 = arith.constant 0 : index
    %0 = vector.load %arg1[%c0, %c0_0, %c0_1, %c0_2] : memref<1x18x18x24xf32, #tpu.memory_space<vmem>>, vector<1x18x18x24xf32>
    %1 = vector.shape_cast %0 : vector<1x18x18x24xf32> to vector<18x18x24xf32>
    %2 = vector.extract_strided_slice %1 {offsets = [0, 0, 0], sizes = [16, 16, 24], strides = [1, 1, 1]} : vector<18x18x24xf32> to vector<16x16x24xf32>
    %3 = vector.extract_strided_slice %1 {offsets = [0, 1, 0], sizes = [16, 16, 24], strides = [1, 1, 1]} : vector<18x18x24xf32> to vector<16x16x24xf32>
    %4 = arith.maximumf %2, %3 : vector<16x16x24xf32>
    %5 = vector.extract_strided_slice %1 {offsets = [0, 2, 0], sizes = [16, 16, 24], strides = [1, 1, 1]} : vector<18x18x24xf32> to vector<16x16x24xf32>
    %6 = arith.maximumf %4, %5 : vector<16x16x24xf32>
    %7 = vector.extract_strided_slice %1 {offsets = [1, 0, 0], sizes = [16, 16, 24], strides = [1, 1, 1]} : vector<18x18x24xf32> to vector<16x16x24xf32>
    %8 = arith.maximumf %6, %7 : vector<16x16x24xf32>
    %9 = vector.extract_strided_slice %1 {offsets = [1, 1, 0], sizes = [16, 16, 24], strides = [1, 1, 1]} : vector<18x18x24xf32> to vector<16x16x24xf32>
    %10 = arith.maximumf %8, %9 : vector<16x16x24xf32>
    %11 = vector.extract_strided_slice %1 {offsets = [1, 2, 0], sizes = [16, 16, 24], strides = [1, 1, 1]} : vector<18x18x24xf32> to vector<16x16x24xf32>
    %12 = arith.maximumf %10, %11 : vector<16x16x24xf32>
    %13 = vector.extract_strided_slice %1 {offsets = [2, 0, 0], sizes = [16, 16, 24], strides = [1, 1, 1]} : vector<18x18x24xf32> to vector<16x16x24xf32>
    %14 = arith.maximumf %12, %13 : vector<16x16x24xf32>
    %15 = vector.extract_strided_slice %1 {offsets = [2, 1, 0], sizes = [16, 16, 24], strides = [1, 1, 1]} : vector<18x18x24xf32> to vector<16x16x24xf32>
    %16 = arith.maximumf %14, %15 : vector<16x16x24xf32>
    %17 = vector.extract_strided_slice %1 {offsets = [2, 2, 0], sizes = [16, 16, 24], strides = [1, 1, 1]} : vector<18x18x24xf32> to vector<16x16x24xf32>
    %18 = arith.maximumf %16, %17 : vector<16x16x24xf32>
    %c0_3 = arith.constant 0 : index
    %c0_4 = arith.constant 0 : index
    %c0_5 = arith.constant 0 : index
    %c0_6 = arith.constant 0 : index
    %19 = vector.load %arg2[%c0_3, %c0_4, %c0_5, %c0_6] : memref<1x16x16x24xf32, #tpu.memory_space<vmem>>, vector<1x16x16x24xf32>
    %20 = vector.shape_cast %19 : vector<1x16x16x24xf32> to vector<16x16x24xf32>
    %21 = vector.shape_cast %18 : vector<16x16x24xf32> to vector<1x16x16x24xf32>
    tpu.vector_store %arg2[%c0_3, %c0_4, %c0_5, %c0_6], %21 {strides = array<i32>} : memref<1x16x16x24xf32, #tpu.memory_space<vmem>>, vector<1x16x16x24xf32>,
    return
  }
  func.func @transform_0(%arg0: i32) -> (i32, i32, i32, i32) {
    %c0_i32 = arith.constant 0 : i32
    %c0_i32_0 = arith.constant 0 : i32
    %c0_i32_1 = arith.constant 0 : i32
    %c0_i32_2 = arith.constant 0 : i32
    return %arg0, %c0_i32, %c0_i32_0, %c0_i32_1 : i32, i32, i32, i32
  }
  func.func @transform_1(%arg0: i32) -> (i32, i32, i32, i32) {
    %c0_i32 = arith.constant 0 : i32
    %c0_i32_0 = arith.constant 0 : i32
    %c0_i32_1 = arith.constant 0 : i32
    %c0_i32_2 = arith.constant 0 : i32
    return %arg0, %c0_i32, %c0_i32_0, %c0_i32_1 : i32, i32, i32, i32
  }
}

module attributes {stable_mosaic.version = 11 : i64} {
  func.func @_matmul_bias_kernel(%arg0: i32, %arg1: memref<128x24xf32, #tpu.memory_space<vmem>>, %arg2: memref<24x58xf32, #tpu.memory_space<vmem>>, %arg3: memref<1x58xf32, #tpu.memory_space<vmem>>, %arg4: memref<128x58xf32, #tpu.memory_space<vmem>>) attributes {dimension_semantics = [#tpu.dimension_semantics<parallel>], iteration_bounds = array<i64: 1>, scalar_prefetch = 0 : i64, scratch_operands = 0 : i64, tpu.core_type = #tpu.core_type<tc>, window_params = [{transform_indices = @transform_0, window_bounds = array<i64: 128, 24>}, {pipeline_mode = #tpu.pipeline_mode<synchronous>, transform_indices = @transform_1, window_bounds = array<i64: 24, 58>}, {pipeline_mode = #tpu.pipeline_mode<synchronous>, transform_indices = @transform_2, window_bounds = array<i64: 1, 58>}, {transform_indices = @transform_3, window_bounds = array<i64: 128, 58>}]} {
    %c0 = arith.constant 0 : index
    %c0_0 = arith.constant 0 : index
    %0 = vector.load %arg1[%c0, %c0_0] : memref<128x24xf32, #tpu.memory_space<vmem>>, vector<128x24xf32>
    %c0_1 = arith.constant 0 : index
    %c0_2 = arith.constant 0 : index
    %1 = vector.load %arg2[%c0_1, %c0_2] : memref<24x58xf32, #tpu.memory_space<vmem>>, vector<24x58xf32>
    %cst = arith.constant dense<0.000000e+00> : vector<128x58xf32>
    %2 = tpu.matmul %0, %1, %cst {dimension_numbers = #tpu.dot_dimension_numbers<[1], [0], [0], [1], [0, 0, 1, 1], [], []>} : vector<128x24xf32>, vector<24x58xf32>, vector<128x58xf32> -> vector<128x58xf32>
    %c0_3 = arith.constant 0 : index
    %c0_4 = arith.constant 0 : index
    %3 = vector.load %arg3[%c0_3, %c0_4] : memref<1x58xf32, #tpu.memory_space<vmem>>, vector<1x58xf32>
    %4 = vector.broadcast %3 : vector<1x58xf32> to vector<128x58xf32>
    %5 = arith.addf %2, %4 : vector<128x58xf32>
    %cst_5 = arith.constant 0.000000e+00 : f32
    %6 = vector.broadcast %cst_5 : f32 to vector<128x58xf32>
    %7 = arith.maximumf %5, %6 : vector<128x58xf32>
    %c0_6 = arith.constant 0 : index
    %c0_7 = arith.constant 0 : index
    %8 = vector.load %arg4[%c0_6, %c0_7] : memref<128x58xf32, #tpu.memory_space<vmem>>, vector<128x58xf32>
    tpu.vector_store %arg4[%c0_6, %c0_7], %7 {strides = array<i32>} : memref<128x58xf32, #tpu.memory_space<vmem>>, vector<128x58xf32>,
    return
  }
  func.func @transform_0(%arg0: i32) -> (i32, i32) {
    %c0_i32 = arith.constant 0 : i32
    %c0_i32_0 = arith.constant 0 : i32
    return %arg0, %c0_i32 : i32, i32
  }
  func.func @transform_1(%arg0: i32) -> (i32, i32) {
    %c0_i32 = arith.constant 0 : i32
    %c0_i32_0 = arith.constant 0 : i32
    %c0_i32_1 = arith.constant 0 : i32
    return %c0_i32, %c0_i32_0 : i32, i32
  }
  func.func @transform_2(%arg0: i32) -> (i32, i32) {
    %c0_i32 = arith.constant 0 : i32
    %c0_i32_0 = arith.constant 0 : i32
    %c0_i32_1 = arith.constant 0 : i32
    return %c0_i32, %c0_i32_0 : i32, i32
  }
  func.func @transform_3(%arg0: i32) -> (i32, i32) {
    %c0_i32 = arith.constant 0 : i32
    %c0_i32_0 = arith.constant 0 : i32
    return %arg0, %c0_i32 : i32, i32
  }
}

module attributes {stable_mosaic.version = 11 : i64} {
  func.func @_dwconv_kernel(%arg0: i32, %arg1: memref<1x10x10x58xf32, #tpu.memory_space<vmem>>, %arg2: memref<9x1x58xf32, #tpu.memory_space<vmem>>, %arg3: memref<1x58xf32, #tpu.memory_space<vmem>>, %arg4: memref<1x8x8x58xf32, #tpu.memory_space<vmem>>) attributes {dimension_semantics = [#tpu.dimension_semantics<parallel>], iteration_bounds = array<i64: 2>, scalar_prefetch = 0 : i64, scratch_operands = 0 : i64, tpu.core_type = #tpu.core_type<tc>, window_params = [{transform_indices = @transform_0, window_bounds = array<i64: 1, 10, 10, 58>}, {pipeline_mode = #tpu.pipeline_mode<synchronous>, transform_indices = @transform_1, window_bounds = array<i64: 9, 1, 58>}, {pipeline_mode = #tpu.pipeline_mode<synchronous>, transform_indices = @transform_2, window_bounds = array<i64: 1, 58>}, {transform_indices = @transform_3, window_bounds = array<i64: 1, 8, 8, 58>}]} {
    %c0 = arith.constant 0 : index
    %c0_0 = arith.constant 0 : index
    %c0_1 = arith.constant 0 : index
    %c0_2 = arith.constant 0 : index
    %0 = vector.load %arg1[%c0, %c0_0, %c0_1, %c0_2] : memref<1x10x10x58xf32, #tpu.memory_space<vmem>>, vector<1x10x10x58xf32>
    %1 = vector.shape_cast %0 : vector<1x10x10x58xf32> to vector<10x10x58xf32>
    %2 = vector.extract_strided_slice %1 {offsets = [0, 0, 0], sizes = [8, 8, 58], strides = [1, 1, 1]} : vector<10x10x58xf32> to vector<8x8x58xf32>
    %c0_3 = arith.constant 0 : index
    %c0_4 = arith.constant 0 : index
    %c0_5 = arith.constant 0 : index
    %3 = vector.load %arg2[%c0_3, %c0_4, %c0_5] : memref<9x1x58xf32, #tpu.memory_space<vmem>>, vector<1x1x58xf32>
    %4 = vector.shape_cast %3 : vector<1x1x58xf32> to vector<1x58xf32>
    %5 = vector.shape_cast %4 : vector<1x58xf32> to vector<1x1x58xf32>
    %6 = vector.broadcast %5 : vector<1x1x58xf32> to vector<8x8x58xf32>
    %7 = arith.mulf %2, %6 : vector<8x8x58xf32>
    %8 = vector.extract_strided_slice %1 {offsets = [0, 1, 0], sizes = [8, 8, 58], strides = [1, 1, 1]} : vector<10x10x58xf32> to vector<8x8x58xf32>
    %c1 = arith.constant 1 : index
    %c0_6 = arith.constant 0 : index
    %c0_7 = arith.constant 0 : index
    %9 = vector.load %arg2[%c1, %c0_6, %c0_7] : memref<9x1x58xf32, #tpu.memory_space<vmem>>, vector<1x1x58xf32>
    %10 = vector.shape_cast %9 : vector<1x1x58xf32> to vector<1x58xf32>
    %11 = vector.shape_cast %10 : vector<1x58xf32> to vector<1x1x58xf32>
    %12 = vector.broadcast %11 : vector<1x1x58xf32> to vector<8x8x58xf32>
    %13 = arith.mulf %8, %12 : vector<8x8x58xf32>
    %14 = arith.addf %7, %13 : vector<8x8x58xf32>
    %15 = vector.extract_strided_slice %1 {offsets = [0, 2, 0], sizes = [8, 8, 58], strides = [1, 1, 1]} : vector<10x10x58xf32> to vector<8x8x58xf32>
    %c2 = arith.constant 2 : index
    %c0_8 = arith.constant 0 : index
    %c0_9 = arith.constant 0 : index
    %16 = vector.load %arg2[%c2, %c0_8, %c0_9] : memref<9x1x58xf32, #tpu.memory_space<vmem>>, vector<1x1x58xf32>
    %17 = vector.shape_cast %16 : vector<1x1x58xf32> to vector<1x58xf32>
    %18 = vector.shape_cast %17 : vector<1x58xf32> to vector<1x1x58xf32>
    %19 = vector.broadcast %18 : vector<1x1x58xf32> to vector<8x8x58xf32>
    %20 = arith.mulf %15, %19 : vector<8x8x58xf32>
    %21 = arith.addf %14, %20 : vector<8x8x58xf32>
    %22 = vector.extract_strided_slice %1 {offsets = [1, 0, 0], sizes = [8, 8, 58], strides = [1, 1, 1]} : vector<10x10x58xf32> to vector<8x8x58xf32>
    %c3 = arith.constant 3 : index
    %c0_10 = arith.constant 0 : index
    %c0_11 = arith.constant 0 : index
    %23 = vector.load %arg2[%c3, %c0_10, %c0_11] : memref<9x1x58xf32, #tpu.memory_space<vmem>>, vector<1x1x58xf32>
    %24 = vector.shape_cast %23 : vector<1x1x58xf32> to vector<1x58xf32>
    %25 = vector.shape_cast %24 : vector<1x58xf32> to vector<1x1x58xf32>
    %26 = vector.broadcast %25 : vector<1x1x58xf32> to vector<8x8x58xf32>
    %27 = arith.mulf %22, %26 : vector<8x8x58xf32>
    %28 = arith.addf %21, %27 : vector<8x8x58xf32>
    %29 = vector.extract_strided_slice %1 {offsets = [1, 1, 0], sizes = [8, 8, 58], strides = [1, 1, 1]} : vector<10x10x58xf32> to vector<8x8x58xf32>
    %c4 = arith.constant 4 : index
    %c0_12 = arith.constant 0 : index
    %c0_13 = arith.constant 0 : index
    %30 = vector.load %arg2[%c4, %c0_12, %c0_13] : memref<9x1x58xf32, #tpu.memory_space<vmem>>, vector<1x1x58xf32>
    %31 = vector.shape_cast %30 : vector<1x1x58xf32> to vector<1x58xf32>
    %32 = vector.shape_cast %31 : vector<1x58xf32> to vector<1x1x58xf32>
    %33 = vector.broadcast %32 : vector<1x1x58xf32> to vector<8x8x58xf32>
    %34 = arith.mulf %29, %33 : vector<8x8x58xf32>
    %35 = arith.addf %28, %34 : vector<8x8x58xf32>
    %36 = vector.extract_strided_slice %1 {offsets = [1, 2, 0], sizes = [8, 8, 58], strides = [1, 1, 1]} : vector<10x10x58xf32> to vector<8x8x58xf32>
    %c5 = arith.constant 5 : index
    %c0_14 = arith.constant 0 : index
    %c0_15 = arith.constant 0 : index
    %37 = vector.load %arg2[%c5, %c0_14, %c0_15] : memref<9x1x58xf32, #tpu.memory_space<vmem>>, vector<1x1x58xf32>
    %38 = vector.shape_cast %37 : vector<1x1x58xf32> to vector<1x58xf32>
    %39 = vector.shape_cast %38 : vector<1x58xf32> to vector<1x1x58xf32>
    %40 = vector.broadcast %39 : vector<1x1x58xf32> to vector<8x8x58xf32>
    %41 = arith.mulf %36, %40 : vector<8x8x58xf32>
    %42 = arith.addf %35, %41 : vector<8x8x58xf32>
    %43 = vector.extract_strided_slice %1 {offsets = [2, 0, 0], sizes = [8, 8, 58], strides = [1, 1, 1]} : vector<10x10x58xf32> to vector<8x8x58xf32>
    %c6 = arith.constant 6 : index
    %c0_16 = arith.constant 0 : index
    %c0_17 = arith.constant 0 : index
    %44 = vector.load %arg2[%c6, %c0_16, %c0_17] : memref<9x1x58xf32, #tpu.memory_space<vmem>>, vector<1x1x58xf32>
    %45 = vector.shape_cast %44 : vector<1x1x58xf32> to vector<1x58xf32>
    %46 = vector.shape_cast %45 : vector<1x58xf32> to vector<1x1x58xf32>
    %47 = vector.broadcast %46 : vector<1x1x58xf32> to vector<8x8x58xf32>
    %48 = arith.mulf %43, %47 : vector<8x8x58xf32>
    %49 = arith.addf %42, %48 : vector<8x8x58xf32>
    %50 = vector.extract_strided_slice %1 {offsets = [2, 1, 0], sizes = [8, 8, 58], strides = [1, 1, 1]} : vector<10x10x58xf32> to vector<8x8x58xf32>
    %c7 = arith.constant 7 : index
    %c0_18 = arith.constant 0 : index
    %c0_19 = arith.constant 0 : index
    %51 = vector.load %arg2[%c7, %c0_18, %c0_19] : memref<9x1x58xf32, #tpu.memory_space<vmem>>, vector<1x1x58xf32>
    %52 = vector.shape_cast %51 : vector<1x1x58xf32> to vector<1x58xf32>
    %53 = vector.shape_cast %52 : vector<1x58xf32> to vector<1x1x58xf32>
    %54 = vector.broadcast %53 : vector<1x1x58xf32> to vector<8x8x58xf32>
    %55 = arith.mulf %50, %54 : vector<8x8x58xf32>
    %56 = arith.addf %49, %55 : vector<8x8x58xf32>
    %57 = vector.extract_strided_slice %1 {offsets = [2, 2, 0], sizes = [8, 8, 58], strides = [1, 1, 1]} : vector<10x10x58xf32> to vector<8x8x58xf32>
    %c8 = arith.constant 8 : index
    %c0_20 = arith.constant 0 : index
    %c0_21 = arith.constant 0 : index
    %58 = vector.load %arg2[%c8, %c0_20, %c0_21] : memref<9x1x58xf32, #tpu.memory_space<vmem>>, vector<1x1x58xf32>
    %59 = vector.shape_cast %58 : vector<1x1x58xf32> to vector<1x58xf32>
    %60 = vector.shape_cast %59 : vector<1x58xf32> to vector<1x1x58xf32>
    %61 = vector.broadcast %60 : vector<1x1x58xf32> to vector<8x8x58xf32>
    %62 = arith.mulf %57, %61 : vector<8x8x58xf32>
    %63 = arith.addf %56, %62 : vector<8x8x58xf32>
    %c0_22 = arith.constant 0 : index
    %c0_23 = arith.constant 0 : index
    %64 = vector.load %arg3[%c0_22, %c0_23] : memref<1x58xf32, #tpu.memory_space<vmem>>, vector<1x58xf32>
    %65 = vector.shape_cast %64 : vector<1x58xf32> to vector<1x1x58xf32>
    %66 = vector.broadcast %65 : vector<1x1x58xf32> to vector<8x8x58xf32>
    %67 = arith.addf %63, %66 : vector<8x8x58xf32>
    %c0_24 = arith.constant 0 : index
    %c0_25 = arith.constant 0 : index
    %c0_26 = arith.constant 0 : index
    %c0_27 = arith.constant 0 : index
    %68 = vector.load %arg4[%c0_24, %c0_25, %c0_26, %c0_27] : memref<1x8x8x58xf32, #tpu.memory_space<vmem>>, vector<1x8x8x58xf32>
    %69 = vector.shape_cast %68 : vector<1x8x8x58xf32> to vector<8x8x58xf32>
    %70 = vector.shape_cast %67 : vector<8x8x58xf32> to vector<1x8x8x58xf32>
    tpu.vector_store %arg4[%c0_24, %c0_25, %c0_26, %c0_27], %70 {strides = array<i32>} : memref<1x8x8x58xf32, #tpu.memory_space<vmem>>, vector<1x8x8x58xf32>,
    return
  }
  func.func @transform_0(%arg0: i32) -> (i32, i32, i32, i32) {
    %c0_i32 = arith.constant 0 : i32
    %c0_i32_0 = arith.constant 0 : i32
    %c0_i32_1 = arith.constant 0 : i32
    %c0_i32_2 = arith.constant 0 : i32
    return %arg0, %c0_i32, %c0_i32_0, %c0_i32_1 : i32, i32, i32, i32
  }
  func.func @transform_1(%arg0: i32) -> (i32, i32, i32) {
    %c0_i32 = arith.constant 0 : i32
    %c0_i32_0 = arith.constant 0 : i32
    %c0_i32_1 = arith.constant 0 : i32
    %c0_i32_2 = arith.constant 0 : i32
    return %c0_i32, %c0_i32_0, %c0_i32_1 : i32, i32, i32
  }
  func.func @transform_2(%arg0: i32) -> (i32, i32) {
    %c0_i32 = arith.constant 0 : i32
    %c0_i32_0 = arith.constant 0 : i32
    %c0_i32_1 = arith.constant 0 : i32
    return %c0_i32, %c0_i32_0 : i32, i32
  }
  func.func @transform_3(%arg0: i32) -> (i32, i32, i32, i32) {
    %c0_i32 = arith.constant 0 : i32
    %c0_i32_0 = arith.constant 0 : i32
    %c0_i32_1 = arith.constant 0 : i32
    %c0_i32_2 = arith.constant 0 : i32
    return %arg0, %c0_i32, %c0_i32_0, %c0_i32_1 : i32, i32, i32, i32
  }
}

module attributes {stable_mosaic.version = 11 : i64} {
  func.func @_matmul_bias_kernel(%arg0: i32, %arg1: memref<32x58xf32, #tpu.memory_space<vmem>>, %arg2: memref<58x58xf32, #tpu.memory_space<vmem>>, %arg3: memref<1x58xf32, #tpu.memory_space<vmem>>, %arg4: memref<32x58xf32, #tpu.memory_space<vmem>>) attributes {dimension_semantics = [#tpu.dimension_semantics<parallel>], iteration_bounds = array<i64: 1>, scalar_prefetch = 0 : i64, scratch_operands = 0 : i64, tpu.core_type = #tpu.core_type<tc>, window_params = [{transform_indices = @transform_0, window_bounds = array<i64: 32, 58>}, {pipeline_mode = #tpu.pipeline_mode<synchronous>, transform_indices = @transform_1, window_bounds = array<i64: 58, 58>}, {pipeline_mode = #tpu.pipeline_mode<synchronous>, transform_indices = @transform_2, window_bounds = array<i64: 1, 58>}, {transform_indices = @transform_3, window_bounds = array<i64: 32, 58>}]} {
    %c0 = arith.constant 0 : index
    %c0_0 = arith.constant 0 : index
    %0 = vector.load %arg1[%c0, %c0_0] : memref<32x58xf32, #tpu.memory_space<vmem>>, vector<32x58xf32>
    %c0_1 = arith.constant 0 : index
    %c0_2 = arith.constant 0 : index
    %1 = vector.load %arg2[%c0_1, %c0_2] : memref<58x58xf32, #tpu.memory_space<vmem>>, vector<58x58xf32>
    %cst = arith.constant dense<0.000000e+00> : vector<32x58xf32>
    %2 = tpu.matmul %0, %1, %cst {dimension_numbers = #tpu.dot_dimension_numbers<[1], [0], [0], [1], [0, 0, 1, 1], [], []>} : vector<32x58xf32>, vector<58x58xf32>, vector<32x58xf32> -> vector<32x58xf32>
    %c0_3 = arith.constant 0 : index
    %c0_4 = arith.constant 0 : index
    %3 = vector.load %arg3[%c0_3, %c0_4] : memref<1x58xf32, #tpu.memory_space<vmem>>, vector<1x58xf32>
    %4 = vector.broadcast %3 : vector<1x58xf32> to vector<32x58xf32>
    %5 = arith.addf %2, %4 : vector<32x58xf32>
    %cst_5 = arith.constant 0.000000e+00 : f32
    %6 = vector.broadcast %cst_5 : f32 to vector<32x58xf32>
    %7 = arith.maximumf %5, %6 : vector<32x58xf32>
    %c0_6 = arith.constant 0 : index
    %c0_7 = arith.constant 0 : index
    %8 = vector.load %arg4[%c0_6, %c0_7] : memref<32x58xf32, #tpu.memory_space<vmem>>, vector<32x58xf32>
    tpu.vector_store %arg4[%c0_6, %c0_7], %7 {strides = array<i32>} : memref<32x58xf32, #tpu.memory_space<vmem>>, vector<32x58xf32>,
    return
  }
  func.func @transform_0(%arg0: i32) -> (i32, i32) {
    %c0_i32 = arith.constant 0 : i32
    %c0_i32_0 = arith.constant 0 : i32
    return %arg0, %c0_i32 : i32, i32
  }
  func.func @transform_1(%arg0: i32) -> (i32, i32) {
    %c0_i32 = arith.constant 0 : i32
    %c0_i32_0 = arith.constant 0 : i32
    %c0_i32_1 = arith.constant 0 : i32
    return %c0_i32, %c0_i32_0 : i32, i32
  }
  func.func @transform_2(%arg0: i32) -> (i32, i32) {
    %c0_i32 = arith.constant 0 : i32
    %c0_i32_0 = arith.constant 0 : i32
    %c0_i32_1 = arith.constant 0 : i32
    return %c0_i32, %c0_i32_0 : i32, i32
  }
  func.func @transform_3(%arg0: i32) -> (i32, i32) {
    %c0_i32 = arith.constant 0 : i32
    %c0_i32_0 = arith.constant 0 : i32
    return %arg0, %c0_i32 : i32, i32
  }
}

module attributes {stable_mosaic.version = 11 : i64} {
  func.func @_matmul_bias_kernel(%arg0: i32, %arg1: memref<32x24xf32, #tpu.memory_space<vmem>>, %arg2: memref<24x58xf32, #tpu.memory_space<vmem>>, %arg3: memref<1x58xf32, #tpu.memory_space<vmem>>, %arg4: memref<32x58xf32, #tpu.memory_space<vmem>>) attributes {dimension_semantics = [#tpu.dimension_semantics<parallel>], iteration_bounds = array<i64: 1>, scalar_prefetch = 0 : i64, scratch_operands = 0 : i64, tpu.core_type = #tpu.core_type<tc>, window_params = [{transform_indices = @transform_0, window_bounds = array<i64: 32, 24>}, {pipeline_mode = #tpu.pipeline_mode<synchronous>, transform_indices = @transform_1, window_bounds = array<i64: 24, 58>}, {pipeline_mode = #tpu.pipeline_mode<synchronous>, transform_indices = @transform_2, window_bounds = array<i64: 1, 58>}, {transform_indices = @transform_3, window_bounds = array<i64: 32, 58>}]} {
    %c0 = arith.constant 0 : index
    %c0_0 = arith.constant 0 : index
    %0 = vector.load %arg1[%c0, %c0_0] : memref<32x24xf32, #tpu.memory_space<vmem>>, vector<32x24xf32>
    %c0_1 = arith.constant 0 : index
    %c0_2 = arith.constant 0 : index
    %1 = vector.load %arg2[%c0_1, %c0_2] : memref<24x58xf32, #tpu.memory_space<vmem>>, vector<24x58xf32>
    %cst = arith.constant dense<0.000000e+00> : vector<32x58xf32>
    %2 = tpu.matmul %0, %1, %cst {dimension_numbers = #tpu.dot_dimension_numbers<[1], [0], [0], [1], [0, 0, 1, 1], [], []>} : vector<32x24xf32>, vector<24x58xf32>, vector<32x58xf32> -> vector<32x58xf32>
    %c0_3 = arith.constant 0 : index
    %c0_4 = arith.constant 0 : index
    %3 = vector.load %arg3[%c0_3, %c0_4] : memref<1x58xf32, #tpu.memory_space<vmem>>, vector<1x58xf32>
    %4 = vector.broadcast %3 : vector<1x58xf32> to vector<32x58xf32>
    %5 = arith.addf %2, %4 : vector<32x58xf32>
    %cst_5 = arith.constant 0.000000e+00 : f32
    %6 = vector.broadcast %cst_5 : f32 to vector<32x58xf32>
    %7 = arith.maximumf %5, %6 : vector<32x58xf32>
    %c0_6 = arith.constant 0 : index
    %c0_7 = arith.constant 0 : index
    %8 = vector.load %arg4[%c0_6, %c0_7] : memref<32x58xf32, #tpu.memory_space<vmem>>, vector<32x58xf32>
    tpu.vector_store %arg4[%c0_6, %c0_7], %7 {strides = array<i32>} : memref<32x58xf32, #tpu.memory_space<vmem>>, vector<32x58xf32>,
    return
  }
  func.func @transform_0(%arg0: i32) -> (i32, i32) {
    %c0_i32 = arith.constant 0 : i32
    %c0_i32_0 = arith.constant 0 : i32
    return %arg0, %c0_i32 : i32, i32
  }
  func.func @transform_1(%arg0: i32) -> (i32, i32) {
    %c0_i32 = arith.constant 0 : i32
    %c0_i32_0 = arith.constant 0 : i32
    %c0_i32_1 = arith.constant 0 : i32
    return %c0_i32, %c0_i32_0 : i32, i32
  }
  func.func @transform_2(%arg0: i32) -> (i32, i32) {
    %c0_i32 = arith.constant 0 : i32
    %c0_i32_0 = arith.constant 0 : i32
    %c0_i32_1 = arith.constant 0 : i32
    return %c0_i32, %c0_i32_0 : i32, i32
  }
  func.func @transform_3(%arg0: i32) -> (i32, i32) {
    %c0_i32 = arith.constant 0 : i32
    %c0_i32_0 = arith.constant 0 : i32
    return %arg0, %c0_i32 : i32, i32
  }
}

module attributes {stable_mosaic.version = 11 : i64} {
  func.func @_dwconv_kernel(%arg0: i32, %arg1: memref<1x10x10x24xf32, #tpu.memory_space<vmem>>, %arg2: memref<9x1x24xf32, #tpu.memory_space<vmem>>, %arg3: memref<1x24xf32, #tpu.memory_space<vmem>>, %arg4: memref<1x8x8x24xf32, #tpu.memory_space<vmem>>) attributes {dimension_semantics = [#tpu.dimension_semantics<parallel>], iteration_bounds = array<i64: 2>, scalar_prefetch = 0 : i64, scratch_operands = 0 : i64, tpu.core_type = #tpu.core_type<tc>, window_params = [{transform_indices = @transform_0, window_bounds = array<i64: 1, 10, 10, 24>}, {pipeline_mode = #tpu.pipeline_mode<synchronous>, transform_indices = @transform_1, window_bounds = array<i64: 9, 1, 24>}, {pipeline_mode = #tpu.pipeline_mode<synchronous>, transform_indices = @transform_2, window_bounds = array<i64: 1, 24>}, {transform_indices = @transform_3, window_bounds = array<i64: 1, 8, 8, 24>}]} {
    %c0 = arith.constant 0 : index
    %c0_0 = arith.constant 0 : index
    %c0_1 = arith.constant 0 : index
    %c0_2 = arith.constant 0 : index
    %0 = vector.load %arg1[%c0, %c0_0, %c0_1, %c0_2] : memref<1x10x10x24xf32, #tpu.memory_space<vmem>>, vector<1x10x10x24xf32>
    %1 = vector.shape_cast %0 : vector<1x10x10x24xf32> to vector<10x10x24xf32>
    %2 = vector.extract_strided_slice %1 {offsets = [0, 0, 0], sizes = [8, 8, 24], strides = [1, 1, 1]} : vector<10x10x24xf32> to vector<8x8x24xf32>
    %c0_3 = arith.constant 0 : index
    %c0_4 = arith.constant 0 : index
    %c0_5 = arith.constant 0 : index
    %3 = vector.load %arg2[%c0_3, %c0_4, %c0_5] : memref<9x1x24xf32, #tpu.memory_space<vmem>>, vector<1x1x24xf32>
    %4 = vector.shape_cast %3 : vector<1x1x24xf32> to vector<1x24xf32>
    %5 = vector.shape_cast %4 : vector<1x24xf32> to vector<1x1x24xf32>
    %6 = vector.broadcast %5 : vector<1x1x24xf32> to vector<8x8x24xf32>
    %7 = arith.mulf %2, %6 : vector<8x8x24xf32>
    %8 = vector.extract_strided_slice %1 {offsets = [0, 1, 0], sizes = [8, 8, 24], strides = [1, 1, 1]} : vector<10x10x24xf32> to vector<8x8x24xf32>
    %c1 = arith.constant 1 : index
    %c0_6 = arith.constant 0 : index
    %c0_7 = arith.constant 0 : index
    %9 = vector.load %arg2[%c1, %c0_6, %c0_7] : memref<9x1x24xf32, #tpu.memory_space<vmem>>, vector<1x1x24xf32>
    %10 = vector.shape_cast %9 : vector<1x1x24xf32> to vector<1x24xf32>
    %11 = vector.shape_cast %10 : vector<1x24xf32> to vector<1x1x24xf32>
    %12 = vector.broadcast %11 : vector<1x1x24xf32> to vector<8x8x24xf32>
    %13 = arith.mulf %8, %12 : vector<8x8x24xf32>
    %14 = arith.addf %7, %13 : vector<8x8x24xf32>
    %15 = vector.extract_strided_slice %1 {offsets = [0, 2, 0], sizes = [8, 8, 24], strides = [1, 1, 1]} : vector<10x10x24xf32> to vector<8x8x24xf32>
    %c2 = arith.constant 2 : index
    %c0_8 = arith.constant 0 : index
    %c0_9 = arith.constant 0 : index
    %16 = vector.load %arg2[%c2, %c0_8, %c0_9] : memref<9x1x24xf32, #tpu.memory_space<vmem>>, vector<1x1x24xf32>
    %17 = vector.shape_cast %16 : vector<1x1x24xf32> to vector<1x24xf32>
    %18 = vector.shape_cast %17 : vector<1x24xf32> to vector<1x1x24xf32>
    %19 = vector.broadcast %18 : vector<1x1x24xf32> to vector<8x8x24xf32>
    %20 = arith.mulf %15, %19 : vector<8x8x24xf32>
    %21 = arith.addf %14, %20 : vector<8x8x24xf32>
    %22 = vector.extract_strided_slice %1 {offsets = [1, 0, 0], sizes = [8, 8, 24], strides = [1, 1, 1]} : vector<10x10x24xf32> to vector<8x8x24xf32>
    %c3 = arith.constant 3 : index
    %c0_10 = arith.constant 0 : index
    %c0_11 = arith.constant 0 : index
    %23 = vector.load %arg2[%c3, %c0_10, %c0_11] : memref<9x1x24xf32, #tpu.memory_space<vmem>>, vector<1x1x24xf32>
    %24 = vector.shape_cast %23 : vector<1x1x24xf32> to vector<1x24xf32>
    %25 = vector.shape_cast %24 : vector<1x24xf32> to vector<1x1x24xf32>
    %26 = vector.broadcast %25 : vector<1x1x24xf32> to vector<8x8x24xf32>
    %27 = arith.mulf %22, %26 : vector<8x8x24xf32>
    %28 = arith.addf %21, %27 : vector<8x8x24xf32>
    %29 = vector.extract_strided_slice %1 {offsets = [1, 1, 0], sizes = [8, 8, 24], strides = [1, 1, 1]} : vector<10x10x24xf32> to vector<8x8x24xf32>
    %c4 = arith.constant 4 : index
    %c0_12 = arith.constant 0 : index
    %c0_13 = arith.constant 0 : index
    %30 = vector.load %arg2[%c4, %c0_12, %c0_13] : memref<9x1x24xf32, #tpu.memory_space<vmem>>, vector<1x1x24xf32>
    %31 = vector.shape_cast %30 : vector<1x1x24xf32> to vector<1x24xf32>
    %32 = vector.shape_cast %31 : vector<1x24xf32> to vector<1x1x24xf32>
    %33 = vector.broadcast %32 : vector<1x1x24xf32> to vector<8x8x24xf32>
    %34 = arith.mulf %29, %33 : vector<8x8x24xf32>
    %35 = arith.addf %28, %34 : vector<8x8x24xf32>
    %36 = vector.extract_strided_slice %1 {offsets = [1, 2, 0], sizes = [8, 8, 24], strides = [1, 1, 1]} : vector<10x10x24xf32> to vector<8x8x24xf32>
    %c5 = arith.constant 5 : index
    %c0_14 = arith.constant 0 : index
    %c0_15 = arith.constant 0 : index
    %37 = vector.load %arg2[%c5, %c0_14, %c0_15] : memref<9x1x24xf32, #tpu.memory_space<vmem>>, vector<1x1x24xf32>
    %38 = vector.shape_cast %37 : vector<1x1x24xf32> to vector<1x24xf32>
    %39 = vector.shape_cast %38 : vector<1x24xf32> to vector<1x1x24xf32>
    %40 = vector.broadcast %39 : vector<1x1x24xf32> to vector<8x8x24xf32>
    %41 = arith.mulf %36, %40 : vector<8x8x24xf32>
    %42 = arith.addf %35, %41 : vector<8x8x24xf32>
    %43 = vector.extract_strided_slice %1 {offsets = [2, 0, 0], sizes = [8, 8, 24], strides = [1, 1, 1]} : vector<10x10x24xf32> to vector<8x8x24xf32>
    %c6 = arith.constant 6 : index
    %c0_16 = arith.constant 0 : index
    %c0_17 = arith.constant 0 : index
    %44 = vector.load %arg2[%c6, %c0_16, %c0_17] : memref<9x1x24xf32, #tpu.memory_space<vmem>>, vector<1x1x24xf32>
    %45 = vector.shape_cast %44 : vector<1x1x24xf32> to vector<1x24xf32>
    %46 = vector.shape_cast %45 : vector<1x24xf32> to vector<1x1x24xf32>
    %47 = vector.broadcast %46 : vector<1x1x24xf32> to vector<8x8x24xf32>
    %48 = arith.mulf %43, %47 : vector<8x8x24xf32>
    %49 = arith.addf %42, %48 : vector<8x8x24xf32>
    %50 = vector.extract_strided_slice %1 {offsets = [2, 1, 0], sizes = [8, 8, 24], strides = [1, 1, 1]} : vector<10x10x24xf32> to vector<8x8x24xf32>
    %c7 = arith.constant 7 : index
    %c0_18 = arith.constant 0 : index
    %c0_19 = arith.constant 0 : index
    %51 = vector.load %arg2[%c7, %c0_18, %c0_19] : memref<9x1x24xf32, #tpu.memory_space<vmem>>, vector<1x1x24xf32>
    %52 = vector.shape_cast %51 : vector<1x1x24xf32> to vector<1x24xf32>
    %53 = vector.shape_cast %52 : vector<1x24xf32> to vector<1x1x24xf32>
    %54 = vector.broadcast %53 : vector<1x1x24xf32> to vector<8x8x24xf32>
    %55 = arith.mulf %50, %54 : vector<8x8x24xf32>
    %56 = arith.addf %49, %55 : vector<8x8x24xf32>
    %57 = vector.extract_strided_slice %1 {offsets = [2, 2, 0], sizes = [8, 8, 24], strides = [1, 1, 1]} : vector<10x10x24xf32> to vector<8x8x24xf32>
    %c8 = arith.constant 8 : index
    %c0_20 = arith.constant 0 : index
    %c0_21 = arith.constant 0 : index
    %58 = vector.load %arg2[%c8, %c0_20, %c0_21] : memref<9x1x24xf32, #tpu.memory_space<vmem>>, vector<1x1x24xf32>
    %59 = vector.shape_cast %58 : vector<1x1x24xf32> to vector<1x24xf32>
    %60 = vector.shape_cast %59 : vector<1x24xf32> to vector<1x1x24xf32>
    %61 = vector.broadcast %60 : vector<1x1x24xf32> to vector<8x8x24xf32>
    %62 = arith.mulf %57, %61 : vector<8x8x24xf32>
    %63 = arith.addf %56, %62 : vector<8x8x24xf32>
    %c0_22 = arith.constant 0 : index
    %c0_23 = arith.constant 0 : index
    %64 = vector.load %arg3[%c0_22, %c0_23] : memref<1x24xf32, #tpu.memory_space<vmem>>, vector<1x24xf32>
    %65 = vector.shape_cast %64 : vector<1x24xf32> to vector<1x1x24xf32>
    %66 = vector.broadcast %65 : vector<1x1x24xf32> to vector<8x8x24xf32>
    %67 = arith.addf %63, %66 : vector<8x8x24xf32>
    %c0_24 = arith.constant 0 : index
    %c0_25 = arith.constant 0 : index
    %c0_26 = arith.constant 0 : index
    %c0_27 = arith.constant 0 : index
    %68 = vector.load %arg4[%c0_24, %c0_25, %c0_26, %c0_27] : memref<1x8x8x24xf32, #tpu.memory_space<vmem>>, vector<1x8x8x24xf32>
    %69 = vector.shape_cast %68 : vector<1x8x8x24xf32> to vector<8x8x24xf32>
    %70 = vector.shape_cast %67 : vector<8x8x24xf32> to vector<1x8x8x24xf32>
    tpu.vector_store %arg4[%c0_24, %c0_25, %c0_26, %c0_27], %70 {strides = array<i32>} : memref<1x8x8x24xf32, #tpu.memory_space<vmem>>, vector<1x8x8x24xf32>,
    return
  }
  func.func @transform_0(%arg0: i32) -> (i32, i32, i32, i32) {
    %c0_i32 = arith.constant 0 : i32
    %c0_i32_0 = arith.constant 0 : i32
    %c0_i32_1 = arith.constant 0 : i32
    %c0_i32_2 = arith.constant 0 : i32
    return %arg0, %c0_i32, %c0_i32_0, %c0_i32_1 : i32, i32, i32, i32
  }
  func.func @transform_1(%arg0: i32) -> (i32, i32, i32) {
    %c0_i32 = arith.constant 0 : i32
    %c0_i32_0 = arith.constant 0 : i32
    %c0_i32_1 = arith.constant 0 : i32
    %c0_i32_2 = arith.constant 0 : i32
    return %c0_i32, %c0_i32_0, %c0_i32_1 : i32, i32, i32
  }
  func.func @transform_2(%arg0: i32) -> (i32, i32) {
    %c0_i32 = arith.constant 0 : i32
    %c0_i32_0 = arith.constant 0 : i32
    %c0_i32_1 = arith.constant 0 : i32
    return %c0_i32, %c0_i32_0 : i32, i32
  }
  func.func @transform_3(%arg0: i32) -> (i32, i32, i32, i32) {
    %c0_i32 = arith.constant 0 : i32
    %c0_i32_0 = arith.constant 0 : i32
    %c0_i32_1 = arith.constant 0 : i32
    %c0_i32_2 = arith.constant 0 : i32
    return %arg0, %c0_i32, %c0_i32_0, %c0_i32_1 : i32, i32, i32, i32
  }
}

module attributes {stable_mosaic.version = 11 : i64} {
  func.func @_dwconv_kernel(%arg0: i32, %arg1: memref<1x6x6x58xf32, #tpu.memory_space<vmem>>, %arg2: memref<9x1x58xf32, #tpu.memory_space<vmem>>, %arg3: memref<1x58xf32, #tpu.memory_space<vmem>>, %arg4: memref<1x4x4x58xf32, #tpu.memory_space<vmem>>) attributes {dimension_semantics = [#tpu.dimension_semantics<parallel>], iteration_bounds = array<i64: 2>, scalar_prefetch = 0 : i64, scratch_operands = 0 : i64, tpu.core_type = #tpu.core_type<tc>, window_params = [{transform_indices = @transform_0, window_bounds = array<i64: 1, 6, 6, 58>}, {pipeline_mode = #tpu.pipeline_mode<synchronous>, transform_indices = @transform_1, window_bounds = array<i64: 9, 1, 58>}, {pipeline_mode = #tpu.pipeline_mode<synchronous>, transform_indices = @transform_2, window_bounds = array<i64: 1, 58>}, {transform_indices = @transform_3, window_bounds = array<i64: 1, 4, 4, 58>}]} {
    %c0 = arith.constant 0 : index
    %c0_0 = arith.constant 0 : index
    %c0_1 = arith.constant 0 : index
    %c0_2 = arith.constant 0 : index
    %0 = vector.load %arg1[%c0, %c0_0, %c0_1, %c0_2] : memref<1x6x6x58xf32, #tpu.memory_space<vmem>>, vector<1x6x6x58xf32>
    %1 = vector.shape_cast %0 : vector<1x6x6x58xf32> to vector<6x6x58xf32>
    %2 = vector.extract_strided_slice %1 {offsets = [0, 0, 0], sizes = [4, 4, 58], strides = [1, 1, 1]} : vector<6x6x58xf32> to vector<4x4x58xf32>
    %c0_3 = arith.constant 0 : index
    %c0_4 = arith.constant 0 : index
    %c0_5 = arith.constant 0 : index
    %3 = vector.load %arg2[%c0_3, %c0_4, %c0_5] : memref<9x1x58xf32, #tpu.memory_space<vmem>>, vector<1x1x58xf32>
    %4 = vector.shape_cast %3 : vector<1x1x58xf32> to vector<1x58xf32>
    %5 = vector.shape_cast %4 : vector<1x58xf32> to vector<1x1x58xf32>
    %6 = vector.broadcast %5 : vector<1x1x58xf32> to vector<4x4x58xf32>
    %7 = arith.mulf %2, %6 : vector<4x4x58xf32>
    %8 = vector.extract_strided_slice %1 {offsets = [0, 1, 0], sizes = [4, 4, 58], strides = [1, 1, 1]} : vector<6x6x58xf32> to vector<4x4x58xf32>
    %c1 = arith.constant 1 : index
    %c0_6 = arith.constant 0 : index
    %c0_7 = arith.constant 0 : index
    %9 = vector.load %arg2[%c1, %c0_6, %c0_7] : memref<9x1x58xf32, #tpu.memory_space<vmem>>, vector<1x1x58xf32>
    %10 = vector.shape_cast %9 : vector<1x1x58xf32> to vector<1x58xf32>
    %11 = vector.shape_cast %10 : vector<1x58xf32> to vector<1x1x58xf32>
    %12 = vector.broadcast %11 : vector<1x1x58xf32> to vector<4x4x58xf32>
    %13 = arith.mulf %8, %12 : vector<4x4x58xf32>
    %14 = arith.addf %7, %13 : vector<4x4x58xf32>
    %15 = vector.extract_strided_slice %1 {offsets = [0, 2, 0], sizes = [4, 4, 58], strides = [1, 1, 1]} : vector<6x6x58xf32> to vector<4x4x58xf32>
    %c2 = arith.constant 2 : index
    %c0_8 = arith.constant 0 : index
    %c0_9 = arith.constant 0 : index
    %16 = vector.load %arg2[%c2, %c0_8, %c0_9] : memref<9x1x58xf32, #tpu.memory_space<vmem>>, vector<1x1x58xf32>
    %17 = vector.shape_cast %16 : vector<1x1x58xf32> to vector<1x58xf32>
    %18 = vector.shape_cast %17 : vector<1x58xf32> to vector<1x1x58xf32>
    %19 = vector.broadcast %18 : vector<1x1x58xf32> to vector<4x4x58xf32>
    %20 = arith.mulf %15, %19 : vector<4x4x58xf32>
    %21 = arith.addf %14, %20 : vector<4x4x58xf32>
    %22 = vector.extract_strided_slice %1 {offsets = [1, 0, 0], sizes = [4, 4, 58], strides = [1, 1, 1]} : vector<6x6x58xf32> to vector<4x4x58xf32>
    %c3 = arith.constant 3 : index
    %c0_10 = arith.constant 0 : index
    %c0_11 = arith.constant 0 : index
    %23 = vector.load %arg2[%c3, %c0_10, %c0_11] : memref<9x1x58xf32, #tpu.memory_space<vmem>>, vector<1x1x58xf32>
    %24 = vector.shape_cast %23 : vector<1x1x58xf32> to vector<1x58xf32>
    %25 = vector.shape_cast %24 : vector<1x58xf32> to vector<1x1x58xf32>
    %26 = vector.broadcast %25 : vector<1x1x58xf32> to vector<4x4x58xf32>
    %27 = arith.mulf %22, %26 : vector<4x4x58xf32>
    %28 = arith.addf %21, %27 : vector<4x4x58xf32>
    %29 = vector.extract_strided_slice %1 {offsets = [1, 1, 0], sizes = [4, 4, 58], strides = [1, 1, 1]} : vector<6x6x58xf32> to vector<4x4x58xf32>
    %c4 = arith.constant 4 : index
    %c0_12 = arith.constant 0 : index
    %c0_13 = arith.constant 0 : index
    %30 = vector.load %arg2[%c4, %c0_12, %c0_13] : memref<9x1x58xf32, #tpu.memory_space<vmem>>, vector<1x1x58xf32>
    %31 = vector.shape_cast %30 : vector<1x1x58xf32> to vector<1x58xf32>
    %32 = vector.shape_cast %31 : vector<1x58xf32> to vector<1x1x58xf32>
    %33 = vector.broadcast %32 : vector<1x1x58xf32> to vector<4x4x58xf32>
    %34 = arith.mulf %29, %33 : vector<4x4x58xf32>
    %35 = arith.addf %28, %34 : vector<4x4x58xf32>
    %36 = vector.extract_strided_slice %1 {offsets = [1, 2, 0], sizes = [4, 4, 58], strides = [1, 1, 1]} : vector<6x6x58xf32> to vector<4x4x58xf32>
    %c5 = arith.constant 5 : index
    %c0_14 = arith.constant 0 : index
    %c0_15 = arith.constant 0 : index
    %37 = vector.load %arg2[%c5, %c0_14, %c0_15] : memref<9x1x58xf32, #tpu.memory_space<vmem>>, vector<1x1x58xf32>
    %38 = vector.shape_cast %37 : vector<1x1x58xf32> to vector<1x58xf32>
    %39 = vector.shape_cast %38 : vector<1x58xf32> to vector<1x1x58xf32>
    %40 = vector.broadcast %39 : vector<1x1x58xf32> to vector<4x4x58xf32>
    %41 = arith.mulf %36, %40 : vector<4x4x58xf32>
    %42 = arith.addf %35, %41 : vector<4x4x58xf32>
    %43 = vector.extract_strided_slice %1 {offsets = [2, 0, 0], sizes = [4, 4, 58], strides = [1, 1, 1]} : vector<6x6x58xf32> to vector<4x4x58xf32>
    %c6 = arith.constant 6 : index
    %c0_16 = arith.constant 0 : index
    %c0_17 = arith.constant 0 : index
    %44 = vector.load %arg2[%c6, %c0_16, %c0_17] : memref<9x1x58xf32, #tpu.memory_space<vmem>>, vector<1x1x58xf32>
    %45 = vector.shape_cast %44 : vector<1x1x58xf32> to vector<1x58xf32>
    %46 = vector.shape_cast %45 : vector<1x58xf32> to vector<1x1x58xf32>
    %47 = vector.broadcast %46 : vector<1x1x58xf32> to vector<4x4x58xf32>
    %48 = arith.mulf %43, %47 : vector<4x4x58xf32>
    %49 = arith.addf %42, %48 : vector<4x4x58xf32>
    %50 = vector.extract_strided_slice %1 {offsets = [2, 1, 0], sizes = [4, 4, 58], strides = [1, 1, 1]} : vector<6x6x58xf32> to vector<4x4x58xf32>
    %c7 = arith.constant 7 : index
    %c0_18 = arith.constant 0 : index
    %c0_19 = arith.constant 0 : index
    %51 = vector.load %arg2[%c7, %c0_18, %c0_19] : memref<9x1x58xf32, #tpu.memory_space<vmem>>, vector<1x1x58xf32>
    %52 = vector.shape_cast %51 : vector<1x1x58xf32> to vector<1x58xf32>
    %53 = vector.shape_cast %52 : vector<1x58xf32> to vector<1x1x58xf32>
    %54 = vector.broadcast %53 : vector<1x1x58xf32> to vector<4x4x58xf32>
    %55 = arith.mulf %50, %54 : vector<4x4x58xf32>
    %56 = arith.addf %49, %55 : vector<4x4x58xf32>
    %57 = vector.extract_strided_slice %1 {offsets = [2, 2, 0], sizes = [4, 4, 58], strides = [1, 1, 1]} : vector<6x6x58xf32> to vector<4x4x58xf32>
    %c8 = arith.constant 8 : index
    %c0_20 = arith.constant 0 : index
    %c0_21 = arith.constant 0 : index
    %58 = vector.load %arg2[%c8, %c0_20, %c0_21] : memref<9x1x58xf32, #tpu.memory_space<vmem>>, vector<1x1x58xf32>
    %59 = vector.shape_cast %58 : vector<1x1x58xf32> to vector<1x58xf32>
    %60 = vector.shape_cast %59 : vector<1x58xf32> to vector<1x1x58xf32>
    %61 = vector.broadcast %60 : vector<1x1x58xf32> to vector<4x4x58xf32>
    %62 = arith.mulf %57, %61 : vector<4x4x58xf32>
    %63 = arith.addf %56, %62 : vector<4x4x58xf32>
    %c0_22 = arith.constant 0 : index
    %c0_23 = arith.constant 0 : index
    %64 = vector.load %arg3[%c0_22, %c0_23] : memref<1x58xf32, #tpu.memory_space<vmem>>, vector<1x58xf32>
    %65 = vector.shape_cast %64 : vector<1x58xf32> to vector<1x1x58xf32>
    %66 = vector.broadcast %65 : vector<1x1x58xf32> to vector<4x4x58xf32>
    %67 = arith.addf %63, %66 : vector<4x4x58xf32>
    %c0_24 = arith.constant 0 : index
    %c0_25 = arith.constant 0 : index
    %c0_26 = arith.constant 0 : index
    %c0_27 = arith.constant 0 : index
    %68 = vector.load %arg4[%c0_24, %c0_25, %c0_26, %c0_27] : memref<1x4x4x58xf32, #tpu.memory_space<vmem>>, vector<1x4x4x58xf32>
    %69 = vector.shape_cast %68 : vector<1x4x4x58xf32> to vector<4x4x58xf32>
    %70 = vector.shape_cast %67 : vector<4x4x58xf32> to vector<1x4x4x58xf32>
    tpu.vector_store %arg4[%c0_24, %c0_25, %c0_26, %c0_27], %70 {strides = array<i32>} : memref<1x4x4x58xf32, #tpu.memory_space<vmem>>, vector<1x4x4x58xf32>,
    return
  }
  func.func @transform_0(%arg0: i32) -> (i32, i32, i32, i32) {
    %c0_i32 = arith.constant 0 : i32
    %c0_i32_0 = arith.constant 0 : i32
    %c0_i32_1 = arith.constant 0 : i32
    %c0_i32_2 = arith.constant 0 : i32
    return %arg0, %c0_i32, %c0_i32_0, %c0_i32_1 : i32, i32, i32, i32
  }
  func.func @transform_1(%arg0: i32) -> (i32, i32, i32) {
    %c0_i32 = arith.constant 0 : i32
    %c0_i32_0 = arith.constant 0 : i32
    %c0_i32_1 = arith.constant 0 : i32
    %c0_i32_2 = arith.constant 0 : i32
    return %c0_i32, %c0_i32_0, %c0_i32_1 : i32, i32, i32
  }
  func.func @transform_2(%arg0: i32) -> (i32, i32) {
    %c0_i32 = arith.constant 0 : i32
    %c0_i32_0 = arith.constant 0 : i32
    %c0_i32_1 = arith.constant 0 : i32
    return %c0_i32, %c0_i32_0 : i32, i32
  }
  func.func @transform_3(%arg0: i32) -> (i32, i32, i32, i32) {
    %c0_i32 = arith.constant 0 : i32
    %c0_i32_0 = arith.constant 0 : i32
    %c0_i32_1 = arith.constant 0 : i32
    %c0_i32_2 = arith.constant 0 : i32
    return %arg0, %c0_i32, %c0_i32_0, %c0_i32_1 : i32, i32, i32, i32
  }
}

module attributes {stable_mosaic.version = 11 : i64} {
  func.func @_matmul_bias_kernel(%arg0: i32, %arg1: memref<32x116xf32, #tpu.memory_space<vmem>>, %arg2: memref<116x116xf32, #tpu.memory_space<vmem>>, %arg3: memref<1x116xf32, #tpu.memory_space<vmem>>, %arg4: memref<32x116xf32, #tpu.memory_space<vmem>>) attributes {dimension_semantics = [#tpu.dimension_semantics<parallel>], iteration_bounds = array<i64: 1>, scalar_prefetch = 0 : i64, scratch_operands = 0 : i64, tpu.core_type = #tpu.core_type<tc>, window_params = [{transform_indices = @transform_0, window_bounds = array<i64: 32, 116>}, {pipeline_mode = #tpu.pipeline_mode<synchronous>, transform_indices = @transform_1, window_bounds = array<i64: 116, 116>}, {pipeline_mode = #tpu.pipeline_mode<synchronous>, transform_indices = @transform_2, window_bounds = array<i64: 1, 116>}, {transform_indices = @transform_3, window_bounds = array<i64: 32, 116>}]} {
    %c0 = arith.constant 0 : index
    %c0_0 = arith.constant 0 : index
    %0 = vector.load %arg1[%c0, %c0_0] : memref<32x116xf32, #tpu.memory_space<vmem>>, vector<32x116xf32>
    %c0_1 = arith.constant 0 : index
    %c0_2 = arith.constant 0 : index
    %1 = vector.load %arg2[%c0_1, %c0_2] : memref<116x116xf32, #tpu.memory_space<vmem>>, vector<116x116xf32>
    %cst = arith.constant dense<0.000000e+00> : vector<32x116xf32>
    %2 = tpu.matmul %0, %1, %cst {dimension_numbers = #tpu.dot_dimension_numbers<[1], [0], [0], [1], [0, 0, 1, 1], [], []>} : vector<32x116xf32>, vector<116x116xf32>, vector<32x116xf32> -> vector<32x116xf32>
    %c0_3 = arith.constant 0 : index
    %c0_4 = arith.constant 0 : index
    %3 = vector.load %arg3[%c0_3, %c0_4] : memref<1x116xf32, #tpu.memory_space<vmem>>, vector<1x116xf32>
    %4 = vector.broadcast %3 : vector<1x116xf32> to vector<32x116xf32>
    %5 = arith.addf %2, %4 : vector<32x116xf32>
    %cst_5 = arith.constant 0.000000e+00 : f32
    %6 = vector.broadcast %cst_5 : f32 to vector<32x116xf32>
    %7 = arith.maximumf %5, %6 : vector<32x116xf32>
    %c0_6 = arith.constant 0 : index
    %c0_7 = arith.constant 0 : index
    %8 = vector.load %arg4[%c0_6, %c0_7] : memref<32x116xf32, #tpu.memory_space<vmem>>, vector<32x116xf32>
    tpu.vector_store %arg4[%c0_6, %c0_7], %7 {strides = array<i32>} : memref<32x116xf32, #tpu.memory_space<vmem>>, vector<32x116xf32>,
    return
  }
  func.func @transform_0(%arg0: i32) -> (i32, i32) {
    %c0_i32 = arith.constant 0 : i32
    %c0_i32_0 = arith.constant 0 : i32
    return %arg0, %c0_i32 : i32, i32
  }
  func.func @transform_1(%arg0: i32) -> (i32, i32) {
    %c0_i32 = arith.constant 0 : i32
    %c0_i32_0 = arith.constant 0 : i32
    %c0_i32_1 = arith.constant 0 : i32
    return %c0_i32, %c0_i32_0 : i32, i32
  }
  func.func @transform_2(%arg0: i32) -> (i32, i32) {
    %c0_i32 = arith.constant 0 : i32
    %c0_i32_0 = arith.constant 0 : i32
    %c0_i32_1 = arith.constant 0 : i32
    return %c0_i32, %c0_i32_0 : i32, i32
  }
  func.func @transform_3(%arg0: i32) -> (i32, i32) {
    %c0_i32 = arith.constant 0 : i32
    %c0_i32_0 = arith.constant 0 : i32
    return %arg0, %c0_i32 : i32, i32
  }
}

module attributes {stable_mosaic.version = 11 : i64} {
  func.func @_matmul_bias_kernel(%arg0: i32, %arg1: memref<8x116xf32, #tpu.memory_space<vmem>>, %arg2: memref<116x116xf32, #tpu.memory_space<vmem>>, %arg3: memref<1x116xf32, #tpu.memory_space<vmem>>, %arg4: memref<8x116xf32, #tpu.memory_space<vmem>>) attributes {dimension_semantics = [#tpu.dimension_semantics<parallel>], iteration_bounds = array<i64: 1>, scalar_prefetch = 0 : i64, scratch_operands = 0 : i64, tpu.core_type = #tpu.core_type<tc>, window_params = [{transform_indices = @transform_0, window_bounds = array<i64: 8, 116>}, {pipeline_mode = #tpu.pipeline_mode<synchronous>, transform_indices = @transform_1, window_bounds = array<i64: 116, 116>}, {pipeline_mode = #tpu.pipeline_mode<synchronous>, transform_indices = @transform_2, window_bounds = array<i64: 1, 116>}, {transform_indices = @transform_3, window_bounds = array<i64: 8, 116>}]} {
    %c0 = arith.constant 0 : index
    %c0_0 = arith.constant 0 : index
    %0 = vector.load %arg1[%c0, %c0_0] : memref<8x116xf32, #tpu.memory_space<vmem>>, vector<8x116xf32>
    %c0_1 = arith.constant 0 : index
    %c0_2 = arith.constant 0 : index
    %1 = vector.load %arg2[%c0_1, %c0_2] : memref<116x116xf32, #tpu.memory_space<vmem>>, vector<116x116xf32>
    %cst = arith.constant dense<0.000000e+00> : vector<8x116xf32>
    %2 = tpu.matmul %0, %1, %cst {dimension_numbers = #tpu.dot_dimension_numbers<[1], [0], [0], [1], [0, 0, 1, 1], [], []>} : vector<8x116xf32>, vector<116x116xf32>, vector<8x116xf32> -> vector<8x116xf32>
    %c0_3 = arith.constant 0 : index
    %c0_4 = arith.constant 0 : index
    %3 = vector.load %arg3[%c0_3, %c0_4] : memref<1x116xf32, #tpu.memory_space<vmem>>, vector<1x116xf32>
    %4 = vector.broadcast %3 : vector<1x116xf32> to vector<8x116xf32>
    %5 = arith.addf %2, %4 : vector<8x116xf32>
    %cst_5 = arith.constant 0.000000e+00 : f32
    %6 = vector.broadcast %cst_5 : f32 to vector<8x116xf32>
    %7 = arith.maximumf %5, %6 : vector<8x116xf32>
    %c0_6 = arith.constant 0 : index
    %c0_7 = arith.constant 0 : index
    %8 = vector.load %arg4[%c0_6, %c0_7] : memref<8x116xf32, #tpu.memory_space<vmem>>, vector<8x116xf32>
    tpu.vector_store %arg4[%c0_6, %c0_7], %7 {strides = array<i32>} : memref<8x116xf32, #tpu.memory_space<vmem>>, vector<8x116xf32>,
    return
  }
  func.func @transform_0(%arg0: i32) -> (i32, i32) {
    %c0_i32 = arith.constant 0 : i32
    %c0_i32_0 = arith.constant 0 : i32
    return %arg0, %c0_i32 : i32, i32
  }
  func.func @transform_1(%arg0: i32) -> (i32, i32) {
    %c0_i32 = arith.constant 0 : i32
    %c0_i32_0 = arith.constant 0 : i32
    %c0_i32_1 = arith.constant 0 : i32
    return %c0_i32, %c0_i32_0 : i32, i32
  }
  func.func @transform_2(%arg0: i32) -> (i32, i32) {
    %c0_i32 = arith.constant 0 : i32
    %c0_i32_0 = arith.constant 0 : i32
    %c0_i32_1 = arith.constant 0 : i32
    return %c0_i32, %c0_i32_0 : i32, i32
  }
  func.func @transform_3(%arg0: i32) -> (i32, i32) {
    %c0_i32 = arith.constant 0 : i32
    %c0_i32_0 = arith.constant 0 : i32
    return %arg0, %c0_i32 : i32, i32
  }
}

module attributes {stable_mosaic.version = 11 : i64} {
  func.func @_dwconv_kernel(%arg0: i32, %arg1: memref<1x6x6x116xf32, #tpu.memory_space<vmem>>, %arg2: memref<9x1x116xf32, #tpu.memory_space<vmem>>, %arg3: memref<1x116xf32, #tpu.memory_space<vmem>>, %arg4: memref<1x4x4x116xf32, #tpu.memory_space<vmem>>) attributes {dimension_semantics = [#tpu.dimension_semantics<parallel>], iteration_bounds = array<i64: 2>, scalar_prefetch = 0 : i64, scratch_operands = 0 : i64, tpu.core_type = #tpu.core_type<tc>, window_params = [{transform_indices = @transform_0, window_bounds = array<i64: 1, 6, 6, 116>}, {pipeline_mode = #tpu.pipeline_mode<synchronous>, transform_indices = @transform_1, window_bounds = array<i64: 9, 1, 116>}, {pipeline_mode = #tpu.pipeline_mode<synchronous>, transform_indices = @transform_2, window_bounds = array<i64: 1, 116>}, {transform_indices = @transform_3, window_bounds = array<i64: 1, 4, 4, 116>}]} {
    %c0 = arith.constant 0 : index
    %c0_0 = arith.constant 0 : index
    %c0_1 = arith.constant 0 : index
    %c0_2 = arith.constant 0 : index
    %0 = vector.load %arg1[%c0, %c0_0, %c0_1, %c0_2] : memref<1x6x6x116xf32, #tpu.memory_space<vmem>>, vector<1x6x6x116xf32>
    %1 = vector.shape_cast %0 : vector<1x6x6x116xf32> to vector<6x6x116xf32>
    %2 = vector.extract_strided_slice %1 {offsets = [0, 0, 0], sizes = [4, 4, 116], strides = [1, 1, 1]} : vector<6x6x116xf32> to vector<4x4x116xf32>
    %c0_3 = arith.constant 0 : index
    %c0_4 = arith.constant 0 : index
    %c0_5 = arith.constant 0 : index
    %3 = vector.load %arg2[%c0_3, %c0_4, %c0_5] : memref<9x1x116xf32, #tpu.memory_space<vmem>>, vector<1x1x116xf32>
    %4 = vector.shape_cast %3 : vector<1x1x116xf32> to vector<1x116xf32>
    %5 = vector.shape_cast %4 : vector<1x116xf32> to vector<1x1x116xf32>
    %6 = vector.broadcast %5 : vector<1x1x116xf32> to vector<4x4x116xf32>
    %7 = arith.mulf %2, %6 : vector<4x4x116xf32>
    %8 = vector.extract_strided_slice %1 {offsets = [0, 1, 0], sizes = [4, 4, 116], strides = [1, 1, 1]} : vector<6x6x116xf32> to vector<4x4x116xf32>
    %c1 = arith.constant 1 : index
    %c0_6 = arith.constant 0 : index
    %c0_7 = arith.constant 0 : index
    %9 = vector.load %arg2[%c1, %c0_6, %c0_7] : memref<9x1x116xf32, #tpu.memory_space<vmem>>, vector<1x1x116xf32>
    %10 = vector.shape_cast %9 : vector<1x1x116xf32> to vector<1x116xf32>
    %11 = vector.shape_cast %10 : vector<1x116xf32> to vector<1x1x116xf32>
    %12 = vector.broadcast %11 : vector<1x1x116xf32> to vector<4x4x116xf32>
    %13 = arith.mulf %8, %12 : vector<4x4x116xf32>
    %14 = arith.addf %7, %13 : vector<4x4x116xf32>
    %15 = vector.extract_strided_slice %1 {offsets = [0, 2, 0], sizes = [4, 4, 116], strides = [1, 1, 1]} : vector<6x6x116xf32> to vector<4x4x116xf32>
    %c2 = arith.constant 2 : index
    %c0_8 = arith.constant 0 : index
    %c0_9 = arith.constant 0 : index
    %16 = vector.load %arg2[%c2, %c0_8, %c0_9] : memref<9x1x116xf32, #tpu.memory_space<vmem>>, vector<1x1x116xf32>
    %17 = vector.shape_cast %16 : vector<1x1x116xf32> to vector<1x116xf32>
    %18 = vector.shape_cast %17 : vector<1x116xf32> to vector<1x1x116xf32>
    %19 = vector.broadcast %18 : vector<1x1x116xf32> to vector<4x4x116xf32>
    %20 = arith.mulf %15, %19 : vector<4x4x116xf32>
    %21 = arith.addf %14, %20 : vector<4x4x116xf32>
    %22 = vector.extract_strided_slice %1 {offsets = [1, 0, 0], sizes = [4, 4, 116], strides = [1, 1, 1]} : vector<6x6x116xf32> to vector<4x4x116xf32>
    %c3 = arith.constant 3 : index
    %c0_10 = arith.constant 0 : index
    %c0_11 = arith.constant 0 : index
    %23 = vector.load %arg2[%c3, %c0_10, %c0_11] : memref<9x1x116xf32, #tpu.memory_space<vmem>>, vector<1x1x116xf32>
    %24 = vector.shape_cast %23 : vector<1x1x116xf32> to vector<1x116xf32>
    %25 = vector.shape_cast %24 : vector<1x116xf32> to vector<1x1x116xf32>
    %26 = vector.broadcast %25 : vector<1x1x116xf32> to vector<4x4x116xf32>
    %27 = arith.mulf %22, %26 : vector<4x4x116xf32>
    %28 = arith.addf %21, %27 : vector<4x4x116xf32>
    %29 = vector.extract_strided_slice %1 {offsets = [1, 1, 0], sizes = [4, 4, 116], strides = [1, 1, 1]} : vector<6x6x116xf32> to vector<4x4x116xf32>
    %c4 = arith.constant 4 : index
    %c0_12 = arith.constant 0 : index
    %c0_13 = arith.constant 0 : index
    %30 = vector.load %arg2[%c4, %c0_12, %c0_13] : memref<9x1x116xf32, #tpu.memory_space<vmem>>, vector<1x1x116xf32>
    %31 = vector.shape_cast %30 : vector<1x1x116xf32> to vector<1x116xf32>
    %32 = vector.shape_cast %31 : vector<1x116xf32> to vector<1x1x116xf32>
    %33 = vector.broadcast %32 : vector<1x1x116xf32> to vector<4x4x116xf32>
    %34 = arith.mulf %29, %33 : vector<4x4x116xf32>
    %35 = arith.addf %28, %34 : vector<4x4x116xf32>
    %36 = vector.extract_strided_slice %1 {offsets = [1, 2, 0], sizes = [4, 4, 116], strides = [1, 1, 1]} : vector<6x6x116xf32> to vector<4x4x116xf32>
    %c5 = arith.constant 5 : index
    %c0_14 = arith.constant 0 : index
    %c0_15 = arith.constant 0 : index
    %37 = vector.load %arg2[%c5, %c0_14, %c0_15] : memref<9x1x116xf32, #tpu.memory_space<vmem>>, vector<1x1x116xf32>
    %38 = vector.shape_cast %37 : vector<1x1x116xf32> to vector<1x116xf32>
    %39 = vector.shape_cast %38 : vector<1x116xf32> to vector<1x1x116xf32>
    %40 = vector.broadcast %39 : vector<1x1x116xf32> to vector<4x4x116xf32>
    %41 = arith.mulf %36, %40 : vector<4x4x116xf32>
    %42 = arith.addf %35, %41 : vector<4x4x116xf32>
    %43 = vector.extract_strided_slice %1 {offsets = [2, 0, 0], sizes = [4, 4, 116], strides = [1, 1, 1]} : vector<6x6x116xf32> to vector<4x4x116xf32>
    %c6 = arith.constant 6 : index
    %c0_16 = arith.constant 0 : index
    %c0_17 = arith.constant 0 : index
    %44 = vector.load %arg2[%c6, %c0_16, %c0_17] : memref<9x1x116xf32, #tpu.memory_space<vmem>>, vector<1x1x116xf32>
    %45 = vector.shape_cast %44 : vector<1x1x116xf32> to vector<1x116xf32>
    %46 = vector.shape_cast %45 : vector<1x116xf32> to vector<1x1x116xf32>
    %47 = vector.broadcast %46 : vector<1x1x116xf32> to vector<4x4x116xf32>
    %48 = arith.mulf %43, %47 : vector<4x4x116xf32>
    %49 = arith.addf %42, %48 : vector<4x4x116xf32>
    %50 = vector.extract_strided_slice %1 {offsets = [2, 1, 0], sizes = [4, 4, 116], strides = [1, 1, 1]} : vector<6x6x116xf32> to vector<4x4x116xf32>
    %c7 = arith.constant 7 : index
    %c0_18 = arith.constant 0 : index
    %c0_19 = arith.constant 0 : index
    %51 = vector.load %arg2[%c7, %c0_18, %c0_19] : memref<9x1x116xf32, #tpu.memory_space<vmem>>, vector<1x1x116xf32>
    %52 = vector.shape_cast %51 : vector<1x1x116xf32> to vector<1x116xf32>
    %53 = vector.shape_cast %52 : vector<1x116xf32> to vector<1x1x116xf32>
    %54 = vector.broadcast %53 : vector<1x1x116xf32> to vector<4x4x116xf32>
    %55 = arith.mulf %50, %54 : vector<4x4x116xf32>
    %56 = arith.addf %49, %55 : vector<4x4x116xf32>
    %57 = vector.extract_strided_slice %1 {offsets = [2, 2, 0], sizes = [4, 4, 116], strides = [1, 1, 1]} : vector<6x6x116xf32> to vector<4x4x116xf32>
    %c8 = arith.constant 8 : index
    %c0_20 = arith.constant 0 : index
    %c0_21 = arith.constant 0 : index
    %58 = vector.load %arg2[%c8, %c0_20, %c0_21] : memref<9x1x116xf32, #tpu.memory_space<vmem>>, vector<1x1x116xf32>
    %59 = vector.shape_cast %58 : vector<1x1x116xf32> to vector<1x116xf32>
    %60 = vector.shape_cast %59 : vector<1x116xf32> to vector<1x1x116xf32>
    %61 = vector.broadcast %60 : vector<1x1x116xf32> to vector<4x4x116xf32>
    %62 = arith.mulf %57, %61 : vector<4x4x116xf32>
    %63 = arith.addf %56, %62 : vector<4x4x116xf32>
    %c0_22 = arith.constant 0 : index
    %c0_23 = arith.constant 0 : index
    %64 = vector.load %arg3[%c0_22, %c0_23] : memref<1x116xf32, #tpu.memory_space<vmem>>, vector<1x116xf32>
    %65 = vector.shape_cast %64 : vector<1x116xf32> to vector<1x1x116xf32>
    %66 = vector.broadcast %65 : vector<1x1x116xf32> to vector<4x4x116xf32>
    %67 = arith.addf %63, %66 : vector<4x4x116xf32>
    %c0_24 = arith.constant 0 : index
    %c0_25 = arith.constant 0 : index
    %c0_26 = arith.constant 0 : index
    %c0_27 = arith.constant 0 : index
    %68 = vector.load %arg4[%c0_24, %c0_25, %c0_26, %c0_27] : memref<1x4x4x116xf32, #tpu.memory_space<vmem>>, vector<1x4x4x116xf32>
    %69 = vector.shape_cast %68 : vector<1x4x4x116xf32> to vector<4x4x116xf32>
    %70 = vector.shape_cast %67 : vector<4x4x116xf32> to vector<1x4x4x116xf32>
    tpu.vector_store %arg4[%c0_24, %c0_25, %c0_26, %c0_27], %70 {strides = array<i32>} : memref<1x4x4x116xf32, #tpu.memory_space<vmem>>, vector<1x4x4x116xf32>,
    return
  }
  func.func @transform_0(%arg0: i32) -> (i32, i32, i32, i32) {
    %c0_i32 = arith.constant 0 : i32
    %c0_i32_0 = arith.constant 0 : i32
    %c0_i32_1 = arith.constant 0 : i32
    %c0_i32_2 = arith.constant 0 : i32
    return %arg0, %c0_i32, %c0_i32_0, %c0_i32_1 : i32, i32, i32, i32
  }
  func.func @transform_1(%arg0: i32) -> (i32, i32, i32) {
    %c0_i32 = arith.constant 0 : i32
    %c0_i32_0 = arith.constant 0 : i32
    %c0_i32_1 = arith.constant 0 : i32
    %c0_i32_2 = arith.constant 0 : i32
    return %c0_i32, %c0_i32_0, %c0_i32_1 : i32, i32, i32
  }
  func.func @transform_2(%arg0: i32) -> (i32, i32) {
    %c0_i32 = arith.constant 0 : i32
    %c0_i32_0 = arith.constant 0 : i32
    %c0_i32_1 = arith.constant 0 : i32
    return %c0_i32, %c0_i32_0 : i32, i32
  }
  func.func @transform_3(%arg0: i32) -> (i32, i32, i32, i32) {
    %c0_i32 = arith.constant 0 : i32
    %c0_i32_0 = arith.constant 0 : i32
    %c0_i32_1 = arith.constant 0 : i32
    %c0_i32_2 = arith.constant 0 : i32
    return %arg0, %c0_i32, %c0_i32_0, %c0_i32_1 : i32, i32, i32, i32
  }
}

module attributes {stable_mosaic.version = 11 : i64} {
  func.func @_dwconv_kernel(%arg0: i32, %arg1: memref<1x4x4x116xf32, #tpu.memory_space<vmem>>, %arg2: memref<9x1x116xf32, #tpu.memory_space<vmem>>, %arg3: memref<1x116xf32, #tpu.memory_space<vmem>>, %arg4: memref<1x2x2x116xf32, #tpu.memory_space<vmem>>) attributes {dimension_semantics = [#tpu.dimension_semantics<parallel>], iteration_bounds = array<i64: 2>, scalar_prefetch = 0 : i64, scratch_operands = 0 : i64, tpu.core_type = #tpu.core_type<tc>, window_params = [{transform_indices = @transform_0, window_bounds = array<i64: 1, 4, 4, 116>}, {pipeline_mode = #tpu.pipeline_mode<synchronous>, transform_indices = @transform_1, window_bounds = array<i64: 9, 1, 116>}, {pipeline_mode = #tpu.pipeline_mode<synchronous>, transform_indices = @transform_2, window_bounds = array<i64: 1, 116>}, {transform_indices = @transform_3, window_bounds = array<i64: 1, 2, 2, 116>}]} {
    %c0 = arith.constant 0 : index
    %c0_0 = arith.constant 0 : index
    %c0_1 = arith.constant 0 : index
    %c0_2 = arith.constant 0 : index
    %0 = vector.load %arg1[%c0, %c0_0, %c0_1, %c0_2] : memref<1x4x4x116xf32, #tpu.memory_space<vmem>>, vector<1x4x4x116xf32>
    %1 = vector.shape_cast %0 : vector<1x4x4x116xf32> to vector<4x4x116xf32>
    %2 = vector.extract_strided_slice %1 {offsets = [0, 0, 0], sizes = [2, 2, 116], strides = [1, 1, 1]} : vector<4x4x116xf32> to vector<2x2x116xf32>
    %c0_3 = arith.constant 0 : index
    %c0_4 = arith.constant 0 : index
    %c0_5 = arith.constant 0 : index
    %3 = vector.load %arg2[%c0_3, %c0_4, %c0_5] : memref<9x1x116xf32, #tpu.memory_space<vmem>>, vector<1x1x116xf32>
    %4 = vector.shape_cast %3 : vector<1x1x116xf32> to vector<1x116xf32>
    %5 = vector.shape_cast %4 : vector<1x116xf32> to vector<1x1x116xf32>
    %6 = vector.broadcast %5 : vector<1x1x116xf32> to vector<2x2x116xf32>
    %7 = arith.mulf %2, %6 : vector<2x2x116xf32>
    %8 = vector.extract_strided_slice %1 {offsets = [0, 1, 0], sizes = [2, 2, 116], strides = [1, 1, 1]} : vector<4x4x116xf32> to vector<2x2x116xf32>
    %c1 = arith.constant 1 : index
    %c0_6 = arith.constant 0 : index
    %c0_7 = arith.constant 0 : index
    %9 = vector.load %arg2[%c1, %c0_6, %c0_7] : memref<9x1x116xf32, #tpu.memory_space<vmem>>, vector<1x1x116xf32>
    %10 = vector.shape_cast %9 : vector<1x1x116xf32> to vector<1x116xf32>
    %11 = vector.shape_cast %10 : vector<1x116xf32> to vector<1x1x116xf32>
    %12 = vector.broadcast %11 : vector<1x1x116xf32> to vector<2x2x116xf32>
    %13 = arith.mulf %8, %12 : vector<2x2x116xf32>
    %14 = arith.addf %7, %13 : vector<2x2x116xf32>
    %15 = vector.extract_strided_slice %1 {offsets = [0, 2, 0], sizes = [2, 2, 116], strides = [1, 1, 1]} : vector<4x4x116xf32> to vector<2x2x116xf32>
    %c2 = arith.constant 2 : index
    %c0_8 = arith.constant 0 : index
    %c0_9 = arith.constant 0 : index
    %16 = vector.load %arg2[%c2, %c0_8, %c0_9] : memref<9x1x116xf32, #tpu.memory_space<vmem>>, vector<1x1x116xf32>
    %17 = vector.shape_cast %16 : vector<1x1x116xf32> to vector<1x116xf32>
    %18 = vector.shape_cast %17 : vector<1x116xf32> to vector<1x1x116xf32>
    %19 = vector.broadcast %18 : vector<1x1x116xf32> to vector<2x2x116xf32>
    %20 = arith.mulf %15, %19 : vector<2x2x116xf32>
    %21 = arith.addf %14, %20 : vector<2x2x116xf32>
    %22 = vector.extract_strided_slice %1 {offsets = [1, 0, 0], sizes = [2, 2, 116], strides = [1, 1, 1]} : vector<4x4x116xf32> to vector<2x2x116xf32>
    %c3 = arith.constant 3 : index
    %c0_10 = arith.constant 0 : index
    %c0_11 = arith.constant 0 : index
    %23 = vector.load %arg2[%c3, %c0_10, %c0_11] : memref<9x1x116xf32, #tpu.memory_space<vmem>>, vector<1x1x116xf32>
    %24 = vector.shape_cast %23 : vector<1x1x116xf32> to vector<1x116xf32>
    %25 = vector.shape_cast %24 : vector<1x116xf32> to vector<1x1x116xf32>
    %26 = vector.broadcast %25 : vector<1x1x116xf32> to vector<2x2x116xf32>
    %27 = arith.mulf %22, %26 : vector<2x2x116xf32>
    %28 = arith.addf %21, %27 : vector<2x2x116xf32>
    %29 = vector.extract_strided_slice %1 {offsets = [1, 1, 0], sizes = [2, 2, 116], strides = [1, 1, 1]} : vector<4x4x116xf32> to vector<2x2x116xf32>
    %c4 = arith.constant 4 : index
    %c0_12 = arith.constant 0 : index
    %c0_13 = arith.constant 0 : index
    %30 = vector.load %arg2[%c4, %c0_12, %c0_13] : memref<9x1x116xf32, #tpu.memory_space<vmem>>, vector<1x1x116xf32>
    %31 = vector.shape_cast %30 : vector<1x1x116xf32> to vector<1x116xf32>
    %32 = vector.shape_cast %31 : vector<1x116xf32> to vector<1x1x116xf32>
    %33 = vector.broadcast %32 : vector<1x1x116xf32> to vector<2x2x116xf32>
    %34 = arith.mulf %29, %33 : vector<2x2x116xf32>
    %35 = arith.addf %28, %34 : vector<2x2x116xf32>
    %36 = vector.extract_strided_slice %1 {offsets = [1, 2, 0], sizes = [2, 2, 116], strides = [1, 1, 1]} : vector<4x4x116xf32> to vector<2x2x116xf32>
    %c5 = arith.constant 5 : index
    %c0_14 = arith.constant 0 : index
    %c0_15 = arith.constant 0 : index
    %37 = vector.load %arg2[%c5, %c0_14, %c0_15] : memref<9x1x116xf32, #tpu.memory_space<vmem>>, vector<1x1x116xf32>
    %38 = vector.shape_cast %37 : vector<1x1x116xf32> to vector<1x116xf32>
    %39 = vector.shape_cast %38 : vector<1x116xf32> to vector<1x1x116xf32>
    %40 = vector.broadcast %39 : vector<1x1x116xf32> to vector<2x2x116xf32>
    %41 = arith.mulf %36, %40 : vector<2x2x116xf32>
    %42 = arith.addf %35, %41 : vector<2x2x116xf32>
    %43 = vector.extract_strided_slice %1 {offsets = [2, 0, 0], sizes = [2, 2, 116], strides = [1, 1, 1]} : vector<4x4x116xf32> to vector<2x2x116xf32>
    %c6 = arith.constant 6 : index
    %c0_16 = arith.constant 0 : index
    %c0_17 = arith.constant 0 : index
    %44 = vector.load %arg2[%c6, %c0_16, %c0_17] : memref<9x1x116xf32, #tpu.memory_space<vmem>>, vector<1x1x116xf32>
    %45 = vector.shape_cast %44 : vector<1x1x116xf32> to vector<1x116xf32>
    %46 = vector.shape_cast %45 : vector<1x116xf32> to vector<1x1x116xf32>
    %47 = vector.broadcast %46 : vector<1x1x116xf32> to vector<2x2x116xf32>
    %48 = arith.mulf %43, %47 : vector<2x2x116xf32>
    %49 = arith.addf %42, %48 : vector<2x2x116xf32>
    %50 = vector.extract_strided_slice %1 {offsets = [2, 1, 0], sizes = [2, 2, 116], strides = [1, 1, 1]} : vector<4x4x116xf32> to vector<2x2x116xf32>
    %c7 = arith.constant 7 : index
    %c0_18 = arith.constant 0 : index
    %c0_19 = arith.constant 0 : index
    %51 = vector.load %arg2[%c7, %c0_18, %c0_19] : memref<9x1x116xf32, #tpu.memory_space<vmem>>, vector<1x1x116xf32>
    %52 = vector.shape_cast %51 : vector<1x1x116xf32> to vector<1x116xf32>
    %53 = vector.shape_cast %52 : vector<1x116xf32> to vector<1x1x116xf32>
    %54 = vector.broadcast %53 : vector<1x1x116xf32> to vector<2x2x116xf32>
    %55 = arith.mulf %50, %54 : vector<2x2x116xf32>
    %56 = arith.addf %49, %55 : vector<2x2x116xf32>
    %57 = vector.extract_strided_slice %1 {offsets = [2, 2, 0], sizes = [2, 2, 116], strides = [1, 1, 1]} : vector<4x4x116xf32> to vector<2x2x116xf32>
    %c8 = arith.constant 8 : index
    %c0_20 = arith.constant 0 : index
    %c0_21 = arith.constant 0 : index
    %58 = vector.load %arg2[%c8, %c0_20, %c0_21] : memref<9x1x116xf32, #tpu.memory_space<vmem>>, vector<1x1x116xf32>
    %59 = vector.shape_cast %58 : vector<1x1x116xf32> to vector<1x116xf32>
    %60 = vector.shape_cast %59 : vector<1x116xf32> to vector<1x1x116xf32>
    %61 = vector.broadcast %60 : vector<1x1x116xf32> to vector<2x2x116xf32>
    %62 = arith.mulf %57, %61 : vector<2x2x116xf32>
    %63 = arith.addf %56, %62 : vector<2x2x116xf32>
    %c0_22 = arith.constant 0 : index
    %c0_23 = arith.constant 0 : index
    %64 = vector.load %arg3[%c0_22, %c0_23] : memref<1x116xf32, #tpu.memory_space<vmem>>, vector<1x116xf32>
    %65 = vector.shape_cast %64 : vector<1x116xf32> to vector<1x1x116xf32>
    %66 = vector.broadcast %65 : vector<1x1x116xf32> to vector<2x2x116xf32>
    %67 = arith.addf %63, %66 : vector<2x2x116xf32>
    %c0_24 = arith.constant 0 : index
    %c0_25 = arith.constant 0 : index
    %c0_26 = arith.constant 0 : index
    %c0_27 = arith.constant 0 : index
    %68 = vector.load %arg4[%c0_24, %c0_25, %c0_26, %c0_27] : memref<1x2x2x116xf32, #tpu.memory_space<vmem>>, vector<1x2x2x116xf32>
    %69 = vector.shape_cast %68 : vector<1x2x2x116xf32> to vector<2x2x116xf32>
    %70 = vector.shape_cast %67 : vector<2x2x116xf32> to vector<1x2x2x116xf32>
    tpu.vector_store %arg4[%c0_24, %c0_25, %c0_26, %c0_27], %70 {strides = array<i32>} : memref<1x2x2x116xf32, #tpu.memory_space<vmem>>, vector<1x2x2x116xf32>,
    return
  }
  func.func @transform_0(%arg0: i32) -> (i32, i32, i32, i32) {
    %c0_i32 = arith.constant 0 : i32
    %c0_i32_0 = arith.constant 0 : i32
    %c0_i32_1 = arith.constant 0 : i32
    %c0_i32_2 = arith.constant 0 : i32
    return %arg0, %c0_i32, %c0_i32_0, %c0_i32_1 : i32, i32, i32, i32
  }
  func.func @transform_1(%arg0: i32) -> (i32, i32, i32) {
    %c0_i32 = arith.constant 0 : i32
    %c0_i32_0 = arith.constant 0 : i32
    %c0_i32_1 = arith.constant 0 : i32
    %c0_i32_2 = arith.constant 0 : i32
    return %c0_i32, %c0_i32_0, %c0_i32_1 : i32, i32, i32
  }
  func.func @transform_2(%arg0: i32) -> (i32, i32) {
    %c0_i32 = arith.constant 0 : i32
    %c0_i32_0 = arith.constant 0 : i32
    %c0_i32_1 = arith.constant 0 : i32
    return %c0_i32, %c0_i32_0 : i32, i32
  }
  func.func @transform_3(%arg0: i32) -> (i32, i32, i32, i32) {
    %c0_i32 = arith.constant 0 : i32
    %c0_i32_0 = arith.constant 0 : i32
    %c0_i32_1 = arith.constant 0 : i32
    %c0_i32_2 = arith.constant 0 : i32
    return %arg0, %c0_i32, %c0_i32_0, %c0_i32_1 : i32, i32, i32, i32
  }
}

module attributes {stable_mosaic.version = 11 : i64} {
  func.func @_matmul_bias_kernel(%arg0: i32, %arg1: memref<8x232xf32, #tpu.memory_space<vmem>>, %arg2: memref<232x232xf32, #tpu.memory_space<vmem>>, %arg3: memref<1x232xf32, #tpu.memory_space<vmem>>, %arg4: memref<8x232xf32, #tpu.memory_space<vmem>>) attributes {dimension_semantics = [#tpu.dimension_semantics<parallel>], iteration_bounds = array<i64: 1>, scalar_prefetch = 0 : i64, scratch_operands = 0 : i64, tpu.core_type = #tpu.core_type<tc>, window_params = [{transform_indices = @transform_0, window_bounds = array<i64: 8, 232>}, {pipeline_mode = #tpu.pipeline_mode<synchronous>, transform_indices = @transform_1, window_bounds = array<i64: 232, 232>}, {pipeline_mode = #tpu.pipeline_mode<synchronous>, transform_indices = @transform_2, window_bounds = array<i64: 1, 232>}, {transform_indices = @transform_3, window_bounds = array<i64: 8, 232>}]} {
    %c0 = arith.constant 0 : index
    %c0_0 = arith.constant 0 : index
    %0 = vector.load %arg1[%c0, %c0_0] : memref<8x232xf32, #tpu.memory_space<vmem>>, vector<8x232xf32>
    %c0_1 = arith.constant 0 : index
    %c0_2 = arith.constant 0 : index
    %1 = vector.load %arg2[%c0_1, %c0_2] : memref<232x232xf32, #tpu.memory_space<vmem>>, vector<232x232xf32>
    %cst = arith.constant dense<0.000000e+00> : vector<8x232xf32>
    %2 = tpu.matmul %0, %1, %cst {dimension_numbers = #tpu.dot_dimension_numbers<[1], [0], [0], [1], [0, 0, 1, 1], [], []>} : vector<8x232xf32>, vector<232x232xf32>, vector<8x232xf32> -> vector<8x232xf32>
    %c0_3 = arith.constant 0 : index
    %c0_4 = arith.constant 0 : index
    %3 = vector.load %arg3[%c0_3, %c0_4] : memref<1x232xf32, #tpu.memory_space<vmem>>, vector<1x232xf32>
    %4 = vector.broadcast %3 : vector<1x232xf32> to vector<8x232xf32>
    %5 = arith.addf %2, %4 : vector<8x232xf32>
    %cst_5 = arith.constant 0.000000e+00 : f32
    %6 = vector.broadcast %cst_5 : f32 to vector<8x232xf32>
    %7 = arith.maximumf %5, %6 : vector<8x232xf32>
    %c0_6 = arith.constant 0 : index
    %c0_7 = arith.constant 0 : index
    %8 = vector.load %arg4[%c0_6, %c0_7] : memref<8x232xf32, #tpu.memory_space<vmem>>, vector<8x232xf32>
    tpu.vector_store %arg4[%c0_6, %c0_7], %7 {strides = array<i32>} : memref<8x232xf32, #tpu.memory_space<vmem>>, vector<8x232xf32>,
    return
  }
  func.func @transform_0(%arg0: i32) -> (i32, i32) {
    %c0_i32 = arith.constant 0 : i32
    %c0_i32_0 = arith.constant 0 : i32
    return %arg0, %c0_i32 : i32, i32
  }
  func.func @transform_1(%arg0: i32) -> (i32, i32) {
    %c0_i32 = arith.constant 0 : i32
    %c0_i32_0 = arith.constant 0 : i32
    %c0_i32_1 = arith.constant 0 : i32
    return %c0_i32, %c0_i32_0 : i32, i32
  }
  func.func @transform_2(%arg0: i32) -> (i32, i32) {
    %c0_i32 = arith.constant 0 : i32
    %c0_i32_0 = arith.constant 0 : i32
    %c0_i32_1 = arith.constant 0 : i32
    return %c0_i32, %c0_i32_0 : i32, i32
  }
  func.func @transform_3(%arg0: i32) -> (i32, i32) {
    %c0_i32 = arith.constant 0 : i32
    %c0_i32_0 = arith.constant 0 : i32
    return %arg0, %c0_i32 : i32, i32
  }
}

module attributes {stable_mosaic.version = 11 : i64} {
  func.func @_dwconv_kernel(%arg0: i32, %arg1: memref<1x4x4x232xf32, #tpu.memory_space<vmem>>, %arg2: memref<9x1x232xf32, #tpu.memory_space<vmem>>, %arg3: memref<1x232xf32, #tpu.memory_space<vmem>>, %arg4: memref<1x2x2x232xf32, #tpu.memory_space<vmem>>) attributes {dimension_semantics = [#tpu.dimension_semantics<parallel>], iteration_bounds = array<i64: 2>, scalar_prefetch = 0 : i64, scratch_operands = 0 : i64, tpu.core_type = #tpu.core_type<tc>, window_params = [{transform_indices = @transform_0, window_bounds = array<i64: 1, 4, 4, 232>}, {pipeline_mode = #tpu.pipeline_mode<synchronous>, transform_indices = @transform_1, window_bounds = array<i64: 9, 1, 232>}, {pipeline_mode = #tpu.pipeline_mode<synchronous>, transform_indices = @transform_2, window_bounds = array<i64: 1, 232>}, {transform_indices = @transform_3, window_bounds = array<i64: 1, 2, 2, 232>}]} {
    %c0 = arith.constant 0 : index
    %c0_0 = arith.constant 0 : index
    %c0_1 = arith.constant 0 : index
    %c0_2 = arith.constant 0 : index
    %0 = vector.load %arg1[%c0, %c0_0, %c0_1, %c0_2] : memref<1x4x4x232xf32, #tpu.memory_space<vmem>>, vector<1x4x4x232xf32>
    %1 = vector.shape_cast %0 : vector<1x4x4x232xf32> to vector<4x4x232xf32>
    %2 = vector.extract_strided_slice %1 {offsets = [0, 0, 0], sizes = [2, 2, 232], strides = [1, 1, 1]} : vector<4x4x232xf32> to vector<2x2x232xf32>
    %c0_3 = arith.constant 0 : index
    %c0_4 = arith.constant 0 : index
    %c0_5 = arith.constant 0 : index
    %3 = vector.load %arg2[%c0_3, %c0_4, %c0_5] : memref<9x1x232xf32, #tpu.memory_space<vmem>>, vector<1x1x232xf32>
    %4 = vector.shape_cast %3 : vector<1x1x232xf32> to vector<1x232xf32>
    %5 = vector.shape_cast %4 : vector<1x232xf32> to vector<1x1x232xf32>
    %6 = vector.broadcast %5 : vector<1x1x232xf32> to vector<2x2x232xf32>
    %7 = arith.mulf %2, %6 : vector<2x2x232xf32>
    %8 = vector.extract_strided_slice %1 {offsets = [0, 1, 0], sizes = [2, 2, 232], strides = [1, 1, 1]} : vector<4x4x232xf32> to vector<2x2x232xf32>
    %c1 = arith.constant 1 : index
    %c0_6 = arith.constant 0 : index
    %c0_7 = arith.constant 0 : index
    %9 = vector.load %arg2[%c1, %c0_6, %c0_7] : memref<9x1x232xf32, #tpu.memory_space<vmem>>, vector<1x1x232xf32>
    %10 = vector.shape_cast %9 : vector<1x1x232xf32> to vector<1x232xf32>
    %11 = vector.shape_cast %10 : vector<1x232xf32> to vector<1x1x232xf32>
    %12 = vector.broadcast %11 : vector<1x1x232xf32> to vector<2x2x232xf32>
    %13 = arith.mulf %8, %12 : vector<2x2x232xf32>
    %14 = arith.addf %7, %13 : vector<2x2x232xf32>
    %15 = vector.extract_strided_slice %1 {offsets = [0, 2, 0], sizes = [2, 2, 232], strides = [1, 1, 1]} : vector<4x4x232xf32> to vector<2x2x232xf32>
    %c2 = arith.constant 2 : index
    %c0_8 = arith.constant 0 : index
    %c0_9 = arith.constant 0 : index
    %16 = vector.load %arg2[%c2, %c0_8, %c0_9] : memref<9x1x232xf32, #tpu.memory_space<vmem>>, vector<1x1x232xf32>
    %17 = vector.shape_cast %16 : vector<1x1x232xf32> to vector<1x232xf32>
    %18 = vector.shape_cast %17 : vector<1x232xf32> to vector<1x1x232xf32>
    %19 = vector.broadcast %18 : vector<1x1x232xf32> to vector<2x2x232xf32>
    %20 = arith.mulf %15, %19 : vector<2x2x232xf32>
    %21 = arith.addf %14, %20 : vector<2x2x232xf32>
    %22 = vector.extract_strided_slice %1 {offsets = [1, 0, 0], sizes = [2, 2, 232], strides = [1, 1, 1]} : vector<4x4x232xf32> to vector<2x2x232xf32>
    %c3 = arith.constant 3 : index
    %c0_10 = arith.constant 0 : index
    %c0_11 = arith.constant 0 : index
    %23 = vector.load %arg2[%c3, %c0_10, %c0_11] : memref<9x1x232xf32, #tpu.memory_space<vmem>>, vector<1x1x232xf32>
    %24 = vector.shape_cast %23 : vector<1x1x232xf32> to vector<1x232xf32>
    %25 = vector.shape_cast %24 : vector<1x232xf32> to vector<1x1x232xf32>
    %26 = vector.broadcast %25 : vector<1x1x232xf32> to vector<2x2x232xf32>
    %27 = arith.mulf %22, %26 : vector<2x2x232xf32>
    %28 = arith.addf %21, %27 : vector<2x2x232xf32>
    %29 = vector.extract_strided_slice %1 {offsets = [1, 1, 0], sizes = [2, 2, 232], strides = [1, 1, 1]} : vector<4x4x232xf32> to vector<2x2x232xf32>
    %c4 = arith.constant 4 : index
    %c0_12 = arith.constant 0 : index
    %c0_13 = arith.constant 0 : index
    %30 = vector.load %arg2[%c4, %c0_12, %c0_13] : memref<9x1x232xf32, #tpu.memory_space<vmem>>, vector<1x1x232xf32>
    %31 = vector.shape_cast %30 : vector<1x1x232xf32> to vector<1x232xf32>
    %32 = vector.shape_cast %31 : vector<1x232xf32> to vector<1x1x232xf32>
    %33 = vector.broadcast %32 : vector<1x1x232xf32> to vector<2x2x232xf32>
    %34 = arith.mulf %29, %33 : vector<2x2x232xf32>
    %35 = arith.addf %28, %34 : vector<2x2x232xf32>
    %36 = vector.extract_strided_slice %1 {offsets = [1, 2, 0], sizes = [2, 2, 232], strides = [1, 1, 1]} : vector<4x4x232xf32> to vector<2x2x232xf32>
    %c5 = arith.constant 5 : index
    %c0_14 = arith.constant 0 : index
    %c0_15 = arith.constant 0 : index
    %37 = vector.load %arg2[%c5, %c0_14, %c0_15] : memref<9x1x232xf32, #tpu.memory_space<vmem>>, vector<1x1x232xf32>
    %38 = vector.shape_cast %37 : vector<1x1x232xf32> to vector<1x232xf32>
    %39 = vector.shape_cast %38 : vector<1x232xf32> to vector<1x1x232xf32>
    %40 = vector.broadcast %39 : vector<1x1x232xf32> to vector<2x2x232xf32>
    %41 = arith.mulf %36, %40 : vector<2x2x232xf32>
    %42 = arith.addf %35, %41 : vector<2x2x232xf32>
    %43 = vector.extract_strided_slice %1 {offsets = [2, 0, 0], sizes = [2, 2, 232], strides = [1, 1, 1]} : vector<4x4x232xf32> to vector<2x2x232xf32>
    %c6 = arith.constant 6 : index
    %c0_16 = arith.constant 0 : index
    %c0_17 = arith.constant 0 : index
    %44 = vector.load %arg2[%c6, %c0_16, %c0_17] : memref<9x1x232xf32, #tpu.memory_space<vmem>>, vector<1x1x232xf32>
    %45 = vector.shape_cast %44 : vector<1x1x232xf32> to vector<1x232xf32>
    %46 = vector.shape_cast %45 : vector<1x232xf32> to vector<1x1x232xf32>
    %47 = vector.broadcast %46 : vector<1x1x232xf32> to vector<2x2x232xf32>
    %48 = arith.mulf %43, %47 : vector<2x2x232xf32>
    %49 = arith.addf %42, %48 : vector<2x2x232xf32>
    %50 = vector.extract_strided_slice %1 {offsets = [2, 1, 0], sizes = [2, 2, 232], strides = [1, 1, 1]} : vector<4x4x232xf32> to vector<2x2x232xf32>
    %c7 = arith.constant 7 : index
    %c0_18 = arith.constant 0 : index
    %c0_19 = arith.constant 0 : index
    %51 = vector.load %arg2[%c7, %c0_18, %c0_19] : memref<9x1x232xf32, #tpu.memory_space<vmem>>, vector<1x1x232xf32>
    %52 = vector.shape_cast %51 : vector<1x1x232xf32> to vector<1x232xf32>
    %53 = vector.shape_cast %52 : vector<1x232xf32> to vector<1x1x232xf32>
    %54 = vector.broadcast %53 : vector<1x1x232xf32> to vector<2x2x232xf32>
    %55 = arith.mulf %50, %54 : vector<2x2x232xf32>
    %56 = arith.addf %49, %55 : vector<2x2x232xf32>
    %57 = vector.extract_strided_slice %1 {offsets = [2, 2, 0], sizes = [2, 2, 232], strides = [1, 1, 1]} : vector<4x4x232xf32> to vector<2x2x232xf32>
    %c8 = arith.constant 8 : index
    %c0_20 = arith.constant 0 : index
    %c0_21 = arith.constant 0 : index
    %58 = vector.load %arg2[%c8, %c0_20, %c0_21] : memref<9x1x232xf32, #tpu.memory_space<vmem>>, vector<1x1x232xf32>
    %59 = vector.shape_cast %58 : vector<1x1x232xf32> to vector<1x232xf32>
    %60 = vector.shape_cast %59 : vector<1x232xf32> to vector<1x1x232xf32>
    %61 = vector.broadcast %60 : vector<1x1x232xf32> to vector<2x2x232xf32>
    %62 = arith.mulf %57, %61 : vector<2x2x232xf32>
    %63 = arith.addf %56, %62 : vector<2x2x232xf32>
    %c0_22 = arith.constant 0 : index
    %c0_23 = arith.constant 0 : index
    %64 = vector.load %arg3[%c0_22, %c0_23] : memref<1x232xf32, #tpu.memory_space<vmem>>, vector<1x232xf32>
    %65 = vector.shape_cast %64 : vector<1x232xf32> to vector<1x1x232xf32>
    %66 = vector.broadcast %65 : vector<1x1x232xf32> to vector<2x2x232xf32>
    %67 = arith.addf %63, %66 : vector<2x2x232xf32>
    %c0_24 = arith.constant 0 : index
    %c0_25 = arith.constant 0 : index
    %c0_26 = arith.constant 0 : index
    %c0_27 = arith.constant 0 : index
    %68 = vector.load %arg4[%c0_24, %c0_25, %c0_26, %c0_27] : memref<1x2x2x232xf32, #tpu.memory_space<vmem>>, vector<1x2x2x232xf32>
    %69 = vector.shape_cast %68 : vector<1x2x2x232xf32> to vector<2x2x232xf32>
    %70 = vector.shape_cast %67 : vector<2x2x232xf32> to vector<1x2x2x232xf32>
    tpu.vector_store %arg4[%c0_24, %c0_25, %c0_26, %c0_27], %70 {strides = array<i32>} : memref<1x2x2x232xf32, #tpu.memory_space<vmem>>, vector<1x2x2x232xf32>,
    return
  }
  func.func @transform_0(%arg0: i32) -> (i32, i32, i32, i32) {
    %c0_i32 = arith.constant 0 : i32
    %c0_i32_0 = arith.constant 0 : i32
    %c0_i32_1 = arith.constant 0 : i32
    %c0_i32_2 = arith.constant 0 : i32
    return %arg0, %c0_i32, %c0_i32_0, %c0_i32_1 : i32, i32, i32, i32
  }
  func.func @transform_1(%arg0: i32) -> (i32, i32, i32) {
    %c0_i32 = arith.constant 0 : i32
    %c0_i32_0 = arith.constant 0 : i32
    %c0_i32_1 = arith.constant 0 : i32
    %c0_i32_2 = arith.constant 0 : i32
    return %c0_i32, %c0_i32_0, %c0_i32_1 : i32, i32, i32
  }
  func.func @transform_2(%arg0: i32) -> (i32, i32) {
    %c0_i32 = arith.constant 0 : i32
    %c0_i32_0 = arith.constant 0 : i32
    %c0_i32_1 = arith.constant 0 : i32
    return %c0_i32, %c0_i32_0 : i32, i32
  }
  func.func @transform_3(%arg0: i32) -> (i32, i32, i32, i32) {
    %c0_i32 = arith.constant 0 : i32
    %c0_i32_0 = arith.constant 0 : i32
    %c0_i32_1 = arith.constant 0 : i32
    %c0_i32_2 = arith.constant 0 : i32
    return %arg0, %c0_i32, %c0_i32_0, %c0_i32_1 : i32, i32, i32, i32
  }
}

module attributes {stable_mosaic.version = 11 : i64} {
  func.func @_matmul_bias_kernel(%arg0: i32, %arg1: memref<2x232xf32, #tpu.memory_space<vmem>>, %arg2: memref<232x232xf32, #tpu.memory_space<vmem>>, %arg3: memref<1x232xf32, #tpu.memory_space<vmem>>, %arg4: memref<2x232xf32, #tpu.memory_space<vmem>>) attributes {dimension_semantics = [#tpu.dimension_semantics<parallel>], iteration_bounds = array<i64: 1>, scalar_prefetch = 0 : i64, scratch_operands = 0 : i64, tpu.core_type = #tpu.core_type<tc>, window_params = [{transform_indices = @transform_0, window_bounds = array<i64: 2, 232>}, {pipeline_mode = #tpu.pipeline_mode<synchronous>, transform_indices = @transform_1, window_bounds = array<i64: 232, 232>}, {pipeline_mode = #tpu.pipeline_mode<synchronous>, transform_indices = @transform_2, window_bounds = array<i64: 1, 232>}, {transform_indices = @transform_3, window_bounds = array<i64: 2, 232>}]} {
    %c0 = arith.constant 0 : index
    %c0_0 = arith.constant 0 : index
    %0 = vector.load %arg1[%c0, %c0_0] : memref<2x232xf32, #tpu.memory_space<vmem>>, vector<2x232xf32>
    %c0_1 = arith.constant 0 : index
    %c0_2 = arith.constant 0 : index
    %1 = vector.load %arg2[%c0_1, %c0_2] : memref<232x232xf32, #tpu.memory_space<vmem>>, vector<232x232xf32>
    %cst = arith.constant dense<0.000000e+00> : vector<2x232xf32>
    %2 = tpu.matmul %0, %1, %cst {dimension_numbers = #tpu.dot_dimension_numbers<[1], [0], [0], [1], [0, 0, 1, 1], [], []>} : vector<2x232xf32>, vector<232x232xf32>, vector<2x232xf32> -> vector<2x232xf32>
    %c0_3 = arith.constant 0 : index
    %c0_4 = arith.constant 0 : index
    %3 = vector.load %arg3[%c0_3, %c0_4] : memref<1x232xf32, #tpu.memory_space<vmem>>, vector<1x232xf32>
    %4 = vector.broadcast %3 : vector<1x232xf32> to vector<2x232xf32>
    %5 = arith.addf %2, %4 : vector<2x232xf32>
    %cst_5 = arith.constant 0.000000e+00 : f32
    %6 = vector.broadcast %cst_5 : f32 to vector<2x232xf32>
    %7 = arith.maximumf %5, %6 : vector<2x232xf32>
    %c0_6 = arith.constant 0 : index
    %c0_7 = arith.constant 0 : index
    %8 = vector.load %arg4[%c0_6, %c0_7] : memref<2x232xf32, #tpu.memory_space<vmem>>, vector<2x232xf32>
    tpu.vector_store %arg4[%c0_6, %c0_7], %7 {strides = array<i32>} : memref<2x232xf32, #tpu.memory_space<vmem>>, vector<2x232xf32>,
    return
  }
  func.func @transform_0(%arg0: i32) -> (i32, i32) {
    %c0_i32 = arith.constant 0 : i32
    %c0_i32_0 = arith.constant 0 : i32
    return %arg0, %c0_i32 : i32, i32
  }
  func.func @transform_1(%arg0: i32) -> (i32, i32) {
    %c0_i32 = arith.constant 0 : i32
    %c0_i32_0 = arith.constant 0 : i32
    %c0_i32_1 = arith.constant 0 : i32
    return %c0_i32, %c0_i32_0 : i32, i32
  }
  func.func @transform_2(%arg0: i32) -> (i32, i32) {
    %c0_i32 = arith.constant 0 : i32
    %c0_i32_0 = arith.constant 0 : i32
    %c0_i32_1 = arith.constant 0 : i32
    return %c0_i32, %c0_i32_0 : i32, i32
  }
  func.func @transform_3(%arg0: i32) -> (i32, i32) {
    %c0_i32 = arith.constant 0 : i32
    %c0_i32_0 = arith.constant 0 : i32
    return %arg0, %c0_i32 : i32, i32
  }
}

module attributes {stable_mosaic.version = 11 : i64} {
  func.func @_dwconv_kernel(%arg0: i32, %arg1: memref<1x3x3x232xf32, #tpu.memory_space<vmem>>, %arg2: memref<9x1x232xf32, #tpu.memory_space<vmem>>, %arg3: memref<1x232xf32, #tpu.memory_space<vmem>>, %arg4: memref<1x1x1x232xf32, #tpu.memory_space<vmem>>) attributes {dimension_semantics = [#tpu.dimension_semantics<parallel>], iteration_bounds = array<i64: 2>, scalar_prefetch = 0 : i64, scratch_operands = 0 : i64, tpu.core_type = #tpu.core_type<tc>, window_params = [{transform_indices = @transform_0, window_bounds = array<i64: 1, 3, 3, 232>}, {pipeline_mode = #tpu.pipeline_mode<synchronous>, transform_indices = @transform_1, window_bounds = array<i64: 9, 1, 232>}, {pipeline_mode = #tpu.pipeline_mode<synchronous>, transform_indices = @transform_2, window_bounds = array<i64: 1, 232>}, {transform_indices = @transform_3, window_bounds = array<i64: 1, 1, 1, 232>}]} {
    %c0 = arith.constant 0 : index
    %c0_0 = arith.constant 0 : index
    %c0_1 = arith.constant 0 : index
    %c0_2 = arith.constant 0 : index
    %0 = vector.load %arg1[%c0, %c0_0, %c0_1, %c0_2] : memref<1x3x3x232xf32, #tpu.memory_space<vmem>>, vector<1x3x3x232xf32>
    %1 = vector.shape_cast %0 : vector<1x3x3x232xf32> to vector<3x3x232xf32>
    %2 = vector.extract_strided_slice %1 {offsets = [0, 0, 0], sizes = [1, 1, 232], strides = [1, 1, 1]} : vector<3x3x232xf32> to vector<1x1x232xf32>
    %c0_3 = arith.constant 0 : index
    %c0_4 = arith.constant 0 : index
    %c0_5 = arith.constant 0 : index
    %3 = vector.load %arg2[%c0_3, %c0_4, %c0_5] : memref<9x1x232xf32, #tpu.memory_space<vmem>>, vector<1x1x232xf32>
    %4 = vector.shape_cast %3 : vector<1x1x232xf32> to vector<1x232xf32>
    %5 = vector.shape_cast %4 : vector<1x232xf32> to vector<1x1x232xf32>
    %6 = arith.mulf %2, %5 : vector<1x1x232xf32>
    %7 = vector.extract_strided_slice %1 {offsets = [0, 1, 0], sizes = [1, 1, 232], strides = [1, 1, 1]} : vector<3x3x232xf32> to vector<1x1x232xf32>
    %c1 = arith.constant 1 : index
    %c0_6 = arith.constant 0 : index
    %c0_7 = arith.constant 0 : index
    %8 = vector.load %arg2[%c1, %c0_6, %c0_7] : memref<9x1x232xf32, #tpu.memory_space<vmem>>, vector<1x1x232xf32>
    %9 = vector.shape_cast %8 : vector<1x1x232xf32> to vector<1x232xf32>
    %10 = vector.shape_cast %9 : vector<1x232xf32> to vector<1x1x232xf32>
    %11 = arith.mulf %7, %10 : vector<1x1x232xf32>
    %12 = arith.addf %6, %11 : vector<1x1x232xf32>
    %13 = vector.extract_strided_slice %1 {offsets = [0, 2, 0], sizes = [1, 1, 232], strides = [1, 1, 1]} : vector<3x3x232xf32> to vector<1x1x232xf32>
    %c2 = arith.constant 2 : index
    %c0_8 = arith.constant 0 : index
    %c0_9 = arith.constant 0 : index
    %14 = vector.load %arg2[%c2, %c0_8, %c0_9] : memref<9x1x232xf32, #tpu.memory_space<vmem>>, vector<1x1x232xf32>
    %15 = vector.shape_cast %14 : vector<1x1x232xf32> to vector<1x232xf32>
    %16 = vector.shape_cast %15 : vector<1x232xf32> to vector<1x1x232xf32>
    %17 = arith.mulf %13, %16 : vector<1x1x232xf32>
    %18 = arith.addf %12, %17 : vector<1x1x232xf32>
    %19 = vector.extract_strided_slice %1 {offsets = [1, 0, 0], sizes = [1, 1, 232], strides = [1, 1, 1]} : vector<3x3x232xf32> to vector<1x1x232xf32>
    %c3 = arith.constant 3 : index
    %c0_10 = arith.constant 0 : index
    %c0_11 = arith.constant 0 : index
    %20 = vector.load %arg2[%c3, %c0_10, %c0_11] : memref<9x1x232xf32, #tpu.memory_space<vmem>>, vector<1x1x232xf32>
    %21 = vector.shape_cast %20 : vector<1x1x232xf32> to vector<1x232xf32>
    %22 = vector.shape_cast %21 : vector<1x232xf32> to vector<1x1x232xf32>
    %23 = arith.mulf %19, %22 : vector<1x1x232xf32>
    %24 = arith.addf %18, %23 : vector<1x1x232xf32>
    %25 = vector.extract_strided_slice %1 {offsets = [1, 1, 0], sizes = [1, 1, 232], strides = [1, 1, 1]} : vector<3x3x232xf32> to vector<1x1x232xf32>
    %c4 = arith.constant 4 : index
    %c0_12 = arith.constant 0 : index
    %c0_13 = arith.constant 0 : index
    %26 = vector.load %arg2[%c4, %c0_12, %c0_13] : memref<9x1x232xf32, #tpu.memory_space<vmem>>, vector<1x1x232xf32>
    %27 = vector.shape_cast %26 : vector<1x1x232xf32> to vector<1x232xf32>
    %28 = vector.shape_cast %27 : vector<1x232xf32> to vector<1x1x232xf32>
    %29 = arith.mulf %25, %28 : vector<1x1x232xf32>
    %30 = arith.addf %24, %29 : vector<1x1x232xf32>
    %31 = vector.extract_strided_slice %1 {offsets = [1, 2, 0], sizes = [1, 1, 232], strides = [1, 1, 1]} : vector<3x3x232xf32> to vector<1x1x232xf32>
    %c5 = arith.constant 5 : index
    %c0_14 = arith.constant 0 : index
    %c0_15 = arith.constant 0 : index
    %32 = vector.load %arg2[%c5, %c0_14, %c0_15] : memref<9x1x232xf32, #tpu.memory_space<vmem>>, vector<1x1x232xf32>
    %33 = vector.shape_cast %32 : vector<1x1x232xf32> to vector<1x232xf32>
    %34 = vector.shape_cast %33 : vector<1x232xf32> to vector<1x1x232xf32>
    %35 = arith.mulf %31, %34 : vector<1x1x232xf32>
    %36 = arith.addf %30, %35 : vector<1x1x232xf32>
    %37 = vector.extract_strided_slice %1 {offsets = [2, 0, 0], sizes = [1, 1, 232], strides = [1, 1, 1]} : vector<3x3x232xf32> to vector<1x1x232xf32>
    %c6 = arith.constant 6 : index
    %c0_16 = arith.constant 0 : index
    %c0_17 = arith.constant 0 : index
    %38 = vector.load %arg2[%c6, %c0_16, %c0_17] : memref<9x1x232xf32, #tpu.memory_space<vmem>>, vector<1x1x232xf32>
    %39 = vector.shape_cast %38 : vector<1x1x232xf32> to vector<1x232xf32>
    %40 = vector.shape_cast %39 : vector<1x232xf32> to vector<1x1x232xf32>
    %41 = arith.mulf %37, %40 : vector<1x1x232xf32>
    %42 = arith.addf %36, %41 : vector<1x1x232xf32>
    %43 = vector.extract_strided_slice %1 {offsets = [2, 1, 0], sizes = [1, 1, 232], strides = [1, 1, 1]} : vector<3x3x232xf32> to vector<1x1x232xf32>
    %c7 = arith.constant 7 : index
    %c0_18 = arith.constant 0 : index
    %c0_19 = arith.constant 0 : index
    %44 = vector.load %arg2[%c7, %c0_18, %c0_19] : memref<9x1x232xf32, #tpu.memory_space<vmem>>, vector<1x1x232xf32>
    %45 = vector.shape_cast %44 : vector<1x1x232xf32> to vector<1x232xf32>
    %46 = vector.shape_cast %45 : vector<1x232xf32> to vector<1x1x232xf32>
    %47 = arith.mulf %43, %46 : vector<1x1x232xf32>
    %48 = arith.addf %42, %47 : vector<1x1x232xf32>
    %49 = vector.extract_strided_slice %1 {offsets = [2, 2, 0], sizes = [1, 1, 232], strides = [1, 1, 1]} : vector<3x3x232xf32> to vector<1x1x232xf32>
    %c8 = arith.constant 8 : index
    %c0_20 = arith.constant 0 : index
    %c0_21 = arith.constant 0 : index
    %50 = vector.load %arg2[%c8, %c0_20, %c0_21] : memref<9x1x232xf32, #tpu.memory_space<vmem>>, vector<1x1x232xf32>
    %51 = vector.shape_cast %50 : vector<1x1x232xf32> to vector<1x232xf32>
    %52 = vector.shape_cast %51 : vector<1x232xf32> to vector<1x1x232xf32>
    %53 = arith.mulf %49, %52 : vector<1x1x232xf32>
    %54 = arith.addf %48, %53 : vector<1x1x232xf32>
    %c0_22 = arith.constant 0 : index
    %c0_23 = arith.constant 0 : index
    %55 = vector.load %arg3[%c0_22, %c0_23] : memref<1x232xf32, #tpu.memory_space<vmem>>, vector<1x232xf32>
    %56 = vector.shape_cast %55 : vector<1x232xf32> to vector<1x1x232xf32>
    %57 = arith.addf %54, %56 : vector<1x1x232xf32>
    %c0_24 = arith.constant 0 : index
    %c0_25 = arith.constant 0 : index
    %c0_26 = arith.constant 0 : index
    %c0_27 = arith.constant 0 : index
    %58 = vector.load %arg4[%c0_24, %c0_25, %c0_26, %c0_27] : memref<1x1x1x232xf32, #tpu.memory_space<vmem>>, vector<1x1x1x232xf32>
    %59 = vector.shape_cast %58 : vector<1x1x1x232xf32> to vector<1x1x232xf32>
    %60 = vector.shape_cast %57 : vector<1x1x232xf32> to vector<1x1x1x232xf32>
    tpu.vector_store %arg4[%c0_24, %c0_25, %c0_26, %c0_27], %60 {strides = array<i32>} : memref<1x1x1x232xf32, #tpu.memory_space<vmem>>, vector<1x1x1x232xf32>,
    return
  }
  func.func @transform_0(%arg0: i32) -> (i32, i32, i32, i32) {
    %c0_i32 = arith.constant 0 : i32
    %c0_i32_0 = arith.constant 0 : i32
    %c0_i32_1 = arith.constant 0 : i32
    %c0_i32_2 = arith.constant 0 : i32
    return %arg0, %c0_i32, %c0_i32_0, %c0_i32_1 : i32, i32, i32, i32
  }
  func.func @transform_1(%arg0: i32) -> (i32, i32, i32) {
    %c0_i32 = arith.constant 0 : i32
    %c0_i32_0 = arith.constant 0 : i32
    %c0_i32_1 = arith.constant 0 : i32
    %c0_i32_2 = arith.constant 0 : i32
    return %c0_i32, %c0_i32_0, %c0_i32_1 : i32, i32, i32
  }
  func.func @transform_2(%arg0: i32) -> (i32, i32) {
    %c0_i32 = arith.constant 0 : i32
    %c0_i32_0 = arith.constant 0 : i32
    %c0_i32_1 = arith.constant 0 : i32
    return %c0_i32, %c0_i32_0 : i32, i32
  }
  func.func @transform_3(%arg0: i32) -> (i32, i32, i32, i32) {
    %c0_i32 = arith.constant 0 : i32
    %c0_i32_0 = arith.constant 0 : i32
    %c0_i32_1 = arith.constant 0 : i32
    %c0_i32_2 = arith.constant 0 : i32
    return %arg0, %c0_i32, %c0_i32_0, %c0_i32_1 : i32, i32, i32, i32
  }
}

module attributes {stable_mosaic.version = 11 : i64} {
  func.func @_head_kernel(%arg0: i32, %arg1: memref<1x1x464xf32, #tpu.memory_space<vmem>>, %arg2: memref<464x1024xf32, #tpu.memory_space<vmem>>, %arg3: memref<1x1024xf32, #tpu.memory_space<vmem>>, %arg4: memref<1024x10xf32, #tpu.memory_space<vmem>>, %arg5: memref<1x10xf32, #tpu.memory_space<vmem>>, %arg6: memref<1x1x10xf32, #tpu.memory_space<vmem>>) attributes {dimension_semantics = [#tpu.dimension_semantics<parallel>], iteration_bounds = array<i64: 2>, scalar_prefetch = 0 : i64, scratch_operands = 0 : i64, tpu.core_type = #tpu.core_type<tc>, window_params = [{transform_indices = @transform_0, window_bounds = array<i64: 1, 1, 464>}, {pipeline_mode = #tpu.pipeline_mode<synchronous>, transform_indices = @transform_1, window_bounds = array<i64: 464, 1024>}, {pipeline_mode = #tpu.pipeline_mode<synchronous>, transform_indices = @transform_2, window_bounds = array<i64: 1, 1024>}, {pipeline_mode = #tpu.pipeline_mode<synchronous>, transform_indices = @transform_3, window_bounds = array<i64: 1024, 10>}, {pipeline_mode = #tpu.pipeline_mode<synchronous>, transform_indices = @transform_4, window_bounds = array<i64: 1, 10>}, {transform_indices = @transform_5, window_bounds = array<i64: 1, 1, 10>}]} {
    %c0 = arith.constant 0 : index
    %c0_0 = arith.constant 0 : index
    %c0_1 = arith.constant 0 : index
    %0 = vector.load %arg1[%c0, %c0_0, %c0_1] : memref<1x1x464xf32, #tpu.memory_space<vmem>>, vector<1x1x464xf32>
    %1 = vector.shape_cast %0 : vector<1x1x464xf32> to vector<1x464xf32>
    %c0_2 = arith.constant 0 : index
    %c0_3 = arith.constant 0 : index
    %2 = vector.load %arg2[%c0_2, %c0_3] : memref<464x1024xf32, #tpu.memory_space<vmem>>, vector<464x1024xf32>
    %cst = arith.constant dense<0.000000e+00> : vector<1x1024xf32>
    %3 = tpu.matmul %1, %2, %cst {dimension_numbers = #tpu.dot_dimension_numbers<[1], [0], [0], [1], [0, 0, 1, 1], [], []>} : vector<1x464xf32>, vector<464x1024xf32>, vector<1x1024xf32> -> vector<1x1024xf32>
    %c0_4 = arith.constant 0 : index
    %c0_5 = arith.constant 0 : index
    %4 = vector.load %arg3[%c0_4, %c0_5] : memref<1x1024xf32, #tpu.memory_space<vmem>>, vector<1x1024xf32>
    %5 = arith.addf %3, %4 : vector<1x1024xf32>
    %cst_6 = arith.constant 0.000000e+00 : f32
    %6 = vector.broadcast %cst_6 : f32 to vector<1x1024xf32>
    %7 = arith.maximumf %5, %6 : vector<1x1024xf32>
    %cst_7 = arith.constant dense<0.000000e+00> : vector<1024xf32>
    %8 = vector.multi_reduction <add>, %7, %cst_7 [0] : vector<1x1024xf32> to vector<1024xf32>
    %9 = vector.shape_cast %8 : vector<1024xf32> to vector<1x1024xf32>
    %cst_8 = arith.constant 1.000000e+00 : f32
    %10 = vector.broadcast %cst_8 : f32 to vector<1x1024xf32>
    %11 = arith.mulf %9, %10 : vector<1x1024xf32>
    %c0_9 = arith.constant 0 : index
    %c0_10 = arith.constant 0 : index
    %12 = vector.load %arg4[%c0_9, %c0_10] : memref<1024x10xf32, #tpu.memory_space<vmem>>, vector<1024x10xf32>
    %cst_11 = arith.constant dense<0.000000e+00> : vector<1x10xf32>
    %13 = tpu.matmul %11, %12, %cst_11 {dimension_numbers = #tpu.dot_dimension_numbers<[1], [0], [0], [1], [0, 0, 1, 1], [], []>} : vector<1x1024xf32>, vector<1024x10xf32>, vector<1x10xf32> -> vector<1x10xf32>
    %c0_12 = arith.constant 0 : index
    %c0_13 = arith.constant 0 : index
    %14 = vector.load %arg5[%c0_12, %c0_13] : memref<1x10xf32, #tpu.memory_space<vmem>>, vector<1x10xf32>
    %15 = arith.addf %13, %14 : vector<1x10xf32>
    %c0_14 = arith.constant 0 : index
    %c0_15 = arith.constant 0 : index
    %c0_16 = arith.constant 0 : index
    %16 = vector.load %arg6[%c0_14, %c0_15, %c0_16] : memref<1x1x10xf32, #tpu.memory_space<vmem>>, vector<1x1x10xf32>
    %17 = vector.shape_cast %16 : vector<1x1x10xf32> to vector<1x10xf32>
    %18 = vector.shape_cast %15 : vector<1x10xf32> to vector<1x1x10xf32>
    tpu.vector_store %arg6[%c0_14, %c0_15, %c0_16], %18 {strides = array<i32>} : memref<1x1x10xf32, #tpu.memory_space<vmem>>, vector<1x1x10xf32>,
    return
  }
  func.func @transform_0(%arg0: i32) -> (i32, i32, i32) {
    %c0_i32 = arith.constant 0 : i32
    %c0_i32_0 = arith.constant 0 : i32
    %c0_i32_1 = arith.constant 0 : i32
    return %arg0, %c0_i32, %c0_i32_0 : i32, i32, i32
  }
  func.func @transform_1(%arg0: i32) -> (i32, i32) {
    %c0_i32 = arith.constant 0 : i32
    %c0_i32_0 = arith.constant 0 : i32
    %c0_i32_1 = arith.constant 0 : i32
    return %c0_i32, %c0_i32_0 : i32, i32
  }
  func.func @transform_2(%arg0: i32) -> (i32, i32) {
    %c0_i32 = arith.constant 0 : i32
    %c0_i32_0 = arith.constant 0 : i32
    %c0_i32_1 = arith.constant 0 : i32
    return %c0_i32, %c0_i32_0 : i32, i32
  }
  func.func @transform_3(%arg0: i32) -> (i32, i32) {
    %c0_i32 = arith.constant 0 : i32
    %c0_i32_0 = arith.constant 0 : i32
    %c0_i32_1 = arith.constant 0 : i32
    return %c0_i32, %c0_i32_0 : i32, i32
  }
  func.func @transform_4(%arg0: i32) -> (i32, i32) {
    %c0_i32 = arith.constant 0 : i32
    %c0_i32_0 = arith.constant 0 : i32
    %c0_i32_1 = arith.constant 0 : i32
    return %c0_i32, %c0_i32_0 : i32, i32
  }
  func.func @transform_5(%arg0: i32) -> (i32, i32, i32) {
    %c0_i32 = arith.constant 0 : i32
    %c0_i32_0 = arith.constant 0 : i32
    %c0_i32_1 = arith.constant 0 : i32
    return %arg0, %c0_i32, %c0_i32_0 : i32, i32, i32
  }
}

</mosaic_0001>

<bundles_post_ra>
// kernel: shufflenet_forward.57
= control target key start
LH: loop header
LB: loop body
LE: loop exit
PB: predicated region body
PF: predicated region fallthrough
CT: control target
= control target key end

     0   :  { %vm282_vm0 = vcmask 1042432   ;;  %vm89_vm1 = vcmask 220160   ;;  %vm1057_vm2 = vmmov 1   ;;  %vm735_vm4 = vcmask 195584   ;;  %s1671_s1 = inlined_call_operand.vmem [shape: f32[27,24], index: 1, kind: input, shape index: {}]   ;;  %s1672_s0 = inlined_call_operand.vmem [shape: f32[512,27], index: 0, kind: input, shape index: {}]   ;;  %s1673_s2 = inlined_call_operand.vmem [shape: f32[1,24], index: 2, kind: input, shape index: {}]   ;;  %s1674_s3 = inlined_call_operand.vmem [shape: f32[512,24], index: 3, kind: output, shape index: {}]  }
   0x1   :  { %v78_v0 = vld [vmem:[%s1671_s1] sm:$0xff]  ;;  %v79_v1 = vld [vmem:[%s1671_s1 + $0x8] sm:$0xff]  ;;  %v80_v2 = vld [vmem:[%s1671_s1 + $0x10] sm:$0xff] }
   0x2   :  { %v1042_v3 = vpack.c.bf16 %v79_v1, %v78_v0  ;;  %v81_v4 = vld [vmem:[%s1671_s1 + $0x18] sm:$0x7]  ;;  %v14_v5 = vld [vmem:[%s1672_s0] sm:$0xff]  ;;  %vm1047_vm3 = vmpackc.low %vm282_vm0, %vm1057_vm2 }
   0x3   :  { %v1046_v6 = vpack.c.bf16 %v81_v4, %v80_v2  ;;  %946 = vmatprep.mubr.msk.f32.mxu0 %vm89_vm1, %v14_v5  ;;  %v46_v7 = vld [vmem:[%s1672_s0 + $0x100] sm:$0xff]  ;;  %v15_v8 = vld [vmem:[%s1672_s0 + $0x8] sm:$0xff]  ;;  %v16_v10 = vld [vmem:[%s1672_s0 + $0x10] sm:$0xff] }
   0x4   :  { %1043 = vmatprep.subr.bf16.mxu0 %v1042_v3  ;;  %1052 = vmatprep.subr.bf16.mxu1 %v1042_v3  ;;  %v47_v9 = vld [vmem:[%s1672_s0 + $0x108] sm:$0xff]  ;;  %v48_v11 = vld [vmem:[%s1672_s0 + $0x110] sm:$0xff]  ;;  %v17_v12 = vld [vmem:[%s1672_s0 + $0x18] sm:$0xff] }
   0x5   :  { %1045 = vmatpush3.bf16.msra.mxu0 %v1042_v3  ;;  %1054 = vmatpush3.bf16.msra.mxu1 %v1042_v3  ;;  %v49_v13 = vld [vmem:[%s1672_s0 + $0x118] sm:$0xff]  ;;  %v18_v14 = vld [vmem:[%s1672_s0 + $0x20] sm:$0xff]  ;;  %v19_v16 = vld [vmem:[%s1672_s0 + $0x28] sm:$0xff] }
   0x6   :  { %1048 = vmatprep.subr.msk.bf16.mxu0 %vm1047_vm3, %v1046_v6  ;;  %1053 = vmatprep.subr.msk.bf16.mxu1 %vm1047_vm3, %v1046_v6  ;;  %v50_v15 = vld [vmem:[%s1672_s0 + $0x120] sm:$0xff]  ;;  %v51_v17 = vld [vmem:[%s1672_s0 + $0x128] sm:$0xff]  ;;  %v20_v18 = vld [vmem:[%s1672_s0 + $0x30] sm:$0xff] }
   0x7   :  { %994 = vmatprep.mubr.msk.f32.mxu1 %vm89_vm1, %v46_v7  ;;  %v52_v19 = vld [vmem:[%s1672_s0 + $0x130] sm:$0xff]  ;;  %v21_v20 = vld [vmem:[%s1672_s0 + $0x38] sm:$0xff]  ;;  %v22_v22 = vld [vmem:[%s1672_s0 + $0x40] sm:$0xff] }
   0x8   :  { %v53_v21 = vld [vmem:[%s1672_s0 + $0x138] sm:$0xff]  ;;  %v54_v23 = vld [vmem:[%s1672_s0 + $0x140] sm:$0xff]  ;;  %v23_v24 = vld [vmem:[%s1672_s0 + $0x48] sm:$0xff] }
   0x9   :  { %1051 = vmatpush3.bf16.msk.msra.mxu0 %vm1047_vm3, %v1046_v6  ;;  %1055 = vmatpush3.bf16.msk.msra.mxu1 %vm1047_vm3, %v1046_v6  ;;  %v55_v25 = vld [vmem:[%s1672_s0 + $0x148] sm:$0xff]  ;;  %v24_v26 = vld [vmem:[%s1672_s0 + $0x50] sm:$0xff]  ;;  %v25_v28 = vld [vmem:[%s1672_s0 + $0x58] sm:$0xff] }
   0xa   :  { %v56_v27 = vld [vmem:[%s1672_s0 + $0x150] sm:$0xff]  ;;  %v57_v29 = vld [vmem:[%s1672_s0 + $0x158] sm:$0xff]  ;;  %v26_v30 = vld [vmem:[%s1672_s0 + $0x60] sm:$0xff] }
   0xb   :  { %v58_v31 = vld [vmem:[%s1672_s0 + $0x160] sm:$0xff]  ;;  %v27_v32 = vld [vmem:[%s1672_s0 + $0x68] sm:$0xff]  ;;  %v28_v34 = vld [vmem:[%s1672_s0 + $0x70] sm:$0xff] }
   0xc   :  { %947 = vmatmul.mubr.msk.f32.vlgmr.msra.gmra.mrb[0].mxu0 %vm89_vm1, %v15_v8  ;;  %995 = vmatmul.mubr.msk.f32.vlgmr.msra.gmra.mrb[0].mxu1 %vm89_vm1, %v47_v9  ;;  %v59_v33 = vld [vmem:[%s1672_s0 + $0x168] sm:$0xff]  ;;  %v60_v35 = vld [vmem:[%s1672_s0 + $0x170] sm:$0xff]  ;;  %v29_v36 = vld [vmem:[%s1672_s0 + $0x78] sm:$0xff] }
   0xd   :  { %949 = vmatprep.mubr.msk.f32.mxu0 %vm89_vm1, %v16_v10  ;;  %997 = vmatprep.mubr.msk.f32.mxu1 %vm89_vm1, %v48_v11  ;;  %v61_v37 = vld [vmem:[%s1672_s0 + $0x178] sm:$0xff]  ;;  %v30_v38 = vld [vmem:[%s1672_s0 + $0x80] sm:$0xff]  ;;  %v31_v40 = vld [vmem:[%s1672_s0 + $0x88] sm:$0xff] }
   0xe   :  { %v62_v39 = vld [vmem:[%s1672_s0 + $0x180] sm:$0xff]  ;;  %v63_v41 = vld [vmem:[%s1672_s0 + $0x188] sm:$0xff]  ;;  %v32_v42 = vld [vmem:[%s1672_s0 + $0x90] sm:$0xff] }
   0xf   :  { %v64_v43 = vld [vmem:[%s1672_s0 + $0x190] sm:$0xff]  ;;  %v33_v44 = vld [vmem:[%s1672_s0 + $0x98] sm:$0xff]  ;;  %v34_v46 = vld [vmem:[%s1672_s0 + $0xa0] sm:$0xff] }
  0x10   :  { %950 = vmatmul.mubr.msk.f32.gmra.mrb[2].mxu0 %vm89_vm1, %v17_v12  ;;  %998 = vmatmul.mubr.msk.f32.gmra.mrb[2].mxu1 %vm89_vm1, %v49_v13  ;;  %v65_v45 = vld [vmem:[%s1672_s0 + $0x198] sm:$0xff]  ;;  %v66_v47 = vld [vmem:[%s1672_s0 + $0x1a0] sm:$0xff]  ;;  %v35_v48 = vld [vmem:[%s1672_s0 + $0xa8] sm:$0xff] }
  0x11   :  { %952 = vmatprep.mubr.msk.f32.mxu0 %vm89_vm1, %v18_v14  ;;  %1000 = vmatprep.mubr.msk.f32.mxu1 %vm89_vm1, %v50_v15  ;;  %v67_v49 = vld [vmem:[%s1672_s0 + $0x1a8] sm:$0xff]  ;;  %v36_v50 = vld [vmem:[%s1672_s0 + $0xb0] sm:$0xff]  ;;  %v37_v52 = vld [vmem:[%s1672_s0 + $0xb8] sm:$0xff] }
  0x12   :  { %v68_v51 = vld [vmem:[%s1672_s0 + $0x1b0] sm:$0xff]  ;;  %v69_v53 = vld [vmem:[%s1672_s0 + $0x1b8] sm:$0xff]  ;;  %v38_v54 = vld [vmem:[%s1672_s0 + $0xc0] sm:$0xff] }
  0x13   :  { %v70_v55 = vld [vmem:[%s1672_s0 + $0x1c0] sm:$0xff]  ;;  %v39_v56 = vld [vmem:[%s1672_s0 + $0xc8] sm:$0xff]  ;;  %v40_v58 = vld [vmem:[%s1672_s0 + $0xd0] sm:$0xff] }
  0x14   :  { %953 = vmatmul.mubr.msk.f32.gmra.mrb[4].mxu0 %vm89_vm1, %v19_v16  ;;  %1001 = vmatmul.mubr.msk.f32.gmra.mrb[4].mxu1 %vm89_vm1, %v51_v17  ;;  %v71_v57 = vld [vmem:[%s1672_s0 + $0x1c8] sm:$0xff]  ;;  %v72_v59 = vld [vmem:[%s1672_s0 + $0x1d0] sm:$0xff]  ;;  %v41_v60 = vld [vmem:[%s1672_s0 + $0xd8] sm:$0xff] }
  0x15   :  { %955 = vmatprep.mubr.msk.f32.mxu0 %vm89_vm1, %v20_v18  ;;  %1003 = vmatprep.mubr.msk.f32.mxu1 %vm89_vm1, %v52_v19  ;;  %v73_v61 = vld [vmem:[%s1672_s0 + $0x1d8] sm:$0xff]  ;;  %v42_v62 = vld [vmem:[%s1672_s0 + $0xe0] sm:$0xff]  ;;  %v43_v0 = vld [vmem:[%s1672_s0 + $0xe8] sm:$0xff] }
  0x16   :  { %v74_v63 = vld [vmem:[%s1672_s0 + $0x1e0] sm:$0xff]  ;;  %v75_v1 = vld [vmem:[%s1672_s0 + $0x1e8] sm:$0xff]  ;;  %v44_v2 = vld [vmem:[%s1672_s0 + $0xf0] sm:$0xff] }
  0x17   :  { %v76_v3 = vld [vmem:[%s1672_s0 + $0x1f0] sm:$0xff]  ;;  %v45_v4 = vld [vmem:[%s1672_s0 + $0xf8] sm:$0xff]  ;;  %v1349_v6 = vld [vmem:[%s1673_s2] ss:$0 sm:$0xff] }
  0x18   :  { %956 = vmatmul.mubr.msk.f32.gmra.mrb[6].mxu0 %vm89_vm1, %v21_v20  ;;  %1004 = vmatmul.mubr.msk.f32.gmra.mrb[6].mxu1 %vm89_vm1, %v53_v21  ;;  %v77_v5 = vld [vmem:[%s1672_s0 + $0x1f8] sm:$0xff] }
  0x19   :  { %958 = vmatprep.mubr.msk.f32.mxu0 %vm89_vm1, %v22_v22  ;;  %1006 = vmatprep.mubr.msk.f32.mxu1 %vm89_vm1, %v54_v23 }
  0x1c   :  { %959 = vmatmul.mubr.msk.f32.gmra.mrb[8].mxu0 %vm89_vm1, %v23_v24  ;;  %1007 = vmatmul.mubr.msk.f32.gmra.mrb[8].mxu1 %vm89_vm1, %v55_v25 }
  0x1d   :  { %961 = vmatprep.mubr.msk.f32.mxu0 %vm89_vm1, %v24_v26  ;;  %1009 = vmatprep.mubr.msk.f32.mxu1 %vm89_vm1, %v56_v27 }
  0x20   :  { %962 = vmatmul.mubr.msk.f32.gmra.mrb[10].mxu0 %vm89_vm1, %v25_v28  ;;  %1010 = vmatmul.mubr.msk.f32.gmra.mrb[10].mxu1 %vm89_vm1, %v57_v29 }
  0x21   :  { %964 = vmatprep.mubr.msk.f32.mxu0 %vm89_vm1, %v26_v30  ;;  %1012 = vmatprep.mubr.msk.f32.mxu1 %vm89_vm1, %v58_v31 }
  0x24   :  { %965 = vmatmul.mubr.msk.f32.gmra.mrb[12].mxu0 %vm89_vm1, %v27_v32  ;;  %1013 = vmatmul.mubr.msk.f32.gmra.mrb[12].mxu1 %vm89_vm1, %v59_v33 }
  0x25   :  { %967 = vmatprep.mubr.msk.f32.mxu0 %vm89_vm1, %v28_v34  ;;  %1015 = vmatprep.mubr.msk.f32.mxu1 %vm89_vm1, %v60_v35 }
  0x28   :  { %968 = vmatmul.mubr.msk.f32.gmra.mrb[14].mxu0 %vm89_vm1, %v29_v36  ;;  %1016 = vmatmul.mubr.msk.f32.gmra.mrb[14].mxu1 %vm89_vm1, %v61_v37 }
  0x29   :  { %970 = vmatprep.mubr.msk.f32.mxu0 %vm89_vm1, %v30_v38  ;;  %1018 = vmatprep.mubr.msk.f32.mxu1 %vm89_vm1, %v62_v39 }
  0x2c   :  { %971 = vmatmul.mubr.msk.f32.gmra.mrb[16].mxu0 %vm89_vm1, %v31_v40  ;;  %1019 = vmatmul.mubr.msk.f32.gmra.mrb[16].mxu1 %vm89_vm1, %v63_v41 }
  0x2d   :  { %973 = vmatprep.mubr.msk.f32.mxu0 %vm89_vm1, %v32_v42  ;;  %1021 = vmatprep.mubr.msk.f32.mxu1 %vm89_vm1, %v64_v43 }
  0x30   :  { %974 = vmatmul.mubr.msk.f32.gmra.mrb[18].mxu0 %vm89_vm1, %v33_v44  ;;  %1022 = vmatmul.mubr.msk.f32.gmra.mrb[18].mxu1 %vm89_vm1, %v65_v45 }
  0x31   :  { %976 = vmatprep.mubr.msk.f32.mxu0 %vm89_vm1, %v34_v46  ;;  %1024 = vmatprep.mubr.msk.f32.mxu1 %vm89_vm1, %v66_v47 }
  0x34   :  { %977 = vmatmul.mubr.msk.f32.gmra.mrb[20].mxu0 %vm89_vm1, %v35_v48  ;;  %1025 = vmatmul.mubr.msk.f32.gmra.mrb[20].mxu1 %vm89_vm1, %v67_v49 }
  0x35   :  { %979 = vmatprep.mubr.msk.f32.mxu0 %vm89_vm1, %v36_v50  ;;  %1027 = vmatprep.mubr.msk.f32.mxu1 %vm89_vm1, %v68_v51 }
  0x38   :  { %980 = vmatmul.mubr.msk.f32.gmra.mrb[22].mxu0 %vm89_vm1, %v37_v52  ;;  %1028 = vmatmul.mubr.msk.f32.gmra.mrb[22].mxu1 %vm89_vm1, %v69_v53 }
  0x39   :  { %982 = vmatprep.mubr.msk.f32.mxu0 %vm89_vm1, %v38_v54  ;;  %1030 = vmatprep.mubr.msk.f32.mxu1 %vm89_vm1, %v70_v55 }
  0x3c   :  { %983 = vmatmul.mubr.msk.f32.gmra.mrb[24].mxu0 %vm89_vm1, %v39_v56  ;;  %1031 = vmatmul.mubr.msk.f32.gmra.mrb[24].mxu1 %vm89_vm1, %v71_v57 }
  0x3d   :  { %985 = vmatprep.mubr.msk.f32.mxu0 %vm89_vm1, %v40_v58  ;;  %1033 = vmatprep.mubr.msk.f32.mxu1 %vm89_vm1, %v72_v59 }
  0x40   :  { %986 = vmatmul.mubr.msk.f32.gmra.mrb[26].mxu0 %vm89_vm1, %v41_v60  ;;  %1034 = vmatmul.mubr.msk.f32.gmra.mrb[26].mxu1 %vm89_vm1, %v73_v61 }
  0x41   :  { %988 = vmatprep.mubr.msk.f32.mxu0 %vm89_vm1, %v42_v62  ;;  %1036 = vmatprep.mubr.msk.f32.mxu1 %vm89_vm1, %v74_v63 }
  0x44   :  { %989 = vmatmul.mubr.msk.f32.gmra.mrb[28].mxu0 %vm89_vm1, %v43_v0  ;;  %1037 = vmatmul.mubr.msk.f32.gmra.mrb[28].mxu1 %vm89_vm1, %v75_v1 }
  0x45   :  { %991 = vmatprep.mubr.msk.f32.mxu0 %vm89_vm1, %v44_v2  ;;  %1039 = vmatprep.mubr.msk.f32.mxu1 %vm89_vm1, %v76_v3 }
  0x48   :  { %992 = vmatmul.mubr.msk.f32.gmra.mrb[30].mxu0 %vm89_vm1, %v45_v4  ;;  %1040 = vmatmul.mubr.msk.f32.gmra.mrb[30].mxu1 %vm89_vm1, %v77_v5 }
  0xdf   :  { %v948_v7 = vpop.f32.mrb[0].mxu0  ;;  %v996_v8 = vpop.f32.mrb[0].mxu1 }
  0xe0   :  { %v358_v9 = vadd.f32 %v948_v7, %v1349_v6  ;;  %v518_v10 = vadd.f32 %v996_v8, %v1349_v6  ;;  %v352_v11 = vpop.f32.mrb[1].mxu0  ;;  %v512_v12 = vpop.f32.mrb[1].mxu1 }
  0xe1   :  { %v353_v13 = vadd.f32 %v1349_v6, %v352_v11  ;;  %v513_v14 = vadd.f32 %v1349_v6, %v512_v12 }
  0xe2   :  { %v672_v15 = vmax.f32 %v358_v9, 0.0  ;;  %v704_v16 = vmax.f32 %v518_v10, 0.0 }
  0xe3   :  { %v671_v17 = vmax.f32 %v353_v13, 0.0  ;;  %v703_v18 = vmax.f32 %v513_v14, 0.0  ;;  %v951_v19 = vpop.f32.mrb[2].mxu0  ;;  %v999_v20 = vpop.f32.mrb[2].mxu1 }
  0xe4   :  { %737 = vst.msk [vmem:[%s1674_s3 + $0x8] sm:$0xff] %vm735_vm4, %v672_v15  ;;  %769 = vst.msk [vmem:[%s1674_s3 + $0x108] sm:$0xff] %vm735_vm4, %v704_v16  ;;  %v368_v21 = vadd.f32 %v951_v19, %v1349_v6  ;;  %v528_v22 = vadd.f32 %v999_v20, %v1349_v6  ;;  %v362_v23 = vpop.f32.mrb[3].mxu0  ;;  %v522_v24 = vpop.f32.mrb[3].mxu1 }
  0xe5   :  { %736 = vst.msk [vmem:[%s1674_s3] sm:$0xff] %vm735_vm4, %v671_v17  ;;  %768 = vst.msk [vmem:[%s1674_s3 + $0x100] sm:$0xff] %vm735_vm4, %v703_v18  ;;  %v363_v25 = vadd.f32 %v1349_v6, %v362_v23  ;;  %v523_v26 = vadd.f32 %v1349_v6, %v522_v24 }
  0xe6   :  { %v674_v27 = vmax.f32 %v368_v21, 0.0  ;;  %v706_v28 = vmax.f32 %v528_v22, 0.0 }
  0xe7   :  { %v673_v29 = vmax.f32 %v363_v25, 0.0  ;;  %v705_v30 = vmax.f32 %v523_v26, 0.0  ;;  %v954_v31 = vpop.f32.mrb[4].mxu0  ;;  %v1002_v32 = vpop.f32.mrb[4].mxu1 }
  0xe8   :  { %739 = vst.msk [vmem:[%s1674_s3 + $0x18] sm:$0xff] %vm735_vm4, %v674_v27  ;;  %771 = vst.msk [vmem:[%s1674_s3 + $0x118] sm:$0xff] %vm735_vm4, %v706_v28  ;;  %v378_v33 = vadd.f32 %v954_v31, %v1349_v6  ;;  %v538_v34 = vadd.f32 %v1002_v32, %v1349_v6  ;;  %v372_v35 = vpop.f32.mrb[5].mxu0  ;;  %v532_v36 = vpop.f32.mrb[5].mxu1 }
  0xe9   :  { %738 = vst.msk [vmem:[%s1674_s3 + $0x10] sm:$0xff] %vm735_vm4, %v673_v29  ;;  %770 = vst.msk [vmem:[%s1674_s3 + $0x110] sm:$0xff] %vm735_vm4, %v705_v30  ;;  %v373_v37 = vadd.f32 %v1349_v6, %v372_v35  ;;  %v533_v38 = vadd.f32 %v1349_v6, %v532_v36 }
  0xea   :  { %v676_v39 = vmax.f32 %v378_v33, 0.0  ;;  %v708_v40 = vmax.f32 %v538_v34, 0.0 }
  0xeb   :  { %v675_v41 = vmax.f32 %v373_v37, 0.0  ;;  %v707_v42 = vmax.f32 %v533_v38, 0.0  ;;  %v957_v43 = vpop.f32.mrb[6].mxu0  ;;  %v1005_v44 = vpop.f32.mrb[6].mxu1 }
  0xec   :  { %741 = vst.msk [vmem:[%s1674_s3 + $0x28] sm:$0xff] %vm735_vm4, %v676_v39  ;;  %773 = vst.msk [vmem:[%s1674_s3 + $0x128] sm:$0xff] %vm735_vm4, %v708_v40  ;;  %v388_v45 = vadd.f32 %v957_v43, %v1349_v6  ;;  %v548_v46 = vadd.f32 %v1005_v44, %v1349_v6  ;;  %v382_v47 = vpop.f32.mrb[7].mxu0  ;;  %v542_v48 = vpop.f32.mrb[7].mxu1 }
  0xed   :  { %740 = vst.msk [vmem:[%s1674_s3 + $0x20] sm:$0xff] %vm735_vm4, %v675_v41  ;;  %772 = vst.msk [vmem:[%s1674_s3 + $0x120] sm:$0xff] %vm735_vm4, %v707_v42  ;;  %v383_v49 = vadd.f32 %v1349_v6, %v382_v47  ;;  %v543_v50 = vadd.f32 %v1349_v6, %v542_v48 }
  0xee   :  { %v678_v51 = vmax.f32 %v388_v45, 0.0  ;;  %v710_v52 = vmax.f32 %v548_v46, 0.0 }
  0xef   :  { %v677_v53 = vmax.f32 %v383_v49, 0.0  ;;  %v709_v54 = vmax.f32 %v543_v50, 0.0  ;;  %v960_v55 = vpop.f32.mrb[8].mxu0  ;;  %v1008_v56 = vpop.f32.mrb[8].mxu1 }
  0xf0   :  { %743 = vst.msk [vmem:[%s1674_s3 + $0x38] sm:$0xff] %vm735_vm4, %v678_v51  ;;  %775 = vst.msk [vmem:[%s1674_s3 + $0x138] sm:$0xff] %vm735_vm4, %v710_v52  ;;  %v398_v57 = vadd.f32 %v960_v55, %v1349_v6  ;;  %v558_v58 = vadd.f32 %v1008_v56, %v1349_v6  ;;  %v392_v59 = vpop.f32.mrb[9].mxu0  ;;  %v552_v60 = vpop.f32.mrb[9].mxu1 }
  0xf1   :  { %742 = vst.msk [vmem:[%s1674_s3 + $0x30] sm:$0xff] %vm735_vm4, %v677_v53  ;;  %774 = vst.msk [vmem:[%s1674_s3 + $0x130] sm:$0xff] %vm735_vm4, %v709_v54  ;;  %v393_v61 = vadd.f32 %v1349_v6, %v392_v59  ;;  %v553_v62 = vadd.f32 %v1349_v6, %v552_v60 }
  0xf2   :  { %v680_v63 = vmax.f32 %v398_v57, 0.0  ;;  %v712_v0 = vmax.f32 %v558_v58, 0.0 }
  0xf3   :  { %v679_v1 = vmax.f32 %v393_v61, 0.0  ;;  %v711_v2 = vmax.f32 %v553_v62, 0.0  ;;  %v963_v3 = vpop.f32.mrb[10].mxu0  ;;  %v1011_v4 = vpop.f32.mrb[10].mxu1 }
  0xf4   :  { %745 = vst.msk [vmem:[%s1674_s3 + $0x48] sm:$0xff] %vm735_vm4, %v680_v63  ;;  %777 = vst.msk [vmem:[%s1674_s3 + $0x148] sm:$0xff] %vm735_vm4, %v712_v0  ;;  %v408_v5 = vadd.f32 %v963_v3, %v1349_v6  ;;  %v568_v7 = vadd.f32 %v1011_v4, %v1349_v6  ;;  %v402_v8 = vpop.f32.mrb[11].mxu0  ;;  %v562_v9 = vpop.f32.mrb[11].mxu1 }
  0xf5   :  { %744 = vst.msk [vmem:[%s1674_s3 + $0x40] sm:$0xff] %vm735_vm4, %v679_v1  ;;  %776 = vst.msk [vmem:[%s1674_s3 + $0x140] sm:$0xff] %vm735_vm4, %v711_v2  ;;  %v403_v10 = vadd.f32 %v1349_v6, %v402_v8  ;;  %v563_v11 = vadd.f32 %v1349_v6, %v562_v9 }
  0xf6   :  { %v682_v12 = vmax.f32 %v408_v5, 0.0  ;;  %v714_v13 = vmax.f32 %v568_v7, 0.0 }
  0xf7   :  { %v681_v14 = vmax.f32 %v403_v10, 0.0  ;;  %v713_v15 = vmax.f32 %v563_v11, 0.0  ;;  %v966_v16 = vpop.f32.mrb[12].mxu0  ;;  %v1014_v17 = vpop.f32.mrb[12].mxu1 }
  0xf8   :  { %747 = vst.msk [vmem:[%s1674_s3 + $0x58] sm:$0xff] %vm735_vm4, %v682_v12  ;;  %779 = vst.msk [vmem:[%s1674_s3 + $0x158] sm:$0xff] %vm735_vm4, %v714_v13  ;;  %v418_v18 = vadd.f32 %v966_v16, %v1349_v6  ;;  %v578_v19 = vadd.f32 %v1014_v17, %v1349_v6  ;;  %v412_v20 = vpop.f32.mrb[13].mxu0  ;;  %v572_v21 = vpop.f32.mrb[13].mxu1 }
  0xf9   :  { %746 = vst.msk [vmem:[%s1674_s3 + $0x50] sm:$0xff] %vm735_vm4, %v681_v14  ;;  %778 = vst.msk [vmem:[%s1674_s3 + $0x150] sm:$0xff] %vm735_vm4, %v713_v15  ;;  %v413_v22 = vadd.f32 %v1349_v6, %v412_v20  ;;  %v573_v23 = vadd.f32 %v1349_v6, %v572_v21 }
  0xfa   :  { %v684_v24 = vmax.f32 %v418_v18, 0.0  ;;  %v716_v25 = vmax.f32 %v578_v19, 0.0 }
  0xfb   :  { %v683_v26 = vmax.f32 %v413_v22, 0.0  ;;  %v715_v27 = vmax.f32 %v573_v23, 0.0  ;;  %v969_v28 = vpop.f32.mrb[14].mxu0  ;;  %v1017_v29 = vpop.f32.mrb[14].mxu1 }
  0xfc   :  { %749 = vst.msk [vmem:[%s1674_s3 + $0x68] sm:$0xff] %vm735_vm4, %v684_v24  ;;  %781 = vst.msk [vmem:[%s1674_s3 + $0x168] sm:$0xff] %vm735_vm4, %v716_v25  ;;  %v428_v30 = vadd.f32 %v969_v28, %v1349_v6  ;;  %v588_v31 = vadd.f32 %v1017_v29, %v1349_v6  ;;  %v422_v32 = vpop.f32.mrb[15].mxu0  ;;  %v582_v33 = vpop.f32.mrb[15].mxu1 }
  0xfd   :  { %748 = vst.msk [vmem:[%s1674_s3 + $0x60] sm:$0xff] %vm735_vm4, %v683_v26  ;;  %780 = vst.msk [vmem:[%s1674_s3 + $0x160] sm:$0xff] %vm735_vm4, %v715_v27  ;;  %v423_v34 = vadd.f32 %v1349_v6, %v422_v32  ;;  %v583_v35 = vadd.f32 %v1349_v6, %v582_v33 }
  0xfe   :  { %v686_v36 = vmax.f32 %v428_v30, 0.0  ;;  %v718_v37 = vmax.f32 %v588_v31, 0.0 }
  0xff   :  { %v685_v38 = vmax.f32 %v423_v34, 0.0  ;;  %v717_v39 = vmax.f32 %v583_v35, 0.0  ;;  %v972_v40 = vpop.f32.mrb[16].mxu0  ;;  %v1020_v41 = vpop.f32.mrb[16].mxu1 }
 0x100   :  { %751 = vst.msk [vmem:[%s1674_s3 + $0x78] sm:$0xff] %vm735_vm4, %v686_v36  ;;  %783 = vst.msk [vmem:[%s1674_s3 + $0x178] sm:$0xff] %vm735_vm4, %v718_v37  ;;  %v438_v42 = vadd.f32 %v972_v40, %v1349_v6  ;;  %v598_v43 = vadd.f32 %v1020_v41, %v1349_v6  ;;  %v432_v44 = vpop.f32.mrb[17].mxu0  ;;  %v592_v45 = vpop.f32.mrb[17].mxu1 }
 0x101   :  { %750 = vst.msk [vmem:[%s1674_s3 + $0x70] sm:$0xff] %vm735_vm4, %v685_v38  ;;  %782 = vst.msk [vmem:[%s1674_s3 + $0x170] sm:$0xff] %vm735_vm4, %v717_v39  ;;  %v433_v46 = vadd.f32 %v1349_v6, %v432_v44  ;;  %v593_v47 = vadd.f32 %v1349_v6, %v592_v45 }
 0x102   :  { %v688_v48 = vmax.f32 %v438_v42, 0.0  ;;  %v720_v49 = vmax.f32 %v598_v43, 0.0 }
 0x103   :  { %v687_v50 = vmax.f32 %v433_v46, 0.0  ;;  %v719_v51 = vmax.f32 %v593_v47, 0.0  ;;  %v975_v52 = vpop.f32.mrb[18].mxu0  ;;  %v1023_v53 = vpop.f32.mrb[18].mxu1 }
 0x104   :  { %753 = vst.msk [vmem:[%s1674_s3 + $0x88] sm:$0xff] %vm735_vm4, %v688_v48  ;;  %785 = vst.msk [vmem:[%s1674_s3 + $0x188] sm:$0xff] %vm735_vm4, %v720_v49  ;;  %v448_v54 = vadd.f32 %v975_v52, %v1349_v6  ;;  %v608_v55 = vadd.f32 %v1023_v53, %v1349_v6  ;;  %v442_v56 = vpop.f32.mrb[19].mxu0  ;;  %v602_v57 = vpop.f32.mrb[19].mxu1 }
 0x105   :  { %752 = vst.msk [vmem:[%s1674_s3 + $0x80] sm:$0xff] %vm735_vm4, %v687_v50  ;;  %784 = vst.msk [vmem:[%s1674_s3 + $0x180] sm:$0xff] %vm735_vm4, %v719_v51  ;;  %v443_v58 = vadd.f32 %v1349_v6, %v442_v56  ;;  %v603_v59 = vadd.f32 %v1349_v6, %v602_v57 }
 0x106   :  { %v690_v60 = vmax.f32 %v448_v54, 0.0  ;;  %v722_v61 = vmax.f32 %v608_v55, 0.0 }
 0x107   :  { %v689_v62 = vmax.f32 %v443_v58, 0.0  ;;  %v721_v63 = vmax.f32 %v603_v59, 0.0  ;;  %v978_v0 = vpop.f32.mrb[20].mxu0  ;;  %v1026_v1 = vpop.f32.mrb[20].mxu1 }
 0x108   :  { %755 = vst.msk [vmem:[%s1674_s3 + $0x98] sm:$0xff] %vm735_vm4, %v690_v60  ;;  %787 = vst.msk [vmem:[%s1674_s3 + $0x198] sm:$0xff] %vm735_vm4, %v722_v61  ;;  %v458_v2 = vadd.f32 %v978_v0, %v1349_v6  ;;  %v618_v3 = vadd.f32 %v1026_v1, %v1349_v6  ;;  %v452_v4 = vpop.f32.mrb[21].mxu0  ;;  %v612_v5 = vpop.f32.mrb[21].mxu1 }
 0x109   :  { %754 = vst.msk [vmem:[%s1674_s3 + $0x90] sm:$0xff] %vm735_vm4, %v689_v62  ;;  %786 = vst.msk [vmem:[%s1674_s3 + $0x190] sm:$0xff] %vm735_vm4, %v721_v63  ;;  %v453_v7 = vadd.f32 %v1349_v6, %v452_v4  ;;  %v613_v8 = vadd.f32 %v1349_v6, %v612_v5 }
 0x10a   :  { %v692_v9 = vmax.f32 %v458_v2, 0.0  ;;  %v724_v10 = vmax.f32 %v618_v3, 0.0 }
 0x10b   :  { %v691_v11 = vmax.f32 %v453_v7, 0.0  ;;  %v723_v12 = vmax.f32 %v613_v8, 0.0  ;;  %v981_v13 = vpop.f32.mrb[22].mxu0  ;;  %v1029_v14 = vpop.f32.mrb[22].mxu1 }
 0x10c   :  { %757 = vst.msk [vmem:[%s1674_s3 + $0xa8] sm:$0xff] %vm735_vm4, %v692_v9  ;;  %789 = vst.msk [vmem:[%s1674_s3 + $0x1a8] sm:$0xff] %vm735_vm4, %v724_v10  ;;  %v468_v15 = vadd.f32 %v981_v13, %v1349_v6  ;;  %v628_v16 = vadd.f32 %v1029_v14, %v1349_v6  ;;  %v462_v17 = vpop.f32.mrb[23].mxu0  ;;  %v622_v18 = vpop.f32.mrb[23].mxu1 }
 0x10d   :  { %756 = vst.msk [vmem:[%s1674_s3 + $0xa0] sm:$0xff] %vm735_vm4, %v691_v11  ;;  %788 = vst.msk [vmem:[%s1674_s3 + $0x1a0] sm:$0xff] %vm735_vm4, %v723_v12  ;;  %v463_v19 = vadd.f32 %v1349_v6, %v462_v17  ;;  %v623_v20 = vadd.f32 %v1349_v6, %v622_v18 }
 0x10e   :  { %v694_v21 = vmax.f32 %v468_v15, 0.0  ;;  %v726_v22 = vmax.f32 %v628_v16, 0.0 }
 0x10f   :  { %v693_v23 = vmax.f32 %v463_v19, 0.0  ;;  %v725_v24 = vmax.f32 %v623_v20, 0.0  ;;  %v984_v25 = vpop.f32.mrb[24].mxu0  ;;  %v1032_v26 = vpop.f32.mrb[24].mxu1 }
 0x110   :  { %759 = vst.msk [vmem:[%s1674_s3 + $0xb8] sm:$0xff] %vm735_vm4, %v694_v21  ;;  %791 = vst.msk [vmem:[%s1674_s3 + $0x1b8] sm:$0xff] %vm735_vm4, %v726_v22  ;;  %v478_v27 = vadd.f32 %v984_v25, %v1349_v6  ;;  %v638_v28 = vadd.f32 %v1032_v26, %v1349_v6  ;;  %v472_v29 = vpop.f32.mrb[25].mxu0  ;;  %v632_v30 = vpop.f32.mrb[25].mxu1 }
 0x111   :  { %758 = vst.msk [vmem:[%s1674_s3 + $0xb0] sm:$0xff] %vm735_vm4, %v693_v23  ;;  %790 = vst.msk [vmem:[%s1674_s3 + $0x1b0] sm:$0xff] %vm735_vm4, %v725_v24  ;;  %v473_v31 = vadd.f32 %v1349_v6, %v472_v29  ;;  %v633_v32 = vadd.f32 %v1349_v6, %v632_v30 }
 0x112   :  { %v696_v33 = vmax.f32 %v478_v27, 0.0  ;;  %v728_v34 = vmax.f32 %v638_v28, 0.0 }
 0x113   :  { %v695_v35 = vmax.f32 %v473_v31, 0.0  ;;  %v727_v36 = vmax.f32 %v633_v32, 0.0  ;;  %v987_v37 = vpop.f32.mrb[26].mxu0  ;;  %v1035_v38 = vpop.f32.mrb[26].mxu1 }
 0x114   :  { %761 = vst.msk [vmem:[%s1674_s3 + $0xc8] sm:$0xff] %vm735_vm4, %v696_v33  ;;  %793 = vst.msk [vmem:[%s1674_s3 + $0x1c8] sm:$0xff] %vm735_vm4, %v728_v34  ;;  %v488_v39 = vadd.f32 %v987_v37, %v1349_v6  ;;  %v648_v40 = vadd.f32 %v1035_v38, %v1349_v6  ;;  %v482_v41 = vpop.f32.mrb[27].mxu0  ;;  %v642_v42 = vpop.f32.mrb[27].mxu1 }
 0x115   :  { %760 = vst.msk [vmem:[%s1674_s3 + $0xc0] sm:$0xff] %vm735_vm4, %v695_v35  ;;  %792 = vst.msk [vmem:[%s1674_s3 + $0x1c0] sm:$0xff] %vm735_vm4, %v727_v36  ;;  %v483_v43 = vadd.f32 %v1349_v6, %v482_v41  ;;  %v643_v44 = vadd.f32 %v1349_v6, %v642_v42 }
 0x116   :  { %v698_v45 = vmax.f32 %v488_v39, 0.0  ;;  %v730_v46 = vmax.f32 %v648_v40, 0.0 }
 0x117   :  { %v697_v47 = vmax.f32 %v483_v43, 0.0  ;;  %v729_v48 = vmax.f32 %v643_v44, 0.0  ;;  %v990_v49 = vpop.f32.mrb[28].mxu0  ;;  %v1038_v50 = vpop.f32.mrb[28].mxu1 }
 0x118   :  { %763 = vst.msk [vmem:[%s1674_s3 + $0xd8] sm:$0xff] %vm735_vm4, %v698_v45  ;;  %795 = vst.msk [vmem:[%s1674_s3 + $0x1d8] sm:$0xff] %vm735_vm4, %v730_v46  ;;  %v498_v51 = vadd.f32 %v990_v49, %v1349_v6  ;;  %v658_v52 = vadd.f32 %v1038_v50, %v1349_v6  ;;  %v492_v53 = vpop.f32.mrb[29].mxu0  ;;  %v652_v54 = vpop.f32.mrb[29].mxu1 }
 0x119   :  { %762 = vst.msk [vmem:[%s1674_s3 + $0xd0] sm:$0xff] %vm735_vm4, %v697_v47  ;;  %794 = vst.msk [vmem:[%s1674_s3 + $0x1d0] sm:$0xff] %vm735_vm4, %v729_v48  ;;  %v493_v55 = vadd.f32 %v1349_v6, %v492_v53  ;;  %v653_v56 = vadd.f32 %v1349_v6, %v652_v54 }
 0x11a   :  { %v700_v57 = vmax.f32 %v498_v51, 0.0  ;;  %v732_v58 = vmax.f32 %v658_v52, 0.0 }
 0x11b   :  { %v699_v59 = vmax.f32 %v493_v55, 0.0  ;;  %v731_v60 = vmax.f32 %v653_v56, 0.0  ;;  %v993_v61 = vpop.f32.mrb[30].mxu0  ;;  %v1041_v62 = vpop.f32.mrb[30].mxu1 }
 0x11c   :  { %765 = vst.msk [vmem:[%s1674_s3 + $0xe8] sm:$0xff] %vm735_vm4, %v700_v57  ;;  %797 = vst.msk [vmem:[%s1674_s3 + $0x1e8] sm:$0xff] %vm735_vm4, %v732_v58  ;;  %v508_v63 = vadd.f32 %v993_v61, %v1349_v6  ;;  %v668_v0 = vadd.f32 %v1041_v62, %v1349_v6  ;;  %v502_v1 = vpop.f32.mrb[31].mxu0  ;;  %v662_v2 = vpop.f32.mrb[31].mxu1 }
 0x11d   :  { %764 = vst.msk [vmem:[%s1674_s3 + $0xe0] sm:$0xff] %vm735_vm4, %v699_v59  ;;  %796 = vst.msk [vmem:[%s1674_s3 + $0x1e0] sm:$0xff] %vm735_vm4, %v731_v60  ;;  %v503_v3 = vadd.f32 %v1349_v6, %v502_v1  ;;  %v663_v4 = vadd.f32 %v1349_v6, %v662_v2 }
 0x11e   :  { %v702_v5 = vmax.f32 %v508_v63, 0.0  ;;  %v734_v7 = vmax.f32 %v668_v0, 0.0 }
 0x11f   :  { %v701_v8 = vmax.f32 %v503_v3, 0.0  ;;  %v733_v9 = vmax.f32 %v663_v4, 0.0 }
 0x120   :  { %767 = vst.msk [vmem:[%s1674_s3 + $0xf8] sm:$0xff] %vm735_vm4, %v702_v5  ;;  %799 = vst.msk [vmem:[%s1674_s3 + $0x1f8] sm:$0xff] %vm735_vm4, %v734_v7 }
 0x121   :  { %766 = vst.msk [vmem:[%s1674_s3 + $0xf0] sm:$0xff] %vm735_vm4, %v701_v8  ;;  %798 = vst.msk [vmem:[%s1674_s3 + $0x1f0] sm:$0xff] %vm735_vm4, %v733_v9 }

// kernel: shufflenet_forward.58
= control target key start
LH: loop header
LB: loop body
LE: loop exit
PB: predicated region body
PF: predicated region fallthrough
CT: control target
= control target key end

     0   :  { %s861_s6 = smov 0   ;;  %s1099_s0 = inlined_call_operand.vmem [shape: f32[2,18,18,24], index: 0, kind: input, shape index: {}]   ;;  %s1100_s1 = inlined_call_operand.vmem [shape: f32[2,16,16,24], index: 1, kind: output, shape index: {}]  }
   0x1 LB: > { %s823_s7 = sadd.s32 4294967295, %s849_s6   ;;  %p827_p0 = scmp.ge.s32.totalorder %s849_s6, 1  ;;  %s849_s6 = sphi %s861_s6, %s11_s6  }
   0x2   : > { %p87_p1 = scmp.lt.s32.totalorder %s849_s6, 3 }
   0x4   : > { %p88_p2 = pnand %p827_p0, %p87_p1 }
   0x5   : > { %p107_p3 = scmp.lt.s32.totalorder (!%p88_p2), %s823_s7, 1  ;;  %vm219_vm0 = vcmask (!%p88_p2), 1046528   ;;  %vm364_vm1 = vcmask (!%p88_p2), 1045504   ;;  %vm735_vm2 = vcmask (!%p88_p2), 195584  }
   0x6   : > { %91 = sbr.rel (%p88_p2) target bundleno = 133 (0x85), region = 24 }
   0xd   : > { %s1102_s7 = smov (!%p107_p3, %s823_s7), 1 }
   0xe   : > { %s834_s8 = smul.u32 432, %s1102_s7  ;;  %s833_s12 = sshll.u32 %s1102_s7, 8 }
   0xf   : > { %s927_s15 = scalar_lea.vmem %s1100_s1, %s833_s12 }
  0x10   : > { %s875_s11 = scalar_lea.vmem %s1099_s0, %s834_s8 }
  0x11   : > { %v117_v0 = vld [vmem:[%s875_s11] sm:$0xff]  ;;  %v118_v1 = vld [vmem:[%s875_s11 + $0x8] sm:$0xff]  ;;  %v120_v2 = vld [vmem:[%s875_s11 + $0x18] sm:$0xff] }
  0x12   : > { %v881_v3 = vld [vmem:[%s875_s11 + $0x20] sm:$0xff]  ;;  %v123_v4 = vld [vmem:[%s875_s11 + $0x30] sm:$0xff]  ;;  %v885_v5 = vld [vmem:[%s875_s11 + $0x38] sm:$0xff]  ;;  %v220_v6 = vrot.slane %v117_v0, 1  ;;  %v221_v7 = vrot.slane %v118_v1, 1  ;;  %v225_v8 = vrot.slane %v120_v2, 1 }
  0x13   : > { %v226_v9 = vrot.slane %v881_v3, 1  ;;  %v230_v10 = vrot.slane %v123_v4, 1  ;;  %v231_v11 = vrot.slane %v885_v5, 1  ;;  %v365_v12 = vrot.slane %v117_v0, 2  ;;  %v119_v17 = vld [vmem:[%s875_s11 + $0x10] sm:$0x3] }
  0x14   : > { %v222_v13 = vsel %vm219_vm0, %v220_v6, %v221_v7  ;;  %v366_v14 = vrot.slane %v118_v1, 2  ;;  %v370_v15 = vrot.slane %v120_v2, 2  ;;  %v371_v16 = vrot.slane %v881_v3, 2  ;;  %v122_v22 = vld [vmem:[%s875_s11 + $0x28] sm:$0x3]  ;;  %v127_v46 = vld [vmem:[%s875_s11 + $0x50] sm:$0xff] }
  0x15   : > { %v227_v18 = vsel %vm219_vm0, %v225_v8, %v226_v9  ;;  %v894_v19 = vsel %vm219_vm0, %v230_v10, %v231_v11  ;;  %v332_v20 = vmax.f32 %v117_v0, %v222_v13  ;;  %v375_v21 = vrot.slane %v123_v4, 2  ;;  %v125_v23 = vld [vmem:[%s875_s11 + $0x40] sm:$0x3]  ;;  %v126_v40 = vld [vmem:[%s875_s11 + $0x48] sm:$0xff]  ;;  %v128_v58 = vld [vmem:[%s875_s11 + $0x58] sm:$0x3] }
  0x16   : > { %v334_v24 = vmax.f32 %v120_v2, %v227_v18  ;;  %v336_v25 = vmax.f32 %v123_v4, %v894_v19  ;;  %v367_v26 = vsel %vm364_vm1, %v365_v12, %v366_v14  ;;  %v372_v27 = vsel %vm364_vm1, %v370_v15, %v371_v16 }
  0x17   : > { %v376_v28 = vrot.slane %v885_v5, 2  ;;  %v477_v29 = vmax.f32 %v332_v20, %v367_v26  ;;  %v223_v30 = vrot.slane %v119_v17, 1  ;;  %v228_v31 = vrot.slane %v122_v22, 1  ;;  %v130_v20 = vld [vmem:[%s875_s11 + $0x68] sm:$0xff] }
  0x18   : > { %v479_v32 = vmax.f32 %v334_v24, %v372_v27  ;;  %v233_v33 = vrot.slane %v125_v23, 1  ;;  %v368_v34 = vrot.slane %v119_v17, 2  ;;  %v373_v35 = vrot.slane %v122_v22, 2 }
  0x19   : > { %v377_v36 = vsel %vm364_vm1, %v375_v21, %v376_v28  ;;  %v509_v37 = vmax.f32 %v477_v29, %v120_v2  ;;  %v224_v38 = vsel %vm219_vm0, %v221_v7, %v223_v30  ;;  %v229_v39 = vsel %vm219_vm0, %v226_v9, %v228_v31 }
  0x1a   : > { %v481_v41 = vmax.f32 %v336_v25, %v377_v36  ;;  %v511_v42 = vmax.f32 %v479_v32, %v123_v4  ;;  %v907_v43 = vsel %vm219_vm0, %v231_v11, %v233_v33  ;;  %v333_v44 = vmax.f32 %v118_v1, %v224_v38  ;;  %v131_v38 = vld [vmem:[%s875_s11 + $0x70] sm:$0x3] }
  0x1b   : > { %v551_v45 = vmax.f32 %v509_v37, %v227_v18  ;;  %v335_v47 = vmax.f32 %v881_v3, %v229_v39  ;;  %v337_v48 = vmax.f32 %v885_v5, %v907_v43  ;;  %v369_v49 = vsel %vm364_vm1, %v366_v14, %v368_v34 }
  0x1c   : > { %v513_v50 = vmax.f32 %v481_v41, %v126_v40  ;;  %v553_v51 = vmax.f32 %v511_v42, %v894_v19  ;;  %v374_v52 = vsel %vm364_vm1, %v371_v16, %v373_v35  ;;  %v378_v53 = vrot.slane %v125_v23, 2 }
  0x1d   : > { %v590_v54 = vmax.f32 %v551_v45, %v372_v27  ;;  %v478_v55 = vmax.f32 %v333_v44, %v369_v49  ;;  %v480_v56 = vmax.f32 %v335_v47, %v374_v52  ;;  %v235_v57 = vrot.slane %v126_v40, 1 }
  0x1e   : > { %v592_v59 = vmax.f32 %v553_v51, %v377_v36  ;;  %v379_v60 = vsel %vm364_vm1, %v376_v28, %v378_v53  ;;  %v236_v61 = vrot.slane %v127_v46, 1  ;;  %v380_v62 = vrot.slane %v126_v40, 2 }
  0x1f   : > { %v622_v63 = vmax.f32 %v590_v54, %v123_v4  ;;  %v482_v0 = vmax.f32 %v337_v48, %v379_v60  ;;  %v510_v1 = vmax.f32 %v478_v55, %v881_v3  ;;  %v512_v2 = vmax.f32 %v480_v56, %v885_v5  ;;  %v133_v48 = vld [vmem:[%s875_s11 + $0x80] sm:$0xff] }
  0x20   : > { %v237_v6 = vsel %vm219_vm0, %v235_v57, %v236_v61  ;;  %v381_v7 = vrot.slane %v127_v46, 2  ;;  %v624_v8 = vmax.f32 %v592_v59, %v126_v40  ;;  %v238_v9 = vrot.slane %v128_v58, 1 }
  0x21   : > { %v664_v10 = vmax.f32 %v622_v63, %v894_v19  ;;  %v514_v11 = vmax.f32 %v482_v0, %v127_v46  ;;  %v552_v12 = vmax.f32 %v510_v1, %v229_v39  ;;  %v554_v13 = vmax.f32 %v512_v2, %v907_v43  ;;  %v129_v19 = vld [vmem:[%s875_s11 + $0x60] sm:$0xff]  ;;  %v134_v0 = vld [vmem:[%s875_s11 + $0x88] sm:$0x3] }
  0x22   : > { %v338_v3 = vmax.f32 %v126_v40, %v237_v6  ;;  %v382_v4 = vsel %vm364_vm1, %v380_v62, %v381_v7  ;;  %v555_v14 = vmax.f32 %v513_v50, %v237_v6  ;;  %v666_v15 = vmax.f32 %v624_v8, %v237_v6  ;;  %v132_v40 = vld [vmem:[%s875_s11 + $0x78] sm:$0xff] }
  0x23   : > { %v703_v16 = vmax.f32 %v664_v10, %v377_v36  ;;  %v591_v17 = vmax.f32 %v552_v12, %v374_v52  ;;  %v593_v18 = vmax.f32 %v554_v13, %v379_v60  ;;  %v239_v21 = vsel %vm219_vm0, %v236_v61, %v238_v9  ;;  %v135_v10 = vld [vmem:[%s875_s11 + $0x90] sm:$0xff] }
  0x24   : > { %v483_v22 = vmax.f32 %v338_v3, %v382_v4  ;;  %v594_v23 = vmax.f32 %v555_v14, %v382_v4  ;;  %v705_v24 = vmax.f32 %v666_v15, %v382_v4  ;;  %v339_v25 = vmax.f32 %v127_v46, %v239_v21 }
  0x25   : > { %736 = vst.msk [vmem:[%s927_s15] sm:$0xff] %vm735_vm2, %v703_v16  ;;  %v623_v26 = vmax.f32 %v591_v17, %v885_v5  ;;  %v383_v27 = vrot.slane %v128_v58, 2  ;;  %v556_v28 = vmax.f32 %v514_v11, %v239_v21  ;;  %v625_v29 = vmax.f32 %v593_v18, %v127_v46  ;;  %v136_v18 = vld [vmem:[%s875_s11 + $0x98] sm:$0xff] }
  0x26   : > { %v515_v30 = vmax.f32 %v483_v22, %v129_v19  ;;  %738 = vst.msk [vmem:[%s927_s15 + $0x10] sm:$0xff] %vm735_vm2, %v705_v24  ;;  %v240_v31 = vrot.slane %v129_v19, 1  ;;  %v241_v32 = vrot.slane %v130_v20, 1  ;;  %v385_v33 = vrot.slane %v129_v19, 2 }
  0x27   : > { %v665_v34 = vmax.f32 %v623_v26, %v907_v43  ;;  %v384_v35 = vsel %vm364_vm1, %v381_v7, %v383_v27  ;;  %v667_v36 = vmax.f32 %v625_v29, %v239_v21  ;;  %v386_v37 = vrot.slane %v130_v20, 2 }
  0x28   : > { %v484_v5 = vmax.f32 %v339_v25, %v384_v35  ;;  %v595_v39 = vmax.f32 %v556_v28, %v384_v35  ;;  %v242_v41 = vsel %vm219_vm0, %v240_v31, %v241_v32  ;;  %v626_v42 = vmax.f32 %v594_v23, %v129_v19  ;;  %v137_v28 = vld [vmem:[%s875_s11 + $0xa0] sm:$0x3] }
  0x29   : > { %v704_v44 = vmax.f32 %v665_v34, %v379_v60  ;;  %v706_v45 = vmax.f32 %v667_v36, %v384_v35  ;;  %v340_v46 = vmax.f32 %v129_v19, %v242_v41  ;;  %v387_v47 = vsel %vm364_vm1, %v385_v33, %v386_v37 }
  0x2a   : > { %v516_v43 = vmax.f32 %v484_v5, %v130_v20  ;;  %v557_v49 = vmax.f32 %v515_v30, %v242_v41  ;;  %v668_v50 = vmax.f32 %v626_v42, %v242_v41  ;;  %v243_v51 = vrot.slane %v131_v38, 1  ;;  %v138_v41 = vld [vmem:[%s875_s11 + $0xa8] sm:$0xff] }
  0x2b   : > { %737 = vst.msk [vmem:[%s927_s15 + $0x8] sm:$0xff] %vm735_vm2, %v704_v44  ;;  %739 = vst.msk [vmem:[%s927_s15 + $0x18] sm:$0xff] %vm735_vm2, %v706_v45  ;;  %v485_v52 = vmax.f32 %v340_v46, %v387_v47  ;;  %v388_v53 = vrot.slane %v131_v38, 2  ;;  %v627_v54 = vmax.f32 %v595_v39, %v130_v20  ;;  %v245_v55 = vrot.slane %v132_v40, 1  ;;  %v139_v46 = vld [vmem:[%s875_s11 + $0xb0] sm:$0xff] }
  0x2c   : > { %v596_v56 = vmax.f32 %v557_v49, %v387_v47  ;;  %v707_v57 = vmax.f32 %v668_v50, %v387_v47  ;;  %v244_v58 = vsel %vm219_vm0, %v241_v32, %v243_v51  ;;  %v246_v59 = vrot.slane %v133_v48, 1 }
  0x2d   : > { %v517_v60 = vmax.f32 %v485_v52, %v132_v40  ;;  %v341_v61 = vmax.f32 %v130_v20, %v244_v58  ;;  %v389_v62 = vsel %vm364_vm1, %v386_v37, %v388_v53  ;;  %v558_v63 = vmax.f32 %v516_v43, %v244_v58 }
  0x2e   : > { %740 = vst.msk [vmem:[%s927_s15 + $0x20] sm:$0xff] %vm735_vm2, %v707_v57  ;;  %v669_v1 = vmax.f32 %v627_v54, %v244_v58  ;;  %v247_v2 = vsel %vm219_vm0, %v245_v55, %v246_v59  ;;  %v390_v6 = vrot.slane %v132_v40, 2  ;;  %v391_v7 = vrot.slane %v133_v48, 2  ;;  %v140_v58 = vld [vmem:[%s875_s11 + $0xb8] sm:$0x3] }
  0x2f   : > { %v486_v8 = vmax.f32 %v341_v61, %v389_v62  ;;  %v597_v9 = vmax.f32 %v558_v63, %v389_v62  ;;  %v342_v11 = vmax.f32 %v132_v40, %v247_v2  ;;  %v559_v12 = vmax.f32 %v517_v60, %v247_v2 }
  0x30   : > { %v708_v13 = vmax.f32 %v669_v1, %v389_v62  ;;  %v392_v3 = vsel %vm364_vm1, %v390_v6, %v391_v7  ;;  %v628_v4 = vmax.f32 %v596_v56, %v132_v40  ;;  %v248_v14 = vrot.slane %v134_v0, 1 }
  0x31   : > { %v518_v15 = vmax.f32 %v486_v8, %v133_v48  ;;  %v487_v16 = vmax.f32 %v342_v11, %v392_v3  ;;  %v598_v17 = vmax.f32 %v559_v12, %v392_v3  ;;  %v393_v19 = vrot.slane %v134_v0, 2  ;;  %v141_v0 = vld [vmem:[%s875_s11 + $0xc0] sm:$0xff] }
  0x32   : > { %741 = vst.msk [vmem:[%s927_s15 + $0x28] sm:$0xff] %vm735_vm2, %v708_v13  ;;  %v670_v20 = vmax.f32 %v628_v4, %v247_v2  ;;  %v249_v21 = vsel %vm219_vm0, %v246_v59, %v248_v14  ;;  %v629_v22 = vmax.f32 %v597_v9, %v133_v48  ;;  %v250_v23 = vrot.slane %v135_v10, 1  ;;  %v142_v13 = vld [vmem:[%s875_s11 + $0xc8] sm:$0xff] }
  0x33   : > { %v519_v24 = vmax.f32 %v487_v16, %v135_v10  ;;  %v343_v25 = vmax.f32 %v133_v48, %v249_v21  ;;  %v394_v26 = vsel %vm364_vm1, %v391_v7, %v393_v19  ;;  %v560_v27 = vmax.f32 %v518_v15, %v249_v21 }
  0x34   : > { %v709_v29 = vmax.f32 %v670_v20, %v392_v3  ;;  %v671_v30 = vmax.f32 %v629_v22, %v249_v21  ;;  %v251_v31 = vrot.slane %v136_v18, 1  ;;  %v395_v32 = vrot.slane %v135_v10, 2  ;;  %v143_v22 = vld [vmem:[%s875_s11 + $0xd0] sm:$0x3] }
  0x35   : > { %v488_v33 = vmax.f32 %v343_v25, %v394_v26  ;;  %v599_v34 = vmax.f32 %v560_v27, %v394_v26  ;;  %v396_v35 = vrot.slane %v136_v18, 2  ;;  %v630_v36 = vmax.f32 %v598_v17, %v135_v10 }
  0x36   : > { %742 = vst.msk [vmem:[%s927_s15 + $0x30] sm:$0xff] %vm735_vm2, %v709_v29  ;;  %v710_v37 = vmax.f32 %v671_v30, %v394_v26  ;;  %v252_v38 = vsel %vm219_vm0, %v250_v23, %v251_v31  ;;  %v253_v5 = vrot.slane %v137_v28, 1  ;;  %v398_v39 = vrot.slane %v137_v28, 2 }
  0x37   : > { %v520_v40 = vmax.f32 %v488_v33, %v136_v18  ;;  %v344_v42 = vmax.f32 %v135_v10, %v252_v38  ;;  %v397_v44 = vsel %vm364_vm1, %v395_v32, %v396_v35  ;;  %v561_v45 = vmax.f32 %v519_v24, %v252_v38 }
  0x38   : > { %743 = vst.msk [vmem:[%s927_s15 + $0x38] sm:$0xff] %vm735_vm2, %v710_v37  ;;  %v672_v47 = vmax.f32 %v630_v36, %v252_v38  ;;  %v254_v48 = vsel %vm219_vm0, %v251_v31, %v253_v5  ;;  %v399_v43 = vsel %vm364_vm1, %v396_v35, %v398_v39  ;;  %v631_v49 = vmax.f32 %v599_v34, %v136_v18  ;;  %v144_v36 = vld [vmem:[%s875_s11 + $0xd8] sm:$0xff]  ;;  %v145_v39 = vld [vmem:[%s875_s11 + $0xe0] sm:$0xff] }
  0x39   : > { %v489_v50 = vmax.f32 %v344_v42, %v397_v44  ;;  %v600_v51 = vmax.f32 %v561_v45, %v397_v44  ;;  %v345_v52 = vmax.f32 %v136_v18, %v254_v48  ;;  %v562_v53 = vmax.f32 %v520_v40, %v254_v48 }
  0x3a   : > { %v711_v54 = vmax.f32 %v672_v47, %v397_v44  ;;  %v673_v55 = vmax.f32 %v631_v49, %v254_v48  ;;  %v255_v56 = vrot.slane %v138_v41, 1  ;;  %v256_v57 = vrot.slane %v139_v46, 1 }
  0x3b   : > { %v521_v59 = vmax.f32 %v489_v50, %v138_v41  ;;  %v490_v60 = vmax.f32 %v345_v52, %v399_v43  ;;  %v601_v61 = vmax.f32 %v562_v53, %v399_v43  ;;  %v400_v62 = vrot.slane %v138_v41, 2  ;;  %v146_v52 = vld [vmem:[%s875_s11 + $0xe8] sm:$0x3] }
  0x3c   : > { %744 = vst.msk [vmem:[%s927_s15 + $0x40] sm:$0xff] %vm735_vm2, %v711_v54  ;;  %v712_v63 = vmax.f32 %v673_v55, %v399_v43  ;;  %v257_v1 = vsel %vm219_vm0, %v255_v56, %v256_v57  ;;  %v401_v2 = vrot.slane %v139_v46, 2  ;;  %v632_v6 = vmax.f32 %v600_v51, %v138_v41 }
  0x3d   : > { %v522_v7 = vmax.f32 %v490_v60, %v139_v46  ;;  %v346_v8 = vmax.f32 %v138_v41, %v257_v1  ;;  %v563_v9 = vmax.f32 %v521_v59, %v257_v1  ;;  %v258_v10 = vrot.slane %v140_v58, 1 }
  0x3e   : > { %745 = vst.msk [vmem:[%s927_s15 + $0x48] sm:$0xff] %vm735_vm2, %v712_v63  ;;  %v402_v11 = vsel %vm364_vm1, %v400_v62, %v401_v2  ;;  %v674_v12 = vmax.f32 %v632_v6, %v257_v1  ;;  %v403_v3 = vrot.slane %v140_v58, 2  ;;  %v633_v4 = vmax.f32 %v601_v61, %v139_v46  ;;  %v147_v58 = vld [vmem:[%s875_s11 + $0xf0] sm:$0xff] }
  0x3f   : > { %v491_v14 = vmax.f32 %v346_v8, %v402_v11  ;;  %v602_v15 = vmax.f32 %v563_v9, %v402_v11  ;;  %v259_v16 = vsel %vm219_vm0, %v256_v57, %v258_v10  ;;  %v260_v17 = vrot.slane %v141_v0, 1 }
  0x40   : > { %v713_v18 = vmax.f32 %v674_v12, %v402_v11  ;;  %v347_v19 = vmax.f32 %v139_v46, %v259_v16  ;;  %v404_v20 = vsel %vm364_vm1, %v401_v2, %v403_v3  ;;  %v564_v21 = vmax.f32 %v522_v7, %v259_v16  ;;  %v148_v7 = vld [vmem:[%s875_s11 + $0xf8] sm:$0xff] }
  0x41   : > { %v523_v23 = vmax.f32 %v491_v14, %v141_v0  ;;  %v675_v24 = vmax.f32 %v633_v4, %v259_v16  ;;  %v261_v25 = vrot.slane %v142_v13, 1  ;;  %v405_v26 = vrot.slane %v141_v0, 2  ;;  %v149_v16 = vld [vmem:[%s875_s11 + $0x100] sm:$0x3] }
  0x42   : > { %746 = vst.msk [vmem:[%s927_s15 + $0x50] sm:$0xff] %vm735_vm2, %v713_v18  ;;  %v492_v27 = vmax.f32 %v347_v19, %v404_v20  ;;  %v603_v28 = vmax.f32 %v564_v21, %v404_v20  ;;  %v406_v29 = vrot.slane %v142_v13, 2  ;;  %v634_v30 = vmax.f32 %v602_v15, %v141_v0 }
  0x43   : > { %v714_v31 = vmax.f32 %v675_v24, %v404_v20  ;;  %v262_v32 = vsel %vm219_vm0, %v260_v17, %v261_v25  ;;  %v263_v33 = vrot.slane %v143_v22, 1  ;;  %v408_v34 = vrot.slane %v143_v22, 2 }
  0x44   : > { %v524_v35 = vmax.f32 %v492_v27, %v142_v13  ;;  %v348_v37 = vmax.f32 %v141_v0, %v262_v32  ;;  %v407_v38 = vsel %vm364_vm1, %v405_v26, %v406_v29  ;;  %v565_v5 = vmax.f32 %v523_v23, %v262_v32 }
  0x45   : > { %747 = vst.msk [vmem:[%s927_s15 + $0x58] sm:$0xff] %vm735_vm2, %v714_v31  ;;  %v676_v40 = vmax.f32 %v634_v30, %v262_v32  ;;  %v264_v41 = vsel %vm219_vm0, %v261_v25, %v263_v33  ;;  %v409_v42 = vsel %vm364_vm1, %v406_v29, %v408_v34  ;;  %v635_v44 = vmax.f32 %v603_v28, %v142_v13  ;;  %v150_v30 = vld [vmem:[%s875_s11 + $0x108] sm:$0xff]  ;;  %v151_v34 = vld [vmem:[%s875_s11 + $0x110] sm:$0xff] }
  0x46   : > { %v493_v45 = vmax.f32 %v348_v37, %v407_v38  ;;  %v604_v46 = vmax.f32 %v565_v5, %v407_v38  ;;  %v349_v47 = vmax.f32 %v142_v13, %v264_v41  ;;  %v566_v48 = vmax.f32 %v524_v35, %v264_v41 }
  0x47   : > { %v715_v43 = vmax.f32 %v676_v40, %v407_v38  ;;  %v677_v49 = vmax.f32 %v635_v44, %v264_v41  ;;  %v265_v50 = vrot.slane %v144_v36, 1  ;;  %v266_v51 = vrot.slane %v145_v39, 1 }
  0x48   : > { %v525_v53 = vmax.f32 %v493_v45, %v144_v36  ;;  %v494_v54 = vmax.f32 %v349_v47, %v409_v42  ;;  %v605_v55 = vmax.f32 %v566_v48, %v409_v42  ;;  %v410_v56 = vrot.slane %v144_v36, 2  ;;  %v152_v47 = vld [vmem:[%s875_s11 + $0x118] sm:$0x3] }
  0x49   : > { %748 = vst.msk [vmem:[%s927_s15 + $0x60] sm:$0xff] %vm735_vm2, %v715_v43  ;;  %v716_v57 = vmax.f32 %v677_v49, %v409_v42  ;;  %v267_v59 = vsel %vm219_vm0, %v265_v50, %v266_v51  ;;  %v411_v60 = vrot.slane %v145_v39, 2  ;;  %v636_v61 = vmax.f32 %v604_v46, %v144_v36 }
  0x4a   : > { %v526_v62 = vmax.f32 %v494_v54, %v145_v39  ;;  %v350_v63 = vmax.f32 %v144_v36, %v267_v59  ;;  %v567_v0 = vmax.f32 %v525_v53, %v267_v59  ;;  %v268_v1 = vrot.slane %v146_v52, 1 }
  0x4b   : > { %749 = vst.msk [vmem:[%s927_s15 + $0x68] sm:$0xff] %vm735_vm2, %v716_v57  ;;  %v412_v2 = vsel %vm364_vm1, %v410_v56, %v411_v60  ;;  %v678_v6 = vmax.f32 %v636_v61, %v267_v59  ;;  %v413_v8 = vrot.slane %v146_v52, 2  ;;  %v637_v9 = vmax.f32 %v605_v55, %v145_v39  ;;  %v153_v52 = vld [vmem:[%s875_s11 + $0x120] sm:$0xff] }
  0x4c   : > { %v495_v10 = vmax.f32 %v350_v63, %v412_v2  ;;  %v606_v11 = vmax.f32 %v567_v0, %v412_v2  ;;  %v269_v12 = vsel %vm219_vm0, %v266_v51, %v268_v1  ;;  %v270_v13 = vrot.slane %v147_v58, 1 }
  0x4d   : > { %v717_v3 = vmax.f32 %v678_v6, %v412_v2  ;;  %v351_v4 = vmax.f32 %v145_v39, %v269_v12  ;;  %v414_v14 = vsel %vm364_vm1, %v411_v60, %v413_v8  ;;  %v568_v15 = vmax.f32 %v526_v62, %v269_v12  ;;  %v154_v62 = vld [vmem:[%s875_s11 + $0x128] sm:$0xff] }
  0x4e   : > { %v527_v17 = vmax.f32 %v495_v10, %v147_v58  ;;  %v679_v18 = vmax.f32 %v637_v9, %v269_v12  ;;  %v271_v19 = vrot.slane %v148_v7, 1  ;;  %v415_v20 = vrot.slane %v147_v58, 2  ;;  %v155_v12 = vld [vmem:[%s875_s11 + $0x130] sm:$0x3] }
  0x4f   : > { %750 = vst.msk [vmem:[%s927_s15 + $0x70] sm:$0xff] %vm735_vm2, %v717_v3  ;;  %v496_v21 = vmax.f32 %v351_v4, %v414_v14  ;;  %v607_v22 = vmax.f32 %v568_v15, %v414_v14  ;;  %v416_v23 = vrot.slane %v148_v7, 2  ;;  %v638_v24 = vmax.f32 %v606_v11, %v147_v58 }
  0x50   : > { %v718_v25 = vmax.f32 %v679_v18, %v414_v14  ;;  %v272_v26 = vsel %vm219_vm0, %v270_v13, %v271_v19  ;;  %v273_v27 = vrot.slane %v149_v16, 1  ;;  %v418_v28 = vrot.slane %v149_v16, 2 }
  0x51   : > { %v528_v29 = vmax.f32 %v496_v21, %v148_v7  ;;  %v352_v31 = vmax.f32 %v147_v58, %v272_v26  ;;  %v417_v32 = vsel %vm364_vm1, %v415_v20, %v416_v23  ;;  %v569_v33 = vmax.f32 %v527_v17, %v272_v26 }
  0x52   : > { %751 = vst.msk [vmem:[%s927_s15 + $0x78] sm:$0xff] %vm735_vm2, %v718_v25  ;;  %v680_v35 = vmax.f32 %v638_v24, %v272_v26  ;;  %v274_v36 = vsel %vm219_vm0, %v271_v19, %v273_v27  ;;  %v419_v37 = vsel %vm364_vm1, %v416_v23, %v418_v28  ;;  %v639_v38 = vmax.f32 %v607_v22, %v148_v7  ;;  %v156_v24 = vld [vmem:[%s875_s11 + $0x138] sm:$0xff]  ;;  %v157_v28 = vld [vmem:[%s875_s11 + $0x140] sm:$0xff] }
  0x53   : > { %v497_v5 = vmax.f32 %v352_v31, %v417_v32  ;;  %v608_v39 = vmax.f32 %v569_v33, %v417_v32  ;;  %v353_v40 = vmax.f32 %v148_v7, %v274_v36  ;;  %v570_v41 = vmax.f32 %v528_v29, %v274_v36 }
  0x54   : > { %v719_v42 = vmax.f32 %v680_v35, %v417_v32  ;;  %v681_v44 = vmax.f32 %v639_v38, %v274_v36  ;;  %v275_v45 = vrot.slane %v150_v30, 1  ;;  %v276_v46 = vrot.slane %v151_v34, 1 }
  0x55   : > { %v529_v48 = vmax.f32 %v497_v5, %v150_v30  ;;  %v498_v43 = vmax.f32 %v353_v40, %v419_v37  ;;  %v609_v49 = vmax.f32 %v570_v41, %v419_v37  ;;  %v420_v50 = vrot.slane %v150_v30, 2  ;;  %v158_v40 = vld [vmem:[%s875_s11 + $0x148] sm:$0x3] }
  0x56   : > { %752 = vst.msk [vmem:[%s927_s15 + $0x80] sm:$0xff] %vm735_vm2, %v719_v42  ;;  %v720_v51 = vmax.f32 %v681_v44, %v419_v37  ;;  %v277_v53 = vsel %vm219_vm0, %v275_v45, %v276_v46  ;;  %v421_v54 = vrot.slane %v151_v34, 2  ;;  %v640_v55 = vmax.f32 %v608_v39, %v150_v30 }
  0x57   : > { %v530_v56 = vmax.f32 %v498_v43, %v151_v34  ;;  %v354_v57 = vmax.f32 %v150_v30, %v277_v53  ;;  %v571_v58 = vmax.f32 %v529_v48, %v277_v53  ;;  %v278_v59 = vrot.slane %v152_v47, 1 }
  0x58   : > { %753 = vst.msk [vmem:[%s927_s15 + $0x88] sm:$0xff] %vm735_vm2, %v720_v51  ;;  %v422_v60 = vsel %vm364_vm1, %v420_v50, %v421_v54  ;;  %v682_v61 = vmax.f32 %v640_v55, %v277_v53  ;;  %v423_v63 = vrot.slane %v152_v47, 2  ;;  %v641_v0 = vmax.f32 %v609_v49, %v151_v34  ;;  %v159_v47 = vld [vmem:[%s875_s11 + $0x150] sm:$0xff] }
  0x59   : > { %v499_v1 = vmax.f32 %v354_v57, %v422_v60  ;;  %v610_v2 = vmax.f32 %v571_v58, %v422_v60  ;;  %v279_v6 = vsel %vm219_vm0, %v276_v46, %v278_v59  ;;  %v280_v7 = vrot.slane %v153_v52, 1 }
  0x5a   : > { %v721_v8 = vmax.f32 %v682_v61, %v422_v60  ;;  %v355_v9 = vmax.f32 %v151_v34, %v279_v6  ;;  %v424_v10 = vsel %vm364_vm1, %v421_v54, %v423_v63  ;;  %v572_v11 = vmax.f32 %v530_v56, %v279_v6  ;;  %v160_v56 = vld [vmem:[%s875_s11 + $0x158] sm:$0xff] }
  0x5b   : > { %v531_v13 = vmax.f32 %v499_v1, %v153_v52  ;;  %v683_v3 = vmax.f32 %v641_v0, %v279_v6  ;;  %v281_v4 = vrot.slane %v154_v62, 1  ;;  %v425_v14 = vrot.slane %v153_v52, 2  ;;  %v161_v6 = vld [vmem:[%s875_s11 + $0x160] sm:$0x3] }
  0x5c   : > { %754 = vst.msk [vmem:[%s927_s15 + $0x90] sm:$0xff] %vm735_vm2, %v721_v8  ;;  %v500_v15 = vmax.f32 %v355_v9, %v424_v10  ;;  %v611_v16 = vmax.f32 %v572_v11, %v424_v10  ;;  %v426_v17 = vrot.slane %v154_v62, 2  ;;  %v642_v18 = vmax.f32 %v610_v2, %v153_v52 }
  0x5d   : > { %v722_v19 = vmax.f32 %v683_v3, %v424_v10  ;;  %v282_v20 = vsel %vm219_vm0, %v280_v7, %v281_v4  ;;  %v283_v21 = vrot.slane %v155_v12, 1  ;;  %v428_v22 = vrot.slane %v155_v12, 2 }
  0x5e   : > { %v532_v23 = vmax.f32 %v500_v15, %v154_v62  ;;  %v356_v25 = vmax.f32 %v153_v52, %v282_v20  ;;  %v427_v26 = vsel %vm364_vm1, %v425_v14, %v426_v17  ;;  %v573_v27 = vmax.f32 %v531_v13, %v282_v20 }
  0x5f   : > { %755 = vst.msk [vmem:[%s927_s15 + $0x98] sm:$0xff] %vm735_vm2, %v722_v19  ;;  %v684_v29 = vmax.f32 %v642_v18, %v282_v20  ;;  %v284_v30 = vsel %vm219_vm0, %v281_v4, %v283_v21  ;;  %v429_v31 = vsel %vm364_vm1, %v426_v17, %v428_v22  ;;  %v643_v32 = vmax.f32 %v611_v16, %v154_v62  ;;  %v162_v18 = vld [vmem:[%s875_s11 + $0x168] sm:$0xff]  ;;  %v163_v22 = vld [vmem:[%s875_s11 + $0x170] sm:$0xff] }
  0x60   : > { %v501_v33 = vmax.f32 %v356_v25, %v427_v26  ;;  %v612_v34 = vmax.f32 %v573_v27, %v427_v26  ;;  %v357_v35 = vmax.f32 %v154_v62, %v284_v30  ;;  %v574_v36 = vmax.f32 %v532_v23, %v284_v30 }
  0x61   : > { %v723_v37 = vmax.f32 %v684_v29, %v427_v26  ;;  %v685_v38 = vmax.f32 %v643_v32, %v284_v30  ;;  %v285_v5 = vrot.slane %v156_v24, 1  ;;  %v286_v39 = vrot.slane %v157_v28, 1 }
  0x62   : > { %v533_v41 = vmax.f32 %v501_v33, %v156_v24  ;;  %v502_v42 = vmax.f32 %v357_v35, %v429_v31  ;;  %v613_v44 = vmax.f32 %v574_v36, %v429_v31  ;;  %v430_v45 = vrot.slane %v156_v24, 2  ;;  %v164_v35 = vld [vmem:[%s875_s11 + $0x178] sm:$0x3] }
  0x63   : > { %756 = vst.msk [vmem:[%s927_s15 + $0xa0] sm:$0xff] %vm735_vm2, %v723_v37  ;;  %v724_v46 = vmax.f32 %v685_v38, %v429_v31  ;;  %v287_v48 = vsel %vm219_vm0, %v285_v5, %v286_v39  ;;  %v431_v43 = vrot.slane %v157_v28, 2  ;;  %v644_v49 = vmax.f32 %v612_v34, %v156_v24 }
  0x64   : > { %v534_v50 = vmax.f32 %v502_v42, %v157_v28  ;;  %v358_v51 = vmax.f32 %v156_v24, %v287_v48  ;;  %v575_v52 = vmax.f32 %v533_v41, %v287_v48  ;;  %v288_v53 = vrot.slane %v158_v40, 1 }
  0x65   : > { %757 = vst.msk [vmem:[%s927_s15 + $0xa8] sm:$0xff] %vm735_vm2, %v724_v46  ;;  %v432_v54 = vsel %vm364_vm1, %v430_v45, %v431_v43  ;;  %v686_v55 = vmax.f32 %v644_v49, %v287_v48  ;;  %v433_v57 = vrot.slane %v158_v40, 2  ;;  %v645_v58 = vmax.f32 %v613_v44, %v157_v28  ;;  %v165_v44 = vld [vmem:[%s875_s11 + $0x180] sm:$0xff] }
  0x66   : > { %v503_v59 = vmax.f32 %v358_v51, %v432_v54  ;;  %v614_v60 = vmax.f32 %v575_v52, %v432_v54  ;;  %v289_v61 = vsel %vm219_vm0, %v286_v39, %v288_v53  ;;  %v290_v62 = vrot.slane %v159_v47, 1  ;;  %v166_v52 = vld [vmem:[%s875_s11 + $0x188] sm:$0xff] }
  0x67   : > { %v725_v63 = vmax.f32 %v686_v55, %v432_v54  ;;  %v359_v0 = vmax.f32 %v157_v28, %v289_v61  ;;  %v434_v1 = vsel %vm364_vm1, %v431_v43, %v433_v57  ;;  %v576_v2 = vmax.f32 %v534_v50, %v289_v61 }
  0x68   : > { %v535_v7 = vmax.f32 %v503_v59, %v159_v47  ;;  %v687_v8 = vmax.f32 %v645_v58, %v289_v61  ;;  %v291_v9 = vrot.slane %v160_v56, 1  ;;  %v435_v10 = vrot.slane %v159_v47, 2  ;;  %v167_v61 = vld [vmem:[%s875_s11 + $0x190] sm:$0x3] }
  0x69   : > { %758 = vst.msk [vmem:[%s927_s15 + $0xb0] sm:$0xff] %vm735_vm2, %v725_v63  ;;  %v504_v11 = vmax.f32 %v359_v0, %v434_v1  ;;  %v615_v12 = vmax.f32 %v576_v2, %v434_v1  ;;  %v436_v13 = vrot.slane %v160_v56, 2  ;;  %v646_v3 = vmax.f32 %v614_v60, %v159_v47 }
  0x6a   : > { %v726_v4 = vmax.f32 %v687_v8, %v434_v1  ;;  %v292_v14 = vsel %vm219_vm0, %v290_v62, %v291_v9  ;;  %v293_v15 = vrot.slane %v161_v6, 1  ;;  %v438_v16 = vrot.slane %v161_v6, 2 }
  0x6b   : > { %v536_v17 = vmax.f32 %v504_v11, %v160_v56  ;;  %v360_v19 = vmax.f32 %v159_v47, %v292_v14  ;;  %v437_v20 = vsel %vm364_vm1, %v435_v10, %v436_v13  ;;  %v577_v21 = vmax.f32 %v535_v7, %v292_v14 }
  0x6c   : > { %759 = vst.msk [vmem:[%s927_s15 + $0xb8] sm:$0xff] %vm735_vm2, %v726_v4  ;;  %v688_v23 = vmax.f32 %v646_v3, %v292_v14  ;;  %v294_v24 = vsel %vm219_vm0, %v291_v9, %v293_v15  ;;  %v439_v25 = vsel %vm364_vm1, %v436_v13, %v438_v16  ;;  %v647_v26 = vmax.f32 %v615_v12, %v160_v56  ;;  %v168_v9 = vld [vmem:[%s875_s11 + $0x198] sm:$0xff]  ;;  %v169_v3 = vld [vmem:[%s875_s11 + $0x1a0] sm:$0xff] }
  0x6d   : > { %v505_v27 = vmax.f32 %v360_v19, %v437_v20  ;;  %v616_v28 = vmax.f32 %v577_v21, %v437_v20  ;;  %v361_v29 = vmax.f32 %v160_v56, %v294_v24  ;;  %v578_v30 = vmax.f32 %v536_v17, %v294_v24  ;;  %v170_v17 = vld [vmem:[%s875_s11 + $0x1a8] sm:$0x3] }
  0x6e   : > { %v727_v31 = vmax.f32 %v688_v23, %v437_v20  ;;  %v689_v32 = vmax.f32 %v647_v26, %v294_v24  ;;  %v295_v33 = vrot.slane %v162_v18, 1  ;;  %v296_v34 = vrot.slane %v163_v22, 1 }
  0x6f   : > { %v537_v36 = vmax.f32 %v505_v27, %v162_v18  ;;  %v506_v37 = vmax.f32 %v361_v29, %v439_v25  ;;  %v617_v38 = vmax.f32 %v578_v30, %v439_v25  ;;  %v440_v5 = vrot.slane %v162_v18, 2 }
  0x70   : > { %760 = vst.msk [vmem:[%s927_s15 + $0xc0] sm:$0xff] %vm735_vm2, %v727_v31  ;;  %v728_v39 = vmax.f32 %v689_v32, %v439_v25  ;;  %v297_v40 = vsel %vm219_vm0, %v295_v33, %v296_v34  ;;  %v441_v41 = vrot.slane %v163_v22, 2  ;;  %v648_v42 = vmax.f32 %v616_v28, %v162_v18 }
  0x71   : > { %v538_v45 = vmax.f32 %v506_v37, %v163_v22  ;;  %v362_v46 = vmax.f32 %v162_v18, %v297_v40  ;;  %v579_v47 = vmax.f32 %v537_v36, %v297_v40  ;;  %v298_v48 = vrot.slane %v164_v35, 1 }
  0x72   : > { %761 = vst.msk [vmem:[%s927_s15 + $0xc8] sm:$0xff] %vm735_vm2, %v728_v39  ;;  %v442_v43 = vsel %vm364_vm1, %v440_v5, %v441_v41  ;;  %v690_v49 = vmax.f32 %v648_v42, %v297_v40  ;;  %v443_v50 = vrot.slane %v164_v35, 2  ;;  %v649_v51 = vmax.f32 %v617_v38, %v163_v22 }
  0x73   : > { %v507_v53 = vmax.f32 %v362_v46, %v442_v43  ;;  %v618_v54 = vmax.f32 %v579_v47, %v442_v43  ;;  %v299_v55 = vsel %vm219_vm0, %v296_v34, %v298_v48  ;;  %v544_v56 = vrot.slane %v165_v44, 1 }
  0x74   : > { %v729_v57 = vmax.f32 %v690_v49, %v442_v43  ;;  %v363_v58 = vmax.f32 %v163_v22, %v299_v55  ;;  %v444_v59 = vsel %vm364_vm1, %v441_v41, %v443_v50  ;;  %v580_v60 = vmax.f32 %v538_v45, %v299_v55 }
  0x75   : > { %v691_v62 = vmax.f32 %v649_v51, %v299_v55  ;;  %v539_v63 = vmax.f32 %v507_v53, %v165_v44  ;;  %v545_v0 = vrot.slane %v166_v52, 1  ;;  %v583_v1 = vrot.slane %v165_v44, 2 }
  0x76   : > { %762 = vst.msk [vmem:[%s927_s15 + $0xd0] sm:$0xff] %vm735_vm2, %v729_v57  ;;  %v508_v2 = vmax.f32 %v363_v58, %v444_v59  ;;  %v619_v6 = vmax.f32 %v580_v60, %v444_v59  ;;  %v584_v7 = vrot.slane %v166_v52, 2  ;;  %v650_v8 = vmax.f32 %v618_v54, %v165_v44 }
  0x77   : > { %v730_v10 = vmax.f32 %v691_v62, %v444_v59  ;;  %v546_v11 = vsel %vm219_vm0, %v544_v56, %v545_v0  ;;  %v547_v12 = vrot.slane %v167_v61, 1  ;;  %v586_v13 = vrot.slane %v167_v61, 2 }
  0x78   : > { %v581_v4 = vmax.f32 %v539_v63, %v546_v11  ;;  %v585_v14 = vsel %vm364_vm1, %v583_v1, %v584_v7  ;;  %v692_v15 = vmax.f32 %v650_v8, %v546_v11  ;;  %v540_v16 = vmax.f32 %v508_v2, %v166_v52 }
  0x79   : > { %763 = vst.msk [vmem:[%s927_s15 + $0xd8] sm:$0xff] %vm735_vm2, %v730_v10  ;;  %v548_v18 = vsel %vm219_vm0, %v545_v0, %v547_v12  ;;  %v587_v19 = vsel %vm364_vm1, %v584_v7, %v586_v13  ;;  %v651_v20 = vmax.f32 %v619_v6, %v166_v52  ;;  %v657_v21 = vrot.slane %v168_v9, 1 }
  0x7a   : > { %v620_v22 = vmax.f32 %v581_v4, %v585_v14  ;;  %v731_v23 = vmax.f32 %v692_v15, %v585_v14  ;;  %v582_v24 = vmax.f32 %v540_v16, %v548_v18  ;;  %v658_v25 = vrot.slane %v169_v3, 1 }
  0x7b   : > { %v693_v26 = vmax.f32 %v651_v20, %v548_v18  ;;  %v696_v27 = vrot.slane %v168_v9, 2  ;;  %v697_v28 = vrot.slane %v169_v3, 2  ;;  %v660_v29 = vrot.slane %v170_v17, 1 }
  0x7c   : > { %764 = vst.msk [vmem:[%s927_s15 + $0xe0] sm:$0xff] %vm735_vm2, %v731_v23  ;;  %v621_v30 = vmax.f32 %v582_v24, %v587_v19  ;;  %v652_v31 = vmax.f32 %v620_v22, %v168_v9  ;;  %v659_v32 = vsel %vm219_vm0, %v657_v21, %v658_v25  ;;  %v699_v33 = vrot.slane %v170_v17, 2 }
  0x7d   : > { %v732_v34 = vmax.f32 %v693_v26, %v587_v19  ;;  %v698_v35 = vsel %vm364_vm1, %v696_v27, %v697_v28  ;;  %v661_v36 = vsel %vm219_vm0, %v658_v25, %v660_v29 }
  0x7e   : > { %v694_v37 = vmax.f32 %v652_v31, %v659_v32  ;;  %v653_v38 = vmax.f32 %v621_v30, %v169_v3  ;;  %v700_v5 = vsel %vm364_vm1, %v697_v28, %v699_v33 }
  0x7f   : > { %765 = vst.msk [vmem:[%s927_s15 + $0xe8] sm:$0xff] %vm735_vm2, %v732_v34 }
  0x80   : > { %v733_v39 = vmax.f32 %v694_v37, %v698_v35  ;;  %v695_v40 = vmax.f32 %v653_v38, %v661_v36 }
  0x82   : > { %766 = vst.msk [vmem:[%s927_s15 + $0xf0] sm:$0xff] %vm735_vm2, %v733_v39  ;;  %v734_v41 = vmax.f32 %v695_v40, %v700_v5 }
  0x84   : > { %767 = vst.msk [vmem:[%s927_s15 + $0xf8] sm:$0xff] %vm735_vm2, %v734_v41 }
  0x85 PF: > { %s11_s6 = sadd.s32 1, %s849_s6  }
  0x86   : > { %p8_p4 = scmp.ge.s32.totalorder %s11_s6, 4  }
  0x88   :  { %10 = sbr.rel (!%p8_p4) target bundleno = 1 (0x1), region = 54 }

// kernel: shufflenet_forward.61
= control target key start
LH: loop header
LB: loop body
LE: loop exit
PB: predicated region body
PF: predicated region fallthrough
CT: control target
= control target key end

     0   :  { %vm40_vm0 = vcmask 195584   ;;  %vm250_vm1 = vcmask 474112   ;;  %s505_s1 = inlined_call_operand.vmem [shape: f32[24,58], index: 1, kind: input, shape index: {}]   ;;  %s506_s0 = inlined_call_operand.vmem [shape: f32[128,24], index: 0, kind: input, shape index: {}]   ;;  %s507_s2 = inlined_call_operand.vmem [shape: f32[1,58], index: 2, kind: input, shape index: {}]   ;;  %s508_s3 = inlined_call_operand.vmem [shape: f32[128,58], index: 3, kind: output, shape index: {}]  }
   0x1   :  { %v30_v0 = vld [vmem:[%s505_s1] sm:$0xff]  ;;  %v31_v1 = vld [vmem:[%s505_s1 + $0x8] sm:$0xff]  ;;  %v32_v5 = vld [vmem:[%s505_s1 + $0x10] sm:$0xff] }
   0x2   :  { %v337_v2 = vpack.c.bf16 %v31_v1, %v30_v0  ;;  %v14_v3 = vld [vmem:[%s506_s0] sm:$0xff]  ;;  %v15_v6 = vld [vmem:[%s506_s0 + $0x8] sm:$0xff]  ;;  %v16_v8 = vld [vmem:[%s506_s0 + $0x10] sm:$0xff] }
   0x3   :  { %v22_v4 = vld [vmem:[%s506_s0 + $0x40] sm:$0xff]  ;;  %313 = vmatprep.mubr.msk.f32.mxu0 %vm40_vm0, %v14_v3  ;;  %v23_v7 = vld [vmem:[%s506_s0 + $0x48] sm:$0xff]  ;;  %v24_v9 = vld [vmem:[%s506_s0 + $0x50] sm:$0xff] }
   0x4   :  { %325 = vmatprep.mubr.msk.f32.mxu1 %vm40_vm0, %v22_v4  ;;  %338 = vmatprep.subr.bf16.mxu0 %v337_v2  ;;  %v17_v10 = vld [vmem:[%s506_s0 + $0x18] sm:$0xff]  ;;  %v18_v12 = vld [vmem:[%s506_s0 + $0x20] sm:$0xff]  ;;  %v19_v14 = vld [vmem:[%s506_s0 + $0x28] sm:$0xff] }
   0x5   :  { %341 = vmatprep.subr.bf16.mxu1 %v337_v2  ;;  %340 = vmatpush3.bf16.msra.mxu0 %v337_v2  ;;  %v25_v11 = vld [vmem:[%s506_s0 + $0x58] sm:$0xff]  ;;  %v26_v13 = vld [vmem:[%s506_s0 + $0x60] sm:$0xff]  ;;  %v27_v15 = vld [vmem:[%s506_s0 + $0x68] sm:$0xff] }
   0x6   :  { %343 = vmatpush3.bf16.msra.mxu1 %v337_v2  ;;  %311 = vmatprep.subr.mxu0 %v32_v5  ;;  %v20_v16 = vld [vmem:[%s506_s0 + $0x30] sm:$0xff]  ;;  %v21_v18 = vld [vmem:[%s506_s0 + $0x38] sm:$0xff]  ;;  %v271_v20 = vld [vmem:[%s507_s2] ss:$0 sm:$0xff] }
   0x7   :  { %342 = vmatprep.subr.mxu1 %v32_v5  ;;  %v28_v17 = vld [vmem:[%s506_s0 + $0x70] sm:$0xff]  ;;  %v29_v19 = vld [vmem:[%s506_s0 + $0x78] sm:$0xff] }
   0x9   :  { %312 = vmatpush3.msra.mxu0 %v32_v5 }
   0xa   :  { %344 = vmatpush3.msra.mxu1 %v32_v5  ;;  %314 = vmatmul.mubr.msk.f32.vlgmr.msra.gmra.mrb[0].mxu0 %vm40_vm0, %v15_v6 }
   0xb   :  { %326 = vmatmul.mubr.msk.f32.vlgmr.msra.gmra.mrb[0].mxu1 %vm40_vm0, %v23_v7  ;;  %316 = vmatprep.mubr.msk.f32.mxu0 %vm40_vm0, %v16_v8 }
   0xc   :  { %328 = vmatprep.mubr.msk.f32.mxu1 %vm40_vm0, %v24_v9 }
   0xe   :  { %317 = vmatmul.mubr.msk.f32.gmra.mrb[2].mxu0 %vm40_vm0, %v17_v10 }
   0xf   :  { %329 = vmatmul.mubr.msk.f32.gmra.mrb[2].mxu1 %vm40_vm0, %v25_v11  ;;  %319 = vmatprep.mubr.msk.f32.mxu0 %vm40_vm0, %v18_v12 }
  0x10   :  { %331 = vmatprep.mubr.msk.f32.mxu1 %vm40_vm0, %v26_v13 }
  0x12   :  { %320 = vmatmul.mubr.msk.f32.gmra.mrb[4].mxu0 %vm40_vm0, %v19_v14 }
  0x13   :  { %332 = vmatmul.mubr.msk.f32.gmra.mrb[4].mxu1 %vm40_vm0, %v27_v15  ;;  %322 = vmatprep.mubr.msk.f32.mxu0 %vm40_vm0, %v20_v16 }
  0x14   :  { %334 = vmatprep.mubr.msk.f32.mxu1 %vm40_vm0, %v28_v17 }
  0x16   :  { %323 = vmatmul.mubr.msk.f32.gmra.mrb[6].mxu0 %vm40_vm0, %v21_v18 }
  0x17   :  { %335 = vmatmul.mubr.msk.f32.gmra.mrb[6].mxu1 %vm40_vm0, %v29_v19 }
  0xdd   :  { %v315_v21 = vpop.f32.mrb[0].mxu0 }
  0xde   :  { %v327_v22 = vpop.f32.mrb[0].mxu1  ;;  %v161_v23 = vadd.f32 %v315_v21, %v271_v20  ;;  %v155_v25 = vpop.f32.mrb[1].mxu0 }
  0xdf   :  { %v201_v24 = vadd.f32 %v327_v22, %v271_v20  ;;  %v195_v26 = vpop.f32.mrb[1].mxu1  ;;  %v156_v27 = vadd.f32 %v271_v20, %v155_v25 }
  0xe0   :  { %v196_v28 = vadd.f32 %v271_v20, %v195_v26  ;;  %v235_v29 = vmax.f32 %v161_v23, 0.0 }
  0xe1   :  { %v243_v30 = vmax.f32 %v201_v24, 0.0  ;;  %v234_v31 = vmax.f32 %v156_v27, 0.0  ;;  %v318_v33 = vpop.f32.mrb[2].mxu0 }
  0xe2   :  { %v242_v32 = vmax.f32 %v196_v28, 0.0  ;;  %v330_v34 = vpop.f32.mrb[2].mxu1  ;;  %252 = vst.msk [vmem:[%s508_s3 + $0x8] sm:$0xff] %vm250_vm1, %v235_v29  ;;  %v171_v35 = vadd.f32 %v318_v33, %v271_v20  ;;  %v165_v37 = vpop.f32.mrb[3].mxu0 }
  0xe3   :  { %260 = vst.msk [vmem:[%s508_s3 + $0x48] sm:$0xff] %vm250_vm1, %v243_v30  ;;  %v211_v36 = vadd.f32 %v330_v34, %v271_v20  ;;  %v205_v38 = vpop.f32.mrb[3].mxu1  ;;  %251 = vst.msk [vmem:[%s508_s3] sm:$0xff] %vm250_vm1, %v234_v31  ;;  %v166_v39 = vadd.f32 %v271_v20, %v165_v37 }
  0xe4   :  { %259 = vst.msk [vmem:[%s508_s3 + $0x40] sm:$0xff] %vm250_vm1, %v242_v32  ;;  %v206_v40 = vadd.f32 %v271_v20, %v205_v38  ;;  %v237_v41 = vmax.f32 %v171_v35, 0.0 }
  0xe5   :  { %v245_v42 = vmax.f32 %v211_v36, 0.0  ;;  %v236_v43 = vmax.f32 %v166_v39, 0.0  ;;  %v321_v45 = vpop.f32.mrb[4].mxu0 }
  0xe6   :  { %v244_v44 = vmax.f32 %v206_v40, 0.0  ;;  %v333_v46 = vpop.f32.mrb[4].mxu1  ;;  %254 = vst.msk [vmem:[%s508_s3 + $0x18] sm:$0xff] %vm250_vm1, %v237_v41  ;;  %v181_v47 = vadd.f32 %v321_v45, %v271_v20  ;;  %v175_v49 = vpop.f32.mrb[5].mxu0 }
  0xe7   :  { %262 = vst.msk [vmem:[%s508_s3 + $0x58] sm:$0xff] %vm250_vm1, %v245_v42  ;;  %v221_v48 = vadd.f32 %v333_v46, %v271_v20  ;;  %v215_v50 = vpop.f32.mrb[5].mxu1  ;;  %253 = vst.msk [vmem:[%s508_s3 + $0x10] sm:$0xff] %vm250_vm1, %v236_v43  ;;  %v176_v51 = vadd.f32 %v271_v20, %v175_v49 }
  0xe8   :  { %261 = vst.msk [vmem:[%s508_s3 + $0x50] sm:$0xff] %vm250_vm1, %v244_v44  ;;  %v216_v52 = vadd.f32 %v271_v20, %v215_v50  ;;  %v239_v53 = vmax.f32 %v181_v47, 0.0 }
  0xe9   :  { %v247_v54 = vmax.f32 %v221_v48, 0.0  ;;  %v238_v55 = vmax.f32 %v176_v51, 0.0  ;;  %v324_v57 = vpop.f32.mrb[6].mxu0 }
  0xea   :  { %v246_v56 = vmax.f32 %v216_v52, 0.0  ;;  %v336_v58 = vpop.f32.mrb[6].mxu1  ;;  %256 = vst.msk [vmem:[%s508_s3 + $0x28] sm:$0xff] %vm250_vm1, %v239_v53  ;;  %v191_v59 = vadd.f32 %v324_v57, %v271_v20  ;;  %v185_v61 = vpop.f32.mrb[7].mxu0 }
  0xeb   :  { %264 = vst.msk [vmem:[%s508_s3 + $0x68] sm:$0xff] %vm250_vm1, %v247_v54  ;;  %v231_v60 = vadd.f32 %v336_v58, %v271_v20  ;;  %v225_v62 = vpop.f32.mrb[7].mxu1  ;;  %255 = vst.msk [vmem:[%s508_s3 + $0x20] sm:$0xff] %vm250_vm1, %v238_v55  ;;  %v186_v63 = vadd.f32 %v271_v20, %v185_v61 }
  0xec   :  { %263 = vst.msk [vmem:[%s508_s3 + $0x60] sm:$0xff] %vm250_vm1, %v246_v56  ;;  %v226_v0 = vadd.f32 %v271_v20, %v225_v62  ;;  %v241_v1 = vmax.f32 %v191_v59, 0.0 }
  0xed   :  { %v249_v2 = vmax.f32 %v231_v60, 0.0  ;;  %v240_v3 = vmax.f32 %v186_v63, 0.0 }
  0xee   :  { %v248_v4 = vmax.f32 %v226_v0, 0.0  ;;  %258 = vst.msk [vmem:[%s508_s3 + $0x38] sm:$0xff] %vm250_vm1, %v241_v1 }
  0xef   :  { %266 = vst.msk [vmem:[%s508_s3 + $0x78] sm:$0xff] %vm250_vm1, %v249_v2  ;;  %257 = vst.msk [vmem:[%s508_s3 + $0x30] sm:$0xff] %vm250_vm1, %v240_v3 }
  0xf0   :  { %265 = vst.msk [vmem:[%s508_s3 + $0x70] sm:$0xff] %vm250_vm1, %v248_v4 }

// kernel: shufflenet_forward.63
= control target key start
LH: loop header
LB: loop body
LE: loop exit
PB: predicated region body
PF: predicated region fallthrough
CT: control target
= control target key end

     0   :  { %vm33_vm0 = vcmask 474112   ;;  %vm46_vm1 = vcmask 1041408   ;;  %vm214_vm2 = vmmov 1   ;;  %s294_s1 = inlined_call_operand.vmem [shape: f32[58,58], index: 1, kind: input, shape index: {}]   ;;  %s295_s0 = inlined_call_operand.vmem [shape: f32[32,58], index: 0, kind: input, shape index: {}]   ;;  %s296_s2 = inlined_call_operand.vmem [shape: f32[1,58], index: 2, kind: input, shape index: {}]   ;;  %s297_s3 = inlined_call_operand.vmem [shape: f32[32,58], index: 3, kind: output, shape index: {}]  }
   0x1   :  { %v18_v0 = vld [vmem:[%s294_s1] sm:$0xff]  ;;  %v19_v1 = vld [vmem:[%s294_s1 + $0x8] sm:$0xff]  ;;  %v20_v2 = vld [vmem:[%s294_s1 + $0x10] sm:$0xff] }
   0x2   :  { %v187_v3 = vpack.c.bf16 %v19_v1, %v18_v0  ;;  %v21_v4 = vld [vmem:[%s294_s1 + $0x18] sm:$0xff]  ;;  %v22_v6 = vld [vmem:[%s294_s1 + $0x20] sm:$0xff]  ;;  %v23_v7 = vld [vmem:[%s294_s1 + $0x28] sm:$0xff] }
   0x3   :  { %v191_v5 = vpack.c.bf16 %v21_v4, %v20_v2  ;;  %v14_v8 = vld [vmem:[%s295_s0] sm:$0xff]  ;;  %v16_v9 = vld [vmem:[%s295_s0 + $0x10] sm:$0xff]  ;;  %v195_v10 = vpack.c.bf16 %v23_v7, %v22_v6  ;;  %v25_v12 = vld [vmem:[%s294_s1 + $0x38] sm:$0x3] }
   0x4   :  { %188 = vmatprep.subr.bf16.mxu0 %v187_v3  ;;  %205 = vmatprep.subr.bf16.mxu1 %v187_v3  ;;  %v24_v11 = vld [vmem:[%s294_s1 + $0x30] sm:$0xff]  ;;  %vm200_vm3 = vmpackc.low %vm46_vm1, %vm214_vm2  ;;  %v15_v14 = vld [vmem:[%s295_s0 + $0x8] sm:$0xff] }
   0x5   :  { %190 = vmatpush3.bf16.msra.mxu0 %v187_v3  ;;  %209 = vmatpush3.bf16.msra.mxu1 %v187_v3  ;;  %v199_v13 = vpack.c.bf16 %v25_v12, %v24_v11  ;;  %v17_v15 = vld [vmem:[%s295_s0 + $0x18] sm:$0xff]  ;;  %v147_v16 = vld [vmem:[%s296_s2] ss:$0 sm:$0xff] }
   0x6   :  { %192 = vmatprep.subr.bf16.mxu0 %v191_v5  ;;  %206 = vmatprep.subr.bf16.mxu1 %v191_v5 }
   0x7   :  { %181 = vmatprep.mubr.msk.f32.mxu0 %vm33_vm0, %v14_v8  ;;  %184 = vmatprep.mubr.msk.f32.mxu1 %vm33_vm0, %v16_v9 }
   0x9   :  { %194 = vmatpush3.bf16.msra.mxu0 %v191_v5  ;;  %210 = vmatpush3.bf16.msra.mxu1 %v191_v5 }
   0xa   :  { %196 = vmatprep.subr.bf16.mxu0 %v195_v10  ;;  %207 = vmatprep.subr.bf16.mxu1 %v195_v10 }
   0xd   :  { %198 = vmatpush3.bf16.msra.mxu0 %v195_v10  ;;  %211 = vmatpush3.bf16.msra.mxu1 %v195_v10 }
   0xe   :  { %201 = vmatprep.subr.msk.bf16.mxu0 %vm200_vm3, %v199_v13  ;;  %208 = vmatprep.subr.msk.bf16.mxu1 %vm200_vm3, %v199_v13 }
  0x11   :  { %204 = vmatpush3.bf16.msk.msra.mxu0 %vm200_vm3, %v199_v13  ;;  %212 = vmatpush3.bf16.msk.msra.mxu1 %vm200_vm3, %v199_v13 }
  0x14   :  { %182 = vmatmul.mubr.msk.f32.vlgmr.msra.gmra.mrb[0].mxu0 %vm33_vm0, %v15_v14  ;;  %185 = vmatmul.mubr.msk.f32.vlgmr.msra.gmra.mrb[0].mxu1 %vm33_vm0, %v17_v15 }
  0xe7   :  { %v183_v17 = vpop.f32.mrb[0].mxu0  ;;  %v186_v18 = vpop.f32.mrb[0].mxu1 }
  0xe8   :  { %v122_v19 = vadd.f32 %v183_v17, %v147_v16  ;;  %v132_v20 = vadd.f32 %v186_v18, %v147_v16  ;;  %v116_v21 = vpop.f32.mrb[1].mxu0  ;;  %v126_v22 = vpop.f32.mrb[1].mxu1 }
  0xe9   :  { %v117_v23 = vadd.f32 %v147_v16, %v116_v21  ;;  %v127_v24 = vadd.f32 %v147_v16, %v126_v22 }
  0xea   :  { %v136_v25 = vmax.f32 %v122_v19, 0.0  ;;  %v138_v26 = vmax.f32 %v132_v20, 0.0 }
  0xeb   :  { %v135_v27 = vmax.f32 %v117_v23, 0.0  ;;  %v137_v28 = vmax.f32 %v127_v24, 0.0 }
  0xec   :  { %140 = vst.msk [vmem:[%s297_s3 + $0x8] sm:$0xff] %vm33_vm0, %v136_v25  ;;  %142 = vst.msk [vmem:[%s297_s3 + $0x18] sm:$0xff] %vm33_vm0, %v138_v26 }
  0xed   :  { %139 = vst.msk [vmem:[%s297_s3] sm:$0xff] %vm33_vm0, %v135_v27  ;;  %141 = vst.msk [vmem:[%s297_s3 + $0x10] sm:$0xff] %vm33_vm0, %v137_v28 }

// kernel: shufflenet_forward.62
= control target key start
LH: loop header
LB: loop body
LE: loop exit
PB: predicated region body
PF: predicated region fallthrough
CT: control target
= control target key end

     0   :  { %s881_s12 = smov 0   ;;  %s1282_s0 = inlined_call_operand.vmem [shape: f32[2,10,10,58], index: 0, kind: input, shape index: {}]   ;;  %s1283_s1 = inlined_call_operand.vmem [shape: f32[9,1,58], index: 1, kind: input, shape index: {}]   ;;  %s1284_s2 = inlined_call_operand.vmem [shape: f32[1,58], index: 2, kind: input, shape index: {}]   ;;  %s1285_s3 = inlined_call_operand.vmem [shape: f32[2,8,8,58], index: 3, kind: output, shape index: {}]  }
   0x1 LB: > { %s815_s13 = sadd.s32 4294967295, %s859_s12   ;;  %p819_p0 = scmp.ge.s32.totalorder %s859_s12, 1  ;;  %s859_s12 = sphi %s881_s12, %s13_s12  }
   0x2   : > { %p137_p1 = scmp.lt.s32.totalorder %s859_s12, 3 }
   0x4   : > { %p138_p2 = pnand %p819_p0, %p137_p1 }
   0x5   : > { %p161_p3 = scmp.lt.s32.totalorder (!%p138_p2), %s815_s13, 1  ;;  %v895_v0 = vld [vmem:[%s1283_s1] ss:$0 sm:$0xff] (!%p138_p2)  ;;  %v900_v1 = vld [vmem:[%s1283_s1 + $0x1] ss:$0 sm:$0xff] (!%p138_p2)  ;;  %vm246_vm0 = vcmask (!%p138_p2), 1046528  }
   0x6   : > { %141 = sbr.rel (%p138_p2) target bundleno = 114 (0x72), region = 32  ;;  %v905_v2 = vld [vmem:[%s1283_s1 + $0x2] ss:$0 sm:$0xff] (!%p138_p2)  ;;  %v915_v3 = vld [vmem:[%s1283_s1 + $0x3] ss:$0 sm:$0xff] (!%p138_p2)  ;;  %vm327_vm1 = vcmask (!%p138_p2), 1045504  }
   0x7   : > { %v920_v4 = vld [vmem:[%s1283_s1 + $0x4] ss:$0 sm:$0xff] (!%p138_p2)  ;;  %v927_v7 = vld [vmem:[%s1283_s1 + $0x5] ss:$0 sm:$0xff] (!%p138_p2)  ;;  %v942_v18 = vld [vmem:[%s1283_s1 + $0x6] ss:$0 sm:$0xff] (!%p138_p2) }
   0x8   : > { %v947_v19 = vld [vmem:[%s1283_s1 + $0x7] ss:$0 sm:$0xff] (!%p138_p2)  ;;  %v957_v29 = vld [vmem:[%s1283_s1 + $0x8] ss:$0 sm:$0xff] (!%p138_p2)  ;;  %vm751_vm2 = vcmask (!%p138_p2), 474112  }
   0xd   : > { %s1287_s13 = smov (!%p161_p3, %s815_s13), 1 }
   0xe   : > { %s844_s14 = smul.u32 160, %s1287_s13  ;;  %s843_s9 = sshll.u32 %s1287_s13, 6 }
   0xf   : > { %s1029_s15 = scalar_lea.vmem %s1285_s3, %s843_s9 }
  0x10   : > { %s910_s23 = scalar_lea.vmem %s1282_s0, %s844_s14 }
  0x11   : > { %v171_v5 = vld [vmem:[%s910_s23] sm:$0xff]  ;;  %v172_v6 = vld [vmem:[%s910_s23 + $0x8] sm:$0x3]  ;;  %v173_v8 = vld [vmem:[%s910_s23 + $0x10] sm:$0xff] }
  0x12   : > { %v174_v9 = vld [vmem:[%s910_s23 + $0x18] sm:$0x3]  ;;  %v198_v10 = vmul.f32 %v895_v0, %v171_v5  ;;  %v214_v11 = vmul.f32 %v900_v1, %v171_v5  ;;  %v215_v12 = vmul.f32 %v900_v1, %v172_v6  ;;  %v295_v13 = vmul.f32 %v905_v2, %v171_v5  ;;  %v951_v24 = vld [vmem:[%s910_s23 + $0x20] sm:$0xff]  ;;  %v965_v34 = vld [vmem:[%s910_s23 + $0x28] sm:$0x3] }
  0x13   : > { %v296_v14 = vmul.f32 %v905_v2, %v172_v6  ;;  %v376_v15 = vmul.f32 %v915_v3, %v173_v8  ;;  %v400_v16 = vmul.f32 %v920_v4, %v173_v8  ;;  %v401_v17 = vmul.f32 %v920_v4, %v174_v9 }
  0x14   : > { %v247_v20 = vrot.slane %v214_v11, 1  ;;  %v248_v21 = vrot.slane %v215_v12, 1  ;;  %v328_v22 = vrot.slane %v295_v13, 2  ;;  %v480_v23 = vmul.f32 %v927_v7, %v173_v8 }
  0x15   : > { %v329_v25 = vrot.slane %v296_v14, 2  ;;  %v432_v26 = vrot.slane %v400_v16, 1  ;;  %v433_v27 = vrot.slane %v401_v17, 1  ;;  %v481_v28 = vmul.f32 %v927_v7, %v174_v9  ;;  %v999_v14 = vld [vmem:[%s910_s23 + $0x38] sm:$0x3] }
  0x16   : > { %v249_v30 = vsel %vm246_vm0, %v247_v20, %v248_v21  ;;  %v512_v31 = vrot.slane %v480_v23, 2  ;;  %v560_v32 = vmul.f32 %v942_v18, %v951_v24  ;;  %v584_v33 = vmul.f32 %v947_v19, %v951_v24 }
  0x17   : > { %v279_v35 = vadd.f32 %v249_v30, %v198_v10  ;;  %v330_v36 = vsel %vm327_vm1, %v328_v22, %v329_v25  ;;  %v434_v37 = vsel %vm246_vm0, %v432_v26, %v433_v27  ;;  %v513_v38 = vrot.slane %v481_v28, 2  ;;  %v995_v10 = vld [vmem:[%s910_s23 + $0x30] sm:$0xff] }
  0x18   : > { %v585_v39 = vmul.f32 %v947_v19, %v965_v34  ;;  %v616_v40 = vrot.slane %v584_v33, 1  ;;  %v664_v41 = vmul.f32 %v957_v29, %v951_v24  ;;  %v665_v42 = vmul.f32 %v957_v29, %v965_v34 }
  0x19   : > { %v360_v43 = vadd.f32 %v330_v36, %v279_v35  ;;  %v514_v44 = vsel %vm327_vm1, %v512_v31, %v513_v38  ;;  %v199_v45 = vmul.f32 %v895_v0, %v173_v8  ;;  %v216_v46 = vmul.f32 %v900_v1, %v173_v8  ;;  %v1017_v36 = vld [vmem:[%s1284_s2] ss:$0 sm:$0xff] }
  0x1a   : > { %v617_v47 = vrot.slane %v585_v39, 1  ;;  %v696_v48 = vrot.slane %v664_v41, 2  ;;  %v697_v49 = vrot.slane %v665_v42, 2  ;;  %v217_v50 = vmul.f32 %v900_v1, %v174_v9 }
  0x1b   : > { %v384_v51 = vadd.f32 %v376_v15, %v360_v43  ;;  %v250_v52 = vrot.slane %v216_v46, 1  ;;  %v297_v53 = vmul.f32 %v905_v2, %v173_v8  ;;  %v298_v54 = vmul.f32 %v905_v2, %v174_v9 }
  0x1c   : > { %v618_v55 = vsel %vm246_vm0, %v616_v40, %v617_v47  ;;  %v698_v56 = vsel %vm327_vm1, %v696_v48, %v697_v49  ;;  %v251_v57 = vrot.slane %v217_v50, 1  ;;  %v377_v58 = vmul.f32 %v915_v3, %v951_v24 }
  0x1d   : > { %v464_v59 = vadd.f32 %v434_v37, %v384_v51  ;;  %v331_v60 = vrot.slane %v297_v53, 2  ;;  %v332_v61 = vrot.slane %v298_v54, 2  ;;  %v402_v62 = vmul.f32 %v920_v4, %v951_v24 }
  0x1e   : > { %v252_v63 = vsel %vm246_vm0, %v250_v52, %v251_v57  ;;  %v403_v5 = vmul.f32 %v920_v4, %v965_v34  ;;  %v482_v6 = vmul.f32 %v927_v7, %v951_v24  ;;  %v483_v8 = vmul.f32 %v927_v7, %v965_v34 }
  0x1f   : > { %v544_v9 = vadd.f32 %v514_v44, %v464_v59  ;;  %v280_v11 = vadd.f32 %v252_v63, %v199_v45  ;;  %v333_v12 = vsel %vm327_vm1, %v331_v60, %v332_v61  ;;  %v435_v13 = vrot.slane %v402_v62, 1  ;;  %v1051_v59 = vld [vmem:[%s910_s23 + $0x40] sm:$0xff] }
  0x20   : > { %v436_v15 = vrot.slane %v403_v5, 1  ;;  %v515_v16 = vrot.slane %v482_v6, 2  ;;  %v516_v17 = vrot.slane %v483_v8, 2  ;;  %v561_v20 = vmul.f32 %v942_v18, %v995_v10  ;;  %v1055_v6 = vld [vmem:[%s910_s23 + $0x48] sm:$0x3] }
  0x21   : > { %v568_v21 = vadd.f32 %v560_v32, %v544_v9  ;;  %v361_v22 = vadd.f32 %v333_v12, %v280_v11  ;;  %v586_v23 = vmul.f32 %v947_v19, %v995_v10  ;;  %v587_v25 = vmul.f32 %v947_v19, %v999_v14 }
  0x22   : > { %v437_v26 = vsel %vm246_vm0, %v435_v13, %v436_v15  ;;  %v517_v27 = vsel %vm327_vm1, %v515_v16, %v516_v17  ;;  %v666_v28 = vmul.f32 %v957_v29, %v995_v10  ;;  %v667_v30 = vmul.f32 %v957_v29, %v999_v14 }
  0x23   : > { %v648_v31 = vadd.f32 %v618_v55, %v568_v21  ;;  %v385_v32 = vadd.f32 %v377_v58, %v361_v22  ;;  %v619_v33 = vrot.slane %v586_v23, 1  ;;  %v620_v35 = vrot.slane %v587_v25, 1 }
  0x24   : > { %v699_v37 = vrot.slane %v666_v28, 2  ;;  %v700_v38 = vrot.slane %v667_v30, 2  ;;  %v200_v39 = vmul.f32 %v895_v0, %v951_v24  ;;  %v218_v40 = vmul.f32 %v900_v1, %v951_v24 }
  0x25   : > { %v728_v41 = vadd.f32 %v698_v56, %v648_v31  ;;  %v465_v42 = vadd.f32 %v437_v26, %v385_v32  ;;  %v621_v43 = vsel %vm246_vm0, %v619_v33, %v620_v35  ;;  %v219_v44 = vmul.f32 %v900_v1, %v965_v34 }
  0x26   : > { %v701_v45 = vsel %vm327_vm1, %v699_v37, %v700_v38  ;;  %v253_v46 = vrot.slane %v218_v40, 1  ;;  %v299_v47 = vmul.f32 %v905_v2, %v951_v24  ;;  %v300_v48 = vmul.f32 %v905_v2, %v965_v34 }
  0x27   : > { %v743_v49 = vadd.f32 %v1017_v36, %v728_v41  ;;  %v545_v50 = vadd.f32 %v517_v27, %v465_v42  ;;  %v254_v51 = vrot.slane %v219_v44, 1  ;;  %v378_v52 = vmul.f32 %v915_v3, %v995_v10 }
  0x28   : > { %v334_v53 = vrot.slane %v299_v47, 2  ;;  %v335_v54 = vrot.slane %v300_v48, 2  ;;  %v404_v55 = vmul.f32 %v920_v4, %v995_v10  ;;  %v405_v56 = vmul.f32 %v920_v4, %v999_v14  ;;  %v1089_v47 = vld [vmem:[%s910_s23 + $0x50] sm:$0xff] }
  0x29   : > { %752 = vst.msk [vmem:[%s1029_s15] sm:$0xff] %vm751_vm2, %v743_v49  ;;  %v569_v24 = vadd.f32 %v561_v20, %v545_v50  ;;  %v255_v34 = vsel %vm246_vm0, %v253_v46, %v254_v51  ;;  %v484_v57 = vmul.f32 %v927_v7, %v995_v10  ;;  %v485_v58 = vmul.f32 %v927_v7, %v999_v14 }
  0x2a   : > { %v281_v60 = vadd.f32 %v255_v34, %v200_v39  ;;  %v336_v61 = vsel %vm327_vm1, %v334_v53, %v335_v54  ;;  %v438_v62 = vrot.slane %v404_v55, 1  ;;  %v439_v63 = vrot.slane %v405_v56, 1  ;;  %v1101_v54 = vld [vmem:[%s910_s23 + $0x58] sm:$0x3] }
  0x2b   : > { %v649_v5 = vadd.f32 %v621_v43, %v569_v24  ;;  %v518_v8 = vrot.slane %v484_v57, 2  ;;  %v519_v9 = vrot.slane %v485_v58, 2  ;;  %v562_v11 = vmul.f32 %v942_v18, %v1051_v59 }
  0x2c   : > { %v362_v12 = vadd.f32 %v336_v61, %v281_v60  ;;  %v440_v13 = vsel %vm246_vm0, %v438_v62, %v439_v63  ;;  %v588_v15 = vmul.f32 %v947_v19, %v1051_v59  ;;  %v589_v16 = vmul.f32 %v947_v19, %v1055_v6 }
  0x2d   : > { %v729_v17 = vadd.f32 %v701_v45, %v649_v5  ;;  %v520_v20 = vsel %vm327_vm1, %v518_v8, %v519_v9  ;;  %v668_v21 = vmul.f32 %v957_v29, %v1051_v59  ;;  %v669_v22 = vmul.f32 %v957_v29, %v1055_v6 }
  0x2e   : > { %v386_v23 = vadd.f32 %v378_v52, %v362_v12  ;;  %v622_v25 = vrot.slane %v588_v15, 1  ;;  %v623_v26 = vrot.slane %v589_v16, 1  ;;  %v201_v27 = vmul.f32 %v895_v0, %v995_v10 }
  0x2f   : > { %v744_v28 = vadd.f32 %v1017_v36, %v729_v17  ;;  %v702_v30 = vrot.slane %v668_v21, 2  ;;  %v703_v31 = vrot.slane %v669_v22, 2  ;;  %v220_v32 = vmul.f32 %v900_v1, %v995_v10 }
  0x30   : > { %v466_v33 = vadd.f32 %v440_v13, %v386_v23  ;;  %v624_v35 = vsel %vm246_vm0, %v622_v25, %v623_v26  ;;  %v221_v37 = vmul.f32 %v900_v1, %v999_v14  ;;  %v301_v38 = vmul.f32 %v905_v2, %v995_v10 }
  0x31   : > { %753 = vst.msk [vmem:[%s1029_s15 + $0x8] sm:$0xff] %vm751_vm2, %v744_v28  ;;  %v704_v39 = vsel %vm327_vm1, %v702_v30, %v703_v31  ;;  %v256_v40 = vrot.slane %v220_v32, 1  ;;  %v302_v41 = vmul.f32 %v905_v2, %v999_v14  ;;  %v379_v42 = vmul.f32 %v915_v3, %v1051_v59 }
  0x32   : > { %v546_v43 = vadd.f32 %v520_v20, %v466_v33  ;;  %v257_v44 = vrot.slane %v221_v37, 1  ;;  %v337_v45 = vrot.slane %v301_v38, 2  ;;  %v406_v46 = vmul.f32 %v920_v4, %v1051_v59 }
  0x33   : > { %v338_v10 = vrot.slane %v302_v41, 2  ;;  %v407_v48 = vmul.f32 %v920_v4, %v1055_v6  ;;  %v486_v49 = vmul.f32 %v927_v7, %v1051_v59  ;;  %v487_v14 = vmul.f32 %v927_v7, %v1055_v6 }
  0x34   : > { %v570_v50 = vadd.f32 %v562_v11, %v546_v43  ;;  %v258_v51 = vsel %vm246_vm0, %v256_v40, %v257_v44  ;;  %v441_v52 = vrot.slane %v406_v46, 1  ;;  %v563_v53 = vmul.f32 %v942_v18, %v1089_v47  ;;  %v1141_v44 = vld [vmem:[%s910_s23 + $0x60] sm:$0xff] }
  0x35   : > { %v282_v55 = vadd.f32 %v258_v51, %v201_v27  ;;  %v339_v56 = vsel %vm327_vm1, %v337_v45, %v338_v10  ;;  %v442_v24 = vrot.slane %v407_v48, 1  ;;  %v521_v34 = vrot.slane %v486_v49, 2  ;;  %v1145_v48 = vld [vmem:[%s910_s23 + $0x68] sm:$0x3] }
  0x36   : > { %v650_v57 = vadd.f32 %v624_v35, %v570_v50  ;;  %v522_v58 = vrot.slane %v487_v14, 2  ;;  %v590_v60 = vmul.f32 %v947_v19, %v1089_v47  ;;  %v591_v61 = vmul.f32 %v947_v19, %v1101_v54 }
  0x37   : > { %v363_v62 = vadd.f32 %v339_v56, %v282_v55  ;;  %v443_v63 = vsel %vm246_vm0, %v441_v52, %v442_v24  ;;  %v670_v5 = vmul.f32 %v957_v29, %v1089_v47  ;;  %v671_v8 = vmul.f32 %v957_v29, %v1101_v54 }
  0x38   : > { %v730_v9 = vadd.f32 %v704_v39, %v650_v57  ;;  %v523_v11 = vsel %vm327_vm1, %v521_v34, %v522_v58  ;;  %v625_v12 = vrot.slane %v590_v60, 1  ;;  %v626_v13 = vrot.slane %v591_v61, 1 }
  0x39   : > { %v387_v15 = vadd.f32 %v379_v42, %v363_v62  ;;  %v705_v16 = vrot.slane %v670_v5, 2  ;;  %v706_v17 = vrot.slane %v671_v8, 2  ;;  %v202_v20 = vmul.f32 %v895_v0, %v1051_v59 }
  0x3a   : > { %v745_v21 = vadd.f32 %v1017_v36, %v730_v9  ;;  %v627_v22 = vsel %vm246_vm0, %v625_v12, %v626_v13  ;;  %v222_v23 = vmul.f32 %v900_v1, %v1051_v59  ;;  %v223_v25 = vmul.f32 %v900_v1, %v1055_v6 }
  0x3b   : > { %v467_v26 = vadd.f32 %v443_v63, %v387_v15  ;;  %v707_v27 = vsel %vm327_vm1, %v705_v16, %v706_v17  ;;  %v303_v28 = vmul.f32 %v905_v2, %v1051_v59  ;;  %v304_v30 = vmul.f32 %v905_v2, %v1055_v6 }
  0x3c   : > { %754 = vst.msk [vmem:[%s1029_s15 + $0x10] sm:$0xff] %vm751_vm2, %v745_v21  ;;  %v259_v31 = vrot.slane %v222_v23, 1  ;;  %v260_v32 = vrot.slane %v223_v25, 1  ;;  %v380_v33 = vmul.f32 %v915_v3, %v1089_v47  ;;  %v408_v35 = vmul.f32 %v920_v4, %v1089_v47 }
  0x3d   : > { %v547_v37 = vadd.f32 %v523_v11, %v467_v26  ;;  %v340_v38 = vrot.slane %v303_v28, 2  ;;  %v341_v39 = vrot.slane %v304_v30, 2  ;;  %v409_v59 = vmul.f32 %v920_v4, %v1101_v54 }
  0x3e   : > { %v261_v40 = vsel %vm246_vm0, %v259_v31, %v260_v32  ;;  %v444_v6 = vrot.slane %v408_v35, 1  ;;  %v488_v41 = vmul.f32 %v927_v7, %v1089_v47  ;;  %v489_v42 = vmul.f32 %v927_v7, %v1101_v54  ;;  %v1184_v32 = vld [vmem:[%s910_s23 + $0x70] sm:$0xff] }
  0x3f   : > { %v571_v43 = vadd.f32 %v563_v53, %v547_v37  ;;  %v283_v45 = vadd.f32 %v261_v40, %v202_v20  ;;  %v342_v46 = vsel %vm327_vm1, %v340_v38, %v341_v39  ;;  %v445_v10 = vrot.slane %v409_v59, 1 }
  0x40   : > { %v524_v49 = vrot.slane %v488_v41, 2  ;;  %v525_v14 = vrot.slane %v489_v42, 2  ;;  %v564_v50 = vmul.f32 %v942_v18, %v1141_v44  ;;  %v592_v51 = vmul.f32 %v947_v19, %v1141_v44  ;;  %v1192_v41 = vld [vmem:[%s910_s23 + $0x78] sm:$0x3] }
  0x41   : > { %v651_v52 = vadd.f32 %v627_v22, %v571_v43  ;;  %v364_v55 = vadd.f32 %v342_v46, %v283_v45  ;;  %v446_v53 = vsel %vm246_vm0, %v444_v6, %v445_v10  ;;  %v593_v56 = vmul.f32 %v947_v19, %v1145_v48 }
  0x42   : > { %v526_v24 = vsel %vm327_vm1, %v524_v49, %v525_v14  ;;  %v628_v34 = vrot.slane %v592_v51, 1  ;;  %v672_v57 = vmul.f32 %v957_v29, %v1141_v44  ;;  %v673_v58 = vmul.f32 %v957_v29, %v1145_v48 }
  0x43   : > { %v731_v60 = vadd.f32 %v707_v27, %v651_v52  ;;  %v388_v61 = vadd.f32 %v380_v33, %v364_v55  ;;  %v629_v62 = vrot.slane %v593_v56, 1  ;;  %v203_v63 = vmul.f32 %v895_v0, %v1089_v47 }
  0x44   : > { %v708_v5 = vrot.slane %v672_v57, 2  ;;  %v709_v8 = vrot.slane %v673_v58, 2  ;;  %v224_v9 = vmul.f32 %v900_v1, %v1089_v47  ;;  %v225_v11 = vmul.f32 %v900_v1, %v1101_v54 }
  0x45   : > { %v746_v12 = vadd.f32 %v1017_v36, %v731_v60  ;;  %v468_v13 = vadd.f32 %v446_v53, %v388_v61  ;;  %v630_v15 = vsel %vm246_vm0, %v628_v34, %v629_v62  ;;  %v305_v16 = vmul.f32 %v905_v2, %v1089_v47 }
  0x46   : > { %v710_v17 = vsel %vm327_vm1, %v708_v5, %v709_v8  ;;  %v262_v20 = vrot.slane %v224_v9, 1  ;;  %v263_v21 = vrot.slane %v225_v11, 1  ;;  %v306_v22 = vmul.f32 %v905_v2, %v1101_v54 }
  0x47   : > { %755 = vst.msk [vmem:[%s1029_s15 + $0x18] sm:$0xff] %vm751_vm2, %v746_v12  ;;  %v548_v23 = vadd.f32 %v526_v24, %v468_v13  ;;  %v343_v25 = vrot.slane %v305_v16, 2  ;;  %v381_v26 = vmul.f32 %v915_v3, %v1141_v44  ;;  %v410_v27 = vmul.f32 %v920_v4, %v1141_v44 }
  0x48   : > { %v264_v47 = vsel %vm246_vm0, %v262_v20, %v263_v21  ;;  %v344_v28 = vrot.slane %v306_v22, 2  ;;  %v411_v30 = vmul.f32 %v920_v4, %v1145_v48  ;;  %v490_v54 = vmul.f32 %v927_v7, %v1141_v44 }
  0x49   : > { %v572_v31 = vadd.f32 %v564_v50, %v548_v23  ;;  %v284_v33 = vadd.f32 %v264_v47, %v203_v63  ;;  %v447_v35 = vrot.slane %v410_v27, 1  ;;  %v491_v37 = vmul.f32 %v927_v7, %v1145_v48 }
  0x4a   : > { %v345_v38 = vsel %vm327_vm1, %v343_v25, %v344_v28  ;;  %v448_v39 = vrot.slane %v411_v30, 1  ;;  %v527_v59 = vrot.slane %v490_v54, 2  ;;  %v565_v40 = vmul.f32 %v942_v18, %v1184_v32  ;;  %v187_v28 = vld [vmem:[%s910_s23 + $0x80] sm:$0xff]  ;;  %v188_v30 = vld [vmem:[%s910_s23 + $0x88] sm:$0x3] }
  0x4b   : > { %v652_v6 = vadd.f32 %v630_v15, %v572_v31  ;;  %v365_v42 = vadd.f32 %v345_v38, %v284_v33  ;;  %v528_v43 = vrot.slane %v491_v37, 2  ;;  %v594_v45 = vmul.f32 %v947_v19, %v1184_v32 }
  0x4c   : > { %v449_v46 = vsel %vm246_vm0, %v447_v35, %v448_v39  ;;  %v595_v10 = vmul.f32 %v947_v19, %v1192_v41  ;;  %v674_v49 = vmul.f32 %v957_v29, %v1184_v32  ;;  %v675_v14 = vmul.f32 %v957_v29, %v1192_v41 }
  0x4d   : > { %v732_v50 = vadd.f32 %v710_v17, %v652_v6  ;;  %v389_v51 = vadd.f32 %v381_v26, %v365_v42  ;;  %v529_v52 = vsel %vm327_vm1, %v527_v59, %v528_v43  ;;  %v631_v55 = vrot.slane %v594_v45, 1 }
  0x4e   : > { %v632_v53 = vrot.slane %v595_v10, 1  ;;  %v711_v56 = vrot.slane %v674_v49, 2  ;;  %v712_v24 = vrot.slane %v675_v14, 2  ;;  %v204_v34 = vmul.f32 %v895_v0, %v1141_v44 }
  0x4f   : > { %v747_v57 = vadd.f32 %v1017_v36, %v732_v50  ;;  %v469_v58 = vadd.f32 %v449_v46, %v389_v51  ;;  %v226_v60 = vmul.f32 %v900_v1, %v1141_v44  ;;  %v227_v61 = vmul.f32 %v900_v1, %v1145_v48 }
  0x50   : > { %v633_v62 = vsel %vm246_vm0, %v631_v55, %v632_v53  ;;  %v713_v63 = vsel %vm327_vm1, %v711_v56, %v712_v24  ;;  %v307_v5 = vmul.f32 %v905_v2, %v1141_v44  ;;  %v308_v8 = vmul.f32 %v905_v2, %v1145_v48 }
  0x51   : > { %756 = vst.msk [vmem:[%s1029_s15 + $0x20] sm:$0xff] %vm751_vm2, %v747_v57  ;;  %v549_v9 = vadd.f32 %v529_v52, %v469_v58  ;;  %v265_v11 = vrot.slane %v226_v60, 1  ;;  %v266_v12 = vrot.slane %v227_v61, 1  ;;  %v382_v13 = vmul.f32 %v915_v3, %v1184_v32 }
  0x52   : > { %v346_v15 = vrot.slane %v307_v5, 2  ;;  %v347_v16 = vrot.slane %v308_v8, 2  ;;  %v412_v17 = vmul.f32 %v920_v4, %v1184_v32  ;;  %v413_v44 = vmul.f32 %v920_v4, %v1192_v41 }
  0x53   : > { %v573_v20 = vadd.f32 %v565_v40, %v549_v9  ;;  %v267_v48 = vsel %vm246_vm0, %v265_v11, %v266_v12  ;;  %v492_v21 = vmul.f32 %v927_v7, %v1184_v32  ;;  %v493_v22 = vmul.f32 %v927_v7, %v1192_v41 }
  0x54   : > { %v285_v23 = vadd.f32 %v267_v48, %v204_v34  ;;  %v348_v25 = vsel %vm327_vm1, %v346_v15, %v347_v16  ;;  %v450_v26 = vrot.slane %v412_v17, 1  ;;  %v451_v27 = vrot.slane %v413_v44, 1 }
  0x55   : > { %v653_v47 = vadd.f32 %v633_v62, %v573_v20  ;;  %v530_v54 = vrot.slane %v492_v21, 2  ;;  %v531_v31 = vrot.slane %v493_v22, 2  ;;  %v566_v35 = vmul.f32 %v942_v18, %v187_v28  ;;  %v189_v62 = vld [vmem:[%s910_s23 + $0x90] sm:$0xff] }
  0x56   : > { %v366_v33 = vadd.f32 %v348_v25, %v285_v23  ;;  %v596_v37 = vmul.f32 %v947_v19, %v187_v28  ;;  %v597_v38 = vmul.f32 %v947_v19, %v188_v30  ;;  %v452_v59 = vsel %vm246_vm0, %v450_v26, %v451_v27 }
  0x57   : > { %v733_v39 = vadd.f32 %v713_v63, %v653_v47  ;;  %v676_v40 = vmul.f32 %v957_v29, %v187_v28  ;;  %v677_v6 = vmul.f32 %v957_v29, %v188_v30  ;;  %v532_v43 = vsel %vm327_vm1, %v530_v54, %v531_v31 }
  0x58   : > { %v390_v42 = vadd.f32 %v382_v13, %v366_v33  ;;  %v634_v45 = vrot.slane %v596_v37, 1  ;;  %v635_v46 = vrot.slane %v597_v38, 1  ;;  %v228_v50 = vmul.f32 %v900_v1, %v1184_v32 }
  0x59   : > { %v748_v10 = vadd.f32 %v1017_v36, %v733_v39  ;;  %v714_v49 = vrot.slane %v676_v40, 2  ;;  %v715_v14 = vrot.slane %v677_v6, 2  ;;  %v205_v52 = vmul.f32 %v895_v0, %v1184_v32 }
  0x5a   : > { %v470_v51 = vadd.f32 %v452_v59, %v390_v42  ;;  %v229_v55 = vmul.f32 %v900_v1, %v1192_v41  ;;  %v309_v53 = vmul.f32 %v905_v2, %v1184_v32  ;;  %v636_v56 = vsel %vm246_vm0, %v634_v45, %v635_v46  ;;  %v190_v1 = vld [vmem:[%s910_s23 + $0x98] sm:$0x3] }
  0x5b   : > { %757 = vst.msk [vmem:[%s1029_s15 + $0x28] sm:$0xff] %vm751_vm2, %v748_v10  ;;  %v716_v24 = vsel %vm327_vm1, %v714_v49, %v715_v14  ;;  %v268_v34 = vrot.slane %v228_v50, 1  ;;  %v310_v57 = vmul.f32 %v905_v2, %v1192_v41  ;;  %v414_v0 = vmul.f32 %v920_v4, %v187_v28 }
  0x5c   : > { %v550_v58 = vadd.f32 %v532_v43, %v470_v51  ;;  %v269_v60 = vrot.slane %v229_v55, 1  ;;  %v349_v61 = vrot.slane %v309_v53, 2  ;;  %v415_v32 = vmul.f32 %v920_v4, %v188_v30 }
  0x5d   : > { %v350_v63 = vrot.slane %v310_v57, 2  ;;  %v494_v5 = vmul.f32 %v927_v7, %v187_v28  ;;  %v495_v8 = vmul.f32 %v927_v7, %v188_v30  ;;  %v383_v12 = vmul.f32 %v915_v3, %v187_v28 }
  0x5e   : > { %v574_v9 = vadd.f32 %v566_v35, %v550_v58  ;;  %v270_v11 = vsel %vm246_vm0, %v268_v34, %v269_v60  ;;  %v453_v2 = vrot.slane %v414_v0, 1  ;;  %v454_v15 = vrot.slane %v415_v32, 1 }
  0x5f   : > { %v286_v41 = vadd.f32 %v270_v11, %v205_v52  ;;  %v351_v13 = vsel %vm327_vm1, %v349_v61, %v350_v63  ;;  %v533_v16 = vrot.slane %v494_v5, 2  ;;  %v534_v44 = vrot.slane %v495_v8, 2 }
  0x60   : > { %v654_v17 = vadd.f32 %v636_v56, %v574_v9  ;;  %v598_v4 = vmul.f32 %v947_v19, %v189_v62  ;;  %v599_v20 = vmul.f32 %v947_v19, %v190_v1  ;;  %v455_v21 = vsel %vm246_vm0, %v453_v2, %v454_v15 }
  0x61   : > { %v367_v48 = vadd.f32 %v351_v13, %v286_v41  ;;  %v678_v22 = vmul.f32 %v957_v29, %v189_v62  ;;  %v679_v3 = vmul.f32 %v957_v29, %v190_v1  ;;  %v535_v26 = vsel %vm327_vm1, %v533_v16, %v534_v44 }
  0x62   : > { %v734_v7 = vadd.f32 %v716_v24, %v654_v17  ;;  %v637_v27 = vrot.slane %v598_v4, 1  ;;  %v638_v47 = vrot.slane %v599_v20, 1  ;;  %v567_v30 = vmul.f32 %v942_v18, %v189_v62 }
  0x63   : > { %v391_v23 = vadd.f32 %v383_v12, %v367_v48  ;;  %v717_v19 = vrot.slane %v678_v22, 2  ;;  %v718_v54 = vrot.slane %v679_v3, 2 }
  0x64   : > { %v749_v25 = vadd.f32 %v1017_v36, %v734_v7  ;;  %v639_v33 = vsel %vm246_vm0, %v637_v27, %v638_v47 }
  0x65   : > { %v471_v28 = vadd.f32 %v455_v21, %v391_v23  ;;  %v719_v29 = vsel %vm327_vm1, %v717_v19, %v718_v54 }
  0x66   : > { %758 = vst.msk [vmem:[%s1029_s15 + $0x30] sm:$0xff] %vm751_vm2, %v749_v25 }
  0x67   : > { %v551_v31 = vadd.f32 %v535_v26, %v471_v28 }
  0x69   : > { %v575_v35 = vadd.f32 %v567_v30, %v551_v31 }
  0x6b   : > { %v655_v37 = vadd.f32 %v639_v33, %v575_v35 }
  0x6d   : > { %v735_v38 = vadd.f32 %v719_v29, %v655_v37 }
  0x6f   : > { %v750_v39 = vadd.f32 %v1017_v36, %v735_v38 }
  0x71   : > { %759 = vst.msk [vmem:[%s1029_s15 + $0x38] sm:$0xff] %vm751_vm2, %v750_v39 }
  0x72 PF: > { %s13_s12 = sadd.s32 1, %s859_s12  }
  0x73   : > { %p10_p4 = scmp.ge.s32.totalorder %s13_s12, 4  }
  0x75   :  { %12 = sbr.rel (!%p10_p4) target bundleno = 1 (0x1), region = 70 }

// kernel: shufflenet_forward.60
= control target key start
LH: loop header
LB: loop body
LE: loop exit
PB: predicated region body
PF: predicated region fallthrough
CT: control target
= control target key end

     0   :  { %vm28_vm0 = vcmask 195584   ;;  %vm130_vm1 = vcmask 474112   ;;  %s231_s1 = inlined_call_operand.vmem [shape: f32[24,58], index: 1, kind: input, shape index: {}]   ;;  %s232_s0 = inlined_call_operand.vmem [shape: f32[32,24], index: 0, kind: input, shape index: {}]   ;;  %s233_s2 = inlined_call_operand.vmem [shape: f32[1,58], index: 2, kind: input, shape index: {}]   ;;  %s234_s3 = inlined_call_operand.vmem [shape: f32[32,58], index: 3, kind: output, shape index: {}]  }
   0x1   :  { %v18_v0 = vld [vmem:[%s231_s1] sm:$0xff]  ;;  %v19_v1 = vld [vmem:[%s231_s1 + $0x8] sm:$0xff]  ;;  %v16_v4 = vld [vmem:[%s232_s0 + $0x10] sm:$0xff] }
   0x2   :  { %v163_v2 = vpack.c.bf16 %v19_v1, %v18_v0  ;;  %v14_v3 = vld [vmem:[%s232_s0] sm:$0xff]  ;;  %v20_v5 = vld [vmem:[%s231_s1 + $0x10] sm:$0xff]  ;;  %160 = vmatprep.mubr.msk.f32.mxu1 %vm28_vm0, %v16_v4  ;;  %v15_v6 = vld [vmem:[%s232_s0 + $0x8] sm:$0xff] }
   0x3   :  { %157 = vmatprep.mubr.msk.f32.mxu0 %vm28_vm0, %v14_v3  ;;  %v17_v7 = vld [vmem:[%s232_s0 + $0x18] sm:$0xff]  ;;  %v139_v8 = vld [vmem:[%s233_s2] ss:$0 sm:$0xff] }
   0x4   :  { %164 = vmatprep.subr.bf16.mxu0 %v163_v2  ;;  %167 = vmatprep.subr.bf16.mxu1 %v163_v2 }
   0x5   :  { %166 = vmatpush3.bf16.msra.mxu0 %v163_v2  ;;  %169 = vmatpush3.bf16.msra.mxu1 %v163_v2 }
   0x6   :  { %155 = vmatprep.subr.mxu0 %v20_v5  ;;  %168 = vmatprep.subr.mxu1 %v20_v5 }
   0x9   :  { %156 = vmatpush3.msra.mxu0 %v20_v5  ;;  %170 = vmatpush3.msra.mxu1 %v20_v5 }
   0xa   :  { %158 = vmatmul.mubr.msk.f32.vlgmr.msra.gmra.mrb[0].mxu0 %vm28_vm0, %v15_v6  ;;  %161 = vmatmul.mubr.msk.f32.vlgmr.msra.gmra.mrb[0].mxu1 %vm28_vm0, %v17_v7 }
  0xdd   :  { %v159_v9 = vpop.f32.mrb[0].mxu0  ;;  %v162_v10 = vpop.f32.mrb[0].mxu1 }
  0xde   :  { %v113_v11 = vadd.f32 %v159_v9, %v139_v8  ;;  %v123_v12 = vadd.f32 %v162_v10, %v139_v8  ;;  %v107_v13 = vpop.f32.mrb[1].mxu0  ;;  %v117_v14 = vpop.f32.mrb[1].mxu1 }
  0xdf   :  { %v108_v15 = vadd.f32 %v139_v8, %v107_v13  ;;  %v118_v16 = vadd.f32 %v139_v8, %v117_v14 }
  0xe0   :  { %v127_v17 = vmax.f32 %v113_v11, 0.0  ;;  %v129_v18 = vmax.f32 %v123_v12, 0.0 }
  0xe1   :  { %v126_v19 = vmax.f32 %v108_v15, 0.0  ;;  %v128_v20 = vmax.f32 %v118_v16, 0.0 }
  0xe2   :  { %132 = vst.msk [vmem:[%s234_s3 + $0x8] sm:$0xff] %vm130_vm1, %v127_v17  ;;  %134 = vst.msk [vmem:[%s234_s3 + $0x18] sm:$0xff] %vm130_vm1, %v129_v18 }
  0xe3   :  { %131 = vst.msk [vmem:[%s234_s3] sm:$0xff] %vm130_vm1, %v126_v19  ;;  %133 = vst.msk [vmem:[%s234_s3 + $0x10] sm:$0xff] %vm130_vm1, %v128_v20 }

// kernel: shufflenet_forward.59
= control target key start
LH: loop header
LB: loop body
LE: loop exit
PB: predicated region body
PF: predicated region fallthrough
CT: control target
= control target key end

     0   :  { %s881_s12 = smov 0   ;;  %s1282_s0 = inlined_call_operand.vmem [shape: f32[2,10,10,24], index: 0, kind: input, shape index: {}]   ;;  %s1283_s1 = inlined_call_operand.vmem [shape: f32[9,1,24], index: 1, kind: input, shape index: {}]   ;;  %s1284_s2 = inlined_call_operand.vmem [shape: f32[1,24], index: 2, kind: input, shape index: {}]   ;;  %s1285_s3 = inlined_call_operand.vmem [shape: f32[2,8,8,24], index: 3, kind: output, shape index: {}]  }
   0x1 LB: > { %s815_s13 = sadd.s32 4294967295, %s859_s12   ;;  %p819_p0 = scmp.ge.s32.totalorder %s859_s12, 1  ;;  %s859_s12 = sphi %s881_s12, %s13_s12  }
   0x2   : > { %p137_p1 = scmp.lt.s32.totalorder %s859_s12, 3 }
   0x4   : > { %p138_p2 = pnand %p819_p0, %p137_p1 }
   0x5   : > { %p161_p3 = scmp.lt.s32.totalorder (!%p138_p2), %s815_s13, 1  ;;  %v895_v0 = vld [vmem:[%s1283_s1] ss:$0 sm:$0xff] (!%p138_p2)  ;;  %v900_v1 = vld [vmem:[%s1283_s1 + $0x1] ss:$0 sm:$0xff] (!%p138_p2)  ;;  %vm246_vm0 = vcmask (!%p138_p2), 1046528  }
   0x6   : > { %141 = sbr.rel (%p138_p2) target bundleno = 114 (0x72), region = 32  ;;  %v905_v2 = vld [vmem:[%s1283_s1 + $0x2] ss:$0 sm:$0xff] (!%p138_p2)  ;;  %v915_v3 = vld [vmem:[%s1283_s1 + $0x3] ss:$0 sm:$0xff] (!%p138_p2)  ;;  %vm327_vm1 = vcmask (!%p138_p2), 1045504  }
   0x7   : > { %v920_v4 = vld [vmem:[%s1283_s1 + $0x4] ss:$0 sm:$0xff] (!%p138_p2)  ;;  %v927_v7 = vld [vmem:[%s1283_s1 + $0x5] ss:$0 sm:$0xff] (!%p138_p2)  ;;  %v942_v18 = vld [vmem:[%s1283_s1 + $0x6] ss:$0 sm:$0xff] (!%p138_p2) }
   0x8   : > { %v947_v19 = vld [vmem:[%s1283_s1 + $0x7] ss:$0 sm:$0xff] (!%p138_p2)  ;;  %v957_v29 = vld [vmem:[%s1283_s1 + $0x8] ss:$0 sm:$0xff] (!%p138_p2)  ;;  %vm751_vm2 = vcmask (!%p138_p2), 195584  }
   0xd   : > { %s1287_s13 = smov (!%p161_p3, %s815_s13), 1 }
   0xe   : > { %s844_s14 = smul.u32 160, %s1287_s13  ;;  %s843_s9 = sshll.u32 %s1287_s13, 6 }
   0xf   : > { %s1029_s15 = scalar_lea.vmem %s1285_s3, %s843_s9 }
  0x10   : > { %s910_s23 = scalar_lea.vmem %s1282_s0, %s844_s14 }
  0x11   : > { %v171_v5 = vld [vmem:[%s910_s23] sm:$0xff]  ;;  %v172_v6 = vld [vmem:[%s910_s23 + $0x8] sm:$0x3]  ;;  %v173_v8 = vld [vmem:[%s910_s23 + $0x10] sm:$0xff] }
  0x12   : > { %v174_v9 = vld [vmem:[%s910_s23 + $0x18] sm:$0x3]  ;;  %v198_v10 = vmul.f32 %v895_v0, %v171_v5  ;;  %v214_v11 = vmul.f32 %v900_v1, %v171_v5  ;;  %v215_v12 = vmul.f32 %v900_v1, %v172_v6  ;;  %v295_v13 = vmul.f32 %v905_v2, %v171_v5  ;;  %v951_v24 = vld [vmem:[%s910_s23 + $0x20] sm:$0xff]  ;;  %v965_v34 = vld [vmem:[%s910_s23 + $0x28] sm:$0x3] }
  0x13   : > { %v296_v14 = vmul.f32 %v905_v2, %v172_v6  ;;  %v376_v15 = vmul.f32 %v915_v3, %v173_v8  ;;  %v400_v16 = vmul.f32 %v920_v4, %v173_v8  ;;  %v401_v17 = vmul.f32 %v920_v4, %v174_v9 }
  0x14   : > { %v247_v20 = vrot.slane %v214_v11, 1  ;;  %v248_v21 = vrot.slane %v215_v12, 1  ;;  %v328_v22 = vrot.slane %v295_v13, 2  ;;  %v480_v23 = vmul.f32 %v927_v7, %v173_v8 }
  0x15   : > { %v329_v25 = vrot.slane %v296_v14, 2  ;;  %v432_v26 = vrot.slane %v400_v16, 1  ;;  %v433_v27 = vrot.slane %v401_v17, 1  ;;  %v481_v28 = vmul.f32 %v927_v7, %v174_v9  ;;  %v999_v14 = vld [vmem:[%s910_s23 + $0x38] sm:$0x3] }
  0x16   : > { %v249_v30 = vsel %vm246_vm0, %v247_v20, %v248_v21  ;;  %v512_v31 = vrot.slane %v480_v23, 2  ;;  %v560_v32 = vmul.f32 %v942_v18, %v951_v24  ;;  %v584_v33 = vmul.f32 %v947_v19, %v951_v24 }
  0x17   : > { %v279_v35 = vadd.f32 %v249_v30, %v198_v10  ;;  %v330_v36 = vsel %vm327_vm1, %v328_v22, %v329_v25  ;;  %v434_v37 = vsel %vm246_vm0, %v432_v26, %v433_v27  ;;  %v513_v38 = vrot.slane %v481_v28, 2  ;;  %v995_v10 = vld [vmem:[%s910_s23 + $0x30] sm:$0xff] }
  0x18   : > { %v585_v39 = vmul.f32 %v947_v19, %v965_v34  ;;  %v616_v40 = vrot.slane %v584_v33, 1  ;;  %v664_v41 = vmul.f32 %v957_v29, %v951_v24  ;;  %v665_v42 = vmul.f32 %v957_v29, %v965_v34 }
  0x19   : > { %v360_v43 = vadd.f32 %v330_v36, %v279_v35  ;;  %v514_v44 = vsel %vm327_vm1, %v512_v31, %v513_v38  ;;  %v199_v45 = vmul.f32 %v895_v0, %v173_v8  ;;  %v216_v46 = vmul.f32 %v900_v1, %v173_v8  ;;  %v1017_v36 = vld [vmem:[%s1284_s2] ss:$0 sm:$0xff] }
  0x1a   : > { %v617_v47 = vrot.slane %v585_v39, 1  ;;  %v696_v48 = vrot.slane %v664_v41, 2  ;;  %v697_v49 = vrot.slane %v665_v42, 2  ;;  %v217_v50 = vmul.f32 %v900_v1, %v174_v9 }
  0x1b   : > { %v384_v51 = vadd.f32 %v376_v15, %v360_v43  ;;  %v250_v52 = vrot.slane %v216_v46, 1  ;;  %v297_v53 = vmul.f32 %v905_v2, %v173_v8  ;;  %v298_v54 = vmul.f32 %v905_v2, %v174_v9 }
  0x1c   : > { %v618_v55 = vsel %vm246_vm0, %v616_v40, %v617_v47  ;;  %v698_v56 = vsel %vm327_vm1, %v696_v48, %v697_v49  ;;  %v251_v57 = vrot.slane %v217_v50, 1  ;;  %v377_v58 = vmul.f32 %v915_v3, %v951_v24 }
  0x1d   : > { %v464_v59 = vadd.f32 %v434_v37, %v384_v51  ;;  %v331_v60 = vrot.slane %v297_v53, 2  ;;  %v332_v61 = vrot.slane %v298_v54, 2  ;;  %v402_v62 = vmul.f32 %v920_v4, %v951_v24 }
  0x1e   : > { %v252_v63 = vsel %vm246_vm0, %v250_v52, %v251_v57  ;;  %v403_v5 = vmul.f32 %v920_v4, %v965_v34  ;;  %v482_v6 = vmul.f32 %v927_v7, %v951_v24  ;;  %v483_v8 = vmul.f32 %v927_v7, %v965_v34 }
  0x1f   : > { %v544_v9 = vadd.f32 %v514_v44, %v464_v59  ;;  %v280_v11 = vadd.f32 %v252_v63, %v199_v45  ;;  %v333_v12 = vsel %vm327_vm1, %v331_v60, %v332_v61  ;;  %v435_v13 = vrot.slane %v402_v62, 1  ;;  %v1051_v59 = vld [vmem:[%s910_s23 + $0x40] sm:$0xff] }
  0x20   : > { %v436_v15 = vrot.slane %v403_v5, 1  ;;  %v515_v16 = vrot.slane %v482_v6, 2  ;;  %v516_v17 = vrot.slane %v483_v8, 2  ;;  %v561_v20 = vmul.f32 %v942_v18, %v995_v10  ;;  %v1055_v6 = vld [vmem:[%s910_s23 + $0x48] sm:$0x3] }
  0x21   : > { %v568_v21 = vadd.f32 %v560_v32, %v544_v9  ;;  %v361_v22 = vadd.f32 %v333_v12, %v280_v11  ;;  %v586_v23 = vmul.f32 %v947_v19, %v995_v10  ;;  %v587_v25 = vmul.f32 %v947_v19, %v999_v14 }
  0x22   : > { %v437_v26 = vsel %vm246_vm0, %v435_v13, %v436_v15  ;;  %v517_v27 = vsel %vm327_vm1, %v515_v16, %v516_v17  ;;  %v666_v28 = vmul.f32 %v957_v29, %v995_v10  ;;  %v667_v30 = vmul.f32 %v957_v29, %v999_v14 }
  0x23   : > { %v648_v31 = vadd.f32 %v618_v55, %v568_v21  ;;  %v385_v32 = vadd.f32 %v377_v58, %v361_v22  ;;  %v619_v33 = vrot.slane %v586_v23, 1  ;;  %v620_v35 = vrot.slane %v587_v25, 1 }
  0x24   : > { %v699_v37 = vrot.slane %v666_v28, 2  ;;  %v700_v38 = vrot.slane %v667_v30, 2  ;;  %v200_v39 = vmul.f32 %v895_v0, %v951_v24  ;;  %v218_v40 = vmul.f32 %v900_v1, %v951_v24 }
  0x25   : > { %v728_v41 = vadd.f32 %v698_v56, %v648_v31  ;;  %v465_v42 = vadd.f32 %v437_v26, %v385_v32  ;;  %v621_v43 = vsel %vm246_vm0, %v619_v33, %v620_v35  ;;  %v219_v44 = vmul.f32 %v900_v1, %v965_v34 }
  0x26   : > { %v701_v45 = vsel %vm327_vm1, %v699_v37, %v700_v38  ;;  %v253_v46 = vrot.slane %v218_v40, 1  ;;  %v299_v47 = vmul.f32 %v905_v2, %v951_v24  ;;  %v300_v48 = vmul.f32 %v905_v2, %v965_v34 }
  0x27   : > { %v743_v49 = vadd.f32 %v1017_v36, %v728_v41  ;;  %v545_v50 = vadd.f32 %v517_v27, %v465_v42  ;;  %v254_v51 = vrot.slane %v219_v44, 1  ;;  %v378_v52 = vmul.f32 %v915_v3, %v995_v10 }
  0x28   : > { %v334_v53 = vrot.slane %v299_v47, 2  ;;  %v335_v54 = vrot.slane %v300_v48, 2  ;;  %v404_v55 = vmul.f32 %v920_v4, %v995_v10  ;;  %v405_v56 = vmul.f32 %v920_v4, %v999_v14  ;;  %v1089_v47 = vld [vmem:[%s910_s23 + $0x50] sm:$0xff] }
  0x29   : > { %752 = vst.msk [vmem:[%s1029_s15] sm:$0xff] %vm751_vm2, %v743_v49  ;;  %v569_v24 = vadd.f32 %v561_v20, %v545_v50  ;;  %v255_v34 = vsel %vm246_vm0, %v253_v46, %v254_v51  ;;  %v484_v57 = vmul.f32 %v927_v7, %v995_v10  ;;  %v485_v58 = vmul.f32 %v927_v7, %v999_v14 }
  0x2a   : > { %v281_v60 = vadd.f32 %v255_v34, %v200_v39  ;;  %v336_v61 = vsel %vm327_vm1, %v334_v53, %v335_v54  ;;  %v438_v62 = vrot.slane %v404_v55, 1  ;;  %v439_v63 = vrot.slane %v405_v56, 1  ;;  %v1101_v54 = vld [vmem:[%s910_s23 + $0x58] sm:$0x3] }
  0x2b   : > { %v649_v5 = vadd.f32 %v621_v43, %v569_v24  ;;  %v518_v8 = vrot.slane %v484_v57, 2  ;;  %v519_v9 = vrot.slane %v485_v58, 2  ;;  %v562_v11 = vmul.f32 %v942_v18, %v1051_v59 }
  0x2c   : > { %v362_v12 = vadd.f32 %v336_v61, %v281_v60  ;;  %v440_v13 = vsel %vm246_vm0, %v438_v62, %v439_v63  ;;  %v588_v15 = vmul.f32 %v947_v19, %v1051_v59  ;;  %v589_v16 = vmul.f32 %v947_v19, %v1055_v6 }
  0x2d   : > { %v729_v17 = vadd.f32 %v701_v45, %v649_v5  ;;  %v520_v20 = vsel %vm327_vm1, %v518_v8, %v519_v9  ;;  %v668_v21 = vmul.f32 %v957_v29, %v1051_v59  ;;  %v669_v22 = vmul.f32 %v957_v29, %v1055_v6 }
  0x2e   : > { %v386_v23 = vadd.f32 %v378_v52, %v362_v12  ;;  %v622_v25 = vrot.slane %v588_v15, 1  ;;  %v623_v26 = vrot.slane %v589_v16, 1  ;;  %v201_v27 = vmul.f32 %v895_v0, %v995_v10 }
  0x2f   : > { %v744_v28 = vadd.f32 %v1017_v36, %v729_v17  ;;  %v702_v30 = vrot.slane %v668_v21, 2  ;;  %v703_v31 = vrot.slane %v669_v22, 2  ;;  %v220_v32 = vmul.f32 %v900_v1, %v995_v10 }
  0x30   : > { %v466_v33 = vadd.f32 %v440_v13, %v386_v23  ;;  %v624_v35 = vsel %vm246_vm0, %v622_v25, %v623_v26  ;;  %v221_v37 = vmul.f32 %v900_v1, %v999_v14  ;;  %v301_v38 = vmul.f32 %v905_v2, %v995_v10 }
  0x31   : > { %753 = vst.msk [vmem:[%s1029_s15 + $0x8] sm:$0xff] %vm751_vm2, %v744_v28  ;;  %v704_v39 = vsel %vm327_vm1, %v702_v30, %v703_v31  ;;  %v256_v40 = vrot.slane %v220_v32, 1  ;;  %v302_v41 = vmul.f32 %v905_v2, %v999_v14  ;;  %v379_v42 = vmul.f32 %v915_v3, %v1051_v59 }
  0x32   : > { %v546_v43 = vadd.f32 %v520_v20, %v466_v33  ;;  %v257_v44 = vrot.slane %v221_v37, 1  ;;  %v337_v45 = vrot.slane %v301_v38, 2  ;;  %v406_v46 = vmul.f32 %v920_v4, %v1051_v59 }
  0x33   : > { %v338_v10 = vrot.slane %v302_v41, 2  ;;  %v407_v48 = vmul.f32 %v920_v4, %v1055_v6  ;;  %v486_v49 = vmul.f32 %v927_v7, %v1051_v59  ;;  %v487_v14 = vmul.f32 %v927_v7, %v1055_v6 }
  0x34   : > { %v570_v50 = vadd.f32 %v562_v11, %v546_v43  ;;  %v258_v51 = vsel %vm246_vm0, %v256_v40, %v257_v44  ;;  %v441_v52 = vrot.slane %v406_v46, 1  ;;  %v563_v53 = vmul.f32 %v942_v18, %v1089_v47  ;;  %v1141_v44 = vld [vmem:[%s910_s23 + $0x60] sm:$0xff] }
  0x35   : > { %v282_v55 = vadd.f32 %v258_v51, %v201_v27  ;;  %v339_v56 = vsel %vm327_vm1, %v337_v45, %v338_v10  ;;  %v442_v24 = vrot.slane %v407_v48, 1  ;;  %v521_v34 = vrot.slane %v486_v49, 2  ;;  %v1145_v48 = vld [vmem:[%s910_s23 + $0x68] sm:$0x3] }
  0x36   : > { %v650_v57 = vadd.f32 %v624_v35, %v570_v50  ;;  %v522_v58 = vrot.slane %v487_v14, 2  ;;  %v590_v60 = vmul.f32 %v947_v19, %v1089_v47  ;;  %v591_v61 = vmul.f32 %v947_v19, %v1101_v54 }
  0x37   : > { %v363_v62 = vadd.f32 %v339_v56, %v282_v55  ;;  %v443_v63 = vsel %vm246_vm0, %v441_v52, %v442_v24  ;;  %v670_v5 = vmul.f32 %v957_v29, %v1089_v47  ;;  %v671_v8 = vmul.f32 %v957_v29, %v1101_v54 }
  0x38   : > { %v730_v9 = vadd.f32 %v704_v39, %v650_v57  ;;  %v523_v11 = vsel %vm327_vm1, %v521_v34, %v522_v58  ;;  %v625_v12 = vrot.slane %v590_v60, 1  ;;  %v626_v13 = vrot.slane %v591_v61, 1 }
  0x39   : > { %v387_v15 = vadd.f32 %v379_v42, %v363_v62  ;;  %v705_v16 = vrot.slane %v670_v5, 2  ;;  %v706_v17 = vrot.slane %v671_v8, 2  ;;  %v202_v20 = vmul.f32 %v895_v0, %v1051_v59 }
  0x3a   : > { %v745_v21 = vadd.f32 %v1017_v36, %v730_v9  ;;  %v627_v22 = vsel %vm246_vm0, %v625_v12, %v626_v13  ;;  %v222_v23 = vmul.f32 %v900_v1, %v1051_v59  ;;  %v223_v25 = vmul.f32 %v900_v1, %v1055_v6 }
  0x3b   : > { %v467_v26 = vadd.f32 %v443_v63, %v387_v15  ;;  %v707_v27 = vsel %vm327_vm1, %v705_v16, %v706_v17  ;;  %v303_v28 = vmul.f32 %v905_v2, %v1051_v59  ;;  %v304_v30 = vmul.f32 %v905_v2, %v1055_v6 }
  0x3c   : > { %754 = vst.msk [vmem:[%s1029_s15 + $0x10] sm:$0xff] %vm751_vm2, %v745_v21  ;;  %v259_v31 = vrot.slane %v222_v23, 1  ;;  %v260_v32 = vrot.slane %v223_v25, 1  ;;  %v380_v33 = vmul.f32 %v915_v3, %v1089_v47  ;;  %v408_v35 = vmul.f32 %v920_v4, %v1089_v47 }
  0x3d   : > { %v547_v37 = vadd.f32 %v523_v11, %v467_v26  ;;  %v340_v38 = vrot.slane %v303_v28, 2  ;;  %v341_v39 = vrot.slane %v304_v30, 2  ;;  %v409_v59 = vmul.f32 %v920_v4, %v1101_v54 }
  0x3e   : > { %v261_v40 = vsel %vm246_vm0, %v259_v31, %v260_v32  ;;  %v444_v6 = vrot.slane %v408_v35, 1  ;;  %v488_v41 = vmul.f32 %v927_v7, %v1089_v47  ;;  %v489_v42 = vmul.f32 %v927_v7, %v1101_v54  ;;  %v1184_v32 = vld [vmem:[%s910_s23 + $0x70] sm:$0xff] }
  0x3f   : > { %v571_v43 = vadd.f32 %v563_v53, %v547_v37  ;;  %v283_v45 = vadd.f32 %v261_v40, %v202_v20  ;;  %v342_v46 = vsel %vm327_vm1, %v340_v38, %v341_v39  ;;  %v445_v10 = vrot.slane %v409_v59, 1 }
  0x40   : > { %v524_v49 = vrot.slane %v488_v41, 2  ;;  %v525_v14 = vrot.slane %v489_v42, 2  ;;  %v564_v50 = vmul.f32 %v942_v18, %v1141_v44  ;;  %v592_v51 = vmul.f32 %v947_v19, %v1141_v44  ;;  %v1192_v41 = vld [vmem:[%s910_s23 + $0x78] sm:$0x3] }
  0x41   : > { %v651_v52 = vadd.f32 %v627_v22, %v571_v43  ;;  %v364_v55 = vadd.f32 %v342_v46, %v283_v45  ;;  %v446_v53 = vsel %vm246_vm0, %v444_v6, %v445_v10  ;;  %v593_v56 = vmul.f32 %v947_v19, %v1145_v48 }
  0x42   : > { %v526_v24 = vsel %vm327_vm1, %v524_v49, %v525_v14  ;;  %v628_v34 = vrot.slane %v592_v51, 1  ;;  %v672_v57 = vmul.f32 %v957_v29, %v1141_v44  ;;  %v673_v58 = vmul.f32 %v957_v29, %v1145_v48 }
  0x43   : > { %v731_v60 = vadd.f32 %v707_v27, %v651_v52  ;;  %v388_v61 = vadd.f32 %v380_v33, %v364_v55  ;;  %v629_v62 = vrot.slane %v593_v56, 1  ;;  %v203_v63 = vmul.f32 %v895_v0, %v1089_v47 }
  0x44   : > { %v708_v5 = vrot.slane %v672_v57, 2  ;;  %v709_v8 = vrot.slane %v673_v58, 2  ;;  %v224_v9 = vmul.f32 %v900_v1, %v1089_v47  ;;  %v225_v11 = vmul.f32 %v900_v1, %v1101_v54 }
  0x45   : > { %v746_v12 = vadd.f32 %v1017_v36, %v731_v60  ;;  %v468_v13 = vadd.f32 %v446_v53, %v388_v61  ;;  %v630_v15 = vsel %vm246_vm0, %v628_v34, %v629_v62  ;;  %v305_v16 = vmul.f32 %v905_v2, %v1089_v47 }
  0x46   : > { %v710_v17 = vsel %vm327_vm1, %v708_v5, %v709_v8  ;;  %v262_v20 = vrot.slane %v224_v9, 1  ;;  %v263_v21 = vrot.slane %v225_v11, 1  ;;  %v306_v22 = vmul.f32 %v905_v2, %v1101_v54 }
  0x47   : > { %755 = vst.msk [vmem:[%s1029_s15 + $0x18] sm:$0xff] %vm751_vm2, %v746_v12  ;;  %v548_v23 = vadd.f32 %v526_v24, %v468_v13  ;;  %v343_v25 = vrot.slane %v305_v16, 2  ;;  %v381_v26 = vmul.f32 %v915_v3, %v1141_v44  ;;  %v410_v27 = vmul.f32 %v920_v4, %v1141_v44 }
  0x48   : > { %v264_v47 = vsel %vm246_vm0, %v262_v20, %v263_v21  ;;  %v344_v28 = vrot.slane %v306_v22, 2  ;;  %v411_v30 = vmul.f32 %v920_v4, %v1145_v48  ;;  %v490_v54 = vmul.f32 %v927_v7, %v1141_v44 }
  0x49   : > { %v572_v31 = vadd.f32 %v564_v50, %v548_v23  ;;  %v284_v33 = vadd.f32 %v264_v47, %v203_v63  ;;  %v447_v35 = vrot.slane %v410_v27, 1  ;;  %v491_v37 = vmul.f32 %v927_v7, %v1145_v48 }
  0x4a   : > { %v345_v38 = vsel %vm327_vm1, %v343_v25, %v344_v28  ;;  %v448_v39 = vrot.slane %v411_v30, 1  ;;  %v527_v59 = vrot.slane %v490_v54, 2  ;;  %v565_v40 = vmul.f32 %v942_v18, %v1184_v32  ;;  %v187_v28 = vld [vmem:[%s910_s23 + $0x80] sm:$0xff]  ;;  %v188_v30 = vld [vmem:[%s910_s23 + $0x88] sm:$0x3] }
  0x4b   : > { %v652_v6 = vadd.f32 %v630_v15, %v572_v31  ;;  %v365_v42 = vadd.f32 %v345_v38, %v284_v33  ;;  %v528_v43 = vrot.slane %v491_v37, 2  ;;  %v594_v45 = vmul.f32 %v947_v19, %v1184_v32 }
  0x4c   : > { %v449_v46 = vsel %vm246_vm0, %v447_v35, %v448_v39  ;;  %v595_v10 = vmul.f32 %v947_v19, %v1192_v41  ;;  %v674_v49 = vmul.f32 %v957_v29, %v1184_v32  ;;  %v675_v14 = vmul.f32 %v957_v29, %v1192_v41 }
  0x4d   : > { %v732_v50 = vadd.f32 %v710_v17, %v652_v6  ;;  %v389_v51 = vadd.f32 %v381_v26, %v365_v42  ;;  %v529_v52 = vsel %vm327_vm1, %v527_v59, %v528_v43  ;;  %v631_v55 = vrot.slane %v594_v45, 1 }
  0x4e   : > { %v632_v53 = vrot.slane %v595_v10, 1  ;;  %v711_v56 = vrot.slane %v674_v49, 2  ;;  %v712_v24 = vrot.slane %v675_v14, 2  ;;  %v204_v34 = vmul.f32 %v895_v0, %v1141_v44 }
  0x4f   : > { %v747_v57 = vadd.f32 %v1017_v36, %v732_v50  ;;  %v469_v58 = vadd.f32 %v449_v46, %v389_v51  ;;  %v226_v60 = vmul.f32 %v900_v1, %v1141_v44  ;;  %v227_v61 = vmul.f32 %v900_v1, %v1145_v48 }
  0x50   : > { %v633_v62 = vsel %vm246_vm0, %v631_v55, %v632_v53  ;;  %v713_v63 = vsel %vm327_vm1, %v711_v56, %v712_v24  ;;  %v307_v5 = vmul.f32 %v905_v2, %v1141_v44  ;;  %v308_v8 = vmul.f32 %v905_v2, %v1145_v48 }
  0x51   : > { %756 = vst.msk [vmem:[%s1029_s15 + $0x20] sm:$0xff] %vm751_vm2, %v747_v57  ;;  %v549_v9 = vadd.f32 %v529_v52, %v469_v58  ;;  %v265_v11 = vrot.slane %v226_v60, 1  ;;  %v266_v12 = vrot.slane %v227_v61, 1  ;;  %v382_v13 = vmul.f32 %v915_v3, %v1184_v32 }
  0x52   : > { %v346_v15 = vrot.slane %v307_v5, 2  ;;  %v347_v16 = vrot.slane %v308_v8, 2  ;;  %v412_v17 = vmul.f32 %v920_v4, %v1184_v32  ;;  %v413_v44 = vmul.f32 %v920_v4, %v1192_v41 }
  0x53   : > { %v573_v20 = vadd.f32 %v565_v40, %v549_v9  ;;  %v267_v48 = vsel %vm246_vm0, %v265_v11, %v266_v12  ;;  %v492_v21 = vmul.f32 %v927_v7, %v1184_v32  ;;  %v493_v22 = vmul.f32 %v927_v7, %v1192_v41 }
  0x54   : > { %v285_v23 = vadd.f32 %v267_v48, %v204_v34  ;;  %v348_v25 = vsel %vm327_vm1, %v346_v15, %v347_v16  ;;  %v450_v26 = vrot.slane %v412_v17, 1  ;;  %v451_v27 = vrot.slane %v413_v44, 1 }
  0x55   : > { %v653_v47 = vadd.f32 %v633_v62, %v573_v20  ;;  %v530_v54 = vrot.slane %v492_v21, 2  ;;  %v531_v31 = vrot.slane %v493_v22, 2  ;;  %v566_v35 = vmul.f32 %v942_v18, %v187_v28  ;;  %v189_v62 = vld [vmem:[%s910_s23 + $0x90] sm:$0xff] }
  0x56   : > { %v366_v33 = vadd.f32 %v348_v25, %v285_v23  ;;  %v596_v37 = vmul.f32 %v947_v19, %v187_v28  ;;  %v597_v38 = vmul.f32 %v947_v19, %v188_v30  ;;  %v452_v59 = vsel %vm246_vm0, %v450_v26, %v451_v27 }
  0x57   : > { %v733_v39 = vadd.f32 %v713_v63, %v653_v47  ;;  %v676_v40 = vmul.f32 %v957_v29, %v187_v28  ;;  %v677_v6 = vmul.f32 %v957_v29, %v188_v30  ;;  %v532_v43 = vsel %vm327_vm1, %v530_v54, %v531_v31 }
  0x58   : > { %v390_v42 = vadd.f32 %v382_v13, %v366_v33  ;;  %v634_v45 = vrot.slane %v596_v37, 1  ;;  %v635_v46 = vrot.slane %v597_v38, 1  ;;  %v228_v50 = vmul.f32 %v900_v1, %v1184_v32 }
  0x59   : > { %v748_v10 = vadd.f32 %v1017_v36, %v733_v39  ;;  %v714_v49 = vrot.slane %v676_v40, 2  ;;  %v715_v14 = vrot.slane %v677_v6, 2  ;;  %v205_v52 = vmul.f32 %v895_v0, %v1184_v32 }
  0x5a   : > { %v470_v51 = vadd.f32 %v452_v59, %v390_v42  ;;  %v229_v55 = vmul.f32 %v900_v1, %v1192_v41  ;;  %v309_v53 = vmul.f32 %v905_v2, %v1184_v32  ;;  %v636_v56 = vsel %vm246_vm0, %v634_v45, %v635_v46  ;;  %v190_v1 = vld [vmem:[%s910_s23 + $0x98] sm:$0x3] }
  0x5b   : > { %757 = vst.msk [vmem:[%s1029_s15 + $0x28] sm:$0xff] %vm751_vm2, %v748_v10  ;;  %v716_v24 = vsel %vm327_vm1, %v714_v49, %v715_v14  ;;  %v268_v34 = vrot.slane %v228_v50, 1  ;;  %v310_v57 = vmul.f32 %v905_v2, %v1192_v41  ;;  %v414_v0 = vmul.f32 %v920_v4, %v187_v28 }
  0x5c   : > { %v550_v58 = vadd.f32 %v532_v43, %v470_v51  ;;  %v269_v60 = vrot.slane %v229_v55, 1  ;;  %v349_v61 = vrot.slane %v309_v53, 2  ;;  %v415_v32 = vmul.f32 %v920_v4, %v188_v30 }
  0x5d   : > { %v350_v63 = vrot.slane %v310_v57, 2  ;;  %v494_v5 = vmul.f32 %v927_v7, %v187_v28  ;;  %v495_v8 = vmul.f32 %v927_v7, %v188_v30  ;;  %v383_v12 = vmul.f32 %v915_v3, %v187_v28 }
  0x5e   : > { %v574_v9 = vadd.f32 %v566_v35, %v550_v58  ;;  %v270_v11 = vsel %vm246_vm0, %v268_v34, %v269_v60  ;;  %v453_v2 = vrot.slane %v414_v0, 1  ;;  %v454_v15 = vrot.slane %v415_v32, 1 }
  0x5f   : > { %v286_v41 = vadd.f32 %v270_v11, %v205_v52  ;;  %v351_v13 = vsel %vm327_vm1, %v349_v61, %v350_v63  ;;  %v533_v16 = vrot.slane %v494_v5, 2  ;;  %v534_v44 = vrot.slane %v495_v8, 2 }
  0x60   : > { %v654_v17 = vadd.f32 %v636_v56, %v574_v9  ;;  %v598_v4 = vmul.f32 %v947_v19, %v189_v62  ;;  %v599_v20 = vmul.f32 %v947_v19, %v190_v1  ;;  %v455_v21 = vsel %vm246_vm0, %v453_v2, %v454_v15 }
  0x61   : > { %v367_v48 = vadd.f32 %v351_v13, %v286_v41  ;;  %v678_v22 = vmul.f32 %v957_v29, %v189_v62  ;;  %v679_v3 = vmul.f32 %v957_v29, %v190_v1  ;;  %v535_v26 = vsel %vm327_vm1, %v533_v16, %v534_v44 }
  0x62   : > { %v734_v7 = vadd.f32 %v716_v24, %v654_v17  ;;  %v637_v27 = vrot.slane %v598_v4, 1  ;;  %v638_v47 = vrot.slane %v599_v20, 1  ;;  %v567_v30 = vmul.f32 %v942_v18, %v189_v62 }
  0x63   : > { %v391_v23 = vadd.f32 %v383_v12, %v367_v48  ;;  %v717_v19 = vrot.slane %v678_v22, 2  ;;  %v718_v54 = vrot.slane %v679_v3, 2 }
  0x64   : > { %v749_v25 = vadd.f32 %v1017_v36, %v734_v7  ;;  %v639_v33 = vsel %vm246_vm0, %v637_v27, %v638_v47 }
  0x65   : > { %v471_v28 = vadd.f32 %v455_v21, %v391_v23  ;;  %v719_v29 = vsel %vm327_vm1, %v717_v19, %v718_v54 }
  0x66   : > { %758 = vst.msk [vmem:[%s1029_s15 + $0x30] sm:$0xff] %vm751_vm2, %v749_v25 }
  0x67   : > { %v551_v31 = vadd.f32 %v535_v26, %v471_v28 }
  0x69   : > { %v575_v35 = vadd.f32 %v567_v30, %v551_v31 }
  0x6b   : > { %v655_v37 = vadd.f32 %v639_v33, %v575_v35 }
  0x6d   : > { %v735_v38 = vadd.f32 %v719_v29, %v655_v37 }
  0x6f   : > { %v750_v39 = vadd.f32 %v1017_v36, %v735_v38 }
  0x71   : > { %759 = vst.msk [vmem:[%s1029_s15 + $0x38] sm:$0xff] %vm751_vm2, %v750_v39 }
  0x72 PF: > { %s13_s12 = sadd.s32 1, %s859_s12  }
  0x73   : > { %p10_p4 = scmp.ge.s32.totalorder %s13_s12, 4  }
  0x75   :  { %12 = sbr.rel (!%p10_p4) target bundleno = 1 (0x1), region = 70 }

// kernel: shufflenet_forward.65
= control target key start
LH: loop header
LB: loop body
LE: loop exit
PB: predicated region body
PF: predicated region fallthrough
CT: control target
= control target key end

     0   :  { %s525_s12 = smov 0   ;;  %s648_s0 = inlined_call_operand.vmem [shape: f32[2,6,6,58], index: 0, kind: input, shape index: {}]   ;;  %s649_s1 = inlined_call_operand.vmem [shape: f32[9,1,58], index: 1, kind: input, shape index: {}]   ;;  %s650_s2 = inlined_call_operand.vmem [shape: f32[1,58], index: 2, kind: input, shape index: {}]   ;;  %s651_s3 = inlined_call_operand.vmem [shape: f32[2,4,4,58], index: 3, kind: output, shape index: {}]  }
   0x1 LB: > { %s459_s13 = sadd.s32 4294967295, %s503_s12   ;;  %p463_p0 = scmp.ge.s32.totalorder %s503_s12, 1  ;;  %s503_s12 = sphi %s525_s12, %s13_s12  }
   0x2   : > { %p137_p1 = scmp.lt.s32.totalorder %s503_s12, 3 }
   0x4   : > { %p138_p2 = pnand %p463_p0, %p137_p1 }
   0x5   : > { %p161_p3 = scmp.lt.s32.totalorder (!%p138_p2), %s459_s13, 1  ;;  %v539_v0 = vld [vmem:[%s649_s1] ss:$0 sm:$0xff] (!%p138_p2)  ;;  %v544_v1 = vld [vmem:[%s649_s1 + $0x1] ss:$0 sm:$0xff] (!%p138_p2)  ;;  %vm399_vm0 = vcmask (!%p138_p2), 470016  }
   0x6   : > { %141 = sbr.rel (%p138_p2) target bundleno = 53 (0x35), region = 32  ;;  %v549_v2 = vld [vmem:[%s649_s1 + $0x2] ss:$0 sm:$0xff] (!%p138_p2)  ;;  %v559_v3 = vld [vmem:[%s649_s1 + $0x4] ss:$0 sm:$0xff] (!%p138_p2) }
   0x7   : > { %v565_v5 = vld [vmem:[%s649_s1 + $0x5] ss:$0 sm:$0xff] (!%p138_p2)  ;;  %v570_v6 = vld [vmem:[%s649_s1 + $0x7] ss:$0 sm:$0xff] (!%p138_p2)  ;;  %v580_v12 = vld [vmem:[%s649_s1 + $0x3] ss:$0 sm:$0xff] (!%p138_p2) }
   0x8   : > { %v586_v14 = vld [vmem:[%s649_s1 + $0x8] ss:$0 sm:$0xff] (!%p138_p2)  ;;  %v592_v18 = vld [vmem:[%s649_s1 + $0x6] ss:$0 sm:$0xff] (!%p138_p2) }
   0xd   : > { %s653_s13 = smov (!%p161_p3, %s459_s13), 1 }
   0xe   : > { %s488_s14 = smul.u32 48, %s653_s13  ;;  %s487_s9 = sshll.u32 %s653_s13, 4 }
   0xf   : > { %s632_s15 = scalar_lea.vmem %s651_s3, %s487_s9 }
  0x10   : > { %s554_s23 = scalar_lea.vmem %s648_s0, %s488_s14 }
  0x11   : > { %v171_v4 = vld [vmem:[%s554_s23] sm:$0x3f]  ;;  %v172_v7 = vld [vmem:[%s554_s23 + $0x8] sm:$0x3f]  ;;  %v173_v11 = vld [vmem:[%s554_s23 + $0x10] sm:$0x3f] }
  0x12   : > { %v184_v8 = vmul.f32 %v539_v0, %v171_v4  ;;  %v196_v9 = vmul.f32 %v544_v1, %v171_v4  ;;  %v224_v10 = vmul.f32 %v549_v2, %v171_v4  ;;  %v268_v13 = vmul.f32 %v559_v3, %v172_v7  ;;  %v174_v30 = vld [vmem:[%s554_s23 + $0x18] sm:$0x3f]  ;;  %v175_v55 = vld [vmem:[%s554_s23 + $0x20] sm:$0x3f] }
  0x13   : > { %v296_v17 = vmul.f32 %v565_v5, %v172_v7  ;;  %v340_v19 = vmul.f32 %v570_v6, %v173_v11  ;;  %v185_v20 = vmul.f32 %v539_v0, %v172_v7  ;;  %v197_v21 = vmul.f32 %v544_v1, %v172_v7 }
  0x14   : > { %v204_v15 = vrot.slane %v196_v9, 1  ;;  %v232_v16 = vrot.slane %v224_v10, 2  ;;  %v252_v23 = vmul.f32 %v580_v12, %v172_v7  ;;  %v368_v24 = vmul.f32 %v586_v14, %v173_v11 }
  0x15   : > { %v225_v25 = vmul.f32 %v549_v2, %v172_v7  ;;  %v276_v26 = vrot.slane %v268_v13, 1  ;;  %v324_v27 = vmul.f32 %v592_v18, %v173_v11  ;;  %v205_v28 = vrot.slane %v197_v21, 1 }
  0x16   : > { %v212_v22 = vadd.f32 %v204_v15, %v184_v8  ;;  %v269_v29 = vmul.f32 %v559_v3, %v173_v11  ;;  %v304_v32 = vrot.slane %v296_v17, 2  ;;  %v348_v33 = vrot.slane %v340_v19, 1 }
  0x17   : > { %v233_v34 = vrot.slane %v225_v25, 2  ;;  %v213_v35 = vadd.f32 %v205_v28, %v185_v20  ;;  %v253_v36 = vmul.f32 %v580_v12, %v173_v11  ;;  %v297_v37 = vmul.f32 %v565_v5, %v173_v11 }
  0x18   : > { %v240_v31 = vadd.f32 %v232_v16, %v212_v22  ;;  %v341_v38 = vmul.f32 %v570_v6, %v174_v30  ;;  %v376_v40 = vrot.slane %v368_v24, 2  ;;  %v186_v41 = vmul.f32 %v539_v0, %v173_v11 }
  0x19   : > { %v198_v42 = vmul.f32 %v544_v1, %v173_v11  ;;  %v241_v43 = vadd.f32 %v233_v34, %v213_v35  ;;  %v277_v44 = vrot.slane %v269_v29, 1  ;;  %v369_v45 = vmul.f32 %v586_v14, %v174_v30 }
  0x1a   : > { %v256_v39 = vadd.f32 %v252_v23, %v240_v31  ;;  %v226_v46 = vmul.f32 %v549_v2, %v173_v11  ;;  %v325_v48 = vmul.f32 %v592_v18, %v174_v30  ;;  %v270_v50 = vmul.f32 %v559_v3, %v174_v30 }
  0x1b   : > { %v206_v49 = vrot.slane %v198_v42, 1  ;;  %v257_v51 = vadd.f32 %v253_v36, %v241_v43  ;;  %v305_v52 = vrot.slane %v297_v37, 2  ;;  %v349_v53 = vrot.slane %v341_v38, 1 }
  0x1c   : > { %v284_v47 = vadd.f32 %v276_v26, %v256_v39  ;;  %v234_v54 = vrot.slane %v226_v46, 2  ;;  %v254_v58 = vmul.f32 %v580_v12, %v174_v30  ;;  %v298_v59 = vmul.f32 %v565_v5, %v174_v30  ;;  %v176_v26 = vld [vmem:[%s554_s23 + $0x28] sm:$0x3f] }
  0x1d   : > { %v214_v57 = vadd.f32 %v206_v49, %v186_v41  ;;  %v285_v60 = vadd.f32 %v277_v44, %v257_v51  ;;  %v377_v61 = vrot.slane %v369_v45, 2  ;;  %v187_v62 = vmul.f32 %v539_v0, %v174_v30  ;;  %v484_v0 = vld [vmem:[%s650_s2] ss:$0 sm:$0xff] }
  0x1e   : > { %v312_v56 = vadd.f32 %v304_v32, %v284_v47  ;;  %v199_v63 = vmul.f32 %v544_v1, %v174_v30  ;;  %v278_v8 = vrot.slane %v270_v50, 1  ;;  %v227_v9 = vmul.f32 %v549_v2, %v174_v30 }
  0x1f   : > { %v242_v7 = vadd.f32 %v234_v54, %v214_v57  ;;  %v313_v10 = vadd.f32 %v305_v52, %v285_v60  ;;  %v342_v11 = vmul.f32 %v570_v6, %v175_v55  ;;  %v271_v15 = vmul.f32 %v559_v3, %v175_v55 }
  0x20   : > { %v328_v4 = vadd.f32 %v324_v27, %v312_v56  ;;  %v207_v13 = vrot.slane %v199_v63, 1  ;;  %v306_v19 = vrot.slane %v298_v59, 2  ;;  %v235_v20 = vrot.slane %v227_v9, 2 }
  0x21   : > { %v258_v17 = vadd.f32 %v254_v58, %v242_v7  ;;  %v329_v1 = vadd.f32 %v325_v48, %v313_v10  ;;  %v255_v2 = vmul.f32 %v580_v12, %v175_v55  ;;  %v299_v22 = vmul.f32 %v565_v5, %v175_v55 }
  0x22   : > { %v356_v16 = vadd.f32 %v348_v33, %v328_v4  ;;  %v215_v21 = vadd.f32 %v207_v13, %v187_v62  ;;  %v326_v25 = vmul.f32 %v592_v18, %v175_v55  ;;  %v370_v3 = vmul.f32 %v586_v14, %v175_v55 }
  0x23   : > { %v286_v24 = vadd.f32 %v278_v8, %v258_v17  ;;  %v357_v27 = vadd.f32 %v349_v53, %v329_v1  ;;  %v279_v29 = vrot.slane %v271_v15, 1  ;;  %v350_v30 = vrot.slane %v342_v11, 1 }
  0x24   : > { %v384_v23 = vadd.f32 %v376_v40, %v356_v16  ;;  %v243_v28 = vadd.f32 %v235_v20, %v215_v21  ;;  %v307_v33 = vrot.slane %v299_v22, 2  ;;  %v343_v34 = vmul.f32 %v570_v6, %v176_v26 }
  0x25   : > { %v314_v5 = vadd.f32 %v306_v19, %v286_v24  ;;  %v385_v31 = vadd.f32 %v377_v61, %v357_v27  ;;  %v378_v36 = vrot.slane %v370_v3, 2  ;;  %v327_v39 = vmul.f32 %v592_v18, %v176_v26 }
  0x26   : > { %v395_v12 = vadd.f32 %v484_v0, %v384_v23  ;;  %v259_v32 = vadd.f32 %v255_v2, %v243_v28  ;;  %v371_v40 = vmul.f32 %v586_v14, %v176_v26  ;;  %v351_v43 = vrot.slane %v343_v34, 1 }
  0x27   : > { %v330_v35 = vadd.f32 %v326_v25, %v314_v5  ;;  %v396_v37 = vadd.f32 %v484_v0, %v385_v31 }
  0x28   : > { %400 = vst.msk [vmem:[%s632_s15] sm:$0xf] %vm399_vm0, %v395_v12  ;;  %v287_v38 = vadd.f32 %v279_v29, %v259_v32  ;;  %v379_v6 = vrot.slane %v371_v40, 2 }
  0x29   : > { %v358_v41 = vadd.f32 %v350_v30, %v330_v35  ;;  %401 = vst.msk [vmem:[%s632_s15 + $0x4] sm:$0xf] %vm399_vm0, %v396_v37 }
  0x2a   : > { %v315_v42 = vadd.f32 %v307_v33, %v287_v38 }
  0x2b   : > { %v386_v44 = vadd.f32 %v378_v36, %v358_v41 }
  0x2c   : > { %v331_v45 = vadd.f32 %v327_v39, %v315_v42 }
  0x2d   : > { %v397_v46 = vadd.f32 %v484_v0, %v386_v44 }
  0x2e   : > { %v359_v47 = vadd.f32 %v351_v43, %v331_v45 }
  0x2f   : > { %402 = vst.msk [vmem:[%s632_s15 + $0x8] sm:$0xf] %vm399_vm0, %v397_v46 }
  0x30   : > { %v387_v48 = vadd.f32 %v379_v6, %v359_v47 }
  0x32   : > { %v398_v49 = vadd.f32 %v484_v0, %v387_v48 }
  0x34   : > { %403 = vst.msk [vmem:[%s632_s15 + $0xc] sm:$0xf] %vm399_vm0, %v398_v49 }
  0x35 PF: > { %s13_s12 = sadd.s32 1, %s503_s12  }
  0x36   : > { %p10_p4 = scmp.ge.s32.totalorder %s13_s12, 4  }
  0x38   :  { %12 = sbr.rel (!%p10_p4) target bundleno = 1 (0x1), region = 70 }

// kernel: shufflenet_forward.75
= control target key start
LH: loop header
LB: loop body
LE: loop exit
PB: predicated region body
PF: predicated region fallthrough
CT: control target
= control target key end

     0   :  { %vm40_vm0 = vcmask 949248   ;;  %vm53_vm1 = vcmask 1043456   ;;  %s359_s1 = inlined_call_operand.vmem [shape: f32[116,116], index: 1, kind: input, shape index: {}]   ;;  %s360_s0 = inlined_call_operand.vmem [shape: f32[32,116], index: 0, kind: input, shape index: {}]   ;;  %s361_s2 = inlined_call_operand.vmem [shape: f32[1,116], index: 2, kind: input, shape index: {}]   ;;  %s362_s3 = inlined_call_operand.vmem [shape: f32[32,116], index: 3, kind: output, shape index: {}]  }
   0x1   :  { %v18_v0 = vld [vmem:[%s359_s1] sm:$0xff]  ;;  %v19_v1 = vld [vmem:[%s359_s1 + $0x8] sm:$0xff]  ;;  %v20_v2 = vld [vmem:[%s359_s1 + $0x10] sm:$0xff] }
   0x2   :  { %v215_v3 = vpack.c.bf16 %v19_v1, %v18_v0  ;;  %v21_v4 = vld [vmem:[%s359_s1 + $0x18] sm:$0xff]  ;;  %v22_v6 = vld [vmem:[%s359_s1 + $0x20] sm:$0xff]  ;;  %v23_v7 = vld [vmem:[%s359_s1 + $0x28] sm:$0xff] }
   0x3   :  { %v219_v5 = vpack.c.bf16 %v21_v4, %v20_v2  ;;  %v223_v8 = vpack.c.bf16 %v23_v7, %v22_v6  ;;  %v14_v9 = vld [vmem:[%s360_s0] sm:$0xff]  ;;  %v16_v10 = vld [vmem:[%s360_s0 + $0x10] sm:$0xff]  ;;  %v25_v12 = vld [vmem:[%s359_s1 + $0x38] sm:$0xff] }
   0x4   :  { %216 = vmatprep.subr.bf16.mxu0 %v215_v3  ;;  %243 = vmatprep.subr.bf16.mxu1 %v215_v3  ;;  %v24_v11 = vld [vmem:[%s359_s1 + $0x30] sm:$0xff]  ;;  %v26_v14 = vld [vmem:[%s359_s1 + $0x40] sm:$0xff]  ;;  %v27_v15 = vld [vmem:[%s359_s1 + $0x48] sm:$0xff] }
   0x5   :  { %218 = vmatpush3.bf16.msra.mxu0 %v215_v3  ;;  %251 = vmatpush3.bf16.msra.mxu1 %v215_v3  ;;  %v227_v13 = vpack.c.bf16 %v25_v12, %v24_v11  ;;  %v231_v16 = vpack.c.bf16 %v27_v15, %v26_v14  ;;  %v28_v17 = vld [vmem:[%s359_s1 + $0x50] sm:$0xff]  ;;  %v29_v18 = vld [vmem:[%s359_s1 + $0x58] sm:$0xff]  ;;  %v30_v20 = vld [vmem:[%s359_s1 + $0x60] sm:$0xff] }
   0x6   :  { %220 = vmatprep.subr.bf16.mxu0 %v219_v5  ;;  %244 = vmatprep.subr.bf16.mxu1 %v219_v5  ;;  %v235_v19 = vpack.c.bf16 %v29_v18, %v28_v17  ;;  %v31_v21 = vld [vmem:[%s359_s1 + $0x68] sm:$0xff]  ;;  %v32_v23 = vld [vmem:[%s359_s1 + $0x70] sm:$0xf]  ;;  %v17_v25 = vld [vmem:[%s360_s0 + $0x18] sm:$0xff] }
   0x7   :  { %209 = vmatprep.mubr.msk.f32.mxu0 %vm40_vm0, %v14_v9  ;;  %212 = vmatprep.mubr.msk.f32.mxu1 %vm40_vm0, %v16_v10  ;;  %v239_v22 = vpack.c.bf16 %v31_v21, %v30_v20  ;;  %v15_v24 = vld [vmem:[%s360_s0 + $0x8] sm:$0xff]  ;;  %v154_v26 = vld [vmem:[%s361_s2] ss:$0 sm:$0xff] }
   0x9   :  { %222 = vmatpush3.bf16.msra.mxu0 %v219_v5  ;;  %252 = vmatpush3.bf16.msra.mxu1 %v219_v5 }
   0xa   :  { %224 = vmatprep.subr.bf16.mxu0 %v223_v8  ;;  %245 = vmatprep.subr.bf16.mxu1 %v223_v8 }
   0xd   :  { %226 = vmatpush3.bf16.msra.mxu0 %v223_v8  ;;  %253 = vmatpush3.bf16.msra.mxu1 %v223_v8 }
   0xe   :  { %228 = vmatprep.subr.bf16.mxu0 %v227_v13  ;;  %246 = vmatprep.subr.bf16.mxu1 %v227_v13 }
  0x11   :  { %230 = vmatpush3.bf16.msra.mxu0 %v227_v13  ;;  %254 = vmatpush3.bf16.msra.mxu1 %v227_v13 }
  0x12   :  { %232 = vmatprep.subr.bf16.mxu0 %v231_v16  ;;  %247 = vmatprep.subr.bf16.mxu1 %v231_v16 }
  0x15   :  { %234 = vmatpush3.bf16.msra.mxu0 %v231_v16  ;;  %255 = vmatpush3.bf16.msra.mxu1 %v231_v16 }
  0x16   :  { %236 = vmatprep.subr.bf16.mxu0 %v235_v19  ;;  %248 = vmatprep.subr.bf16.mxu1 %v235_v19 }
  0x19   :  { %238 = vmatpush3.bf16.msra.mxu0 %v235_v19  ;;  %256 = vmatpush3.bf16.msra.mxu1 %v235_v19 }
  0x1a   :  { %240 = vmatprep.subr.bf16.mxu0 %v239_v22  ;;  %249 = vmatprep.subr.bf16.mxu1 %v239_v22 }
  0x1d   :  { %242 = vmatpush3.bf16.msra.mxu0 %v239_v22  ;;  %257 = vmatpush3.bf16.msra.mxu1 %v239_v22 }
  0x1e   :  { %207 = vmatprep.subr.msk.mxu0 %vm53_vm1, %v32_v23  ;;  %250 = vmatprep.subr.msk.mxu1 %vm53_vm1, %v32_v23 }
  0x21   :  { %208 = vmatpush3.msk.msra.mxu0 %vm53_vm1, %v32_v23  ;;  %258 = vmatpush3.msk.msra.mxu1 %vm53_vm1, %v32_v23 }
  0x22   :  { %210 = vmatmul.mubr.msk.f32.vlgmr.msra.gmra.mrb[0].mxu0 %vm40_vm0, %v15_v24  ;;  %213 = vmatmul.mubr.msk.f32.vlgmr.msra.gmra.mrb[0].mxu1 %vm40_vm0, %v17_v25 }
  0xf5   :  { %v211_v27 = vpop.f32.mrb[0].mxu0  ;;  %v214_v28 = vpop.f32.mrb[0].mxu1 }
  0xf6   :  { %v129_v29 = vadd.f32 %v211_v27, %v154_v26  ;;  %v139_v30 = vadd.f32 %v214_v28, %v154_v26  ;;  %v123_v31 = vpop.f32.mrb[1].mxu0  ;;  %v133_v32 = vpop.f32.mrb[1].mxu1 }
  0xf7   :  { %v124_v33 = vadd.f32 %v154_v26, %v123_v31  ;;  %v134_v34 = vadd.f32 %v154_v26, %v133_v32 }
  0xf8   :  { %v143_v35 = vmax.f32 %v129_v29, 0.0  ;;  %v145_v36 = vmax.f32 %v139_v30, 0.0 }
  0xf9   :  { %v142_v37 = vmax.f32 %v124_v33, 0.0  ;;  %v144_v38 = vmax.f32 %v134_v34, 0.0 }
  0xfa   :  { %147 = vst.msk [vmem:[%s362_s3 + $0x8] sm:$0xff] %vm40_vm0, %v143_v35  ;;  %149 = vst.msk [vmem:[%s362_s3 + $0x18] sm:$0xff] %vm40_vm0, %v145_v36 }
  0xfb   :  { %146 = vst.msk [vmem:[%s362_s3] sm:$0xff] %vm40_vm0, %v142_v37  ;;  %148 = vst.msk [vmem:[%s362_s3 + $0x10] sm:$0xff] %vm40_vm0, %v144_v38 }

// kernel: shufflenet_forward.77
= control target key start
LH: loop header
LB: loop body
LE: loop exit
PB: predicated region body
PF: predicated region fallthrough
CT: control target
= control target key end

     0   :  { %v197_v0 = vmov 0.0|0.0   ;;  %vm198_vm0 = vmmov 0   ;;  %v199_v4 = vmov 0.0   ;;  %vm41_vm1 = vcmask 1043456   ;;  %s274_s1 = inlined_call_operand.vmem [shape: f32[116,116], index: 1, kind: input, shape index: {}]   ;;  %s275_s0 = inlined_call_operand.vmem [shape: f32[8,116], index: 0, kind: input, shape index: {}]   ;;  %s276_s2 = inlined_call_operand.vmem [shape: f32[1,116], index: 2, kind: input, shape index: {}]   ;;  %s277_s3 = inlined_call_operand.vmem [shape: f32[8,116], index: 3, kind: output, shape index: {}]  }
   0x1   :  { %173 = vmatprep.subr.bf16.mxu0 %v197_v0  ;;  %v15_v1 = vld [vmem:[%s274_s1] sm:$0xff]  ;;  %v16_v2 = vld [vmem:[%s274_s1 + $0x8] sm:$0xff]  ;;  %v17_v3 = vld [vmem:[%s274_s1 + $0x10] sm:$0xff]  ;;  %170 = vmatprep.mubr.msk.f32.mxu0 %vm198_vm0, %v199_v4  ;;  %vm37_vm2 = vcmask 949248  }
   0x2   :  { %v174_v5 = vpack.c.bf16 %v16_v2, %v15_v1  ;;  %v18_v6 = vld [vmem:[%s274_s1 + $0x18] sm:$0xff]  ;;  %v19_v8 = vld [vmem:[%s274_s1 + $0x20] sm:$0xff]  ;;  %v20_v9 = vld [vmem:[%s274_s1 + $0x28] sm:$0xff] }
   0x3   :  { %v177_v7 = vpack.c.bf16 %v18_v6, %v17_v3  ;;  %v180_v10 = vpack.c.bf16 %v20_v9, %v19_v8  ;;  %v21_v11 = vld [vmem:[%s274_s1 + $0x30] sm:$0xff]  ;;  %v22_v12 = vld [vmem:[%s274_s1 + $0x38] sm:$0xff]  ;;  %v23_v14 = vld [vmem:[%s274_s1 + $0x40] sm:$0xff] }
   0x4   :  { %175 = vmatpush3.bf16.msra.mxu0 %v174_v5  ;;  %v183_v13 = vpack.c.bf16 %v22_v12, %v21_v11  ;;  %v24_v15 = vld [vmem:[%s274_s1 + $0x48] sm:$0xff]  ;;  %v25_v17 = vld [vmem:[%s274_s1 + $0x50] sm:$0xff]  ;;  %v26_v18 = vld [vmem:[%s274_s1 + $0x58] sm:$0xff] }
   0x5   :  { %176 = vmatprep.subr.bf16.mxu0 %v197_v0  ;;  %v186_v16 = vpack.c.bf16 %v24_v15, %v23_v14  ;;  %v189_v19 = vpack.c.bf16 %v26_v18, %v25_v17  ;;  %v27_v20 = vld [vmem:[%s274_s1 + $0x60] sm:$0xff]  ;;  %v28_v21 = vld [vmem:[%s274_s1 + $0x68] sm:$0xff]  ;;  %v29_v23 = vld [vmem:[%s274_s1 + $0x70] sm:$0xf] }
   0x6   :  { %v192_v22 = vpack.c.bf16 %v28_v21, %v27_v20  ;;  %v14_v24 = vld [vmem:[%s275_s0] sm:$0xff] }
   0x7   :  { %v121_v25 = vld [vmem:[%s276_s2] ss:$0 sm:$0xff] }
   0x8   :  { %178 = vmatpush3.bf16.msra.mxu0 %v177_v7 }
   0x9   :  { %179 = vmatprep.subr.bf16.mxu0 %v197_v0 }
   0xc   :  { %181 = vmatpush3.bf16.msra.mxu0 %v180_v10 }
   0xd   :  { %182 = vmatprep.subr.bf16.mxu0 %v197_v0 }
  0x10   :  { %184 = vmatpush3.bf16.msra.mxu0 %v183_v13 }
  0x11   :  { %185 = vmatprep.subr.bf16.mxu0 %v197_v0 }
  0x14   :  { %187 = vmatpush3.bf16.msra.mxu0 %v186_v16 }
  0x15   :  { %188 = vmatprep.subr.bf16.mxu0 %v197_v0 }
  0x18   :  { %190 = vmatpush3.bf16.msra.mxu0 %v189_v19 }
  0x19   :  { %191 = vmatprep.subr.bf16.mxu0 %v197_v0 }
  0x1c   :  { %193 = vmatpush3.bf16.msra.mxu0 %v192_v22 }
  0x1d   :  { %168 = vmatprep.subr.mxu0 %v199_v4 }
  0x20   :  { %169 = vmatpush3.msk.msra.mxu0 %vm41_vm1, %v29_v23 }
  0x21   :  { %171 = vmatmul.mubr.msk.f32.vlgmr.msra.gmra.mrb[0].mxu0 %vm37_vm2, %v14_v24 }
  0xf4   :  { %v111_v26 = vpop.f32.mrb[0].mxu0 }
  0xf5   :  { %v112_v27 = vadd.f32 %v121_v25, %v111_v26  ;;  %v172_v28 = vpop.f32.mrb[1].mxu0 }
  0xf7   :  { %v115_v29 = vmax.f32 %v112_v27, 0.0 }
  0xf9   :  { %116 = vst.msk [vmem:[%s277_s3] sm:$0xff] %vm37_vm2, %v115_v29 }

// kernel: shufflenet_forward.76
= control target key start
LH: loop header
LB: loop body
LE: loop exit
PB: predicated region body
PF: predicated region fallthrough
CT: control target
= control target key end

     0   :  { %s525_s12 = smov 0   ;;  %s648_s0 = inlined_call_operand.vmem [shape: f32[2,6,6,116], index: 0, kind: input, shape index: {}]   ;;  %s649_s1 = inlined_call_operand.vmem [shape: f32[9,1,116], index: 1, kind: input, shape index: {}]   ;;  %s650_s2 = inlined_call_operand.vmem [shape: f32[1,116], index: 2, kind: input, shape index: {}]   ;;  %s651_s3 = inlined_call_operand.vmem [shape: f32[2,4,4,116], index: 3, kind: output, shape index: {}]  }
   0x1 LB: > { %s459_s13 = sadd.s32 4294967295, %s503_s12   ;;  %p463_p0 = scmp.ge.s32.totalorder %s503_s12, 1  ;;  %s503_s12 = sphi %s525_s12, %s13_s12  }
   0x2   : > { %p137_p1 = scmp.lt.s32.totalorder %s503_s12, 3 }
   0x4   : > { %p138_p2 = pnand %p463_p0, %p137_p1 }
   0x5   : > { %p161_p3 = scmp.lt.s32.totalorder (!%p138_p2), %s459_s13, 1  ;;  %v539_v0 = vld [vmem:[%s649_s1] ss:$0 sm:$0xff] (!%p138_p2)  ;;  %v544_v1 = vld [vmem:[%s649_s1 + $0x1] ss:$0 sm:$0xff] (!%p138_p2)  ;;  %vm399_vm0 = vcmask (!%p138_p2), 945152  }
   0x6   : > { %141 = sbr.rel (%p138_p2) target bundleno = 53 (0x35), region = 32  ;;  %v549_v2 = vld [vmem:[%s649_s1 + $0x2] ss:$0 sm:$0xff] (!%p138_p2)  ;;  %v559_v3 = vld [vmem:[%s649_s1 + $0x4] ss:$0 sm:$0xff] (!%p138_p2) }
   0x7   : > { %v565_v5 = vld [vmem:[%s649_s1 + $0x5] ss:$0 sm:$0xff] (!%p138_p2)  ;;  %v570_v6 = vld [vmem:[%s649_s1 + $0x7] ss:$0 sm:$0xff] (!%p138_p2)  ;;  %v580_v12 = vld [vmem:[%s649_s1 + $0x3] ss:$0 sm:$0xff] (!%p138_p2) }
   0x8   : > { %v586_v14 = vld [vmem:[%s649_s1 + $0x8] ss:$0 sm:$0xff] (!%p138_p2)  ;;  %v592_v18 = vld [vmem:[%s649_s1 + $0x6] ss:$0 sm:$0xff] (!%p138_p2) }
   0xd   : > { %s653_s13 = smov (!%p161_p3, %s459_s13), 1 }
   0xe   : > { %s488_s14 = smul.u32 48, %s653_s13  ;;  %s487_s9 = sshll.u32 %s653_s13, 4 }
   0xf   : > { %s632_s15 = scalar_lea.vmem %s651_s3, %s487_s9 }
  0x10   : > { %s554_s23 = scalar_lea.vmem %s648_s0, %s488_s14 }
  0x11   : > { %v171_v4 = vld [vmem:[%s554_s23] sm:$0x3f]  ;;  %v172_v7 = vld [vmem:[%s554_s23 + $0x8] sm:$0x3f]  ;;  %v173_v11 = vld [vmem:[%s554_s23 + $0x10] sm:$0x3f] }
  0x12   : > { %v184_v8 = vmul.f32 %v539_v0, %v171_v4  ;;  %v196_v9 = vmul.f32 %v544_v1, %v171_v4  ;;  %v224_v10 = vmul.f32 %v549_v2, %v171_v4  ;;  %v268_v13 = vmul.f32 %v559_v3, %v172_v7  ;;  %v174_v30 = vld [vmem:[%s554_s23 + $0x18] sm:$0x3f]  ;;  %v175_v55 = vld [vmem:[%s554_s23 + $0x20] sm:$0x3f] }
  0x13   : > { %v296_v17 = vmul.f32 %v565_v5, %v172_v7  ;;  %v340_v19 = vmul.f32 %v570_v6, %v173_v11  ;;  %v185_v20 = vmul.f32 %v539_v0, %v172_v7  ;;  %v197_v21 = vmul.f32 %v544_v1, %v172_v7 }
  0x14   : > { %v204_v15 = vrot.slane %v196_v9, 1  ;;  %v232_v16 = vrot.slane %v224_v10, 2  ;;  %v252_v23 = vmul.f32 %v580_v12, %v172_v7  ;;  %v368_v24 = vmul.f32 %v586_v14, %v173_v11 }
  0x15   : > { %v225_v25 = vmul.f32 %v549_v2, %v172_v7  ;;  %v276_v26 = vrot.slane %v268_v13, 1  ;;  %v324_v27 = vmul.f32 %v592_v18, %v173_v11  ;;  %v205_v28 = vrot.slane %v197_v21, 1 }
  0x16   : > { %v212_v22 = vadd.f32 %v204_v15, %v184_v8  ;;  %v269_v29 = vmul.f32 %v559_v3, %v173_v11  ;;  %v304_v32 = vrot.slane %v296_v17, 2  ;;  %v348_v33 = vrot.slane %v340_v19, 1 }
  0x17   : > { %v233_v34 = vrot.slane %v225_v25, 2  ;;  %v213_v35 = vadd.f32 %v205_v28, %v185_v20  ;;  %v253_v36 = vmul.f32 %v580_v12, %v173_v11  ;;  %v297_v37 = vmul.f32 %v565_v5, %v173_v11 }
  0x18   : > { %v240_v31 = vadd.f32 %v232_v16, %v212_v22  ;;  %v341_v38 = vmul.f32 %v570_v6, %v174_v30  ;;  %v376_v40 = vrot.slane %v368_v24, 2  ;;  %v186_v41 = vmul.f32 %v539_v0, %v173_v11 }
  0x19   : > { %v198_v42 = vmul.f32 %v544_v1, %v173_v11  ;;  %v241_v43 = vadd.f32 %v233_v34, %v213_v35  ;;  %v277_v44 = vrot.slane %v269_v29, 1  ;;  %v369_v45 = vmul.f32 %v586_v14, %v174_v30 }
  0x1a   : > { %v256_v39 = vadd.f32 %v252_v23, %v240_v31  ;;  %v226_v46 = vmul.f32 %v549_v2, %v173_v11  ;;  %v325_v48 = vmul.f32 %v592_v18, %v174_v30  ;;  %v270_v50 = vmul.f32 %v559_v3, %v174_v30 }
  0x1b   : > { %v206_v49 = vrot.slane %v198_v42, 1  ;;  %v257_v51 = vadd.f32 %v253_v36, %v241_v43  ;;  %v305_v52 = vrot.slane %v297_v37, 2  ;;  %v349_v53 = vrot.slane %v341_v38, 1 }
  0x1c   : > { %v284_v47 = vadd.f32 %v276_v26, %v256_v39  ;;  %v234_v54 = vrot.slane %v226_v46, 2  ;;  %v254_v58 = vmul.f32 %v580_v12, %v174_v30  ;;  %v298_v59 = vmul.f32 %v565_v5, %v174_v30  ;;  %v176_v26 = vld [vmem:[%s554_s23 + $0x28] sm:$0x3f] }
  0x1d   : > { %v214_v57 = vadd.f32 %v206_v49, %v186_v41  ;;  %v285_v60 = vadd.f32 %v277_v44, %v257_v51  ;;  %v377_v61 = vrot.slane %v369_v45, 2  ;;  %v187_v62 = vmul.f32 %v539_v0, %v174_v30  ;;  %v484_v0 = vld [vmem:[%s650_s2] ss:$0 sm:$0xff] }
  0x1e   : > { %v312_v56 = vadd.f32 %v304_v32, %v284_v47  ;;  %v199_v63 = vmul.f32 %v544_v1, %v174_v30  ;;  %v278_v8 = vrot.slane %v270_v50, 1  ;;  %v227_v9 = vmul.f32 %v549_v2, %v174_v30 }
  0x1f   : > { %v242_v7 = vadd.f32 %v234_v54, %v214_v57  ;;  %v313_v10 = vadd.f32 %v305_v52, %v285_v60  ;;  %v342_v11 = vmul.f32 %v570_v6, %v175_v55  ;;  %v271_v15 = vmul.f32 %v559_v3, %v175_v55 }
  0x20   : > { %v328_v4 = vadd.f32 %v324_v27, %v312_v56  ;;  %v207_v13 = vrot.slane %v199_v63, 1  ;;  %v306_v19 = vrot.slane %v298_v59, 2  ;;  %v235_v20 = vrot.slane %v227_v9, 2 }
  0x21   : > { %v258_v17 = vadd.f32 %v254_v58, %v242_v7  ;;  %v329_v1 = vadd.f32 %v325_v48, %v313_v10  ;;  %v255_v2 = vmul.f32 %v580_v12, %v175_v55  ;;  %v299_v22 = vmul.f32 %v565_v5, %v175_v55 }
  0x22   : > { %v356_v16 = vadd.f32 %v348_v33, %v328_v4  ;;  %v215_v21 = vadd.f32 %v207_v13, %v187_v62  ;;  %v326_v25 = vmul.f32 %v592_v18, %v175_v55  ;;  %v370_v3 = vmul.f32 %v586_v14, %v175_v55 }
  0x23   : > { %v286_v24 = vadd.f32 %v278_v8, %v258_v17  ;;  %v357_v27 = vadd.f32 %v349_v53, %v329_v1  ;;  %v279_v29 = vrot.slane %v271_v15, 1  ;;  %v350_v30 = vrot.slane %v342_v11, 1 }
  0x24   : > { %v384_v23 = vadd.f32 %v376_v40, %v356_v16  ;;  %v243_v28 = vadd.f32 %v235_v20, %v215_v21  ;;  %v307_v33 = vrot.slane %v299_v22, 2  ;;  %v343_v34 = vmul.f32 %v570_v6, %v176_v26 }
  0x25   : > { %v314_v5 = vadd.f32 %v306_v19, %v286_v24  ;;  %v385_v31 = vadd.f32 %v377_v61, %v357_v27  ;;  %v378_v36 = vrot.slane %v370_v3, 2  ;;  %v327_v39 = vmul.f32 %v592_v18, %v176_v26 }
  0x26   : > { %v395_v12 = vadd.f32 %v484_v0, %v384_v23  ;;  %v259_v32 = vadd.f32 %v255_v2, %v243_v28  ;;  %v371_v40 = vmul.f32 %v586_v14, %v176_v26  ;;  %v351_v43 = vrot.slane %v343_v34, 1 }
  0x27   : > { %v330_v35 = vadd.f32 %v326_v25, %v314_v5  ;;  %v396_v37 = vadd.f32 %v484_v0, %v385_v31 }
  0x28   : > { %400 = vst.msk [vmem:[%s632_s15] sm:$0xf] %vm399_vm0, %v395_v12  ;;  %v287_v38 = vadd.f32 %v279_v29, %v259_v32  ;;  %v379_v6 = vrot.slane %v371_v40, 2 }
  0x29   : > { %v358_v41 = vadd.f32 %v350_v30, %v330_v35  ;;  %401 = vst.msk [vmem:[%s632_s15 + $0x4] sm:$0xf] %vm399_vm0, %v396_v37 }
  0x2a   : > { %v315_v42 = vadd.f32 %v307_v33, %v287_v38 }
  0x2b   : > { %v386_v44 = vadd.f32 %v378_v36, %v358_v41 }
  0x2c   : > { %v331_v45 = vadd.f32 %v327_v39, %v315_v42 }
  0x2d   : > { %v397_v46 = vadd.f32 %v484_v0, %v386_v44 }
  0x2e   : > { %v359_v47 = vadd.f32 %v351_v43, %v331_v45 }
  0x2f   : > { %402 = vst.msk [vmem:[%s632_s15 + $0x8] sm:$0xf] %vm399_vm0, %v397_v46 }
  0x30   : > { %v387_v48 = vadd.f32 %v379_v6, %v359_v47 }
  0x32   : > { %v398_v49 = vadd.f32 %v484_v0, %v387_v48 }
  0x34   : > { %403 = vst.msk [vmem:[%s632_s15 + $0xc] sm:$0xf] %vm399_vm0, %v398_v49 }
  0x35 PF: > { %s13_s12 = sadd.s32 1, %s503_s12  }
  0x36   : > { %p10_p4 = scmp.ge.s32.totalorder %s13_s12, 4  }
  0x38   :  { %12 = sbr.rel (!%p10_p4) target bundleno = 1 (0x1), region = 70 }

// kernel: shufflenet_forward.79
= control target key start
LH: loop header
LB: loop body
LE: loop exit
PB: predicated region body
PF: predicated region fallthrough
CT: control target
= control target key end

     0   :  { %s450_s12 = smov 0   ;;  %s501_s0 = inlined_call_operand.vmem [shape: f32[2,4,4,116], index: 0, kind: input, shape index: {}]   ;;  %s502_s1 = inlined_call_operand.vmem [shape: f32[9,1,116], index: 1, kind: input, shape index: {}]   ;;  %s503_s2 = inlined_call_operand.vmem [shape: f32[1,116], index: 2, kind: input, shape index: {}]   ;;  %s504_s3 = inlined_call_operand.vmem [shape: f32[2,2,2,116], index: 3, kind: output, shape index: {}]  }
   0x1 LB: > { %s383_s13 = sadd.s32 4294967295, %s428_s12   ;;  %p387_p0 = scmp.ge.s32.totalorder %s428_s12, 1  ;;  %s428_s12 = sphi %s450_s12, %s13_s12  }
   0x2   : > { %p137_p1 = scmp.lt.s32.totalorder %s428_s12, 3 }
   0x4   : > { %p138_p2 = pnand %p387_p0, %p137_p1 }
   0x5   : > { %p161_p3 = scmp.lt.s32.totalorder (!%p138_p2), %s383_s13, 1  ;;  %v392_v0 = vld [vmem:[%s502_s1] ss:$0 sm:$0xff] (!%p138_p2)  ;;  %v394_v1 = vld [vmem:[%s502_s1 + $0x1] ss:$0 sm:$0xff] (!%p138_p2)  ;;  %vm325_vm0 = vcmask (!%p138_p2), 943104  }
   0x6   : > { %141 = sbr.rel (%p138_p2) target bundleno = 40 (0x28), region = 32  ;;  %v396_v2 = vld [vmem:[%s502_s1 + $0x2] ss:$0 sm:$0xff] (!%p138_p2)  ;;  %v400_v5 = vld [vmem:[%s502_s1 + $0x4] ss:$0 sm:$0xff] (!%p138_p2) }
   0x7   : > { %v402_v10 = vld [vmem:[%s502_s1 + $0x5] ss:$0 sm:$0xff] (!%p138_p2)  ;;  %v398_v13 = vld [vmem:[%s502_s1 + $0x3] ss:$0 sm:$0xff] (!%p138_p2)  ;;  %v406_v24 = vld [vmem:[%s502_s1 + $0x7] ss:$0 sm:$0xff] (!%p138_p2) }
   0x8   : > { %v404_v32 = vld [vmem:[%s502_s1 + $0x6] ss:$0 sm:$0xff] (!%p138_p2)  ;;  %v408_v33 = vld [vmem:[%s502_s1 + $0x8] ss:$0 sm:$0xff] (!%p138_p2)  ;;  %v409_v57 = vld [vmem:[%s503_s2] ss:$0 sm:$0xff] (!%p138_p2) }
   0xd   : > { %s506_s13 = smov (!%p161_p3, %s383_s13), 1 }
   0xe   : > { %s412_s14 = sshll.u32 %s506_s13, 4  ;;  %s413_s9 = sshll.u32 %s506_s13, 2 }
   0xf   : > { %s165_s21 = scalar_lea.vmem %s501_s0, %s412_s14  ;;  %s170_s16 = scalar_lea.vmem %s504_s3, %s413_s9 }
  0x10   : > { %v171_v3 = vld [vmem:[%s165_s21] sm:$0xf]  ;;  %v172_v4 = vld [vmem:[%s165_s21 + $0x4] sm:$0xf]  ;;  %v173_v14 = vld [vmem:[%s165_s21 + $0x8] sm:$0xf] }
  0x11   : > { %v182_v6 = vmul.f32 %v392_v0, %v171_v3  ;;  %v183_v7 = vmul.f32 %v392_v0, %v172_v4  ;;  %v192_v8 = vmul.f32 %v394_v1, %v171_v3  ;;  %v193_v9 = vmul.f32 %v394_v1, %v172_v4  ;;  %v174_v25 = vld [vmem:[%s165_s21 + $0xc] sm:$0xf] }
  0x12   : > { %v210_v11 = vmul.f32 %v396_v2, %v171_v3  ;;  %v211_v12 = vmul.f32 %v396_v2, %v172_v4  ;;  %v240_v17 = vmul.f32 %v400_v5, %v172_v4  ;;  %v258_v20 = vmul.f32 %v402_v10, %v172_v4 }
  0x13   : > { %v196_v15 = vrot.slane %v192_v8, 1  ;;  %v197_v16 = vrot.slane %v193_v9, 1  ;;  %v228_v23 = vmul.f32 %v398_v13, %v172_v4  ;;  %v229_v26 = vmul.f32 %v398_v13, %v173_v14 }
  0x14   : > { %v214_v18 = vrot.slane %v210_v11, 2  ;;  %v215_v19 = vrot.slane %v211_v12, 2  ;;  %v241_v27 = vmul.f32 %v400_v5, %v173_v14  ;;  %v259_v28 = vmul.f32 %v402_v10, %v173_v14 }
  0x15   : > { %v200_v21 = vadd.f32 %v196_v15, %v182_v6  ;;  %v201_v22 = vadd.f32 %v197_v16, %v183_v7  ;;  %v244_v31 = vrot.slane %v240_v17, 1  ;;  %v262_v34 = vrot.slane %v258_v20, 2 }
  0x16   : > { %v288_v35 = vmul.f32 %v406_v24, %v173_v14  ;;  %v245_v36 = vrot.slane %v241_v27, 1  ;;  %v263_v39 = vrot.slane %v259_v28, 2  ;;  %v289_v40 = vmul.f32 %v406_v24, %v174_v25 }
  0x17   : > { %v218_v29 = vadd.f32 %v214_v18, %v200_v21  ;;  %v219_v30 = vadd.f32 %v215_v19, %v201_v22  ;;  %v276_v41 = vmul.f32 %v404_v32, %v173_v14  ;;  %v306_v42 = vmul.f32 %v408_v33, %v173_v14 }
  0x18   : > { %v277_v45 = vmul.f32 %v404_v32, %v174_v25  ;;  %v307_v46 = vmul.f32 %v408_v33, %v174_v25  ;;  %v292_v48 = vrot.slane %v288_v35, 1  ;;  %v293_v50 = vrot.slane %v289_v40, 1 }
  0x19   : > { %v230_v37 = vadd.f32 %v228_v23, %v218_v29  ;;  %v231_v38 = vadd.f32 %v229_v26, %v219_v30  ;;  %v310_v52 = vrot.slane %v306_v42, 2 }
  0x1a   : > { %v311_v54 = vrot.slane %v307_v46, 2 }
  0x1b   : > { %v248_v43 = vadd.f32 %v244_v31, %v230_v37  ;;  %v249_v44 = vadd.f32 %v245_v36, %v231_v38 }
  0x1d   : > { %v266_v47 = vadd.f32 %v262_v34, %v248_v43  ;;  %v267_v49 = vadd.f32 %v263_v39, %v249_v44 }
  0x1f   : > { %v278_v51 = vadd.f32 %v276_v41, %v266_v47  ;;  %v279_v53 = vadd.f32 %v277_v45, %v267_v49 }
  0x21   : > { %v296_v55 = vadd.f32 %v292_v48, %v278_v51  ;;  %v297_v56 = vadd.f32 %v293_v50, %v279_v53 }
  0x23   : > { %v314_v58 = vadd.f32 %v310_v52, %v296_v55  ;;  %v315_v59 = vadd.f32 %v311_v54, %v297_v56 }
  0x25   : > { %v323_v60 = vadd.f32 %v409_v57, %v314_v58  ;;  %v324_v61 = vadd.f32 %v409_v57, %v315_v59 }
  0x27   : > { %326 = vst.msk [vmem:[%s170_s16] sm:$0x3] %vm325_vm0, %v323_v60  ;;  %327 = vst.msk [vmem:[%s170_s16 + $0x2] sm:$0x3] %vm325_vm0, %v324_v61 }
  0x28 PF: > { %s13_s12 = sadd.s32 1, %s428_s12  }
  0x29   : > { %p10_p4 = scmp.ge.s32.totalorder %s13_s12, 4  }
  0x2b   :  { %12 = sbr.rel (!%p10_p4) target bundleno = 1 (0x1), region = 70 }

// kernel: shufflenet_forward.101
= control target key start
LH: loop header
LB: loop body
LE: loop exit
PB: predicated region body
PF: predicated region fallthrough
CT: control target
= control target key end

     0   :  { %vm86_vm0 = vcmask 850944   ;;  %s437_s1 = inlined_call_operand.vmem [shape: f32[232,232], index: 1, kind: input, shape index: {}]   ;;  %s438_s0 = inlined_call_operand.vmem [shape: f32[8,232], index: 0, kind: input, shape index: {}]   ;;  %s439_s2 = inlined_call_operand.vmem [shape: f32[1,232], index: 2, kind: input, shape index: {}]   ;;  %s440_s3 = inlined_call_operand.vmem [shape: f32[8,232], index: 3, kind: output, shape index: {}]  }
   0x1   :  { %v17_v0 = vld [vmem:[%s437_s1 + $0x8] sm:$0xff]  ;;  %v19_v1 = vld [vmem:[%s437_s1 + $0x18] sm:$0xff]  ;;  %v16_v2 = vld [vmem:[%s437_s1] sm:$0xff] }
   0x2   :  { %v170_v3 = vpack.c.bf16 %v19_v1, %v17_v0  ;;  %v18_v4 = vld [vmem:[%s437_s1 + $0x10] sm:$0xff]  ;;  %v21_v5 = vld [vmem:[%s437_s1 + $0x28] sm:$0xff]  ;;  %v23_v6 = vld [vmem:[%s437_s1 + $0x38] sm:$0xff] }
   0x3   :  { %v172_v7 = vpack.c.bf16 %v18_v4, %v16_v2  ;;  %v174_v8 = vpack.c.bf16 %v23_v6, %v21_v5  ;;  %v20_v9 = vld [vmem:[%s437_s1 + $0x20] sm:$0xff]  ;;  %v22_v10 = vld [vmem:[%s437_s1 + $0x30] sm:$0xff]  ;;  %v25_v11 = vld [vmem:[%s437_s1 + $0x48] sm:$0xff] }
   0x4   :  { %171 = vmatprep.subr.bf16.mxu0 %v170_v3  ;;  %v27_v12 = vld [vmem:[%s437_s1 + $0x58] sm:$0xff]  ;;  %v176_v13 = vpack.c.bf16 %v22_v10, %v20_v9  ;;  %v24_v15 = vld [vmem:[%s437_s1 + $0x40] sm:$0xff]  ;;  %v26_v16 = vld [vmem:[%s437_s1 + $0x50] sm:$0xff] }
   0x5   :  { %173 = vmatpush1.bf16.msra.mxu0 %v172_v7  ;;  %v178_v14 = vpack.c.bf16 %v27_v12, %v25_v11  ;;  %v29_v17 = vld [vmem:[%s437_s1 + $0x68] sm:$0xff]  ;;  %v31_v18 = vld [vmem:[%s437_s1 + $0x78] sm:$0xff]  ;;  %v180_v19 = vpack.c.bf16 %v26_v16, %v24_v15  ;;  %v28_v21 = vld [vmem:[%s437_s1 + $0x60] sm:$0xff] }
   0x6   :  { %175 = vmatprep.subr.bf16.mxu0 %v174_v8  ;;  %v182_v20 = vpack.c.bf16 %v31_v18, %v29_v17  ;;  %v30_v22 = vld [vmem:[%s437_s1 + $0x70] sm:$0xff]  ;;  %v33_v23 = vld [vmem:[%s437_s1 + $0x88] sm:$0xff]  ;;  %v35_v24 = vld [vmem:[%s437_s1 + $0x98] sm:$0xff] }
   0x7   :  { %v184_v25 = vpack.c.bf16 %v30_v22, %v28_v21  ;;  %v186_v26 = vpack.c.bf16 %v35_v24, %v33_v23  ;;  %v32_v27 = vld [vmem:[%s437_s1 + $0x80] sm:$0xff]  ;;  %v34_v28 = vld [vmem:[%s437_s1 + $0x90] sm:$0xff]  ;;  %v37_v29 = vld [vmem:[%s437_s1 + $0xa8] sm:$0xff]  ;;  %v76_v24 = vlaneseq }
   0x8   :  { %v39_v30 = vld [vmem:[%s437_s1 + $0xb8] sm:$0xff]  ;;  %v188_v31 = vpack.c.bf16 %v34_v28, %v32_v27  ;;  %v36_v33 = vld [vmem:[%s437_s1 + $0xa0] sm:$0xff]  ;;  %v38_v34 = vld [vmem:[%s437_s1 + $0xb0] sm:$0xff] }
   0x9   :  { %177 = vmatpush1.bf16.msra.mxu0 %v176_v13  ;;  %v190_v32 = vpack.c.bf16 %v39_v30, %v37_v29  ;;  %v41_v35 = vld [vmem:[%s437_s1 + $0xc8] sm:$0xff]  ;;  %v43_v36 = vld [vmem:[%s437_s1 + $0xd8] sm:$0xff]  ;;  %v192_v38 = vpack.c.bf16 %v38_v34, %v36_v33  ;;  %v40_v40 = vld [vmem:[%s437_s1 + $0xc0] sm:$0xff] }
   0xa   :  { %179 = vmatprep.subr.bf16.mxu0 %v178_v14  ;;  %v15_v37 = vld [vmem:[%s438_s0 + $0x8] sm:$0xff]  ;;  %v194_v39 = vpack.c.bf16 %v43_v36, %v41_v35  ;;  %v42_v41 = vld [vmem:[%s437_s1 + $0xd0] sm:$0xff]  ;;  %v47_v43 = vld [vmem:[%s437_s1 + $0xf8] sm:$0xff] }
   0xb   :  { %169 = vmatprep.mubr.msk.f32.mxu0 %vm86_vm0, %v15_v37  ;;  %v45_v42 = vld [vmem:[%s437_s1 + $0xe8] sm:$0xff]  ;;  %v196_v44 = vpack.c.bf16 %v42_v41, %v40_v40  ;;  %v44_v46 = vld [vmem:[%s437_s1 + $0xe0] sm:$0xff]  ;;  %v46_v47 = vld [vmem:[%s437_s1 + $0xf0] sm:$0xff] }
   0xc   :  { %v198_v45 = vpack.c.bf16 %v47_v43, %v45_v42  ;;  %v49_v48 = vld [vmem:[%s437_s1 + $0x108] sm:$0xff]  ;;  %v51_v49 = vld [vmem:[%s437_s1 + $0x118] sm:$0xff]  ;;  %v200_v50 = vpack.c.bf16 %v46_v47, %v44_v46  ;;  %v48_v52 = vld [vmem:[%s437_s1 + $0x100] sm:$0xff] }
   0xd   :  { %181 = vmatpush1.bf16.msra.mxu0 %v180_v19  ;;  %v202_v51 = vpack.c.bf16 %v51_v49, %v49_v48  ;;  %v50_v53 = vld [vmem:[%s437_s1 + $0x110] sm:$0xff]  ;;  %v53_v54 = vld [vmem:[%s437_s1 + $0x128] sm:$0xff]  ;;  %v55_v55 = vld [vmem:[%s437_s1 + $0x138] sm:$0xff] }
   0xe   :  { %183 = vmatprep.subr.bf16.mxu0 %v182_v20  ;;  %v204_v56 = vpack.c.bf16 %v50_v53, %v48_v52  ;;  %v206_v57 = vpack.c.bf16 %v55_v55, %v53_v54  ;;  %v52_v58 = vld [vmem:[%s437_s1 + $0x120] sm:$0xff]  ;;  %v54_v59 = vld [vmem:[%s437_s1 + $0x130] sm:$0xff]  ;;  %v57_v60 = vld [vmem:[%s437_s1 + $0x148] sm:$0xff] }
   0xf   :  { %v59_v61 = vld [vmem:[%s437_s1 + $0x158] sm:$0xff]  ;;  %v208_v62 = vpack.c.bf16 %v54_v59, %v52_v58  ;;  %v56_v0 = vld [vmem:[%s437_s1 + $0x140] sm:$0xff]  ;;  %v58_v1 = vld [vmem:[%s437_s1 + $0x150] sm:$0xff] }
  0x10   :  { %v210_v63 = vpack.c.bf16 %v59_v61, %v57_v60  ;;  %v61_v2 = vld [vmem:[%s437_s1 + $0x168] sm:$0xff]  ;;  %v63_v3 = vld [vmem:[%s437_s1 + $0x178] sm:$0xff]  ;;  %v212_v4 = vpack.c.bf16 %v58_v1, %v56_v0  ;;  %v60_v6 = vld [vmem:[%s437_s1 + $0x160] sm:$0xff] }
  0x11   :  { %185 = vmatpush1.bf16.msra.mxu0 %v184_v25  ;;  %v214_v5 = vpack.c.bf16 %v63_v3, %v61_v2  ;;  %v62_v7 = vld [vmem:[%s437_s1 + $0x170] sm:$0xff]  ;;  %v65_v8 = vld [vmem:[%s437_s1 + $0x188] sm:$0xff]  ;;  %v67_v9 = vld [vmem:[%s437_s1 + $0x198] sm:$0xff]  ;;  %v77_v25 = vshrl.u32 %v76_v24, 7 }
  0x12   :  { %187 = vmatprep.subr.bf16.mxu0 %v186_v26  ;;  %v216_v10 = vpack.c.bf16 %v62_v7, %v60_v6  ;;  %v218_v11 = vpack.c.bf16 %v67_v9, %v65_v8  ;;  %v64_v12 = vld [vmem:[%s437_s1 + $0x180] sm:$0xff]  ;;  %v66_v13 = vld [vmem:[%s437_s1 + $0x190] sm:$0xff]  ;;  %v69_v14 = vld [vmem:[%s437_s1 + $0x1a8] sm:$0xff] }
  0x13   :  { %v71_v15 = vld [vmem:[%s437_s1 + $0x1b8] sm:$0xff]  ;;  %v220_v16 = vpack.c.bf16 %v66_v13, %v64_v12  ;;  %v68_v18 = vld [vmem:[%s437_s1 + $0x1a0] sm:$0xff]  ;;  %v70_v19 = vld [vmem:[%s437_s1 + $0x1b0] sm:$0xff]  ;;  %v78_v26 = vsub.s32 0, %v77_v25  ;;  %v82_v28 = vsub.s32 1, %v77_v25 }
  0x14   :  { %v222_v17 = vpack.c.bf16 %v71_v15, %v69_v14  ;;  %v224_v20 = vpack.c.bf16 %v70_v19, %v68_v18  ;;  %v73_v21 = vld [vmem:[%s437_s1 + $0x1c8] sm:$0xff]  ;;  %v72_v22 = vld [vmem:[%s437_s1 + $0x1c0] sm:$0xff] }
  0x15   :  { %189 = vmatpush1.bf16.msra.mxu0 %v188_v31  ;;  %v14_v23 = vld [vmem:[%s438_s0] sm:$0xff] }
  0x16   :  { %191 = vmatprep.subr.bf16.mxu0 %v190_v32  ;;  %v74_v27 = vld [vmem:[%s439_s2] sm:$0x3] }
  0x17   :  { %v79_v29 = vrot.slane %v74_v27, %v78_v26  ;;  %v83_v30 = vrot.slane %v74_v27, %v82_v28 }
  0x19   :  { %193 = vmatpush1.bf16.msra.mxu0 %v192_v38 }
  0x1a   :  { %195 = vmatprep.subr.bf16.mxu0 %v194_v39 }
  0x1d   :  { %197 = vmatpush1.bf16.msra.mxu0 %v196_v44 }
  0x1e   :  { %199 = vmatprep.subr.bf16.mxu0 %v198_v45 }
  0x21   :  { %201 = vmatpush1.bf16.msra.mxu0 %v200_v50 }
  0x22   :  { %203 = vmatprep.subr.bf16.mxu0 %v202_v51 }
  0x25   :  { %205 = vmatpush1.bf16.msra.mxu0 %v204_v56 }
  0x26   :  { %207 = vmatprep.subr.bf16.mxu0 %v206_v57 }
  0x29   :  { %209 = vmatpush1.bf16.msra.mxu0 %v208_v62 }
  0x2a   :  { %211 = vmatprep.subr.bf16.mxu0 %v210_v63 }
  0x2d   :  { %213 = vmatpush1.bf16.msra.mxu0 %v212_v4 }
  0x2e   :  { %215 = vmatprep.subr.bf16.mxu0 %v214_v5 }
  0x31   :  { %217 = vmatpush1.bf16.msra.mxu0 %v216_v10 }
  0x32   :  { %219 = vmatprep.subr.bf16.mxu0 %v218_v11 }
  0x35   :  { %221 = vmatpush1.bf16.msra.mxu0 %v220_v16 }
  0x36   :  { %223 = vmatprep.subr.bf16.mxu0 %v222_v17 }
  0x39   :  { %225 = vmatpush1.bf16.msra.mxu0 %v224_v20 }
  0x3a   :  { %146 = vmatprep.subr.mxu0 %v73_v21 }
  0x3d   :  { %147 = vmatpush1.msra.mxu0 %v72_v22 }
  0x3e   :  { %155 = vmatmul.mubr.f32.vlgmr.msra.gmra.mrb[0].mxu0 %v14_v23 }
 0x111   :  { %v156_v31 = vpop.f32.mrb[0].mxu0 }
 0x112   :  { %v157_v32 = vadd.f32 %v156_v31, %v79_v29  ;;  %v158_v33 = vpop.f32.mrb[1].mxu0 }
 0x113   :  { %v159_v34 = vadd.f32 %v158_v33, %v83_v30 }
 0x114   :  { %v161_v35 = vmax.f32 %v157_v32, 0.0 }
 0x115   :  { %v162_v36 = vmax.f32 %v159_v34, 0.0 }
 0x116   :  { %163 = vst [vmem:[%s440_s3] sm:$0xff] %v161_v35 }
 0x117   :  { %164 = vst.msk [vmem:[%s440_s3 + $0x8] sm:$0xff] %vm86_vm0, %v162_v36 }

// kernel: shufflenet_forward.102
= control target key start
LH: loop header
LB: loop body
LE: loop exit
PB: predicated region body
PF: predicated region fallthrough
CT: control target
= control target key end

     0   :  { %s542_s12 = smov 0   ;;  %s628_s0 = inlined_call_operand.vmem [shape: f32[2,4,4,232], index: 0, kind: input, shape index: {}]   ;;  %s629_s1 = inlined_call_operand.vmem [shape: f32[9,1,232], index: 1, kind: input, shape index: {}]   ;;  %s630_s2 = inlined_call_operand.vmem [shape: f32[1,232], index: 2, kind: input, shape index: {}]   ;;  %s631_s3 = inlined_call_operand.vmem [shape: f32[2,2,2,232], index: 3, kind: output, shape index: {}]  }
   0x1 LB: > { %s471_s13 = sadd.s32 4294967295, %s519_s12   ;;  %p475_p0 = scmp.ge.s32.totalorder %s519_s12, 1  ;;  %s519_s12 = sphi %s542_s12, %s13_s12  }
   0x2   : > { %p137_p1 = scmp.lt.s32.totalorder %s519_s12, 3 }
   0x4   : > { %p138_p2 = pnand %p475_p0, %p137_p1 }
   0x5   : > { %p161_p3 = scmp.lt.s32.totalorder (!%p138_p2), %s471_s13, 1  ;;  %v177_v0 = vlaneseq (!%p138_p2)  ;;  %v175_v2 = vld [vmem:[%s629_s1] sm:$0x3] (!%p138_p2)  ;;  %v480_v3 = vld [vmem:[%s629_s1 + $0x2] sm:$0x3] (!%p138_p2)  ;;  %vm411_vm0 = vcmask (!%p138_p2), 1041408  }
   0x6   : > { %141 = sbr.rel (%p138_p2) target bundleno = 42 (0x2a), region = 32  ;;  %v483_v4 = vld [vmem:[%s629_s1 + $0x4] sm:$0x3] (!%p138_p2)  ;;  %v486_v7 = vld [vmem:[%s629_s1 + $0x6] sm:$0x3] (!%p138_p2)  ;;  %vm412_vm1 = vcmask (!%p138_p2), 846850  }
   0x7   : > { %v552_v1 = vshrl.u32 (!%p138_p2), %v177_v0, 7  ;;  %v487_v8 = vld [vmem:[%s629_s1 + $0x8] sm:$0x3] (!%p138_p2)  ;;  %v490_v13 = vld [vmem:[%s629_s1 + $0xa] sm:$0x3] (!%p138_p2)  ;;  %vm413_vm2 = vmor (!%p138_p2), %vm412_vm1, %vm411_vm0 }
   0x8   : > { %v493_v27 = vld [vmem:[%s629_s1 + $0xc] sm:$0x3] (!%p138_p2)  ;;  %v494_v35 = vld [vmem:[%s629_s1 + $0xe] sm:$0x3] (!%p138_p2)  ;;  %v497_v49 = vld [vmem:[%s629_s1 + $0x10] sm:$0x3] (!%p138_p2) }
   0x9   : > { %v565_v5 = vsub.s32 (!%p138_p2), 0, %v552_v1  ;;  %v568_v6 = vsub.s32 (!%p138_p2), 1, %v552_v1 }
   0xb   : > { %v180_v9 = vrot.slane (!%p138_p2), %v175_v2, %v565_v5  ;;  %v184_v10 = vrot.slane (!%p138_p2), %v175_v2, %v568_v6  ;;  %v195_v11 = vrot.slane (!%p138_p2), %v480_v3, %v565_v5  ;;  %v199_v12 = vrot.slane (!%p138_p2), %v480_v3, %v568_v6 }
   0xc   : > { %v221_v14 = vrot.slane (!%p138_p2), %v483_v4, %v565_v5  ;;  %v225_v15 = vrot.slane (!%p138_p2), %v483_v4, %v568_v6  ;;  %v247_v16 = vrot.slane (!%p138_p2), %v486_v7, %v565_v5  ;;  %v251_v17 = vrot.slane (!%p138_p2), %v486_v7, %v568_v6 }
   0xd   : > { %s633_s13 = smov (!%p161_p3, %s471_s13), 1  ;;  %v185_v18 = vcombine.low %v180_v9, %v184_v10  ;;  %v200_v19 = vcombine.low %v195_v11, %v199_v12  ;;  %v264_v20 = vrot.slane %v487_v8, %v565_v5  ;;  %v268_v21 = vrot.slane %v487_v8, %v568_v6  ;;  %v379_v10 = vld [vmem:[%s630_s2] sm:$0x3] }
   0xe   : > { %s502_s20 = sshll.u32 %s633_s13, 5  ;;  %v226_v24 = vcombine.low %v221_v14, %v225_v15  ;;  %v290_v25 = vrot.slane %v490_v13, %v565_v5  ;;  %v294_v26 = vrot.slane %v490_v13, %v568_v6  ;;  %v252_v29 = vcombine.low %v247_v16, %v251_v17  ;;  %s503_s11 = sshll.u32 %s633_s13, 3 }
   0xf   : > { %s579_s27 = scalar_lea.vmem %s628_s0, %s502_s20  ;;  %v201_v28 = vrot.slane %v200_v19, 7  ;;  %v269_v30 = vcombine.low %v264_v20, %v268_v21  ;;  %v316_v39 = vrot.slane %v493_v27, %v565_v5  ;;  %v320_v44 = vrot.slane %v493_v27, %v568_v6  ;;  %s170_s16 = scalar_lea.vmem %s631_s3, %s503_s11 }
  0x10   : > { %v171_v22 = vld [vmem:[%s579_s27] sm:$0xff]  ;;  %v172_v23 = vld [vmem:[%s579_s27 + $0x8] sm:$0xff]  ;;  %v227_v33 = vrot.slane %v226_v24, 6  ;;  %v295_v34 = vcombine.low %v290_v25, %v294_v26  ;;  %v173_v40 = vld [vmem:[%s579_s27 + $0x10] sm:$0xff]  ;;  %v333_v48 = vrot.slane %v494_v35, %v565_v5  ;;  %v337_v57 = vrot.slane %v494_v35, %v568_v6 }
  0x11   : > { %v187_v31 = vmul.f32 %v185_v18, %v171_v22  ;;  %v188_v32 = vmul.f32 %v185_v18, %v172_v23  ;;  %v203_v36 = vmul.f32 %v201_v28, %v171_v22  ;;  %v204_v37 = vmul.f32 %v201_v28, %v172_v23  ;;  %v174_v2 = vld [vmem:[%s579_s27 + $0x18] sm:$0xff] }
  0x12   : > { %v270_v38 = vrot.slane %v269_v30, 7  ;;  %v229_v41 = vmul.f32 %v227_v33, %v171_v22  ;;  %v230_v42 = vmul.f32 %v227_v33, %v172_v23  ;;  %v296_v43 = vrot.slane %v295_v34, 6 }
  0x13   : > { %v481_v45 = vrot.slane %v203_v36, 9  ;;  %v482_v46 = vrot.slane %v204_v37, 9  ;;  %v254_v52 = vmul.f32 %v252_v29, %v172_v23  ;;  %v255_v56 = vmul.f32 %v252_v29, %v173_v40 }
  0x14   : > { %v272_v47 = vmul.f32 %v270_v38, %v172_v23  ;;  %v484_v50 = vrot.slane %v229_v41, 10  ;;  %v485_v51 = vrot.slane %v230_v42, 10  ;;  %v298_v53 = vmul.f32 %v296_v43, %v172_v23 }
  0x15   : > { %v213_v54 = vadd.f32 %v481_v45, %v187_v31  ;;  %v214_v55 = vadd.f32 %v482_v46, %v188_v32  ;;  %v321_v59 = vcombine.low %v316_v39, %v320_v44  ;;  %v359_v60 = vrot.slane %v497_v49, %v565_v5 }
  0x16   : > { %v488_v58 = vrot.slane %v272_v47, 9  ;;  %v338_v63 = vcombine.low %v333_v48, %v337_v57  ;;  %v363_v0 = vrot.slane %v497_v49, %v568_v6  ;;  %v491_v3 = vrot.slane %v298_v53, 10 }
  0x17   : > { %v239_v61 = vadd.f32 %v484_v50, %v213_v54  ;;  %v240_v62 = vadd.f32 %v485_v51, %v214_v55  ;;  %v273_v4 = vmul.f32 %v270_v38, %v173_v40  ;;  %v323_v12 = vmul.f32 %v321_v59, %v173_v40 }
  0x18   : > { %v339_v8 = vrot.slane %v338_v63, 7  ;;  %v364_v9 = vcombine.low %v359_v60, %v363_v0  ;;  %v521_v13 = vmov 1983009808   ;;  %v299_v16 = vmul.f32 %v296_v43, %v173_v40 }
  0x19   : > { %v256_v7 = vadd.f32 %v254_v52, %v239_v61  ;;  %v257_v11 = vadd.f32 %v255_v56, %v240_v62  ;;  %v396_v14 = vunpack.c.l.s4 %v521_v13  ;;  %v489_v15 = vrot.slane %v273_v4, 9 }
  0x1a   : > { %v341_v18 = vmul.f32 %v339_v8, %v173_v40  ;;  %v365_v19 = vrot.slane %v364_v9, 6  ;;  %v342_v20 = vmul.f32 %v339_v8, %v174_v2  ;;  %v324_v21 = vmul.f32 %v321_v59, %v174_v2 }
  0x1b   : > { %v282_v17 = vadd.f32 %v488_v58, %v256_v7  ;;  %v384_v22 = vrot.slane %v379_v10, %v565_v5  ;;  %v283_v23 = vadd.f32 %v489_v15, %v257_v11  ;;  %v492_v24 = vrot.slane %v299_v16, 10 }
  0x1c   : > { %v495_v26 = vrot.slane %v341_v18, 9  ;;  %v367_v27 = vmul.f32 %v365_v19, %v173_v40  ;;  %v388_v28 = vrot.slane %v379_v10, %v568_v6  ;;  %v496_v30 = vrot.slane %v342_v20, 9 }
  0x1d   : > { %v308_v25 = vadd.f32 %v491_v3, %v282_v17  ;;  %v309_v29 = vadd.f32 %v492_v24, %v283_v23  ;;  %v368_v31 = vmul.f32 %v365_v19, %v174_v2  ;;  %v397_v34 = vunpack.c.0.s8 %v396_v14 }
  0x1e   : > { %v498_v33 = vrot.slane %v367_v27, 10  ;;  %v389_v38 = vcombine.low %v384_v22, %v388_v28 }
  0x1f   : > { %v325_v32 = vadd.f32 %v323_v12, %v308_v25  ;;  %v326_v35 = vadd.f32 %v324_v21, %v309_v29  ;;  %v499_v36 = vrot.slane %v368_v31, 10  ;;  %v400_v41 = vsub.s32 %v397_v34, %v552_v1 }
  0x21   : > { %v351_v37 = vadd.f32 %v495_v26, %v325_v32  ;;  %v352_v39 = vadd.f32 %v496_v30, %v326_v35 }
  0x23   : > { %v377_v5 = vadd.f32 %v498_v33, %v351_v37  ;;  %v378_v40 = vadd.f32 %v499_v36, %v352_v39 }
  0x25   : > { %v391_v42 = vadd.f32 %v389_v38, %v377_v5  ;;  %v392_v6 = vadd.f32 %v389_v38, %v378_v40 }
  0x27   : > { %v401_v43 = vrot.slane %v391_v42, %v400_v41  ;;  %v408_v44 = vrot.slane %v392_v6, %v400_v41 }
  0x29   : > { %414 = vst.msk [vmem:[%s170_s16] sm:$0xf] %vm413_vm2, %v401_v43  ;;  %415 = vst.msk [vmem:[%s170_s16 + $0x4] sm:$0xf] %vm413_vm2, %v408_v44 }
  0x2a PF: > { %s13_s12 = sadd.s32 1, %s519_s12  }
  0x2b   : > { %p10_p4 = scmp.ge.s32.totalorder %s13_s12, 4  }
  0x2d   :  { %12 = sbr.rel (!%p10_p4) target bundleno = 1 (0x1), region = 70 }

// kernel: shufflenet_forward.103
= control target key start
LH: loop header
LB: loop body
LE: loop exit
PB: predicated region body
PF: predicated region fallthrough
CT: control target
= control target key end

     0   :  { %vm95_vm0 = vcmask 850944   ;;  %vm182_vm1 = vcmask 1041408   ;;  %vm183_vm2 = vcmask 846850   ;;  %s458_s1 = inlined_call_operand.vmem [shape: f32[232,232], index: 1, kind: input, shape index: {}]   ;;  %s459_s0 = inlined_call_operand.vmem [shape: f32[2,232], index: 0, kind: input, shape index: {}]   ;;  %s460_s2 = inlined_call_operand.vmem [shape: f32[1,232], index: 2, kind: input, shape index: {}]   ;;  %s461_s3 = inlined_call_operand.vmem [shape: f32[2,232], index: 3, kind: output, shape index: {}]  }
   0x1   :  { %v16_v0 = vld [vmem:[%s458_s1 + $0x8] sm:$0xff]  ;;  %v18_v1 = vld [vmem:[%s458_s1 + $0x18] sm:$0xff]  ;;  %v15_v2 = vld [vmem:[%s458_s1] sm:$0xff] }
   0x2   :  { %v192_v3 = vpack.c.bf16 %v18_v1, %v16_v0  ;;  %v17_v4 = vld [vmem:[%s458_s1 + $0x10] sm:$0xff]  ;;  %v20_v5 = vld [vmem:[%s458_s1 + $0x28] sm:$0xff]  ;;  %v22_v6 = vld [vmem:[%s458_s1 + $0x38] sm:$0xff] }
   0x3   :  { %v194_v7 = vpack.c.bf16 %v17_v4, %v15_v2  ;;  %v196_v8 = vpack.c.bf16 %v22_v6, %v20_v5  ;;  %v19_v9 = vld [vmem:[%s458_s1 + $0x20] sm:$0xff]  ;;  %v21_v10 = vld [vmem:[%s458_s1 + $0x30] sm:$0xff]  ;;  %v24_v11 = vld [vmem:[%s458_s1 + $0x48] sm:$0xff] }
   0x4   :  { %193 = vmatprep.subr.bf16.mxu0 %v192_v3  ;;  %v26_v12 = vld [vmem:[%s458_s1 + $0x58] sm:$0xff]  ;;  %v198_v13 = vpack.c.bf16 %v21_v10, %v19_v9  ;;  %v23_v15 = vld [vmem:[%s458_s1 + $0x40] sm:$0xff]  ;;  %v25_v16 = vld [vmem:[%s458_s1 + $0x50] sm:$0xff] }
   0x5   :  { %195 = vmatpush1.bf16.msra.mxu0 %v194_v7  ;;  %v200_v14 = vpack.c.bf16 %v26_v12, %v24_v11  ;;  %v28_v17 = vld [vmem:[%s458_s1 + $0x68] sm:$0xff]  ;;  %v30_v18 = vld [vmem:[%s458_s1 + $0x78] sm:$0xff]  ;;  %v202_v19 = vpack.c.bf16 %v25_v16, %v23_v15  ;;  %v27_v21 = vld [vmem:[%s458_s1 + $0x60] sm:$0xff] }
   0x6   :  { %197 = vmatprep.subr.bf16.mxu0 %v196_v8  ;;  %v204_v20 = vpack.c.bf16 %v30_v18, %v28_v17  ;;  %v29_v22 = vld [vmem:[%s458_s1 + $0x70] sm:$0xff]  ;;  %v32_v23 = vld [vmem:[%s458_s1 + $0x88] sm:$0xff]  ;;  %v34_v24 = vld [vmem:[%s458_s1 + $0x98] sm:$0xff] }
   0x7   :  { %v206_v25 = vpack.c.bf16 %v29_v22, %v27_v21  ;;  %v208_v26 = vpack.c.bf16 %v34_v24, %v32_v23  ;;  %v31_v27 = vld [vmem:[%s458_s1 + $0x80] sm:$0xff]  ;;  %v33_v28 = vld [vmem:[%s458_s1 + $0x90] sm:$0xff]  ;;  %v36_v29 = vld [vmem:[%s458_s1 + $0xa8] sm:$0xff]  ;;  %v75_v24 = vlaneseq }
   0x8   :  { %v38_v30 = vld [vmem:[%s458_s1 + $0xb8] sm:$0xff]  ;;  %v210_v31 = vpack.c.bf16 %v33_v28, %v31_v27  ;;  %v35_v33 = vld [vmem:[%s458_s1 + $0xa0] sm:$0xff]  ;;  %v37_v34 = vld [vmem:[%s458_s1 + $0xb0] sm:$0xff] }
   0x9   :  { %199 = vmatpush1.bf16.msra.mxu0 %v198_v13  ;;  %v212_v32 = vpack.c.bf16 %v38_v30, %v36_v29  ;;  %v40_v35 = vld [vmem:[%s458_s1 + $0xc8] sm:$0xff]  ;;  %v42_v36 = vld [vmem:[%s458_s1 + $0xd8] sm:$0xff]  ;;  %v351_v37 = vld.sshfl [vmem:[%s459_s0] sm:$0x33 pattern:$0x76325410]  ;;  %v214_v38 = vpack.c.bf16 %v37_v34, %v35_v33 }
   0xa   :  { %201 = vmatprep.subr.bf16.mxu0 %v200_v14  ;;  %v93_v39 = vcombine.high %v351_v37, %v351_v37  ;;  %v216_v40 = vpack.c.bf16 %v42_v36, %v40_v35  ;;  %v39_v41 = vld [vmem:[%s458_s1 + $0xc0] sm:$0xff]  ;;  %v41_v42 = vld [vmem:[%s458_s1 + $0xd0] sm:$0xff]  ;;  %v44_v43 = vld [vmem:[%s458_s1 + $0xe8] sm:$0xff]  ;;  %v249_v29 = vmov 1983009808  }
   0xb   :  { %v46_v44 = vld [vmem:[%s458_s1 + $0xf8] sm:$0xff]  ;;  %v218_v45 = vpack.c.bf16 %v41_v42, %v39_v41  ;;  %v43_v47 = vld [vmem:[%s458_s1 + $0xe0] sm:$0xff]  ;;  %v45_v48 = vld [vmem:[%s458_s1 + $0xf0] sm:$0xff]  ;;  %v175_v30 = vunpack.c.l.s4 %v249_v29 }
   0xc   :  { %191 = vmatprep.mubr.msk.f32.mxu0 %vm95_vm0, %v93_v39  ;;  %v220_v46 = vpack.c.bf16 %v46_v44, %v44_v43  ;;  %v48_v49 = vld [vmem:[%s458_s1 + $0x108] sm:$0xff]  ;;  %v50_v50 = vld [vmem:[%s458_s1 + $0x118] sm:$0xff]  ;;  %v222_v51 = vpack.c.bf16 %v45_v48, %v43_v47  ;;  %v47_v53 = vld [vmem:[%s458_s1 + $0x100] sm:$0xff] }
   0xd   :  { %203 = vmatpush1.bf16.msra.mxu0 %v202_v19  ;;  %v224_v52 = vpack.c.bf16 %v50_v50, %v48_v49  ;;  %v49_v54 = vld [vmem:[%s458_s1 + $0x110] sm:$0xff]  ;;  %v52_v55 = vld [vmem:[%s458_s1 + $0x128] sm:$0xff]  ;;  %v54_v56 = vld [vmem:[%s458_s1 + $0x138] sm:$0xff]  ;;  %v176_v34 = vunpack.c.0.s8 %v175_v30 }
   0xe   :  { %205 = vmatprep.subr.bf16.mxu0 %v204_v20  ;;  %v226_v57 = vpack.c.bf16 %v49_v54, %v47_v53  ;;  %v228_v58 = vpack.c.bf16 %v54_v56, %v52_v55  ;;  %v51_v59 = vld [vmem:[%s458_s1 + $0x120] sm:$0xff]  ;;  %v53_v60 = vld [vmem:[%s458_s1 + $0x130] sm:$0xff]  ;;  %v56_v61 = vld [vmem:[%s458_s1 + $0x148] sm:$0xff] }
   0xf   :  { %v58_v62 = vld [vmem:[%s458_s1 + $0x158] sm:$0xff]  ;;  %v230_v63 = vpack.c.bf16 %v53_v60, %v51_v59  ;;  %v55_v1 = vld [vmem:[%s458_s1 + $0x140] sm:$0xff]  ;;  %v57_v2 = vld [vmem:[%s458_s1 + $0x150] sm:$0xff] }
  0x10   :  { %v232_v0 = vpack.c.bf16 %v58_v62, %v56_v61  ;;  %v60_v3 = vld [vmem:[%s458_s1 + $0x168] sm:$0xff]  ;;  %v62_v4 = vld [vmem:[%s458_s1 + $0x178] sm:$0xff]  ;;  %v234_v5 = vpack.c.bf16 %v57_v2, %v55_v1  ;;  %v59_v7 = vld [vmem:[%s458_s1 + $0x160] sm:$0xff] }
  0x11   :  { %207 = vmatpush1.bf16.msra.mxu0 %v206_v25  ;;  %v236_v6 = vpack.c.bf16 %v62_v4, %v60_v3  ;;  %v61_v8 = vld [vmem:[%s458_s1 + $0x170] sm:$0xff]  ;;  %v64_v9 = vld [vmem:[%s458_s1 + $0x188] sm:$0xff]  ;;  %v66_v10 = vld [vmem:[%s458_s1 + $0x198] sm:$0xff]  ;;  %v76_v25 = vshrl.u32 %v75_v24, 7 }
  0x12   :  { %209 = vmatprep.subr.bf16.mxu0 %v208_v26  ;;  %v238_v11 = vpack.c.bf16 %v61_v8, %v59_v7  ;;  %v240_v12 = vpack.c.bf16 %v66_v10, %v64_v9  ;;  %v63_v13 = vld [vmem:[%s458_s1 + $0x180] sm:$0xff]  ;;  %v65_v14 = vld [vmem:[%s458_s1 + $0x190] sm:$0xff]  ;;  %v68_v15 = vld [vmem:[%s458_s1 + $0x1a8] sm:$0xff] }
  0x13   :  { %v70_v16 = vld [vmem:[%s458_s1 + $0x1b8] sm:$0xff]  ;;  %v242_v17 = vpack.c.bf16 %v65_v14, %v63_v13  ;;  %v67_v19 = vld [vmem:[%s458_s1 + $0x1a0] sm:$0xff]  ;;  %v69_v20 = vld [vmem:[%s458_s1 + $0x1b0] sm:$0xff]  ;;  %v77_v26 = vsub.s32 0, %v76_v25  ;;  %v81_v28 = vsub.s32 1, %v76_v25 }
  0x14   :  { %v244_v18 = vpack.c.bf16 %v70_v16, %v68_v15  ;;  %v246_v21 = vpack.c.bf16 %v69_v20, %v67_v19  ;;  %v72_v22 = vld [vmem:[%s458_s1 + $0x1c8] sm:$0xff]  ;;  %v71_v23 = vld [vmem:[%s458_s1 + $0x1c0] sm:$0xff]  ;;  %vm184_vm3 = vmor %vm183_vm2, %vm182_vm1 }
  0x15   :  { %211 = vmatpush1.bf16.msra.mxu0 %v210_v31  ;;  %v73_v27 = vld [vmem:[%s460_s2] sm:$0x3] }
  0x16   :  { %213 = vmatprep.subr.bf16.mxu0 %v212_v32  ;;  %v78_v31 = vrot.slane %v73_v27, %v77_v26  ;;  %v82_v32 = vrot.slane %v73_v27, %v81_v28 }
  0x19   :  { %215 = vmatpush1.bf16.msra.mxu0 %v214_v38 }
  0x1a   :  { %217 = vmatprep.subr.bf16.mxu0 %v216_v40 }
  0x1d   :  { %219 = vmatpush1.bf16.msra.mxu0 %v218_v45 }
  0x1e   :  { %221 = vmatprep.subr.bf16.mxu0 %v220_v46 }
  0x21   :  { %223 = vmatpush1.bf16.msra.mxu0 %v222_v51 }
  0x22   :  { %225 = vmatprep.subr.bf16.mxu0 %v224_v52 }
  0x25   :  { %227 = vmatpush1.bf16.msra.mxu0 %v226_v57 }
  0x26   :  { %229 = vmatprep.subr.bf16.mxu0 %v228_v58 }
  0x29   :  { %231 = vmatpush1.bf16.msra.mxu0 %v230_v63 }
  0x2a   :  { %233 = vmatprep.subr.bf16.mxu0 %v232_v0 }
  0x2d   :  { %235 = vmatpush1.bf16.msra.mxu0 %v234_v5 }
  0x2e   :  { %237 = vmatprep.subr.bf16.mxu0 %v236_v6 }
  0x31   :  { %239 = vmatpush1.bf16.msra.mxu0 %v238_v11 }
  0x32   :  { %241 = vmatprep.subr.bf16.mxu0 %v240_v12 }
  0x35   :  { %243 = vmatpush1.bf16.msra.mxu0 %v242_v17 }
  0x36   :  { %245 = vmatprep.subr.bf16.mxu0 %v244_v18 }
  0x39   :  { %247 = vmatpush1.bf16.msra.mxu0 %v246_v21 }
  0x3a   :  { %154 = vmatprep.subr.mxu0 %v72_v22 }
  0x3d   :  { %155 = vmatpush1.msra.mxu0 %v71_v23 }
  0x3e   :  { %163 = vmatmul.mubr.f32.vlgmr.msra.gmra.mrb[0].mxu0 %v351_v37  ;;  %v179_v37 = vsub.s32 %v176_v34, %v76_v25 }
 0x111   :  { %v164_v33 = vpop.f32.mrb[0].mxu0 }
 0x112   :  { %v165_v35 = vadd.f32 %v164_v33, %v78_v31  ;;  %v166_v36 = vpop.f32.mrb[1].mxu0 }
 0x113   :  { %v167_v38 = vadd.f32 %v166_v36, %v82_v32 }
 0x114   :  { %v169_v39 = vmax.f32 %v165_v35, 0.0 }
 0x115   :  { %v170_v40 = vmax.f32 %v167_v38, 0.0 }
 0x117   :  { %v173_v41 = vcombine.low %v169_v39, %v170_v40 }
 0x119   :  { %v180_v42 = vrot.slane %v173_v41, %v179_v37 }
 0x11b   :  { %185 = vst.msk [vmem:[%s461_s3] sm:$0xf] %vm184_vm3, %v180_v42 }

// kernel: shufflenet_forward.105
= control target key start
LH: loop header
LB: loop body
LE: loop exit
PB: predicated region body
PF: predicated region fallthrough
CT: control target
= control target key end

     0   :  { %s460_s12 = smov 0   ;;  %s511_s0 = inlined_call_operand.vmem [shape: f32[2,3,3,232], index: 0, kind: input, shape index: {}]   ;;  %s512_s1 = inlined_call_operand.vmem [shape: f32[9,1,232], index: 1, kind: input, shape index: {}]   ;;  %s513_s2 = inlined_call_operand.vmem [shape: f32[1,232], index: 2, kind: input, shape index: {}]   ;;  %s514_s3 = inlined_call_operand.vmem [shape: f32[2,1,1,232], index: 3, kind: output, shape index: {}]  }
   0x1 LB: > { %s396_s13 = sadd.s32 4294967295, %s436_s12   ;;  %p400_p0 = scmp.ge.s32.totalorder %s436_s12, 1  ;;  %s436_s12 = sphi %s460_s12, %s13_s12  }
   0x2   : > { %p137_p1 = scmp.lt.s32.totalorder %s436_s12, 3 }
   0x4   : > { %p138_p2 = pnand %p400_p0, %p137_p1 }
   0x5   : > { %p160_p3 = scmp.lt.s32.totalorder (!%p138_p2), %s396_s13, 1  ;;  %v177_v0 = vlaneseq (!%p138_p2)  ;;  %v438_v1 = vmov (!%p138_p2), 286326784   ;;  %v172_v4 = vld [vmem:[%s512_s1] sm:$0x3] (!%p138_p2)  ;;  %v403_v6 = vld [vmem:[%s512_s1 + $0x2] sm:$0x3] (!%p138_p2) }
   0x6   : > { %141 = sbr.rel (%p138_p2) target bundleno = 45 (0x2d), region = 32  ;;  %v175_v2 = vunpack.c.l.s4 (!%p138_p2), %v438_v1  ;;  %v405_v7 = vld [vmem:[%s512_s1 + $0x4] sm:$0x3] (!%p138_p2)  ;;  %v407_v9 = vld [vmem:[%s512_s1 + $0x6] sm:$0x3] (!%p138_p2) }
   0x7   : > { %v178_v3 = vshrl.u32 (!%p138_p2), %v177_v0, 7  ;;  %v408_v10 = vld [vmem:[%s512_s1 + $0x8] sm:$0x3] (!%p138_p2)  ;;  %v410_v11 = vld [vmem:[%s512_s1 + $0xa] sm:$0x3] (!%p138_p2)  ;;  %vm340_vm0 = vcmp.lt.s32.totalorder (!%p138_p2), %v177_v0, 232 }
   0x8   : > { %v176_v5 = vunpack.c.0.s8 (!%p138_p2), %v175_v2  ;;  %v413_v23 = vld [vmem:[%s512_s1 + $0xe] sm:$0x3] (!%p138_p2)  ;;  %v412_v27 = vld [vmem:[%s512_s1 + $0xc] sm:$0x3] (!%p138_p2)  ;;  %v415_v28 = vld [vmem:[%s512_s1 + $0x10] sm:$0x3] (!%p138_p2) }
   0x9   : > { %v439_v44 = vmov (!%p138_p2), 1966171168   ;;  %v311_v48 = vld [vmem:[%s513_s2] sm:$0x3] (!%p138_p2) }
   0xa   : > { %v179_v8 = vsub.s32 (!%p138_p2), %v176_v5, %v178_v3  ;;  %v324_v45 = vunpack.c.l.s4 (!%p138_p2), %v439_v44 }
   0xc   : > { %v180_v13 = vrot.slane (!%p138_p2), %v172_v4, %v179_v8  ;;  %v192_v14 = vrot.slane (!%p138_p2), %v403_v6, %v179_v8  ;;  %v209_v15 = vrot.slane (!%p138_p2), %v405_v7, %v179_v8  ;;  %v226_v17 = vrot.slane (!%p138_p2), %v407_v9, %v179_v8 }
   0xd   : > { %s516_s13 = smov (!%p160_p3, %s396_s13), 1  ;;  %v239_v18 = vrot.slane %v408_v10, %v179_v8  ;;  %v256_v22 = vrot.slane %v410_v11, %v179_v8  ;;  %v286_v32 = vrot.slane %v413_v23, %v179_v8  ;;  %v273_v36 = vrot.slane %v412_v27, %v179_v8 }
   0xe   : > { %s419_s16 = smul.u32 24, %s516_s13  ;;  %v303_v37 = vrot.slane %v415_v28, %v179_v8  ;;  %v325_v51 = vunpack.c.0.s8 %v324_v45  ;;  %v319_v53 = vrot.slane %v311_v48, %v179_v8  ;;  %s402_s11 = sshll.u32 %s516_s13, 1 }
  0x10   : > { %s164_s27 = scalar_lea.vmem %s511_s0, %s419_s16  ;;  %v328_v55 = vsub.s32 %v325_v51, %v178_v3  ;;  %s168_s16 = scalar_lea.vmem %s514_s3, %s402_s11 }
  0x11   : > { %v169_v12 = vld [vmem:[%s164_s27] sm:$0x77]  ;;  %v170_v16 = vld [vmem:[%s164_s27 + $0x8] sm:$0x77]  ;;  %v171_v33 = vld [vmem:[%s164_s27 + $0x10] sm:$0x77] }
  0x12   : > { %v182_v19 = vmul.f32 %v180_v13, %v169_v12  ;;  %v194_v20 = vmul.f32 %v192_v14, %v169_v12  ;;  %v211_v21 = vmul.f32 %v209_v15, %v169_v12  ;;  %v241_v26 = vmul.f32 %v239_v18, %v170_v16 }
  0x13   : > { %v228_v30 = vmul.f32 %v226_v17, %v170_v16  ;;  %v258_v31 = vmul.f32 %v256_v22, %v170_v16  ;;  %v288_v40 = vmul.f32 %v286_v32, %v171_v33  ;;  %v275_v42 = vmul.f32 %v273_v36, %v171_v33 }
  0x14   : > { %v404_v24 = vrot.slane %v194_v20, 9  ;;  %v406_v25 = vrot.slane %v211_v21, 10  ;;  %v409_v35 = vrot.slane %v241_v26, 9  ;;  %v305_v43 = vmul.f32 %v303_v37, %v171_v33 }
  0x15   : > { %v411_v39 = vrot.slane %v258_v31, 10  ;;  %v414_v47 = vrot.slane %v288_v40, 9 }
  0x16   : > { %v199_v29 = vadd.f32 %v404_v24, %v182_v19  ;;  %v416_v50 = vrot.slane %v305_v43, 10 }
  0x18   : > { %v216_v34 = vadd.f32 %v406_v25, %v199_v29 }
  0x1a   : > { %v229_v38 = vadd.f32 %v228_v30, %v216_v34 }
  0x1c   : > { %v246_v41 = vadd.f32 %v409_v35, %v229_v38 }
  0x1e   : > { %v263_v46 = vadd.f32 %v411_v39, %v246_v41 }
  0x20   : > { %v276_v49 = vadd.f32 %v275_v42, %v263_v46 }
  0x22   : > { %v293_v52 = vadd.f32 %v414_v47, %v276_v49 }
  0x24   : > { %v310_v54 = vadd.f32 %v416_v50, %v293_v52 }
  0x26   : > { %v321_v56 = vadd.f32 %v319_v53, %v310_v54 }
  0x28   : > { %v329_v57 = vrot.slane %v321_v56, %v328_v55 }
  0x2a   : > { %v336_v58 = vrot.slane %v329_v57, %v328_v55 }
  0x2c   : > { %342 = vst.msk [vmem:[%s168_s16] sm:$0x3] %vm340_vm0, %v336_v58 }
  0x2d PF: > { %s13_s12 = sadd.s32 1, %s436_s12  }
  0x2e   : > { %p10_p4 = scmp.ge.s32.totalorder %s13_s12, 4  }
  0x30   :  { %12 = sbr.rel (!%p10_p4) target bundleno = 1 (0x1), region = 70 }

// kernel: shufflenet_forward.113
= control target key start
LH: loop header
LB: loop body
LE: loop exit
PB: predicated region body
PF: predicated region fallthrough
CT: control target
= control target key end

     0   :  { %10 = vsyncpa [#allocation3], 0  ;;  %s4663_s0 = inlined_call_operand.vmem [shape: f32[2,1,464], index: 0, kind: input, shape index: {}]   ;;  %s4664_s1 = inlined_call_operand.vmem [shape: f32[464,1024], index: 1, kind: input, shape index: {}]   ;;  %s4665_s2 = inlined_call_operand.vmem [shape: f32[1,1024], index: 2, kind: input, shape index: {}]   ;;  %s4666_s3 = inlined_call_operand.vmem [shape: f32[1024,10], index: 3, kind: input, shape index: {}]   ;;  %s4667_s4 = inlined_call_operand.vmem [shape: f32[1,10], index: 4, kind: input, shape index: {}]   ;;  %s4668_s5 = inlined_call_operand.hbm [shape: f32[2,1,10], index: 5, kind: output, shape index: {}]  }
   0x1   :  { %12 = vsyncpa [#allocation3 + $0x1], 0  ;;  %s2706_s18 = smov 0   ;;  %s2708_s19 = smov 0  }
   0x2   :  { %s2710_s20 = smov 0   ;;  %s2712_s21 = smov 0  }
   0x3 LB: > { %s2727_s22 = sadd.s32 4294967295, %s2673_s21   ;;  %s1812_s23 = sadd.s32 4294967294, %s2673_s21   ;;  %s2673_s21 = sphi %s2712_s21, %s4674_s21   ;;  %s2669_s20 = sphi %s2710_s20, %s4673_s20   ;;  %s2665_s19 = sphi %s2708_s19, %s4672_s19   ;;  %s2661_s18 = sphi %s2706_s18, %s4671_s18  }
   0x4   : > { %s2731_s24 = sadd.s32 1, %s2673_s21   ;;  %s135_s25 = sadd.s32 1, %s2669_s20 }
   0x5   : > { %s132_s26 = ssub.s32 %s2673_s21, %s2731_s24  ;;  %p145_p0 = scmp.ne.s32.totalorder %s2669_s20, %s2665_s19 }
   0x6   : > { %p133_p1 = scmp.eq.s32.totalorder %s132_s26, 0  ;;  %p146_p2 = scmp.eq.s32.totalorder %s2727_s22, 1 }
   0x7   : > { %p151_p3 = scmp.ne.s32.totalorder %s2665_s19, %s2661_s18  ;;  %p152_p4 = scmp.eq.s32.totalorder %s1812_s23, 1 }
   0x8   : > { %s2742_s27 = scalar_select %p133_p1, %s2669_s20, %s135_s25  }
   0x9   : > { %p2744_p5 = por %p146_p2, %p145_p0  ;;  %p2748_p6 = por %p152_p4, %p151_p3 }
   0xa   : > { %p1815_p7 = scmp.ge.s32.totalorder %s2673_s21, 1  ;;  %p189_p8 = scmp.lt.s32.totalorder %s2673_s21, 3 }
   0xc   : > { %p190_p9 = pnand %p1815_p7, %p189_p8 }
   0xd   : > { %v221_v0 = vld [vmem:[%s4664_s1 + $0x8] sm:$0xff] (!%p190_p9)  ;;  %v223_v2 = vld [vmem:[%s4664_s1 + $0x18] sm:$0xff] (!%p190_p9)  ;;  %v220_v5 = vld [vmem:[%s4664_s1] sm:$0xff] (!%p190_p9)  ;;  %p215_p10 = scmp.lt.s32.totalorder (!%p190_p9), %s2727_s22, 1  ;;  %vm746_vm0 = vcmask (!%p190_p9), 654336   ;;  %s213_s16 = sand.u32 (!%p190_p9), 1, %s2665_s19  }
   0xe   : > { %193 = sbr.rel (%p190_p9) target bundleno = 700 (0x2bc), region = 40  ;;  %v229_v1 = vld [vmem:[%s4664_s1 + $0x48] sm:$0xff] (!%p190_p9)  ;;  %v231_v4 = vld [vmem:[%s4664_s1 + $0x58] sm:$0xff] (!%p190_p9)  ;;  %v228_v6 = vld [vmem:[%s4664_s1 + $0x40] sm:$0xff] (!%p190_p9)  ;;  %s1821_s17 = sshll.u32 (!%p190_p9), %s2727_s22, 4  ;;  %vm1742_vm1 = vcmask (!%p190_p9), 73728  }
   0xf   : > { %v1964_v3 = vpack.c.bf16 (!%p190_p9), %v229_v1, %v221_v0  ;;  %v2080_v7 = vpack.c.bf16 (!%p190_p9), %v231_v4, %v223_v2  ;;  %v1966_v8 = vpack.c.bf16 (!%p190_p9), %v228_v6, %v220_v5  ;;  %v222_v9 = vld [vmem:[%s4664_s1 + $0x10] sm:$0xff] (!%p190_p9)  ;;  %v237_v11 = vld [vmem:[%s4664_s1 + $0x88] sm:$0xff] (!%p190_p9)  ;;  %v239_v14 = vld [vmem:[%s4664_s1 + $0x98] sm:$0xff] (!%p190_p9)  ;;  %s214_s23 = scalar_lea.vmem (!%p190_p9), [#allocation2], %s213_s16  ;;  %s4621_s6 = scalar_lea.hbm (!%p190_p9), %s4668_s5, %s1821_s17 }
  0x10   : > { %v230_v10 = vld [vmem:[%s4664_s1 + $0x50] sm:$0xff] (!%p190_p9)  ;;  %v245_v13 = vld [vmem:[%s4664_s1 + $0xc8] sm:$0xff] (!%p190_p9)  ;;  %v247_v15 = vld [vmem:[%s4664_s1 + $0xd8] sm:$0xff] (!%p190_p9)  ;;  %s1757_s26 = sshll.u32 (!%p190_p9), %s214_s23, 4  ;;  %s4623_s26 = int_to_ptr.vmem [resolvable:$true] %s1757_s26 }
  0x11   : > { %1965 = vmatprep.subr.bf16.mxu0 (!%p190_p9), %v1964_v3  ;;  %v2082_v12 = vpack.c.bf16 (!%p190_p9), %v230_v10, %v222_v9  ;;  %2081 = vmatprep.subr.bf16.mxu1 (!%p190_p9), %v2080_v7  ;;  %v1968_v16 = vpack.c.bf16 (!%p190_p9), %v245_v13, %v237_v11  ;;  %v2084_v17 = vpack.c.bf16 (!%p190_p9), %v247_v15, %v239_v14  ;;  %v236_v18 = vld [vmem:[%s4664_s1 + $0x80] sm:$0xff] (!%p190_p9)  ;;  %v238_v20 = vld [vmem:[%s4664_s1 + $0x90] sm:$0xff] (!%p190_p9)  ;;  %v253_v23 = vld [vmem:[%s4664_s1 + $0x108] sm:$0xff] (!%p190_p9)  ;;  %s2611_s7 = scalar_lea.vmem (!%p190_p9), %s4623_s26, 16 }
  0x12   : > { %1967 = vmatpush1.bf16.msra.mxu0 (!%p190_p9), %v1966_v8  ;;  %v244_v19 = vld [vmem:[%s4664_s1 + $0xc0] sm:$0xff] (!%p190_p9)  ;;  %v246_v22 = vld [vmem:[%s4664_s1 + $0xd0] sm:$0xff] (!%p190_p9)  ;;  %v261_v24 = vld [vmem:[%s4664_s1 + $0x148] sm:$0xff] (!%p190_p9)  ;;  %p2612_p11 = scmp.ne.s32.totalorder (!%p190_p9), %s4623_s26, %s2611_s7 }
  0x13   : > { %2083 = vmatpush1.bf16.msra.mxu1 (!%p190_p9), %v2082_v12  ;;  %v1970_v21 = vpack.c.bf16 (!%p190_p9), %v244_v19, %v236_v18  ;;  %1969 = vmatprep.subr.bf16.mxu0 (!%p190_p9), %v1968_v16  ;;  %v2086_v25 = vpack.c.bf16 (!%p190_p9), %v246_v22, %v238_v20  ;;  %v1972_v26 = vpack.c.bf16 (!%p190_p9), %v261_v24, %v253_v23  ;;  %v255_v27 = vld [vmem:[%s4664_s1 + $0x118] sm:$0xff] (!%p190_p9)  ;;  %v252_v29 = vld [vmem:[%s4664_s1 + $0x100] sm:$0xff] (!%p190_p9)  ;;  %v254_v32 = vld [vmem:[%s4664_s1 + $0x110] sm:$0xff] (!%p190_p9) }
  0x14   : > { %2085 = vmatprep.subr.bf16.mxu1 (!%p190_p9), %v2084_v17  ;;  %v263_v28 = vld [vmem:[%s4664_s1 + $0x158] sm:$0xff] (!%p190_p9)  ;;  %v260_v31 = vld [vmem:[%s4664_s1 + $0x140] sm:$0xff] (!%p190_p9)  ;;  %v262_v33 = vld [vmem:[%s4664_s1 + $0x150] sm:$0xff] (!%p190_p9)  ;;  %p2613_p12 = pnand (!%p190_p9), %p2612_p11, %p2744_p5 }
  0x15   : > { %v2088_v30 = vpack.c.bf16 %v263_v28, %v255_v27  ;;  %v1974_v34 = vpack.c.bf16 %v260_v31, %v252_v29  ;;  %v269_v35 = vld [vmem:[%s4664_s1 + $0x188] sm:$0xff]  ;;  %v271_v37 = vld [vmem:[%s4664_s1 + $0x198] sm:$0xff]  ;;  %v2090_v38 = vpack.c.bf16 %v262_v33, %v254_v32  ;;  %v268_v41 = vld [vmem:[%s4664_s1 + $0x180] sm:$0xff]  ;;  %s2986_s13 = scalar_select %p215_p10, %s2727_s22, 1 }
  0x16   : > { %1971 = vmatpush1.bf16.msra.mxu0 %v1970_v21  ;;  %v277_v36 = vld [vmem:[%s4664_s1 + $0x1c8] sm:$0xff]  ;;  %v279_v40 = vld [vmem:[%s4664_s1 + $0x1d8] sm:$0xff]  ;;  %v276_v42 = vld [vmem:[%s4664_s1 + $0x1c0] sm:$0xff]  ;;  %p2614_p13 = pneg %p2613_p12  ;;  %s2675_s22 = smov [#allocation2]  }
  0x17   : > { %2087 = vmatpush1.bf16.msra.mxu1 %v2086_v25  ;;  %1973 = vmatprep.subr.bf16.mxu0 %v1972_v26  ;;  %v1976_v39 = vpack.c.bf16 %v277_v36, %v269_v35  ;;  %v2092_v43 = vpack.c.bf16 %v279_v40, %v271_v37  ;;  %v270_v44 = vld [vmem:[%s4664_s1 + $0x190] sm:$0xff]  ;;  %v285_v46 = vld [vmem:[%s4664_s1 + $0x208] sm:$0xff]  ;;  %v287_v48 = vld [vmem:[%s4664_s1 + $0x218] sm:$0xff]  ;;  %v1978_v50 = vpack.c.bf16 %v276_v42, %v268_v41  ;;  %s1816_s15 = sshll.u32 %s2986_s13, 2  ;;  %s1745_s13 = scalar_lea.sflag [#allocation3], %s213_s16 }
  0x18   : > { %2089 = vmatprep.subr.bf16.mxu1 %v2088_v30  ;;  %v278_v45 = vld [vmem:[%s4664_s1 + $0x1d0] sm:$0xff]  ;;  %v293_v47 = vld [vmem:[%s4664_s1 + $0x248] sm:$0xff]  ;;  %v295_v49 = vld [vmem:[%s4664_s1 + $0x258] sm:$0xff]  ;;  %s218_s25 = scalar_lea.vmem %s4663_s0, %s1816_s15  ;;  %s2615_s8 = sshll.u32 %s2675_s22, 4  ;;  %s2616_s8 = int_to_ptr.vmem [resolvable:$false] %s2615_s8 }
  0x19   : > { %v2094_v51 = vpack.c.bf16 %v278_v45, %v270_v44  ;;  %v1980_v52 = vpack.c.bf16 %v293_v47, %v285_v46  ;;  %v284_v53 = vld [vmem:[%s4664_s1 + $0x200] sm:$0xff]  ;;  %v286_v55 = vld [vmem:[%s4664_s1 + $0x210] sm:$0xff]  ;;  %v2096_v56 = vpack.c.bf16 %v295_v49, %v287_v48  ;;  %v301_v58 = vld [vmem:[%s4664_s1 + $0x288] sm:$0xff]  ;;  %v686_v46 = vlaneseq  ;;  %s2617_s15 = scalar_lea.vmem %s2616_s8, 32  ;;  %p2618_p0 = scmp.lt.s32.totalorder %s4623_s26, %s2616_s8 }
  0x1a   : > { %1975 = vmatpush1.bf16.msra.mxu0 %v1974_v34  ;;  %v292_v54 = vld [vmem:[%s4664_s1 + $0x240] sm:$0xff]  ;;  %v294_v57 = vld [vmem:[%s4664_s1 + $0x250] sm:$0xff]  ;;  %v309_v59 = vld [vmem:[%s4664_s1 + $0x2c8] sm:$0xff]  ;;  %p2619_p1 = scmp.lt.s32.totalorder %s2617_s15, %s2611_s7 }
  0x1b   : > { %2091 = vmatpush1.bf16.msra.mxu1 %v2090_v38  ;;  %1977 = vmatprep.subr.bf16.mxu0 %v1976_v39  ;;  %v303_v60 = vld [vmem:[%s4664_s1 + $0x298] sm:$0xff]  ;;  %v1982_v62 = vpack.c.bf16 %v292_v54, %v284_v53  ;;  %v2098_v63 = vpack.c.bf16 %v294_v57, %v286_v55  ;;  %v1984_v0 = vpack.c.bf16 %v309_v59, %v301_v58  ;;  %v300_v1 = vld [vmem:[%s4664_s1 + $0x280] sm:$0xff]  ;;  %v302_v3 = vld [vmem:[%s4664_s1 + $0x290] sm:$0xff]  ;;  %v3012_v59 = vshrl.u32 %v686_v46, 7 }
  0x1c   : > { %2093 = vmatprep.subr.bf16.mxu1 %v2092_v43  ;;  %v311_v61 = vld [vmem:[%s4664_s1 + $0x2d8] sm:$0xff]  ;;  %v308_v2 = vld [vmem:[%s4664_s1 + $0x2c0] sm:$0xff]  ;;  %v310_v5 = vld [vmem:[%s4664_s1 + $0x2d0] sm:$0xff]  ;;  %p2620_p2 = por %p2619_p1, %p2618_p0 }
  0x1d   : > { %v2100_v4 = vpack.c.bf16 %v311_v61, %v303_v60  ;;  %v317_v6 = vld [vmem:[%s4664_s1 + $0x308] sm:$0xff]  ;;  %v319_v8 = vld [vmem:[%s4664_s1 + $0x318] sm:$0xff]  ;;  %v1986_v10 = vpack.c.bf16 %v308_v2, %v300_v1  ;;  %v2102_v11 = vpack.c.bf16 %v310_v5, %v302_v3  ;;  %v316_v13 = vld [vmem:[%s4664_s1 + $0x300] sm:$0xff] }
  0x1e   : > { %1979 = vmatpush1.bf16.msra.mxu0 %v1978_v50  ;;  %v325_v7 = vld [vmem:[%s4664_s1 + $0x348] sm:$0xff]  ;;  %v327_v9 = vld [vmem:[%s4664_s1 + $0x358] sm:$0xff]  ;;  %v324_v14 = vld [vmem:[%s4664_s1 + $0x340] sm:$0xff]  ;;  %p2621_p3 = pnand %p2620_p2, %p2614_p13 }
  0x1f   : > { %2095 = vmatpush1.bf16.msra.mxu1 %v2094_v51  ;;  %1981 = vmatprep.subr.bf16.mxu0 %v1980_v52  ;;  %v1988_v12 = vpack.c.bf16 %v325_v7, %v317_v6  ;;  %v318_v15 = vld [vmem:[%s4664_s1 + $0x310] sm:$0xff]  ;;  %v2104_v16 = vpack.c.bf16 %v327_v9, %v319_v8  ;;  %v333_v18 = vld [vmem:[%s4664_s1 + $0x388] sm:$0xff]  ;;  %v335_v20 = vld [vmem:[%s4664_s1 + $0x398] sm:$0xff]  ;;  %v1990_v22 = vpack.c.bf16 %v324_v14, %v316_v13  ;;  %v692_v8 = vsub.s32 1, %v3012_v59 }
  0x20   : > { %2097 = vmatprep.subr.bf16.mxu1 %v2096_v56  ;;  %v326_v17 = vld [vmem:[%s4664_s1 + $0x350] sm:$0xff]  ;;  %v341_v19 = vld [vmem:[%s4664_s1 + $0x3c8] sm:$0xff]  ;;  %v343_v21 = vld [vmem:[%s4664_s1 + $0x3d8] sm:$0xff] }
  0x21   : > { %v2106_v23 = vpack.c.bf16 %v326_v17, %v318_v15  ;;  %v1992_v24 = vpack.c.bf16 %v341_v19, %v333_v18  ;;  %v332_v25 = vld [vmem:[%s4664_s1 + $0x380] sm:$0xff]  ;;  %v334_v27 = vld [vmem:[%s4664_s1 + $0x390] sm:$0xff]  ;;  %v2108_v28 = vpack.c.bf16 %v343_v21, %v335_v20  ;;  %v349_v30 = vld [vmem:[%s4664_s1 + $0x408] sm:$0xff] }
  0x22   : > { %1983 = vmatpush1.bf16.msra.mxu0 %v1982_v62  ;;  %v340_v26 = vld [vmem:[%s4664_s1 + $0x3c0] sm:$0xff]  ;;  %v342_v29 = vld [vmem:[%s4664_s1 + $0x3d0] sm:$0xff]  ;;  %v357_v31 = vld [vmem:[%s4664_s1 + $0x448] sm:$0xff] }
  0x23   : > { %2099 = vmatpush1.bf16.msra.mxu1 %v2098_v63  ;;  %1985 = vmatprep.subr.bf16.mxu0 %v1984_v0  ;;  %v351_v32 = vld [vmem:[%s4664_s1 + $0x418] sm:$0xff]  ;;  %v1994_v34 = vpack.c.bf16 %v340_v26, %v332_v25  ;;  %v2110_v35 = vpack.c.bf16 %v342_v29, %v334_v27  ;;  %v1996_v36 = vpack.c.bf16 %v357_v31, %v349_v30  ;;  %v348_v37 = vld [vmem:[%s4664_s1 + $0x400] sm:$0xff]  ;;  %v350_v39 = vld [vmem:[%s4664_s1 + $0x410] sm:$0xff] }
  0x24   : > { %2101 = vmatprep.subr.bf16.mxu1 %v2100_v4  ;;  %v359_v33 = vld [vmem:[%s4664_s1 + $0x458] sm:$0xff]  ;;  %v356_v38 = vld [vmem:[%s4664_s1 + $0x440] sm:$0xff]  ;;  %v358_v41 = vld [vmem:[%s4664_s1 + $0x450] sm:$0xff] }
  0x25   : > { %v2112_v40 = vpack.c.bf16 %v359_v33, %v351_v32  ;;  %v365_v42 = vld [vmem:[%s4664_s1 + $0x488] sm:$0xff]  ;;  %v367_v44 = vld [vmem:[%s4664_s1 + $0x498] sm:$0xff]  ;;  %v1998_v47 = vpack.c.bf16 %v356_v38, %v348_v37  ;;  %v2114_v48 = vpack.c.bf16 %v358_v41, %v350_v39  ;;  %v364_v50 = vld [vmem:[%s4664_s1 + $0x480] sm:$0xff] }
  0x26   : > { %1987 = vmatpush1.bf16.msra.mxu0 %v1986_v10  ;;  %v373_v43 = vld [vmem:[%s4664_s1 + $0x4c8] sm:$0xff]  ;;  %v375_v45 = vld [vmem:[%s4664_s1 + $0x4d8] sm:$0xff]  ;;  %v372_v51 = vld [vmem:[%s4664_s1 + $0x4c0] sm:$0xff] }
  0x27   : > { %2103 = vmatpush1.bf16.msra.mxu1 %v2102_v11  ;;  %1989 = vmatprep.subr.bf16.mxu0 %v1988_v12  ;;  %v2000_v49 = vpack.c.bf16 %v373_v43, %v365_v42  ;;  %v366_v52 = vld [vmem:[%s4664_s1 + $0x490] sm:$0xff]  ;;  %v2116_v53 = vpack.c.bf16 %v375_v45, %v367_v44  ;;  %v381_v55 = vld [vmem:[%s4664_s1 + $0x508] sm:$0xff]  ;;  %v383_v57 = vld [vmem:[%s4664_s1 + $0x518] sm:$0xff]  ;;  %v2002_v60 = vpack.c.bf16 %v372_v51, %v364_v50 }
  0x28   : > { %2105 = vmatprep.subr.bf16.mxu1 %v2104_v16  ;;  %v374_v54 = vld [vmem:[%s4664_s1 + $0x4d0] sm:$0xff]  ;;  %v389_v56 = vld [vmem:[%s4664_s1 + $0x548] sm:$0xff]  ;;  %v391_v58 = vld [vmem:[%s4664_s1 + $0x558] sm:$0xff] }
  0x29   : > { %v2118_v61 = vpack.c.bf16 %v374_v54, %v366_v52  ;;  %v2004_v62 = vpack.c.bf16 %v389_v56, %v381_v55  ;;  %v380_v63 = vld [vmem:[%s4664_s1 + $0x500] sm:$0xff]  ;;  %v382_v1 = vld [vmem:[%s4664_s1 + $0x510] sm:$0xff]  ;;  %v2120_v2 = vpack.c.bf16 %v391_v58, %v383_v57  ;;  %v397_v4 = vld [vmem:[%s4664_s1 + $0x588] sm:$0xff] }
  0x2a   : > { %1991 = vmatpush1.bf16.msra.mxu0 %v1990_v22  ;;  %v388_v0 = vld [vmem:[%s4664_s1 + $0x540] sm:$0xff]  ;;  %v390_v3 = vld [vmem:[%s4664_s1 + $0x550] sm:$0xff]  ;;  %v405_v5 = vld [vmem:[%s4664_s1 + $0x5c8] sm:$0xff] }
  0x2b   : > { %2107 = vmatpush1.bf16.msra.mxu1 %v2106_v23  ;;  %1993 = vmatprep.subr.bf16.mxu0 %v1992_v24  ;;  %v399_v6 = vld [vmem:[%s4664_s1 + $0x598] sm:$0xff]  ;;  %v2006_v9 = vpack.c.bf16 %v388_v0, %v380_v63  ;;  %v396_v10 = vld [vmem:[%s4664_s1 + $0x580] sm:$0xff]  ;;  %v2122_v11 = vpack.c.bf16 %v390_v3, %v382_v1  ;;  %v2008_v12 = vpack.c.bf16 %v405_v5, %v397_v4  ;;  %v398_v14 = vld [vmem:[%s4664_s1 + $0x590] sm:$0xff] }
  0x2c   : > { %2109 = vmatprep.subr.bf16.mxu1 %v2108_v28  ;;  %v407_v7 = vld [vmem:[%s4664_s1 + $0x5d8] sm:$0xff]  ;;  %v404_v13 = vld [vmem:[%s4664_s1 + $0x5c0] sm:$0xff]  ;;  %v406_v15 = vld [vmem:[%s4664_s1 + $0x5d0] sm:$0xff] }
  0x2d   : > { %v2124_v16 = vpack.c.bf16 %v407_v7, %v399_v6  ;;  %v413_v17 = vld [vmem:[%s4664_s1 + $0x608] sm:$0xff]  ;;  %v3061_v19 = vld [vmem:[%s218_s25] sm:$0xf]  ;;  %v415_v20 = vld [vmem:[%s4664_s1 + $0x618] sm:$0xff]  ;;  %v2010_v23 = vpack.c.bf16 %v404_v13, %v396_v10  ;;  %v2126_v24 = vpack.c.bf16 %v406_v15, %v398_v14 }
  0x2e   : > { %1995 = vmatpush1.bf16.msra.mxu0 %v1994_v34  ;;  %v421_v18 = vld [vmem:[%s4664_s1 + $0x648] sm:$0xff]  ;;  %v423_v21 = vld [vmem:[%s4664_s1 + $0x658] sm:$0xff]  ;;  %v3072_v22 = vrot.slane %v3061_v19, %v692_v8  ;;  %v412_v26 = vld [vmem:[%s4664_s1 + $0x600] sm:$0xff] }
  0x2f   : > { %2111 = vmatpush1.bf16.msra.mxu1 %v2110_v35  ;;  %1997 = vmatprep.subr.bf16.mxu0 %v1996_v36  ;;  %v2012_v25 = vpack.c.bf16 %v421_v18, %v413_v17  ;;  %v420_v27 = vld [vmem:[%s4664_s1 + $0x640] sm:$0xff]  ;;  %v414_v28 = vld [vmem:[%s4664_s1 + $0x610] sm:$0xff]  ;;  %v2128_v29 = vpack.c.bf16 %v423_v21, %v415_v20  ;;  %v429_v31 = vld [vmem:[%s4664_s1 + $0x688] sm:$0xff]  ;;  %v700_v21 = vsub.s32 3, %v3012_v59 }
  0x30   : > { %2113 = vmatprep.subr.bf16.mxu1 %v2112_v40  ;;  %v422_v30 = vld [vmem:[%s4664_s1 + $0x650] sm:$0xff]  ;;  %v437_v32 = vld [vmem:[%s4664_s1 + $0x6c8] sm:$0xff]  ;;  %813 = vmatprep.mubr.f32.mxu0 %v3072_v22  ;;  %v431_v33 = vld [vmem:[%s4664_s1 + $0x698] sm:$0xff]  ;;  %v2014_v35 = vpack.c.bf16 %v420_v27, %v412_v26 }
  0x31   : > { %v439_v34 = vld [vmem:[%s4664_s1 + $0x6d8] sm:$0xff]  ;;  %955 = vmatprep.mubr.f32.mxu1 %v3072_v22  ;;  %v2130_v36 = vpack.c.bf16 %v422_v30, %v414_v28  ;;  %v2016_v37 = vpack.c.bf16 %v437_v32, %v429_v31  ;;  %v428_v38 = vld [vmem:[%s4664_s1 + $0x680] sm:$0xff]  ;;  %v430_v40 = vld [vmem:[%s4664_s1 + $0x690] sm:$0xff] }
  0x32   : > { %1999 = vmatpush1.bf16.msra.mxu0 %v1998_v47  ;;  %v436_v39 = vld [vmem:[%s4664_s1 + $0x6c0] sm:$0xff]  ;;  %v2132_v41 = vpack.c.bf16 %v439_v34, %v431_v33  ;;  %v438_v42 = vld [vmem:[%s4664_s1 + $0x6d0] sm:$0xff]  ;;  %v445_v43 = vld [vmem:[%s4664_s1 + $0x708] sm:$0xff] }
  0x33   : > { %2115 = vmatpush1.bf16.msra.mxu1 %v2114_v48  ;;  %2001 = vmatprep.subr.bf16.mxu0 %v2000_v49  ;;  %v453_v44 = vld [vmem:[%s4664_s1 + $0x748] sm:$0xff]  ;;  %v447_v45 = vld [vmem:[%s4664_s1 + $0x718] sm:$0xff]  ;;  %v2018_v47 = vpack.c.bf16 %v436_v39, %v428_v38  ;;  %v2134_v48 = vpack.c.bf16 %v438_v42, %v430_v40  ;;  %v444_v50 = vld [vmem:[%s4664_s1 + $0x700] sm:$0xff] }
  0x34   : > { %2117 = vmatprep.subr.bf16.mxu1 %v2116_v53  ;;  %v455_v46 = vld [vmem:[%s4664_s1 + $0x758] sm:$0xff]  ;;  %v2020_v49 = vpack.c.bf16 %v453_v44, %v445_v43  ;;  %v452_v51 = vld [vmem:[%s4664_s1 + $0x740] sm:$0xff]  ;;  %v446_v52 = vld [vmem:[%s4664_s1 + $0x710] sm:$0xff] }
  0x35   : > { %v2136_v53 = vpack.c.bf16 %v455_v46, %v447_v45  ;;  %v454_v54 = vld [vmem:[%s4664_s1 + $0x750] sm:$0xff]  ;;  %v461_v55 = vld [vmem:[%s4664_s1 + $0x788] sm:$0xff]  ;;  %v463_v57 = vld [vmem:[%s4664_s1 + $0x798] sm:$0xff] }
  0x36   : > { %2003 = vmatpush1.bf16.msra.mxu0 %v2002_v60  ;;  %v469_v56 = vld [vmem:[%s4664_s1 + $0x7c8] sm:$0xff]  ;;  %v471_v58 = vld [vmem:[%s4664_s1 + $0x7d8] sm:$0xff]  ;;  %v2022_v60 = vpack.c.bf16 %v452_v51, %v444_v50  ;;  %v460_v63 = vld [vmem:[%s4664_s1 + $0x780] sm:$0xff] }
  0x37   : > { %2119 = vmatpush1.bf16.msra.mxu1 %v2118_v61  ;;  %2005 = vmatprep.subr.bf16.mxu0 %v2004_v62  ;;  %v2138_v61 = vpack.c.bf16 %v454_v54, %v446_v52  ;;  %v2024_v62 = vpack.c.bf16 %v469_v56, %v461_v55  ;;  %v468_v0 = vld [vmem:[%s4664_s1 + $0x7c0] sm:$0xff]  ;;  %v462_v1 = vld [vmem:[%s4664_s1 + $0x790] sm:$0xff]  ;;  %v477_v4 = vld [vmem:[%s4664_s1 + $0x808] sm:$0xff] }
  0x38   : > { %2121 = vmatprep.subr.bf16.mxu1 %v2120_v2  ;;  %v2140_v2 = vpack.c.bf16 %v471_v58, %v463_v57  ;;  %v470_v3 = vld [vmem:[%s4664_s1 + $0x7d0] sm:$0xff]  ;;  %v485_v5 = vld [vmem:[%s4664_s1 + $0x848] sm:$0xff]  ;;  %v479_v6 = vld [vmem:[%s4664_s1 + $0x818] sm:$0xff]  ;;  %v2026_v10 = vpack.c.bf16 %v468_v0, %v460_v63 }
  0x39   : > { %v487_v7 = vld [vmem:[%s4664_s1 + $0x858] sm:$0xff]  ;;  %v476_v13 = vld [vmem:[%s4664_s1 + $0x800] sm:$0xff]  ;;  %v478_v15 = vld [vmem:[%s4664_s1 + $0x810] sm:$0xff] }
  0x3a   : > { %2007 = vmatpush1.bf16.msra.mxu0 %v2006_v9  ;;  %v688_v9 = vsub.s32 0, %v3012_v59  ;;  %v484_v14 = vld [vmem:[%s4664_s1 + $0x840] sm:$0xff]  ;;  %v486_v17 = vld [vmem:[%s4664_s1 + $0x850] sm:$0xff]  ;;  %v493_v18 = vld [vmem:[%s4664_s1 + $0x888] sm:$0xff] }
  0x3b   : > { %2123 = vmatpush1.bf16.msra.mxu1 %v2122_v11  ;;  %2009 = vmatprep.subr.bf16.mxu0 %v2008_v12  ;;  %v2142_v11 = vpack.c.bf16 %v470_v3, %v462_v1  ;;  %v2028_v12 = vpack.c.bf16 %v485_v5, %v477_v4  ;;  %v501_v20 = vld [vmem:[%s4664_s1 + $0x8c8] sm:$0xff]  ;;  %v2030_v26 = vpack.c.bf16 %v484_v14, %v476_v13  ;;  %v500_v30 = vld [vmem:[%s4664_s1 + $0x8c0] sm:$0xff]  ;;  %v494_v31 = vld [vmem:[%s4664_s1 + $0x890] sm:$0xff] }
  0x3c   : > { %2125 = vmatprep.subr.bf16.mxu1 %v2124_v16  ;;  %v2144_v16 = vpack.c.bf16 %v487_v7, %v479_v6  ;;  %v2146_v27 = vpack.c.bf16 %v486_v17, %v478_v15  ;;  %v2032_v28 = vpack.c.bf16 %v501_v20, %v493_v18  ;;  %v502_v33 = vld [vmem:[%s4664_s1 + $0x8d0] sm:$0xff]  ;;  %v509_v34 = vld [vmem:[%s4664_s1 + $0x908] sm:$0xff]  ;;  %v519_v38 = vld [vmem:[%s4664_s1 + $0x958] sm:$0xff] }
  0x3d   : > { %v2150_v40 = vpack.c.bf16 %v502_v33, %v494_v31  ;;  %v508_v42 = vld [vmem:[%s4664_s1 + $0x900] sm:$0xff]  ;;  %v510_v44 = vld [vmem:[%s4664_s1 + $0x910] sm:$0xff]  ;;  %v535_v50 = vld [vmem:[%s4664_s1 + $0x9d8] sm:$0xff] }
  0x3e   : > { %2011 = vmatpush1.bf16.msra.mxu0 %v2010_v23  ;;  %v3195_v23 = vrot.slane %v3061_v19, %v688_v9  ;;  %v516_v43 = vld [vmem:[%s4664_s1 + $0x940] sm:$0xff]  ;;  %v518_v46 = vld [vmem:[%s4664_s1 + $0x950] sm:$0xff]  ;;  %v551_v63 = vld [vmem:[%s4664_s1 + $0xa58] sm:$0xff] }
  0x3f   : > { %2127 = vmatpush1.bf16.msra.mxu1 %v2126_v24  ;;  %2013 = vmatprep.subr.bf16.mxu0 %v2012_v25  ;;  %v495_v24 = vld [vmem:[%s4664_s1 + $0x898] sm:$0xff]  ;;  %v2038_v51 = vpack.c.bf16 %v516_v43, %v508_v42  ;;  %v2154_v52 = vpack.c.bf16 %v518_v46, %v510_v44  ;;  %v524_v54 = vld [vmem:[%s4664_s1 + $0x980] sm:$0xff]  ;;  %v526_v56 = vld [vmem:[%s4664_s1 + $0x990] sm:$0xff] }
  0x40   : > { %2129 = vmatprep.subr.bf16.mxu1 %v2128_v29  ;;  %v503_v25 = vld [vmem:[%s4664_s1 + $0x8d8] sm:$0xff]  ;;  %v492_v29 = vld [vmem:[%s4664_s1 + $0x880] sm:$0xff]  ;;  %v534_v58 = vld [vmem:[%s4664_s1 + $0x9d0] sm:$0xff] }
  0x41   : > { %v2148_v32 = vpack.c.bf16 %v503_v25, %v495_v24  ;;  %v2034_v39 = vpack.c.bf16 %v500_v30, %v492_v29  ;;  %v532_v55 = vld [vmem:[%s4664_s1 + $0x9c0] sm:$0xff]  ;;  %v2158_v1 = vpack.c.bf16 %v534_v58, %v526_v56  ;;  %v542_v5 = vld [vmem:[%s4664_s1 + $0xa10] sm:$0xff]  ;;  %v567_v13 = vld [vmem:[%s4664_s1 + $0xad8] sm:$0xff] }
  0x42   : > { %2015 = vmatpush1.bf16.msra.mxu0 %v2014_v35  ;;  %v517_v35 = vld [vmem:[%s4664_s1 + $0x948] sm:$0xff]  ;;  %v2042_v0 = vpack.c.bf16 %v532_v55, %v524_v54  ;;  %v540_v3 = vld [vmem:[%s4664_s1 + $0xa00] sm:$0xff]  ;;  %v550_v7 = vld [vmem:[%s4664_s1 + $0xa50] sm:$0xff] }
  0x43   : > { %2131 = vmatpush1.bf16.msra.mxu1 %v2130_v36  ;;  %2017 = vmatprep.subr.bf16.mxu0 %v2016_v37  ;;  %v3224_v36 = vrot.slane %v3061_v19, %v700_v21  ;;  %v511_v37 = vld [vmem:[%s4664_s1 + $0x918] sm:$0xff]  ;;  %v548_v4 = vld [vmem:[%s4664_s1 + $0xa40] sm:$0xff]  ;;  %v2162_v15 = vpack.c.bf16 %v550_v7, %v542_v5  ;;  %v558_v20 = vld [vmem:[%s4664_s1 + $0xa90] sm:$0xff] }
  0x44   : > { %2133 = vmatprep.subr.bf16.mxu1 %v2132_v41  ;;  %v2036_v41 = vpack.c.bf16 %v517_v35, %v509_v34  ;;  %v2152_v45 = vpack.c.bf16 %v519_v38, %v511_v37  ;;  %v2046_v14 = vpack.c.bf16 %v548_v4, %v540_v3  ;;  %v556_v17 = vld [vmem:[%s4664_s1 + $0xa80] sm:$0xff]  ;;  %v566_v25 = vld [vmem:[%s4664_s1 + $0xad0] sm:$0xff]  ;;  %v583_v29 = vld [vmem:[%s4664_s1 + $0xb58] sm:$0xff] }
  0x45   : > { %v564_v18 = vld [vmem:[%s4664_s1 + $0xac0] sm:$0xff]  ;;  %v2166_v31 = vpack.c.bf16 %v566_v25, %v558_v20  ;;  %v574_v35 = vld [vmem:[%s4664_s1 + $0xb10] sm:$0xff]  ;;  %v599_v42 = vld [vmem:[%s4664_s1 + $0xbd8] sm:$0xff] }
  0x46   : > { %2019 = vmatpush1.bf16.msra.mxu0 %v2018_v47  ;;  %v525_v47 = vld [vmem:[%s4664_s1 + $0x988] sm:$0xff]  ;;  %v2050_v30 = vpack.c.bf16 %v564_v18, %v556_v17  ;;  %v572_v33 = vld [vmem:[%s4664_s1 + $0xb00] sm:$0xff]  ;;  %v582_v38 = vld [vmem:[%s4664_s1 + $0xb50] sm:$0xff] }
  0x47   : > { %2135 = vmatpush1.bf16.msra.mxu1 %v2134_v48  ;;  %2021 = vmatprep.subr.bf16.mxu0 %v2020_v49  ;;  %v533_v48 = vld [vmem:[%s4664_s1 + $0x9c8] sm:$0xff]  ;;  %v527_v49 = vld [vmem:[%s4664_s1 + $0x998] sm:$0xff]  ;;  %v580_v34 = vld [vmem:[%s4664_s1 + $0xb40] sm:$0xff]  ;;  %v2170_v44 = vpack.c.bf16 %v582_v38, %v574_v35 }
  0x48   : > { %2137 = vmatprep.subr.bf16.mxu1 %v2136_v53  ;;  %v2040_v53 = vpack.c.bf16 %v533_v48, %v525_v47  ;;  %v2156_v57 = vpack.c.bf16 %v535_v50, %v527_v49  ;;  %v2054_v43 = vpack.c.bf16 %v580_v34, %v572_v33  ;;  %v588_v46 = vld [vmem:[%s4664_s1 + $0xb80] sm:$0xff]  ;;  %v590_v48 = vld [vmem:[%s4664_s1 + $0xb90] sm:$0xff]  ;;  %v615_v54 = vld [vmem:[%s4664_s1 + $0xc58] sm:$0xff] }
  0x49   : > { %v596_v47 = vld [vmem:[%s4664_s1 + $0xbc0] sm:$0xff]  ;;  %v598_v50 = vld [vmem:[%s4664_s1 + $0xbd0] sm:$0xff]  ;;  %v631_v3 = vld [vmem:[%s4664_s1 + $0xcd8] sm:$0xff] }
  0x4a   : > { %2023 = vmatpush1.bf16.msra.mxu0 %v2022_v60  ;;  %v541_v60 = vld [vmem:[%s4664_s1 + $0xa08] sm:$0xff]  ;;  %v2058_v55 = vpack.c.bf16 %v596_v47, %v588_v46  ;;  %v2174_v56 = vpack.c.bf16 %v598_v50, %v590_v48  ;;  %v604_v58 = vld [vmem:[%s4664_s1 + $0xc00] sm:$0xff]  ;;  %v647_v17 = vld [vmem:[%s4664_s1 + $0xd58] sm:$0xff] }
  0x4b   : > { %2139 = vmatpush1.bf16.msra.mxu1 %v2138_v61  ;;  %2025 = vmatprep.subr.bf16.mxu0 %v2024_v62  ;;  %v549_v61 = vld [vmem:[%s4664_s1 + $0xa48] sm:$0xff]  ;;  %v543_v62 = vld [vmem:[%s4664_s1 + $0xa18] sm:$0xff]  ;;  %v620_v7 = vld [vmem:[%s4664_s1 + $0xc80] sm:$0xff] }
  0x4c   : > { %2141 = vmatprep.subr.bf16.mxu1 %v2140_v2  ;;  %v2044_v2 = vpack.c.bf16 %v549_v61, %v541_v60  ;;  %v2160_v6 = vpack.c.bf16 %v551_v63, %v543_v62  ;;  %v612_v60 = vld [vmem:[%s4664_s1 + $0xc40] sm:$0xff]  ;;  %v606_v61 = vld [vmem:[%s4664_s1 + $0xc10] sm:$0xff]  ;;  %v663_v33 = vld [vmem:[%s4664_s1 + $0xdd8] sm:$0xff] }
  0x4d   : > { %v614_v63 = vld [vmem:[%s4664_s1 + $0xc50] sm:$0xff]  ;;  %v2062_v4 = vpack.c.bf16 %v612_v60, %v604_v58  ;;  %v636_v25 = vld [vmem:[%s4664_s1 + $0xd00] sm:$0xff]  ;;  %v679_v46 = vld [vmem:[%s4664_s1 + $0xe58] sm:$0xff] }
  0x4e   : > { %2027 = vmatpush1.bf16.msra.mxu0 %v2026_v10  ;;  %v557_v10 = vld [vmem:[%s4664_s1 + $0xa88] sm:$0xff]  ;;  %v2178_v5 = vpack.c.bf16 %v614_v63, %v606_v61  ;;  %v652_v38 = vld [vmem:[%s4664_s1 + $0xd80] sm:$0xff]  ;;  %v227_v58 = vld [vmem:[%s4664_s1 + $0x38] sm:$0xff] }
  0x4f   : > { %2143 = vmatpush1.bf16.msra.mxu1 %v2142_v11  ;;  %2029 = vmatprep.subr.bf16.mxu0 %v2028_v12  ;;  %v565_v11 = vld [vmem:[%s4664_s1 + $0xac8] sm:$0xff]  ;;  %v559_v12 = vld [vmem:[%s4664_s1 + $0xa98] sm:$0xff]  ;;  %v668_v50 = vld [vmem:[%s4664_s1 + $0xe00] sm:$0xff] }
  0x50   : > { %2145 = vmatprep.subr.bf16.mxu1 %v2144_v16  ;;  %v2048_v16 = vpack.c.bf16 %v565_v11, %v557_v10  ;;  %v2164_v24 = vpack.c.bf16 %v567_v13, %v559_v12  ;;  %v628_v10 = vld [vmem:[%s4664_s1 + $0xcc0] sm:$0xff]  ;;  %v622_v11 = vld [vmem:[%s4664_s1 + $0xc90] sm:$0xff]  ;;  %v235_v60 = vld [vmem:[%s4664_s1 + $0x78] sm:$0xff] }
  0x51   : > { %814 = vmatmul.mubr.f32.vlgmr.msra.gmra.mrb[0].mxu0 %v3195_v23  ;;  %v630_v13 = vld [vmem:[%s4664_s1 + $0xcd0] sm:$0xff]  ;;  %v2066_v18 = vpack.c.bf16 %v628_v10, %v620_v7  ;;  %v243_v10 = vld [vmem:[%s4664_s1 + $0xb8] sm:$0xff] }
  0x52   : > { %2031 = vmatpush1.bf16.msra.mxu0 %v2030_v26  ;;  %956 = vmatmul.mubr.f32.vlgmr.msra.gmra.mrb[0].mxu1 %v3195_v23  ;;  %v573_v26 = vld [vmem:[%s4664_s1 + $0xb08] sm:$0xff]  ;;  %v2182_v20 = vpack.c.bf16 %v630_v13, %v622_v11  ;;  %v251_v11 = vld [vmem:[%s4664_s1 + $0xf8] sm:$0xff] }
  0x53   : > { %2147 = vmatpush1.bf16.msra.mxu1 %v2146_v27  ;;  %2033 = vmatprep.subr.bf16.mxu0 %v2032_v28  ;;  %v581_v27 = vld [vmem:[%s4664_s1 + $0xb48] sm:$0xff]  ;;  %v575_v28 = vld [vmem:[%s4664_s1 + $0xb18] sm:$0xff] }
  0x54   : > { %2149 = vmatprep.subr.bf16.mxu1 %v2148_v32  ;;  %1817 = vmatprep.mubr.msk.f32.mxu0 %vm746_vm0, %v3224_v36  ;;  %v2052_v32 = vpack.c.bf16 %v581_v27, %v573_v26  ;;  %v2168_v37 = vpack.c.bf16 %v583_v29, %v575_v28  ;;  %v644_v26 = vld [vmem:[%s4664_s1 + $0xd40] sm:$0xff]  ;;  %v638_v27 = vld [vmem:[%s4664_s1 + $0xd10] sm:$0xff] }
  0x55   : > { %1818 = vmatprep.mubr.msk.f32.mxu1 %vm746_vm0, %v3224_v36  ;;  %v646_v29 = vld [vmem:[%s4664_s1 + $0xd50] sm:$0xff]  ;;  %v2070_v34 = vpack.c.bf16 %v644_v26, %v636_v25  ;;  %v259_v25 = vld [vmem:[%s4664_s1 + $0x138] sm:$0xff] }
  0x56   : > { %2035 = vmatpush1.bf16.msra.mxu0 %v2034_v39  ;;  %v589_v39 = vld [vmem:[%s4664_s1 + $0xb88] sm:$0xff]  ;;  %v2186_v35 = vpack.c.bf16 %v646_v29, %v638_v27  ;;  %v267_v26 = vld [vmem:[%s4664_s1 + $0x178] sm:$0xff] }
  0x57   : > { %2151 = vmatpush1.bf16.msra.mxu1 %v2150_v40  ;;  %2037 = vmatprep.subr.bf16.mxu0 %v2036_v41  ;;  %v597_v40 = vld [vmem:[%s4664_s1 + $0xbc8] sm:$0xff]  ;;  %v591_v41 = vld [vmem:[%s4664_s1 + $0xb98] sm:$0xff] }
  0x58   : > { %2153 = vmatprep.subr.bf16.mxu1 %v2152_v45  ;;  %v2056_v45 = vpack.c.bf16 %v597_v40, %v589_v39  ;;  %v2172_v49 = vpack.c.bf16 %v599_v42, %v591_v41  ;;  %v660_v39 = vld [vmem:[%s4664_s1 + $0xdc0] sm:$0xff]  ;;  %v654_v40 = vld [vmem:[%s4664_s1 + $0xd90] sm:$0xff] }
  0x59   : > { %v662_v42 = vld [vmem:[%s4664_s1 + $0xdd0] sm:$0xff]  ;;  %v2074_v47 = vpack.c.bf16 %v660_v39, %v652_v38  ;;  %v275_v38 = vld [vmem:[%s4664_s1 + $0x1b8] sm:$0xff] }
  0x5a   : > { %2039 = vmatpush1.bf16.msra.mxu0 %v2038_v51  ;;  %v605_v51 = vld [vmem:[%s4664_s1 + $0xc08] sm:$0xff]  ;;  %v2190_v48 = vpack.c.bf16 %v662_v42, %v654_v40  ;;  %v283_v39 = vld [vmem:[%s4664_s1 + $0x1f8] sm:$0xff] }
  0x5b   : > { %2155 = vmatpush1.bf16.msra.mxu1 %v2154_v52  ;;  %2041 = vmatprep.subr.bf16.mxu0 %v2040_v53  ;;  %v613_v52 = vld [vmem:[%s4664_s1 + $0xc48] sm:$0xff]  ;;  %v607_v53 = vld [vmem:[%s4664_s1 + $0xc18] sm:$0xff] }
  0x5c   : > { %2157 = vmatprep.subr.bf16.mxu1 %v2156_v57  ;;  %v2060_v57 = vpack.c.bf16 %v613_v52, %v605_v51  ;;  %v2176_v62 = vpack.c.bf16 %v615_v54, %v607_v53  ;;  %v676_v51 = vld [vmem:[%s4664_s1 + $0xe40] sm:$0xff]  ;;  %v670_v52 = vld [vmem:[%s4664_s1 + $0xe10] sm:$0xff] }
  0x5d   : > { %v678_v54 = vld [vmem:[%s4664_s1 + $0xe50] sm:$0xff]  ;;  %v2078_v61 = vpack.c.bf16 %v676_v51, %v668_v50  ;;  %v299_v50 = vld [vmem:[%s4664_s1 + $0x278] sm:$0xff] }
  0x5e   : > { %2043 = vmatpush1.bf16.msra.mxu0 %v2042_v0  ;;  %v621_v0 = vld [vmem:[%s4664_s1 + $0xc88] sm:$0xff] }
  0x5f   : > { %2159 = vmatpush1.bf16.msra.mxu1 %v2158_v1  ;;  %2045 = vmatprep.subr.bf16.mxu0 %v2044_v2  ;;  %v629_v1 = vld [vmem:[%s4664_s1 + $0xcc8] sm:$0xff]  ;;  %v623_v2 = vld [vmem:[%s4664_s1 + $0xc98] sm:$0xff] }
  0x60   : > { %2161 = vmatprep.subr.bf16.mxu1 %v2160_v6  ;;  %v2064_v6 = vpack.c.bf16 %v629_v1, %v621_v0  ;;  %v2180_v12 = vpack.c.bf16 %v631_v3, %v623_v2  ;;  %v224_v0 = vld [vmem:[%s4664_s1 + $0x20] sm:$0xff]  ;;  %v226_v2 = vld [vmem:[%s4664_s1 + $0x30] sm:$0xff]  ;;  %v2312_v3 = vpack.c.bf16 %v235_v60, %v227_v58 }
  0x61   : > { %v232_v1 = vld [vmem:[%s4664_s1 + $0x60] sm:$0xff]  ;;  %v298_v60 = vld [vmem:[%s4664_s1 + $0x270] sm:$0xff] }
  0x62   : > { %2047 = vmatpush1.bf16.msra.mxu0 %v2046_v14  ;;  %v637_v14 = vld [vmem:[%s4664_s1 + $0xd08] sm:$0xff] }
  0x63   : > { %2163 = vmatpush1.bf16.msra.mxu1 %v2162_v15  ;;  %2049 = vmatprep.subr.bf16.mxu0 %v2048_v16  ;;  %v645_v15 = vld [vmem:[%s4664_s1 + $0xd48] sm:$0xff]  ;;  %v639_v16 = vld [vmem:[%s4664_s1 + $0xd18] sm:$0xff] }
  0x64   : > { %2165 = vmatprep.subr.bf16.mxu1 %v2164_v24  ;;  %v2068_v24 = vpack.c.bf16 %v645_v15, %v637_v14  ;;  %v2184_v28 = vpack.c.bf16 %v647_v17, %v639_v16  ;;  %v240_v15 = vld [vmem:[%s4664_s1 + $0xa0] sm:$0xff]  ;;  %v242_v16 = vld [vmem:[%s4664_s1 + $0xb0] sm:$0xff]  ;;  %v2316_v17 = vpack.c.bf16 %v251_v11, %v243_v10 }
  0x65   : > { %v314_v11 = vld [vmem:[%s4664_s1 + $0x2f0] sm:$0xff] }
  0x66   : > { %2051 = vmatpush1.bf16.msra.mxu0 %v2050_v30  ;;  %v653_v30 = vld [vmem:[%s4664_s1 + $0xd88] sm:$0xff] }
  0x67   : > { %2167 = vmatpush1.bf16.msra.mxu1 %v2166_v31  ;;  %2053 = vmatprep.subr.bf16.mxu0 %v2052_v32  ;;  %v661_v31 = vld [vmem:[%s4664_s1 + $0xdc8] sm:$0xff]  ;;  %v655_v32 = vld [vmem:[%s4664_s1 + $0xd98] sm:$0xff] }
  0x68   : > { %2169 = vmatprep.subr.bf16.mxu1 %v2168_v37  ;;  %v2072_v37 = vpack.c.bf16 %v661_v31, %v653_v30  ;;  %v2188_v41 = vpack.c.bf16 %v663_v33, %v655_v32  ;;  %v256_v30 = vld [vmem:[%s4664_s1 + $0x120] sm:$0xff]  ;;  %v258_v32 = vld [vmem:[%s4664_s1 + $0x130] sm:$0xff]  ;;  %v2320_v33 = vpack.c.bf16 %v267_v26, %v259_v25 }
  0x69   : > { %v264_v31 = vld [vmem:[%s4664_s1 + $0x160] sm:$0xff]  ;;  %v330_v26 = vld [vmem:[%s4664_s1 + $0x370] sm:$0xff] }
  0x6a   : > { %2055 = vmatpush1.bf16.msra.mxu0 %v2054_v43  ;;  %v669_v43 = vld [vmem:[%s4664_s1 + $0xe08] sm:$0xff]  ;;  %v2206_v40 = vpack.c.bf16 %v264_v31, %v256_v30  ;;  %v347_v30 = vld [vmem:[%s4664_s1 + $0x3f8] sm:$0xff] }
  0x6b   : > { %2171 = vmatpush1.bf16.msra.mxu1 %v2170_v44  ;;  %2057 = vmatprep.subr.bf16.mxu0 %v2056_v45  ;;  %v677_v44 = vld [vmem:[%s4664_s1 + $0xe48] sm:$0xff]  ;;  %v671_v45 = vld [vmem:[%s4664_s1 + $0xe18] sm:$0xff] }
  0x6c   : > { %2173 = vmatprep.subr.bf16.mxu1 %v2172_v49  ;;  %v2076_v49 = vpack.c.bf16 %v677_v44, %v669_v43  ;;  %v2192_v53 = vpack.c.bf16 %v679_v46, %v671_v45  ;;  %v272_v43 = vld [vmem:[%s4664_s1 + $0x1a0] sm:$0xff]  ;;  %v274_v45 = vld [vmem:[%s4664_s1 + $0x1b0] sm:$0xff] }
  0x6d   : > { %v280_v44 = vld [vmem:[%s4664_s1 + $0x1e0] sm:$0xff]  ;;  %v282_v46 = vld [vmem:[%s4664_s1 + $0x1f0] sm:$0xff] }
  0x6e   : > { %2059 = vmatpush1.bf16.msra.mxu0 %v2058_v55  ;;  %v225_v55 = vld [vmem:[%s4664_s1 + $0x28] sm:$0xff]  ;;  %v2210_v51 = vpack.c.bf16 %v280_v44, %v272_v43  ;;  %v363_v43 = vld [vmem:[%s4664_s1 + $0x478] sm:$0xff] }
  0x6f   : > { %2175 = vmatpush1.bf16.msra.mxu1 %v2174_v56  ;;  %2061 = vmatprep.subr.bf16.mxu0 %v2060_v57  ;;  %v233_v56 = vld [vmem:[%s4664_s1 + $0x68] sm:$0xff]  ;;  %v696_v57 = vsub.s32 2, %v3012_v59 }
  0x70   : > { %2177 = vmatprep.subr.bf16.mxu1 %v2176_v62  ;;  %v2194_v62 = vpack.c.bf16 %v678_v54, %v670_v52  ;;  %v2196_v63 = vpack.c.bf16 %v233_v56, %v225_v55  ;;  %v2326_v52 = vpack.c.bf16 %v282_v46, %v274_v45  ;;  %v288_v54 = vld [vmem:[%s4664_s1 + $0x220] sm:$0xff]  ;;  %v290_v56 = vld [vmem:[%s4664_s1 + $0x230] sm:$0xff] }
  0x71   : > { %v3524_v7 = vrot.slane %v3061_v19, %v696_v57  ;;  %v248_v19 = vld [vmem:[%s4664_s1 + $0xe0] sm:$0xff] }
  0x72   : > { %2063 = vmatpush1.bf16.msra.mxu0 %v2062_v4  ;;  %v234_v4 = vld [vmem:[%s4664_s1 + $0x70] sm:$0xff]  ;;  %v2202_v27 = vpack.c.bf16 %v248_v19, %v240_v15  ;;  %v296_v55 = vld [vmem:[%s4664_s1 + $0x260] sm:$0xff]  ;;  %v331_v15 = vld [vmem:[%s4664_s1 + $0x378] sm:$0xff] }
  0x73   : > { %2179 = vmatpush1.bf16.msra.mxu1 %v2178_v5  ;;  %2065 = vmatprep.subr.bf16.mxu0 %v2064_v6  ;;  %v241_v5 = vld [vmem:[%s4664_s1 + $0xa8] sm:$0xff]  ;;  %v2314_v13 = vpack.c.bf16 %v234_v4, %v226_v2  ;;  %v2330_v2 = vpack.c.bf16 %v298_v60, %v290_v56  ;;  %v304_v4 = vld [vmem:[%s4664_s1 + $0x2a0] sm:$0xff] }
  0x74   : > { %2181 = vmatprep.subr.bf16.mxu1 %v2180_v12  ;;  %v249_v6 = vld [vmem:[%s4664_s1 + $0xe8] sm:$0xff]  ;;  %v2198_v12 = vpack.c.bf16 %v232_v1, %v224_v0  ;;  %v315_v0 = vld [vmem:[%s4664_s1 + $0x2f8] sm:$0xff]  ;;  %v2214_v1 = vpack.c.bf16 %v296_v55, %v288_v54  ;;  %v352_v46 = vld [vmem:[%s4664_s1 + $0x420] sm:$0xff] }
  0x75   : > { %v2200_v14 = vpack.c.bf16 %v249_v6, %v241_v5  ;;  %v312_v5 = vld [vmem:[%s4664_s1 + $0x2e0] sm:$0xff]  ;;  %v306_v6 = vld [vmem:[%s4664_s1 + $0x2b0] sm:$0xff]  ;;  %v379_v54 = vld [vmem:[%s4664_s1 + $0x4f8] sm:$0xff] }
  0x76   : > { %2067 = vmatpush1.bf16.msra.mxu0 %v2066_v18  ;;  %v250_v18 = vld [vmem:[%s4664_s1 + $0xf0] sm:$0xff]  ;;  %v2218_v19 = vpack.c.bf16 %v312_v5, %v304_v4  ;;  %v368_v60 = vld [vmem:[%s4664_s1 + $0x4a0] sm:$0xff]  ;;  %v395_v4 = vld [vmem:[%s4664_s1 + $0x578] sm:$0xff] }
  0x77   : > { %2183 = vmatpush1.bf16.msra.mxu1 %v2182_v20  ;;  %2069 = vmatprep.subr.bf16.mxu0 %v2068_v24  ;;  %v257_v20 = vld [vmem:[%s4664_s1 + $0x128] sm:$0xff] }
  0x78   : > { %2185 = vmatprep.subr.bf16.mxu1 %v2184_v28  ;;  %v265_v24 = vld [vmem:[%s4664_s1 + $0x168] sm:$0xff]  ;;  %v2318_v28 = vpack.c.bf16 %v250_v18, %v242_v16  ;;  %v2334_v16 = vpack.c.bf16 %v314_v11, %v306_v6  ;;  %v320_v18 = vld [vmem:[%s4664_s1 + $0x320] sm:$0xff] }
  0x79   : > { %v2204_v29 = vpack.c.bf16 %v265_v24, %v257_v20  ;;  %v328_v20 = vld [vmem:[%s4664_s1 + $0x360] sm:$0xff]  ;;  %v322_v24 = vld [vmem:[%s4664_s1 + $0x330] sm:$0xff] }
  0x7a   : > { %2071 = vmatpush1.bf16.msra.mxu0 %v2070_v34  ;;  %v266_v34 = vld [vmem:[%s4664_s1 + $0x170] sm:$0xff]  ;;  %v2222_v31 = vpack.c.bf16 %v328_v20, %v320_v18  ;;  %v384_v11 = vld [vmem:[%s4664_s1 + $0x520] sm:$0xff]  ;;  %v411_v18 = vld [vmem:[%s4664_s1 + $0x5f8] sm:$0xff] }
  0x7b   : > { %2187 = vmatpush1.bf16.msra.mxu1 %v2186_v35  ;;  %2073 = vmatprep.subr.bf16.mxu0 %v2072_v37  ;;  %v273_v35 = vld [vmem:[%s4664_s1 + $0x1a8] sm:$0xff] }
  0x7c   : > { %2189 = vmatprep.subr.bf16.mxu1 %v2188_v41  ;;  %v281_v37 = vld [vmem:[%s4664_s1 + $0x1e8] sm:$0xff]  ;;  %v2322_v41 = vpack.c.bf16 %v266_v34, %v258_v32  ;;  %v2338_v32 = vpack.c.bf16 %v330_v26, %v322_v24  ;;  %v336_v34 = vld [vmem:[%s4664_s1 + $0x3a0] sm:$0xff] }
  0x7d   : > { %v2208_v42 = vpack.c.bf16 %v281_v37, %v273_v35  ;;  %v344_v35 = vld [vmem:[%s4664_s1 + $0x3e0] sm:$0xff]  ;;  %v338_v37 = vld [vmem:[%s4664_s1 + $0x3b0] sm:$0xff] }
  0x7e   : > { %2075 = vmatpush1.bf16.msra.mxu0 %v2074_v47  ;;  %v289_v47 = vld [vmem:[%s4664_s1 + $0x228] sm:$0xff]  ;;  %v2226_v44 = vpack.c.bf16 %v344_v35, %v336_v34  ;;  %v400_v26 = vld [vmem:[%s4664_s1 + $0x5a0] sm:$0xff]  ;;  %v427_v34 = vld [vmem:[%s4664_s1 + $0x678] sm:$0xff] }
  0x7f   : > { %2191 = vmatpush1.bf16.msra.mxu1 %v2190_v48  ;;  %2077 = vmatprep.subr.bf16.mxu0 %v2076_v49  ;;  %v297_v48 = vld [vmem:[%s4664_s1 + $0x268] sm:$0xff]  ;;  %v291_v49 = vld [vmem:[%s4664_s1 + $0x238] sm:$0xff] }
  0x80   : > { %2193 = vmatprep.subr.bf16.mxu1 %v2192_v53  ;;  %v2212_v53 = vpack.c.bf16 %v297_v48, %v289_v47  ;;  %v2328_v58 = vpack.c.bf16 %v299_v50, %v291_v49  ;;  %v360_v47 = vld [vmem:[%s4664_s1 + $0x460] sm:$0xff]  ;;  %v354_v48 = vld [vmem:[%s4664_s1 + $0x430] sm:$0xff] }
  0x81   : > { %v362_v50 = vld [vmem:[%s4664_s1 + $0x470] sm:$0xff]  ;;  %v2230_v55 = vpack.c.bf16 %v360_v47, %v352_v46  ;;  %v443_v46 = vld [vmem:[%s4664_s1 + $0x6f8] sm:$0xff] }
  0x82   : > { %2079 = vmatpush1.bf16.msra.mxu0 %v2078_v61  ;;  %v305_v61 = vld [vmem:[%s4664_s1 + $0x2a8] sm:$0xff]  ;;  %v2346_v56 = vpack.c.bf16 %v362_v50, %v354_v48  ;;  %v432_v50 = vld [vmem:[%s4664_s1 + $0x6a0] sm:$0xff] }
  0x83   : > { %2195 = vmatpush1.bf16.msra.mxu1 %v2194_v62  ;;  %2197 = vmatprep.subr.bf16.mxu0 %v2196_v63  ;;  %v313_v62 = vld [vmem:[%s4664_s1 + $0x2e8] sm:$0xff]  ;;  %v307_v63 = vld [vmem:[%s4664_s1 + $0x2b8] sm:$0xff] }
  0x84   : > { %2313 = vmatprep.subr.bf16.mxu1 %v2312_v3  ;;  %v2216_v3 = vpack.c.bf16 %v313_v62, %v305_v61  ;;  %v2332_v10 = vpack.c.bf16 %v315_v0, %v307_v63  ;;  %v376_v61 = vld [vmem:[%s4664_s1 + $0x4e0] sm:$0xff]  ;;  %v370_v62 = vld [vmem:[%s4664_s1 + $0x4b0] sm:$0xff] }
  0x85   : > { %885 = vmatmul.mubr.f32.vlgmr.msra.gmra.mrb[0].mxu0 %v3524_v7  ;;  %v378_v0 = vld [vmem:[%s4664_s1 + $0x4f0] sm:$0xff]  ;;  %v2234_v5 = vpack.c.bf16 %v376_v61, %v368_v60  ;;  %v459_v60 = vld [vmem:[%s4664_s1 + $0x778] sm:$0xff] }
  0x86   : > { %1027 = vmatmul.mubr.f32.vlgmr.msra.gmra.mrb[0].mxu1 %v3524_v7  ;;  %2199 = vmatpush1.bf16.msra.mxu0 %v2198_v12  ;;  %v321_v12 = vld [vmem:[%s4664_s1 + $0x328] sm:$0xff]  ;;  %v2350_v6 = vpack.c.bf16 %v378_v0, %v370_v62  ;;  %v448_v0 = vld [vmem:[%s4664_s1 + $0x720] sm:$0xff] }
  0x87   : > { %2315 = vmatpush1.bf16.msra.mxu1 %v2314_v13  ;;  %2201 = vmatprep.subr.bf16.mxu0 %v2200_v14  ;;  %v329_v13 = vld [vmem:[%s4664_s1 + $0x368] sm:$0xff]  ;;  %v323_v14 = vld [vmem:[%s4664_s1 + $0x338] sm:$0xff] }
  0x88   : > { %2317 = vmatprep.subr.bf16.mxu1 %v2316_v17  ;;  %1097 = vmatprep.mubr.f32.mxu0 %v3072_v22  ;;  %v2220_v17 = vpack.c.bf16 %v329_v13, %v321_v12  ;;  %v2336_v25 = vpack.c.bf16 %v331_v15, %v323_v14  ;;  %v392_v12 = vld [vmem:[%s4664_s1 + $0x560] sm:$0xff]  ;;  %v386_v13 = vld [vmem:[%s4664_s1 + $0x530] sm:$0xff] }
  0x89   : > { %1239 = vmatprep.mubr.f32.mxu1 %v3072_v22  ;;  %v2324_v22 = vpack.c.bf16 %v283_v39, %v275_v38  ;;  %v346_v39 = vld [vmem:[%s4664_s1 + $0x3f0] sm:$0xff]  ;;  %v2238_v20 = vpack.c.bf16 %v392_v12, %v384_v11  ;;  %v475_v11 = vld [vmem:[%s4664_s1 + $0x7f8] sm:$0xff] }
  0x8a   : > { %2203 = vmatpush1.bf16.msra.mxu0 %v2202_v27  ;;  %v337_v27 = vld [vmem:[%s4664_s1 + $0x3a8] sm:$0xff]  ;;  %v2342_v45 = vpack.c.bf16 %v346_v39, %v338_v37  ;;  %v394_v15 = vld [vmem:[%s4664_s1 + $0x570] sm:$0xff]  ;;  %v416_v39 = vld [vmem:[%s4664_s1 + $0x620] sm:$0xff] }
  0x8b   : > { %2319 = vmatpush1.bf16.msra.mxu1 %v2318_v28  ;;  %2205 = vmatprep.subr.bf16.mxu0 %v2204_v29  ;;  %v345_v28 = vld [vmem:[%s4664_s1 + $0x3e8] sm:$0xff]  ;;  %v339_v29 = vld [vmem:[%s4664_s1 + $0x3b8] sm:$0xff]  ;;  %v2354_v24 = vpack.c.bf16 %v394_v15, %v386_v13  ;;  %v464_v15 = vld [vmem:[%s4664_s1 + $0x7a0] sm:$0xff] }
  0x8c   : > { %2321 = vmatprep.subr.bf16.mxu1 %v2320_v33  ;;  %v2224_v33 = vpack.c.bf16 %v345_v28, %v337_v27  ;;  %v2340_v38 = vpack.c.bf16 %v347_v30, %v339_v29  ;;  %v408_v27 = vld [vmem:[%s4664_s1 + $0x5e0] sm:$0xff]  ;;  %v402_v28 = vld [vmem:[%s4664_s1 + $0x5b0] sm:$0xff] }
  0x8d   : > { %v410_v30 = vld [vmem:[%s4664_s1 + $0x5f0] sm:$0xff]  ;;  %v2242_v35 = vpack.c.bf16 %v408_v27, %v400_v26  ;;  %v491_v26 = vld [vmem:[%s4664_s1 + $0x878] sm:$0xff] }
  0x8e   : > { %2207 = vmatpush1.bf16.msra.mxu0 %v2206_v40  ;;  %v353_v40 = vld [vmem:[%s4664_s1 + $0x428] sm:$0xff]  ;;  %v2358_v37 = vpack.c.bf16 %v410_v30, %v402_v28  ;;  %v480_v30 = vld [vmem:[%s4664_s1 + $0x820] sm:$0xff] }
  0x8f   : > { %2323 = vmatpush1.bf16.msra.mxu1 %v2322_v41  ;;  %2209 = vmatprep.subr.bf16.mxu0 %v2208_v42  ;;  %v361_v41 = vld [vmem:[%s4664_s1 + $0x468] sm:$0xff]  ;;  %v355_v42 = vld [vmem:[%s4664_s1 + $0x438] sm:$0xff] }
  0x90   : > { %2325 = vmatprep.subr.bf16.mxu1 %v2324_v22  ;;  %v2228_v22 = vpack.c.bf16 %v361_v41, %v353_v40  ;;  %v2344_v49 = vpack.c.bf16 %v363_v43, %v355_v42  ;;  %v424_v40 = vld [vmem:[%s4664_s1 + $0x660] sm:$0xff]  ;;  %v418_v41 = vld [vmem:[%s4664_s1 + $0x630] sm:$0xff] }
  0x91   : > { %v426_v43 = vld [vmem:[%s4664_s1 + $0x670] sm:$0xff]  ;;  %v2246_v47 = vpack.c.bf16 %v424_v40, %v416_v39  ;;  %v507_v39 = vld [vmem:[%s4664_s1 + $0x8f8] sm:$0xff] }
  0x92   : > { %2211 = vmatpush1.bf16.msra.mxu0 %v2210_v51  ;;  %v369_v51 = vld [vmem:[%s4664_s1 + $0x4a8] sm:$0xff]  ;;  %v2362_v48 = vpack.c.bf16 %v426_v43, %v418_v41  ;;  %v496_v43 = vld [vmem:[%s4664_s1 + $0x8a0] sm:$0xff] }
  0x93   : > { %2327 = vmatpush1.bf16.msra.mxu1 %v2326_v52  ;;  %2213 = vmatprep.subr.bf16.mxu0 %v2212_v53  ;;  %v377_v52 = vld [vmem:[%s4664_s1 + $0x4e8] sm:$0xff]  ;;  %v371_v53 = vld [vmem:[%s4664_s1 + $0x4b8] sm:$0xff] }
  0x94   : > { %2329 = vmatprep.subr.bf16.mxu1 %v2328_v58  ;;  %v2232_v58 = vpack.c.bf16 %v377_v52, %v369_v51  ;;  %v2348_v63 = vpack.c.bf16 %v379_v54, %v371_v53  ;;  %v440_v51 = vld [vmem:[%s4664_s1 + $0x6e0] sm:$0xff]  ;;  %v434_v52 = vld [vmem:[%s4664_s1 + $0x6b0] sm:$0xff] }
  0x95   : > { %v442_v54 = vld [vmem:[%s4664_s1 + $0x6f0] sm:$0xff]  ;;  %v2250_v61 = vpack.c.bf16 %v440_v51, %v432_v50  ;;  %v523_v50 = vld [vmem:[%s4664_s1 + $0x978] sm:$0xff] }
  0x96   : > { %2215 = vmatpush1.bf16.msra.mxu0 %v2214_v1  ;;  %v385_v1 = vld [vmem:[%s4664_s1 + $0x528] sm:$0xff]  ;;  %v2366_v62 = vpack.c.bf16 %v442_v54, %v434_v52  ;;  %v512_v54 = vld [vmem:[%s4664_s1 + $0x920] sm:$0xff] }
  0x97   : > { %2331 = vmatpush1.bf16.msra.mxu1 %v2330_v2  ;;  %2217 = vmatprep.subr.bf16.mxu0 %v2216_v3  ;;  %v393_v2 = vld [vmem:[%s4664_s1 + $0x568] sm:$0xff]  ;;  %v387_v3 = vld [vmem:[%s4664_s1 + $0x538] sm:$0xff] }
  0x98   : > { %2333 = vmatprep.subr.bf16.mxu1 %v2332_v10  ;;  %v2236_v10 = vpack.c.bf16 %v393_v2, %v385_v1  ;;  %v2352_v14 = vpack.c.bf16 %v395_v4, %v387_v3  ;;  %v456_v1 = vld [vmem:[%s4664_s1 + $0x760] sm:$0xff]  ;;  %v450_v2 = vld [vmem:[%s4664_s1 + $0x730] sm:$0xff] }
  0x99   : > { %v458_v4 = vld [vmem:[%s4664_s1 + $0x770] sm:$0xff]  ;;  %v2254_v12 = vpack.c.bf16 %v456_v1, %v448_v0 }
  0x9a   : > { %2219 = vmatpush1.bf16.msra.mxu0 %v2218_v19  ;;  %v401_v19 = vld [vmem:[%s4664_s1 + $0x5a8] sm:$0xff]  ;;  %v2370_v13 = vpack.c.bf16 %v458_v4, %v450_v2  ;;  %v536_v4 = vld [vmem:[%s4664_s1 + $0x9e0] sm:$0xff] }
  0x9b   : > { %2335 = vmatpush1.bf16.msra.mxu1 %v2334_v16  ;;  %2221 = vmatprep.subr.bf16.mxu0 %v2220_v17  ;;  %v409_v16 = vld [vmem:[%s4664_s1 + $0x5e8] sm:$0xff]  ;;  %v403_v17 = vld [vmem:[%s4664_s1 + $0x5b8] sm:$0xff] }
  0x9c   : > { %2337 = vmatprep.subr.bf16.mxu1 %v2336_v25  ;;  %v2240_v25 = vpack.c.bf16 %v409_v16, %v401_v19  ;;  %v2356_v29 = vpack.c.bf16 %v411_v18, %v403_v17  ;;  %v472_v19 = vld [vmem:[%s4664_s1 + $0x7e0] sm:$0xff]  ;;  %v466_v16 = vld [vmem:[%s4664_s1 + $0x7b0] sm:$0xff] }
  0x9d   : > { %v474_v18 = vld [vmem:[%s4664_s1 + $0x7f0] sm:$0xff]  ;;  %v2258_v27 = vpack.c.bf16 %v472_v19, %v464_v15 }
  0x9e   : > { %2223 = vmatpush1.bf16.msra.mxu0 %v2222_v31  ;;  %v417_v31 = vld [vmem:[%s4664_s1 + $0x628] sm:$0xff]  ;;  %v2374_v28 = vpack.c.bf16 %v474_v18, %v466_v16  ;;  %v544_v16 = vld [vmem:[%s4664_s1 + $0xa20] sm:$0xff]  ;;  %v546_v18 = vld [vmem:[%s4664_s1 + $0xa30] sm:$0xff] }
  0x9f   : > { %2339 = vmatpush1.bf16.msra.mxu1 %v2338_v32  ;;  %2225 = vmatprep.subr.bf16.mxu0 %v2224_v33  ;;  %v425_v32 = vld [vmem:[%s4664_s1 + $0x668] sm:$0xff]  ;;  %v419_v33 = vld [vmem:[%s4664_s1 + $0x638] sm:$0xff] }
  0xa0   : > { %2341 = vmatprep.subr.bf16.mxu1 %v2340_v38  ;;  %v2244_v38 = vpack.c.bf16 %v425_v32, %v417_v31  ;;  %v2360_v42 = vpack.c.bf16 %v427_v34, %v419_v33  ;;  %v488_v31 = vld [vmem:[%s4664_s1 + $0x860] sm:$0xff]  ;;  %v482_v32 = vld [vmem:[%s4664_s1 + $0x830] sm:$0xff] }
  0xa1   : > { %v490_v34 = vld [vmem:[%s4664_s1 + $0x870] sm:$0xff]  ;;  %v2262_v40 = vpack.c.bf16 %v488_v31, %v480_v30 }
  0xa2   : > { %2227 = vmatpush1.bf16.msra.mxu0 %v2226_v44  ;;  %v433_v44 = vld [vmem:[%s4664_s1 + $0x6a8] sm:$0xff]  ;;  %v2378_v41 = vpack.c.bf16 %v490_v34, %v482_v32  ;;  %v560_v32 = vld [vmem:[%s4664_s1 + $0xaa0] sm:$0xff]  ;;  %v562_v34 = vld [vmem:[%s4664_s1 + $0xab0] sm:$0xff] }
  0xa3   : > { %2343 = vmatpush1.bf16.msra.mxu1 %v2342_v45  ;;  %2229 = vmatprep.subr.bf16.mxu0 %v2228_v22  ;;  %v441_v45 = vld [vmem:[%s4664_s1 + $0x6e8] sm:$0xff]  ;;  %v435_v22 = vld [vmem:[%s4664_s1 + $0x6b8] sm:$0xff] }
  0xa4   : > { %2345 = vmatprep.subr.bf16.mxu1 %v2344_v49  ;;  %v2248_v49 = vpack.c.bf16 %v441_v45, %v433_v44  ;;  %v2364_v53 = vpack.c.bf16 %v443_v46, %v435_v22  ;;  %v504_v44 = vld [vmem:[%s4664_s1 + $0x8e0] sm:$0xff]  ;;  %v498_v45 = vld [vmem:[%s4664_s1 + $0x8b0] sm:$0xff] }
  0xa5   : > { %v506_v46 = vld [vmem:[%s4664_s1 + $0x8f0] sm:$0xff]  ;;  %v2266_v51 = vpack.c.bf16 %v504_v44, %v496_v43 }
  0xa6   : > { %2231 = vmatpush1.bf16.msra.mxu0 %v2230_v55  ;;  %v449_v55 = vld [vmem:[%s4664_s1 + $0x728] sm:$0xff]  ;;  %v2382_v52 = vpack.c.bf16 %v506_v46, %v498_v45  ;;  %v576_v45 = vld [vmem:[%s4664_s1 + $0xb20] sm:$0xff]  ;;  %v578_v46 = vld [vmem:[%s4664_s1 + $0xb30] sm:$0xff] }
  0xa7   : > { %2347 = vmatpush1.bf16.msra.mxu1 %v2346_v56  ;;  %2233 = vmatprep.subr.bf16.mxu0 %v2232_v58  ;;  %v457_v56 = vld [vmem:[%s4664_s1 + $0x768] sm:$0xff]  ;;  %v451_v58 = vld [vmem:[%s4664_s1 + $0x738] sm:$0xff] }
  0xa8   : > { %2349 = vmatprep.subr.bf16.mxu1 %v2348_v63  ;;  %v2252_v63 = vpack.c.bf16 %v457_v56, %v449_v55  ;;  %v2368_v3 = vpack.c.bf16 %v459_v60, %v451_v58  ;;  %v520_v55 = vld [vmem:[%s4664_s1 + $0x960] sm:$0xff]  ;;  %v514_v56 = vld [vmem:[%s4664_s1 + $0x930] sm:$0xff]  ;;  %v529_v60 = vld [vmem:[%s4664_s1 + $0x9a8] sm:$0xff] }
  0xa9   : > { %v2270_v0 = vpack.c.bf16 %v520_v55, %v512_v54 }
  0xaa   : > { %2235 = vmatpush1.bf16.msra.mxu0 %v2234_v5  ;;  %v465_v5 = vld [vmem:[%s4664_s1 + $0x7a8] sm:$0xff] }
  0xab   : > { %2351 = vmatpush1.bf16.msra.mxu1 %v2350_v6  ;;  %2237 = vmatprep.subr.bf16.mxu0 %v2236_v10  ;;  %v473_v6 = vld [vmem:[%s4664_s1 + $0x7e8] sm:$0xff]  ;;  %v467_v10 = vld [vmem:[%s4664_s1 + $0x7b8] sm:$0xff] }
  0xac   : > { %2353 = vmatprep.subr.bf16.mxu1 %v2352_v14  ;;  %v2256_v14 = vpack.c.bf16 %v473_v6, %v465_v5  ;;  %v2372_v17 = vpack.c.bf16 %v475_v11, %v467_v10  ;;  %v530_v5 = vld [vmem:[%s4664_s1 + $0x9b0] sm:$0xff]  ;;  %v545_v10 = vld [vmem:[%s4664_s1 + $0xa28] sm:$0xff] }
  0xad   : > { %v538_v6 = vld [vmem:[%s4664_s1 + $0x9f0] sm:$0xff]  ;;  %v553_v11 = vld [vmem:[%s4664_s1 + $0xa68] sm:$0xff] }
  0xae   : > { %2239 = vmatpush1.bf16.msra.mxu0 %v2238_v20  ;;  %v481_v20 = vld [vmem:[%s4664_s1 + $0x828] sm:$0xff]  ;;  %v2390_v15 = vpack.c.bf16 %v538_v6, %v530_v5  ;;  %v2276_v19 = vpack.c.bf16 %v553_v11, %v545_v10  ;;  %v608_v5 = vld [vmem:[%s4664_s1 + $0xc20] sm:$0xff]  ;;  %v610_v6 = vld [vmem:[%s4664_s1 + $0xc30] sm:$0xff] }
  0xaf   : > { %2355 = vmatpush1.bf16.msra.mxu1 %v2354_v24  ;;  %2241 = vmatprep.subr.bf16.mxu0 %v2240_v25  ;;  %v489_v24 = vld [vmem:[%s4664_s1 + $0x868] sm:$0xff]  ;;  %v483_v25 = vld [vmem:[%s4664_s1 + $0x838] sm:$0xff]  ;;  %v618_v11 = vld [vmem:[%s4664_s1 + $0xc70] sm:$0xff] }
  0xb0   : > { %2357 = vmatprep.subr.bf16.mxu1 %v2356_v29  ;;  %v2260_v29 = vpack.c.bf16 %v489_v24, %v481_v20  ;;  %v2376_v33 = vpack.c.bf16 %v491_v26, %v483_v25  ;;  %v554_v24 = vld [vmem:[%s4664_s1 + $0xa70] sm:$0xff]  ;;  %v561_v25 = vld [vmem:[%s4664_s1 + $0xaa8] sm:$0xff] }
  0xb1   : > { %v569_v26 = vld [vmem:[%s4664_s1 + $0xae8] sm:$0xff]  ;;  %v2394_v30 = vpack.c.bf16 %v554_v24, %v546_v18  ;;  %v624_v18 = vld [vmem:[%s4664_s1 + $0xca0] sm:$0xff]  ;;  %v626_v24 = vld [vmem:[%s4664_s1 + $0xcb0] sm:$0xff] }
  0xb2   : > { %2243 = vmatpush1.bf16.msra.mxu0 %v2242_v35  ;;  %v497_v35 = vld [vmem:[%s4664_s1 + $0x8a8] sm:$0xff]  ;;  %v2280_v31 = vpack.c.bf16 %v569_v26, %v561_v25  ;;  %v634_v26 = vld [vmem:[%s4664_s1 + $0xcf0] sm:$0xff] }
  0xb3   : > { %2359 = vmatpush1.bf16.msra.mxu1 %v2358_v37  ;;  %2245 = vmatprep.subr.bf16.mxu0 %v2244_v38  ;;  %v505_v37 = vld [vmem:[%s4664_s1 + $0x8e8] sm:$0xff]  ;;  %v499_v38 = vld [vmem:[%s4664_s1 + $0x8b8] sm:$0xff] }
  0xb4   : > { %2361 = vmatprep.subr.bf16.mxu1 %v2360_v42  ;;  %v2264_v42 = vpack.c.bf16 %v505_v37, %v497_v35  ;;  %v2380_v22 = vpack.c.bf16 %v507_v39, %v499_v38  ;;  %v570_v37 = vld [vmem:[%s4664_s1 + $0xaf0] sm:$0xff]  ;;  %v577_v38 = vld [vmem:[%s4664_s1 + $0xb28] sm:$0xff] }
  0xb5   : > { %v585_v39 = vld [vmem:[%s4664_s1 + $0xb68] sm:$0xff]  ;;  %v2398_v43 = vpack.c.bf16 %v570_v37, %v562_v34  ;;  %v640_v34 = vld [vmem:[%s4664_s1 + $0xd20] sm:$0xff]  ;;  %v642_v37 = vld [vmem:[%s4664_s1 + $0xd30] sm:$0xff] }
  0xb6   : > { %2247 = vmatpush1.bf16.msra.mxu0 %v2246_v47  ;;  %v513_v47 = vld [vmem:[%s4664_s1 + $0x928] sm:$0xff]  ;;  %v2284_v44 = vpack.c.bf16 %v585_v39, %v577_v38  ;;  %v650_v39 = vld [vmem:[%s4664_s1 + $0xd70] sm:$0xff] }
  0xb7   : > { %2363 = vmatpush1.bf16.msra.mxu1 %v2362_v48  ;;  %2249 = vmatprep.subr.bf16.mxu0 %v2248_v49  ;;  %v521_v48 = vld [vmem:[%s4664_s1 + $0x968] sm:$0xff]  ;;  %v515_v49 = vld [vmem:[%s4664_s1 + $0x938] sm:$0xff] }
  0xb8   : > { %2365 = vmatprep.subr.bf16.mxu1 %v2364_v53  ;;  %v2268_v53 = vpack.c.bf16 %v521_v48, %v513_v47  ;;  %v2384_v58 = vpack.c.bf16 %v523_v50, %v515_v49  ;;  %v586_v48 = vld [vmem:[%s4664_s1 + $0xb70] sm:$0xff]  ;;  %v593_v49 = vld [vmem:[%s4664_s1 + $0xba8] sm:$0xff] }
  0xb9   : > { %v601_v50 = vld [vmem:[%s4664_s1 + $0xbe8] sm:$0xff]  ;;  %v2402_v54 = vpack.c.bf16 %v586_v48, %v578_v46  ;;  %v656_v46 = vld [vmem:[%s4664_s1 + $0xda0] sm:$0xff]  ;;  %v658_v48 = vld [vmem:[%s4664_s1 + $0xdb0] sm:$0xff] }
  0xba   : > { %2251 = vmatpush1.bf16.msra.mxu0 %v2250_v61  ;;  %v537_v61 = vld [vmem:[%s4664_s1 + $0x9e8] sm:$0xff]  ;;  %v2288_v55 = vpack.c.bf16 %v601_v50, %v593_v49  ;;  %v666_v50 = vld [vmem:[%s4664_s1 + $0xdf0] sm:$0xff] }
  0xbb   : > { %2367 = vmatpush1.bf16.msra.mxu1 %v2366_v62  ;;  %2253 = vmatprep.subr.bf16.mxu0 %v2252_v63  ;;  %v531_v62 = vld [vmem:[%s4664_s1 + $0x9b8] sm:$0xff]  ;;  %v2272_v2 = vpack.c.bf16 %v537_v61, %v529_v60  ;;  %v602_v61 = vld [vmem:[%s4664_s1 + $0xbf0] sm:$0xff] }
  0xbc   : > { %2369 = vmatprep.subr.bf16.mxu1 %v2368_v3  ;;  %v539_v63 = vld [vmem:[%s4664_s1 + $0x9f8] sm:$0xff]  ;;  %v528_v3 = vld [vmem:[%s4664_s1 + $0x9a0] sm:$0xff] }
  0xbe   : > { %2255 = vmatpush1.bf16.msra.mxu0 %v2254_v12  ;;  %v547_v12 = vld [vmem:[%s4664_s1 + $0xa38] sm:$0xff] }
  0xbf   : > { %2371 = vmatpush1.bf16.msra.mxu1 %v2370_v13  ;;  %2257 = vmatprep.subr.bf16.mxu0 %v2256_v14  ;;  %v555_v13 = vld [vmem:[%s4664_s1 + $0xa78] sm:$0xff]  ;;  %v2274_v14 = vpack.c.bf16 %v536_v4, %v528_v3 }
  0xc0   : > { %2373 = vmatprep.subr.bf16.mxu1 %v2372_v17  ;;  %v552_v17 = vld [vmem:[%s4664_s1 + $0xa60] sm:$0xff]  ;;  %v2392_v20 = vpack.c.bf16 %v555_v13, %v547_v12  ;;  %v625_v12 = vld [vmem:[%s4664_s1 + $0xca8] sm:$0xff] }
  0xc1   : > { %v633_v13 = vld [vmem:[%s4664_s1 + $0xce8] sm:$0xff] }
  0xc2   : > { %2259 = vmatpush1.bf16.msra.mxu0 %v2258_v27  ;;  %v563_v27 = vld [vmem:[%s4664_s1 + $0xab8] sm:$0xff] }
  0xc3   : > { %2375 = vmatpush1.bf16.msra.mxu1 %v2374_v28  ;;  %2261 = vmatprep.subr.bf16.mxu0 %v2260_v29  ;;  %v571_v28 = vld [vmem:[%s4664_s1 + $0xaf8] sm:$0xff]  ;;  %v2278_v29 = vpack.c.bf16 %v552_v17, %v544_v16  ;;  %v2410_v16 = vpack.c.bf16 %v618_v11, %v610_v6  ;;  %v2296_v17 = vpack.c.bf16 %v633_v13, %v625_v12  ;;  %v1333_v6 = vld [vmem:[%s4666_s3] sm:$0xff]  ;;  %v1366_v13 = vld [vmem:[%s4666_s3 + $0x108] sm:$0xff] }
  0xc4   : > { %2377 = vmatprep.subr.bf16.mxu1 %v2376_v33  ;;  %v568_v33 = vld [vmem:[%s4664_s1 + $0xae0] sm:$0xff]  ;;  %v2396_v35 = vpack.c.bf16 %v571_v28, %v563_v27  ;;  %v641_v27 = vld [vmem:[%s4664_s1 + $0xd28] sm:$0xff] }
  0xc5   : > { %1098 = vmatmul.mubr.f32.vlgmr.msra.gmra.mrb[2].mxu0 %v3195_v23  ;;  %v649_v28 = vld [vmem:[%s4664_s1 + $0xd68] sm:$0xff]  ;;  %v1365_v11 = vld [vmem:[%s4666_s3 + $0x100] sm:$0xff] }
  0xc6   : > { %2263 = vmatpush1.bf16.msra.mxu0 %v2262_v40  ;;  %1240 = vmatmul.mubr.f32.vlgmr.msra.gmra.mrb[2].mxu1 %v3195_v23  ;;  %v522_v23 = vld [vmem:[%s4664_s1 + $0x970] sm:$0xff]  ;;  %v579_v40 = vld [vmem:[%s4664_s1 + $0xb38] sm:$0xff] }
  0xc7   : > { %2379 = vmatpush1.bf16.msra.mxu1 %v2378_v41  ;;  %2265 = vmatprep.subr.bf16.mxu0 %v2264_v42  ;;  %v2386_v1 = vpack.c.bf16 %v522_v23, %v514_v56  ;;  %v587_v41 = vld [vmem:[%s4664_s1 + $0xb78] sm:$0xff]  ;;  %v2282_v42 = vpack.c.bf16 %v568_v33, %v560_v32  ;;  %v592_v56 = vld [vmem:[%s4664_s1 + $0xba0] sm:$0xff]  ;;  %v594_v23 = vld [vmem:[%s4664_s1 + $0xbb0] sm:$0xff]  ;;  %v2414_v32 = vpack.c.bf16 %v634_v26, %v626_v24 }
  0xc8   : > { %2381 = vmatprep.subr.bf16.mxu1 %v2380_v22  ;;  %1819 = vmatprep.mubr.msk.f32.mxu0 %vm746_vm0, %v3224_v36  ;;  %v584_v22 = vld [vmem:[%s4664_s1 + $0xb60] sm:$0xff]  ;;  %v2400_v47 = vpack.c.bf16 %v587_v41, %v579_v40  ;;  %v2406_v3 = vpack.c.bf16 %v602_v61, %v594_v23  ;;  %v2300_v33 = vpack.c.bf16 %v649_v28, %v641_v27  ;;  %v657_v40 = vld [vmem:[%s4664_s1 + $0xda8] sm:$0xff]  ;;  %v674_v61 = vld [vmem:[%s4664_s1 + $0xe30] sm:$0xff] }
  0xc9   : > { %1820 = vmatprep.mubr.msk.f32.mxu1 %vm746_vm0, %v3224_v36  ;;  %v2388_v36 = vpack.c.bf16 %v539_v63, %v531_v62  ;;  %v609_v62 = vld [vmem:[%s4664_s1 + $0xc28] sm:$0xff]  ;;  %v672_v23 = vld [vmem:[%s4664_s1 + $0xe20] sm:$0xff]  ;;  %v1335_v24 = vld [vmem:[%s4666_s3 + $0x10] sm:$0xff] }
  0xca   : > { %2267 = vmatpush1.bf16.msra.mxu0 %v2266_v51  ;;  %v595_v51 = vld [vmem:[%s4664_s1 + $0xbb8] sm:$0xff]  ;;  %v617_v63 = vld [vmem:[%s4664_s1 + $0xc68] sm:$0xff]  ;;  %v1367_v26 = vld [vmem:[%s4666_s3 + $0x110] sm:$0xff] }
  0xcb   : > { %2383 = vmatpush1.bf16.msra.mxu1 %v2382_v52  ;;  %2269 = vmatprep.subr.bf16.mxu0 %v2268_v53  ;;  %v603_v52 = vld [vmem:[%s4664_s1 + $0xbf8] sm:$0xff]  ;;  %v2286_v53 = vpack.c.bf16 %v584_v22, %v576_v45  ;;  %v2292_v4 = vpack.c.bf16 %v617_v63, %v609_v62  ;;  %v665_v41 = vld [vmem:[%s4664_s1 + $0xde8] sm:$0xff]  ;;  %v2418_v45 = vpack.c.bf16 %v650_v39, %v642_v37  ;;  %v682_v63 = vld [vmem:[%s4664_s1 + $0xe70] sm:$0xff] }
  0xcc   : > { %2385 = vmatprep.subr.bf16.mxu1 %v2384_v58  ;;  %v600_v58 = vld [vmem:[%s4664_s1 + $0xbe0] sm:$0xff]  ;;  %v2404_v60 = vpack.c.bf16 %v603_v52, %v595_v51  ;;  %v2304_v22 = vpack.c.bf16 %v665_v41, %v657_v40  ;;  %v673_v51 = vld [vmem:[%s4664_s1 + $0xe28] sm:$0xff]  ;;  %v1368_v28 = vld [vmem:[%s4666_s3 + $0x118] sm:$0xff] }
  0xcd   : > { %v681_v52 = vld [vmem:[%s4664_s1 + $0xe68] sm:$0xff]  ;;  %v1337_v37 = vld [vmem:[%s4666_s3 + $0x20] sm:$0xff]  ;;  %v1355_v41 = vld [vmem:[%s4666_s3 + $0xb0] sm:$0xff] }
  0xce   : > { %2271 = vmatpush1.bf16.msra.mxu0 %v2270_v0  ;;  %v611_v0 = vld [vmem:[%s4664_s1 + $0xc38] sm:$0xff]  ;;  %v1369_v39 = vld [vmem:[%s4666_s3 + $0x120] sm:$0xff]  ;;  %v1370_v40 = vld [vmem:[%s4666_s3 + $0x128] sm:$0xff] }
  0xcf   : > { %2387 = vmatpush1.bf16.msra.mxu1 %v2386_v1  ;;  %2273 = vmatprep.subr.bf16.mxu0 %v2272_v2  ;;  %v619_v1 = vld [vmem:[%s4664_s1 + $0xc78] sm:$0xff]  ;;  %v2290_v2 = vpack.c.bf16 %v600_v58, %v592_v56  ;;  %v2422_v56 = vpack.c.bf16 %v666_v50, %v658_v48  ;;  %v2308_v58 = vpack.c.bf16 %v681_v52, %v673_v51  ;;  %v1357_v52 = vld [vmem:[%s4666_s3 + $0xc0] sm:$0xff] }
  0xd0   : > { %2389 = vmatprep.subr.bf16.mxu1 %v2388_v36  ;;  %v616_v36 = vld [vmem:[%s4664_s1 + $0xc60] sm:$0xff]  ;;  %v2408_v10 = vpack.c.bf16 %v619_v1, %v611_v0  ;;  %v1350_v1 = vld [vmem:[%s4666_s3 + $0x88] sm:$0xff]  ;;  %v1340_v48 = vld [vmem:[%s4666_s3 + $0x38] sm:$0xff] }
  0xd1   : > { %v1349_v0 = vld [vmem:[%s4666_s3 + $0x80] sm:$0xff]  ;;  %v1372_v51 = vld [vmem:[%s4666_s3 + $0x138] sm:$0xff] }
  0xd2   : > { %2275 = vmatpush1.bf16.msra.mxu0 %v2274_v14  ;;  %v627_v14 = vld [vmem:[%s4664_s1 + $0xcb8] sm:$0xff] }
  0xd3   : > { %2391 = vmatpush1.bf16.msra.mxu1 %v2390_v15  ;;  %2277 = vmatprep.subr.bf16.mxu0 %v2276_v19  ;;  %v635_v15 = vld [vmem:[%s4664_s1 + $0xcf8] sm:$0xff]  ;;  %v2294_v19 = vpack.c.bf16 %v616_v36, %v608_v5  ;;  %v2426_v5 = vpack.c.bf16 %v682_v63, %v674_v61  ;;  %v2428_v36 = vpack.c.bf16 %v1350_v1, %v1349_v0  ;;  %v1342_v61 = vld [vmem:[%s4666_s3 + $0x48] sm:$0xff]  ;;  %v1359_v1 = vld [vmem:[%s4666_s3 + $0xd0] sm:$0xff] }
  0xd4   : > { %2393 = vmatprep.subr.bf16.mxu1 %v2392_v20  ;;  %v632_v20 = vld [vmem:[%s4664_s1 + $0xce0] sm:$0xff]  ;;  %v2412_v25 = vpack.c.bf16 %v635_v15, %v627_v14  ;;  %v1351_v14 = vld [vmem:[%s4666_s3 + $0x90] sm:$0xff]  ;;  %v1352_v15 = vld [vmem:[%s4666_s3 + $0x98] sm:$0xff] }
  0xd5   : > { %v1374_v0 = vld [vmem:[%s4666_s3 + $0x148] sm:$0xff] }
  0xd6   : > { %2279 = vmatpush1.bf16.msra.mxu0 %v2278_v29  ;;  %v643_v29 = vld [vmem:[%s4664_s1 + $0xd38] sm:$0xff] }
  0xd7   : > { %2395 = vmatpush1.bf16.msra.mxu1 %v2394_v30  ;;  %2281 = vmatprep.subr.bf16.mxu0 %v2280_v31  ;;  %v651_v30 = vld [vmem:[%s4664_s1 + $0xd78] sm:$0xff]  ;;  %v2298_v31 = vpack.c.bf16 %v632_v20, %v624_v18  ;;  %v2462_v18 = vpack.c.bf16 %v1366_v13, %v1365_v11  ;;  %v2432_v20 = vpack.c.bf16 %v1352_v15, %v1351_v14  ;;  %v1361_v15 = vld [vmem:[%s4666_s3 + $0xe0] sm:$0xff] }
  0xd8   : > { %2397 = vmatprep.subr.bf16.mxu1 %v2396_v35  ;;  %v648_v35 = vld [vmem:[%s4664_s1 + $0xd60] sm:$0xff]  ;;  %v2416_v38 = vpack.c.bf16 %v651_v30, %v643_v29  ;;  %v1354_v30 = vld [vmem:[%s4666_s3 + $0xa8] sm:$0xff]  ;;  %v1344_v11 = vld [vmem:[%s4666_s3 + $0x58] sm:$0xff] }
  0xd9   : > { %v1353_v29 = vld [vmem:[%s4666_s3 + $0xa0] sm:$0xff]  ;;  %v1376_v14 = vld [vmem:[%s4666_s3 + $0x158] sm:$0xff] }
  0xda   : > { %2283 = vmatpush1.bf16.msra.mxu0 %v2282_v42  ;;  %v659_v42 = vld [vmem:[%s4664_s1 + $0xdb8] sm:$0xff] }
  0xdb   : > { %2399 = vmatpush1.bf16.msra.mxu1 %v2398_v43  ;;  %2285 = vmatprep.subr.bf16.mxu0 %v2284_v44  ;;  %v667_v43 = vld [vmem:[%s4664_s1 + $0xdf8] sm:$0xff]  ;;  %v2302_v44 = vpack.c.bf16 %v648_v35, %v640_v34  ;;  %v2466_v34 = vpack.c.bf16 %v1368_v28, %v1367_v26  ;;  %v2436_v35 = vpack.c.bf16 %v1354_v30, %v1353_v29  ;;  %v1346_v26 = vld [vmem:[%s4666_s3 + $0x68] sm:$0xff]  ;;  %v1363_v30 = vld [vmem:[%s4666_s3 + $0xf0] sm:$0xff] }
  0xdc   : > { %2401 = vmatprep.subr.bf16.mxu1 %v2400_v47  ;;  %v664_v47 = vld [vmem:[%s4664_s1 + $0xde0] sm:$0xff]  ;;  %v2420_v49 = vpack.c.bf16 %v667_v43, %v659_v42  ;;  %v1356_v42 = vld [vmem:[%s4666_s3 + $0xb8] sm:$0xff]  ;;  %v1387_v43 = vld [vmem:[%s4666_s3 + $0x1b0] sm:$0xff] }
  0xdd   : > { %v1378_v29 = vld [vmem:[%s4666_s3 + $0x168] sm:$0xff] }
  0xde   : > { %2287 = vmatpush1.bf16.msra.mxu0 %v2286_v53  ;;  %v675_v53 = vld [vmem:[%s4664_s1 + $0xe38] sm:$0xff] }
  0xdf   : > { %2403 = vmatpush1.bf16.msra.mxu1 %v2402_v54  ;;  %2289 = vmatprep.subr.bf16.mxu0 %v2288_v55  ;;  %v683_v54 = vld [vmem:[%s4664_s1 + $0xe78] sm:$0xff]  ;;  %v2306_v55 = vpack.c.bf16 %v664_v47, %v656_v46  ;;  %v2440_v46 = vpack.c.bf16 %v1356_v42, %v1355_v41  ;;  %v1339_v47 = vld [vmem:[%s4666_s3 + $0x30] sm:$0xff]  ;;  %v1413_v42 = vld [vmem:[%s4666_s3 + $0x280] sm:$0xff] }
  0xe0   : > { %2405 = vmatprep.subr.bf16.mxu1 %v2404_v60  ;;  %v680_v60 = vld [vmem:[%s4664_s1 + $0xe60] sm:$0xff]  ;;  %v2424_v62 = vpack.c.bf16 %v683_v54, %v675_v53  ;;  %v1358_v53 = vld [vmem:[%s4666_s3 + $0xc8] sm:$0xff]  ;;  %v1380_v41 = vld [vmem:[%s4666_s3 + $0x178] sm:$0xff] }
  0xe1   : > { %v1389_v54 = vld [vmem:[%s4666_s3 + $0x1c0] sm:$0xff] }
  0xe2   : > { %2291 = vmatpush1.bf16.msra.mxu0 %v2290_v2  ;;  %v1381_v2 = vld [vmem:[%s4666_s3 + $0x180] sm:$0xff] }
  0xe3   : > { %2407 = vmatpush1.bf16.msra.mxu1 %v2406_v3  ;;  %2293 = vmatprep.subr.bf16.mxu0 %v2292_v4  ;;  %v1382_v3 = vld [vmem:[%s4666_s3 + $0x188] sm:$0xff]  ;;  %v2310_v4 = vpack.c.bf16 %v680_v60, %v672_v23  ;;  %v2444_v23 = vpack.c.bf16 %v1358_v53, %v1357_v52  ;;  %v1341_v60 = vld [vmem:[%s4666_s3 + $0x40] sm:$0xff] }
  0xe4   : > { %2409 = vmatprep.subr.bf16.mxu1 %v2408_v10  ;;  %v1334_v10 = vld [vmem:[%s4666_s3 + $0x8] sm:$0xff]  ;;  %v2460_v12 = vpack.c.bf16 %v1382_v3, %v1381_v2  ;;  %v1360_v2 = vld [vmem:[%s4666_s3 + $0xd8] sm:$0xff]  ;;  %v1391_v3 = vld [vmem:[%s4666_s3 + $0x1d0] sm:$0xff] }
  0xe6   : > { %2295 = vmatpush1.bf16.msra.mxu0 %v2294_v19  ;;  %v1383_v19 = vld [vmem:[%s4666_s3 + $0x190] sm:$0xff] }
  0xe7   : > { %2411 = vmatpush1.bf16.msra.mxu1 %v2410_v16  ;;  %2297 = vmatprep.subr.bf16.mxu0 %v2296_v17  ;;  %v1384_v16 = vld [vmem:[%s4666_s3 + $0x198] sm:$0xff]  ;;  %v2430_v17 = vpack.c.bf16 %v1334_v10, %v1333_v6  ;;  %v2448_v6 = vpack.c.bf16 %v1360_v2, %v1359_v1  ;;  %v1343_v10 = vld [vmem:[%s4666_s3 + $0x50] sm:$0xff] }
  0xe8   : > { %2413 = vmatprep.subr.bf16.mxu1 %v2412_v25  ;;  %v1336_v25 = vld [vmem:[%s4666_s3 + $0x18] sm:$0xff]  ;;  %v2464_v27 = vpack.c.bf16 %v1384_v16, %v1383_v19  ;;  %v1362_v19 = vld [vmem:[%s4666_s3 + $0xe8] sm:$0xff]  ;;  %v1393_v16 = vld [vmem:[%s4666_s3 + $0x1e0] sm:$0xff] }
  0xe9   : > { %v1447_v1 = vld [vmem:[%s4666_s3 + $0x390] sm:$0xff]  ;;  %v1448_v2 = vld [vmem:[%s4666_s3 + $0x398] sm:$0xff] }
  0xea   : > { %2299 = vmatpush1.bf16.msra.mxu0 %v2298_v31  ;;  %v1385_v31 = vld [vmem:[%s4666_s3 + $0x1a0] sm:$0xff] }
  0xeb   : > { %2415 = vmatpush1.bf16.msra.mxu1 %v2414_v32  ;;  %2301 = vmatprep.subr.bf16.mxu0 %v2300_v33  ;;  %v1386_v32 = vld [vmem:[%s4666_s3 + $0x1a8] sm:$0xff]  ;;  %v2434_v33 = vpack.c.bf16 %v1336_v25, %v1335_v24  ;;  %v2452_v24 = vpack.c.bf16 %v1362_v19, %v1361_v15  ;;  %v1345_v25 = vld [vmem:[%s4666_s3 + $0x60] sm:$0xff]  ;;  %v2528_v15 = vpack.c.bf16 %v1448_v2, %v1447_v1  ;;  %v1432_v19 = vld [vmem:[%s4666_s3 + $0x318] sm:$0xff] }
  0xec   : > { %2417 = vmatprep.subr.bf16.mxu1 %v2416_v38  ;;  %v1338_v38 = vld [vmem:[%s4666_s3 + $0x28] sm:$0xff]  ;;  %v1425_v1 = vld [vmem:[%s4666_s3 + $0x2e0] sm:$0xff] }
  0xed   : > { %v1426_v2 = vld [vmem:[%s4666_s3 + $0x2e8] sm:$0xff] }
  0xee   : > { %2303 = vmatpush1.bf16.msra.mxu0 %v2302_v44  ;;  %v1388_v44 = vld [vmem:[%s4666_s3 + $0x1b8] sm:$0xff] }
  0xef   : > { %2419 = vmatpush1.bf16.msra.mxu1 %v2418_v45  ;;  %2305 = vmatprep.subr.bf16.mxu0 %v2304_v22  ;;  %v2438_v45 = vpack.c.bf16 %v1338_v38, %v1337_v37  ;;  %v2470_v22 = vpack.c.bf16 %v1370_v40, %v1369_v39  ;;  %v2472_v50 = vpack.c.bf16 %v1388_v44, %v1387_v43  ;;  %v1347_v38 = vld [vmem:[%s4666_s3 + $0x70] sm:$0xff]  ;;  %v1348_v39 = vld [vmem:[%s4666_s3 + $0x78] sm:$0xff]  ;;  %v1414_v43 = vld [vmem:[%s4666_s3 + $0x288] sm:$0xff] }
  0xf0   : > { %2421 = vmatprep.subr.bf16.mxu1 %v2420_v49  ;;  %v1371_v49 = vld [vmem:[%s4666_s3 + $0x130] sm:$0xff]  ;;  %v1445_v44 = vld [vmem:[%s4666_s3 + $0x380] sm:$0xff] }
  0xf2   : > { %2307 = vmatpush1.bf16.msra.mxu0 %v2306_v55  ;;  %v1390_v55 = vld [vmem:[%s4666_s3 + $0x1c8] sm:$0xff] }
  0xf3   : > { %2423 = vmatpush1.bf16.msra.mxu1 %v2422_v56  ;;  %2309 = vmatprep.subr.bf16.mxu0 %v2308_v58  ;;  %v2442_v56 = vpack.c.bf16 %v1340_v48, %v1339_v47  ;;  %v2474_v58 = vpack.c.bf16 %v1372_v51, %v1371_v49  ;;  %v2476_v63 = vpack.c.bf16 %v1390_v55, %v1389_v54  ;;  %v4411_v49 = vld [vmem:[%s4665_s2] sm:$0xff] }
  0xf4   : > { %2425 = vmatprep.subr.bf16.mxu1 %v2424_v62  ;;  %v1373_v62 = vld [vmem:[%s4666_s3 + $0x140] sm:$0xff]  ;;  %v2492_v47 = vpack.c.bf16 %v1414_v43, %v1413_v42  ;;  %v717_v51 = vrot.slane %v4411_v49, %v696_v57  ;;  %v713_v52 = vrot.slane %v4411_v49, %v692_v8  ;;  %v721_v53 = vrot.slane %v4411_v49, %v700_v21  ;;  %v1398_v57 = vld [vmem:[%s4666_s3 + $0x208] sm:$0xff]  ;;  %v1436_v43 = vld [vmem:[%s4666_s3 + $0x338] sm:$0xff] }
  0xf5   : > { %v1429_v8 = vld [vmem:[%s4666_s3 + $0x300] sm:$0xff]  ;;  %v1430_v21 = vld [vmem:[%s4666_s3 + $0x308] sm:$0xff] }
  0xf6   : > { %2311 = vmatpush1.bf16.msra.mxu0 %v2310_v4  ;;  %v1392_v4 = vld [vmem:[%s4666_s3 + $0x1d8] sm:$0xff] }
  0xf7   : > { %2427 = vmatpush1.bf16.msra.mxu1 %v2426_v5  ;;  %2429 = vmatprep.subr.bf16.mxu0 %v2428_v36  ;;  %v2446_v5 = vpack.c.bf16 %v1342_v61, %v1341_v60  ;;  %v2478_v36 = vpack.c.bf16 %v1374_v0, %v1373_v62  ;;  %v2480_v13 = vpack.c.bf16 %v1392_v4, %v1391_v3  ;;  %v1415_v62 = vld [vmem:[%s4666_s3 + $0x290] sm:$0xff] }
  0xf8   : > { %2461 = vmatprep.subr.bf16.mxu1 %v2460_v12  ;;  %v1375_v12 = vld [vmem:[%s4666_s3 + $0x150] sm:$0xff] }
  0xf9   : > { %1169 = vmatmul.mubr.f32.vlgmr.msra.gmra.mrb[2].mxu0 %v3524_v7 }
  0xfa   : > { %1311 = vmatmul.mubr.f32.vlgmr.msra.gmra.mrb[2].mxu1 %v3524_v7  ;;  %2431 = vmatpush3.bf16.msra.mxu0 %v2430_v17  ;;  %v2468_v7 = vpack.c.bf16 %v1386_v32, %v1385_v31  ;;  %v1394_v17 = vld [vmem:[%s4666_s3 + $0x1e8] sm:$0xff]  ;;  %v1364_v31 = vld [vmem:[%s4666_s3 + $0xf8] sm:$0xff]  ;;  %v1395_v32 = vld [vmem:[%s4666_s3 + $0x1f0] sm:$0xff] }
  0xfb   : > { %2463 = vmatpush3.bf16.msra.mxu1 %v2462_v18  ;;  %2433 = vmatprep.subr.bf16.mxu0 %v2432_v20  ;;  %v2450_v18 = vpack.c.bf16 %v1344_v11, %v1343_v10  ;;  %v2482_v20 = vpack.c.bf16 %v1376_v14, %v1375_v12  ;;  %v2484_v28 = vpack.c.bf16 %v1394_v17, %v1393_v16  ;;  %v1399_v11 = vld [vmem:[%s4666_s3 + $0x210] sm:$0xff]  ;;  %v1400_v12 = vld [vmem:[%s4666_s3 + $0x218] sm:$0xff]  ;;  %v1417_v16 = vld [vmem:[%s4666_s3 + $0x2a0] sm:$0xff] }
  0xfc   : > { %2465 = vmatprep.subr.bf16.mxu1 %v2464_v27  ;;  %v1377_v27 = vld [vmem:[%s4666_s3 + $0x160] sm:$0xff]  ;;  %v2456_v37 = vpack.c.bf16 %v1364_v31, %v1363_v30  ;;  %v1418_v17 = vld [vmem:[%s4666_s3 + $0x2a8] sm:$0xff] }
  0xfd   : > { %v1434_v31 = vld [vmem:[%s4666_s3 + $0x328] sm:$0xff] }
  0xfe   : > { %2435 = vmatpush3.bf16.msra.mxu0 %v2434_v33  ;;  %v1396_v33 = vld [vmem:[%s4666_s3 + $0x1f8] sm:$0xff] }
  0xff   : > { %2467 = vmatpush3.bf16.msra.mxu1 %v2466_v34  ;;  %2437 = vmatprep.subr.bf16.mxu0 %v2436_v35  ;;  %v2454_v34 = vpack.c.bf16 %v1346_v26, %v1345_v25  ;;  %v2486_v35 = vpack.c.bf16 %v1378_v29, %v1377_v27  ;;  %v2488_v40 = vpack.c.bf16 %v1396_v33, %v1395_v32  ;;  %v1401_v27 = vld [vmem:[%s4666_s3 + $0x220] sm:$0xff]  ;;  %v1419_v32 = vld [vmem:[%s4666_s3 + $0x2b0] sm:$0xff]  ;;  %v1420_v33 = vld [vmem:[%s4666_s3 + $0x2b8] sm:$0xff] }
 0x100   : > { %2469 = vmatprep.subr.bf16.mxu1 %v2468_v7  ;;  %v1379_v7 = vld [vmem:[%s4666_s3 + $0x170] sm:$0xff]  ;;  %v2500_v26 = vpack.c.bf16 %v1418_v17, %v1417_v16  ;;  %v1433_v29 = vld [vmem:[%s4666_s3 + $0x320] sm:$0xff]  ;;  %v1460_v17 = vld [vmem:[%s4666_s3 + $0x3f8] sm:$0xff] }
 0x101   : > { %v1459_v16 = vld [vmem:[%s4666_s3 + $0x3f0] sm:$0xff] }
 0x102   : > { %2439 = vmatpush3.bf16.msra.mxu0 %v2438_v45  ;;  %v1446_v45 = vld [vmem:[%s4666_s3 + $0x388] sm:$0xff] }
 0x103   : > { %2471 = vmatpush3.bf16.msra.mxu1 %v2470_v22  ;;  %2441 = vmatprep.subr.bf16.mxu0 %v2440_v46  ;;  %v2458_v22 = vpack.c.bf16 %v1348_v39, %v1347_v38  ;;  %v2490_v46 = vpack.c.bf16 %v1380_v41, %v1379_v7  ;;  %v2524_v48 = vpack.c.bf16 %v1446_v45, %v1445_v44  ;;  %v1403_v7 = vld [vmem:[%s4666_s3 + $0x230] sm:$0xff]  ;;  %v1421_v44 = vld [vmem:[%s4666_s3 + $0x2c0] sm:$0xff]  ;;  %v1422_v45 = vld [vmem:[%s4666_s3 + $0x2c8] sm:$0xff] }
 0x104   : > { %2473 = vmatprep.subr.bf16.mxu1 %v2472_v50  ;;  %v709_v50 = vrot.slane %v4411_v49, %v688_v9  ;;  %v1397_v9 = vld [vmem:[%s4666_s3 + $0x200] sm:$0xff]  ;;  %v2534_v38 = vpack.c.bf16 %v1434_v31, %v1433_v29  ;;  %v2504_v39 = vpack.c.bf16 %v1420_v33, %v1419_v32  ;;  %v1435_v41 = vld [vmem:[%s4666_s3 + $0x330] sm:$0xff]  ;;  %v1444_v29 = vld [vmem:[%s4666_s3 + $0x378] sm:$0xff]  ;;  %v724_v32 = vsub.s32 4, %v3012_v59 }
 0x105   : > { %v2494_v4 = vpack.c.bf16 %v1398_v57, %v1397_v9  ;;  %v1455_v9 = vld [vmem:[%s4666_s3 + $0x3d0] sm:$0xff]  ;;  %v1456_v57 = vld [vmem:[%s4666_s3 + $0x3d8] sm:$0xff]  ;;  %v732_v33 = vsub.s32 6, %v3012_v59 }
 0x106   : > { %2443 = vmatpush3.bf16.msra.mxu0 %v2442_v56 }
 0x107   : > { %2475 = vmatpush3.bf16.msra.mxu1 %v2474_v58  ;;  %2445 = vmatprep.subr.bf16.mxu0 %v2444_v23 }
 0x108   : > { %2477 = vmatprep.subr.bf16.mxu1 %v2476_v63  ;;  %v1416_v63 = vld [vmem:[%s4666_s3 + $0x298] sm:$0xff] }
 0x109   : > { %v2496_v10 = vpack.c.bf16 %v1416_v63, %v1415_v62  ;;  %v1439_v62 = vld [vmem:[%s4666_s3 + $0x350] sm:$0xff]  ;;  %v2544_v63 = vpack.c.bf16 %v1456_v57, %v1455_v9 }
 0x10a   : > { %2447 = vmatpush3.bf16.msra.mxu0 %v2446_v5 }
 0x10b   : > { %2479 = vmatpush3.bf16.msra.mxu1 %v2478_v36  ;;  %2449 = vmatprep.subr.bf16.mxu0 %v2448_v6  ;;  %v2526_v6 = vpack.c.bf16 %v1430_v21, %v1429_v8  ;;  %v1408_v21 = vld [vmem:[%s4666_s3 + $0x258] sm:$0xff] }
 0x10c   : > { %2481 = vmatprep.subr.bf16.mxu1 %v2480_v13  ;;  %v1431_v13 = vld [vmem:[%s4666_s3 + $0x310] sm:$0xff] }
 0x10d   : > { %v2530_v25 = vpack.c.bf16 %v1432_v19, %v1431_v13  ;;  %v1428_v19 = vld [vmem:[%s4666_s3 + $0x2f8] sm:$0xff] }
 0x10e   : > { %2451 = vmatpush3.bf16.msra.mxu0 %v2450_v18  ;;  %v1449_v18 = vld [vmem:[%s4666_s3 + $0x3a0] sm:$0xff] }
 0x10f   : > { %2483 = vmatpush3.bf16.msra.mxu1 %v2482_v20  ;;  %2453 = vmatprep.subr.bf16.mxu0 %v2452_v24  ;;  %v1450_v20 = vld [vmem:[%s4666_s3 + $0x3a8] sm:$0xff]  ;;  %v2498_v24 = vpack.c.bf16 %v1400_v12, %v1399_v11  ;;  %v1441_v12 = vld [vmem:[%s4666_s3 + $0x360] sm:$0xff] }
 0x110   : > { %2485 = vmatprep.subr.bf16.mxu1 %v2484_v28  ;;  %v1402_v28 = vld [vmem:[%s4666_s3 + $0x228] sm:$0xff]  ;;  %v2532_v30 = vpack.c.bf16 %v1450_v20, %v1449_v18 }
 0x111   : > { %v1410_v11 = vld [vmem:[%s4666_s3 + $0x268] sm:$0xff] }
 0x112   : > { %2455 = vmatpush3.bf16.msra.mxu0 %v2454_v34  ;;  %v1451_v34 = vld [vmem:[%s4666_s3 + $0x3b0] sm:$0xff] }
 0x113   : > { %2487 = vmatpush3.bf16.msra.mxu1 %v2486_v35  ;;  %2457 = vmatprep.subr.bf16.mxu0 %v2456_v37  ;;  %v1452_v35 = vld [vmem:[%s4666_s3 + $0x3b8] sm:$0xff]  ;;  %v2502_v37 = vpack.c.bf16 %v1402_v28, %v1401_v27  ;;  %v2552_v27 = vpack.c.bf16 %v1460_v17, %v1459_v16  ;;  %v1443_v28 = vld [vmem:[%s4666_s3 + $0x370] sm:$0xff] }
 0x114   : > { %2489 = vmatprep.subr.bf16.mxu1 %v2488_v40  ;;  %v1404_v40 = vld [vmem:[%s4666_s3 + $0x238] sm:$0xff]  ;;  %v2536_v42 = vpack.c.bf16 %v1452_v35, %v1451_v34  ;;  %v2554_v31 = vpack.c.bf16 %v1444_v29, %v1443_v28  ;;  %v728_v34 = vsub.s32 5, %v3012_v59  ;;  %v736_v35 = vsub.s32 7, %v3012_v59 }
 0x116   : > { %2459 = vmatpush3.bf16.msra.mxu0 %v2458_v22  ;;  %v1453_v22 = vld [vmem:[%s4666_s3 + $0x3c0] sm:$0xff] }
 0x117   : > { %2491 = vmatpush3.bf16.msra.mxu1 %v2490_v46  ;;  %2493 = vmatprep.subr.bf16.mxu0 %v2492_v47  ;;  %v1454_v46 = vld [vmem:[%s4666_s3 + $0x3c8] sm:$0xff]  ;;  %v2506_v47 = vpack.c.bf16 %v1404_v40, %v1403_v7  ;;  %v737_v7 = vrot.slane %v4411_v49, %v736_v35 }
 0x118   : > { %2525 = vmatprep.subr.bf16.mxu1 %v2524_v48  ;;  %v2538_v48 = vpack.c.bf16 %v1436_v43, %v1435_v41 }
 0x158   : > { %v886_v54 = vpop.f32.mrb[0].mxu0 }
 0x159   : > { %v2556_v55 = vadd.f32 %v886_v54, %v709_v50  ;;  %v1028_v56 = vpop.f32.mrb[0].mxu1  ;;  %v888_v58 = vpop.f32.mrb[1].mxu0  ;;  %v2508_v50 = vpack.c.bf16 %v1422_v45, %v1421_v44  ;;  %v2540_v54 = vpack.c.bf16 %v1454_v46, %v1453_v22 }
 0x15a   : > { %v2558_v23 = vadd.f32 %v1028_v56, %v717_v51  ;;  %v2557_v60 = vadd.f32 %v888_v58, %v713_v52  ;;  %v1030_v61 = vpop.f32.mrb[1].mxu1  ;;  %v1405_v51 = vld [vmem:[%s4666_s3 + $0x240] sm:$0xff]  ;;  %v1406_v52 = vld [vmem:[%s4666_s3 + $0x248] sm:$0xff]  ;;  %v1423_v56 = vld [vmem:[%s4666_s3 + $0x2d0] sm:$0xff] }
 0x15b   : > { %v2559_v0 = vadd.f32 %v1030_v61, %v721_v53  ;;  %v1317_v5 = vmax.f32 %v2556_v55, 0.0  ;;  %v1437_v53 = vld [vmem:[%s4666_s3 + $0x340] sm:$0xff]  ;;  %v1438_v55 = vld [vmem:[%s4666_s3 + $0x348] sm:$0xff]  ;;  %v1424_v58 = vld [vmem:[%s4666_s3 + $0x2d8] sm:$0xff]  ;;  %v2510_v8 = vpack.c.bf16 %v1406_v52, %v1405_v51 }
 0x15c   : > { %v1318_v3 = vmax.f32 %v2557_v60, 0.0  ;;  %v1319_v14 = vmax.f32 %v2558_v23, 0.0  ;;  %v2542_v23 = vpack.c.bf16 %v1438_v55, %v1437_v53  ;;  %v2512_v60 = vpack.c.bf16 %v1424_v58, %v1423_v56  ;;  %v1407_v61 = vld [vmem:[%s4666_s3 + $0x250] sm:$0xff]  ;;  %v1461_v52 = vld [vmem:[%s4667_s4] sm:$0x1] }
 0x15d   : > { %v1320_v36 = vmax.f32 %v2559_v0, 0.0  ;;  %v1440_v0 = vld [vmem:[%s4666_s3 + $0x358] sm:$0xff] }
 0x15e   : > { %1526 = vmatprep.mubr.f32.mxu0 %v1318_v3  ;;  %v1457_v3 = vld [vmem:[%s4666_s3 + $0x3e0] sm:$0xff] }
 0x15f   : > { %1596 = vmatprep.mubr.f32.mxu1 %v1320_v36  ;;  %1527 = vmatmul.mubr.f32.vlgmr.msra.gmra.mrb[4].mxu0 %v1317_v5  ;;  %v2514_v5 = vpack.c.bf16 %v1408_v21, %v1407_v61  ;;  %v2546_v36 = vpack.c.bf16 %v1440_v0, %v1439_v62 }
 0x160   : > { %1597 = vmatmul.mubr.f32.vlgmr.msra.gmra.mrb[4].mxu1 %v1319_v14  ;;  %2495 = vmatpush3.bf16.msra.mxu0 %v2494_v4  ;;  %v1458_v4 = vld [vmem:[%s4666_s3 + $0x3e8] sm:$0xff] }
 0x161   : > { %2527 = vmatpush3.bf16.msra.mxu1 %v2526_v6  ;;  %2497 = vmatprep.subr.bf16.mxu0 %v2496_v10  ;;  %v2516_v6 = vpack.c.bf16 %v1426_v2, %v1425_v1  ;;  %v1409_v10 = vld [vmem:[%s4666_s3 + $0x260] sm:$0xff]  ;;  %v2548_v13 = vpack.c.bf16 %v1458_v4, %v1457_v3  ;;  %v1442_v14 = vld [vmem:[%s4666_s3 + $0x368] sm:$0xff] }
 0x162   : > { %2529 = vmatprep.subr.bf16.mxu1 %v2528_v15  ;;  %v1427_v15 = vld [vmem:[%s4666_s3 + $0x2f0] sm:$0xff]  ;;  %v2518_v18 = vpack.c.bf16 %v1410_v11, %v1409_v10  ;;  %v2550_v20 = vpack.c.bf16 %v1442_v14, %v1441_v12 }
 0x164   : > { %2499 = vmatpush3.bf16.msra.mxu0 %v2498_v24  ;;  %v2520_v24 = vpack.c.bf16 %v1428_v19, %v1427_v15 }
 0x165   : > { %2531 = vmatpush3.bf16.msra.mxu1 %v2530_v25  ;;  %2501 = vmatprep.subr.bf16.mxu0 %v2500_v26  ;;  %v1411_v25 = vld [vmem:[%s4666_s3 + $0x270] sm:$0xff]  ;;  %v1412_v26 = vld [vmem:[%s4666_s3 + $0x278] sm:$0xff] }
 0x166   : > { %2533 = vmatprep.subr.bf16.mxu1 %v2532_v30  ;;  %v2522_v30 = vpack.c.bf16 %v1412_v26, %v1411_v25 }
 0x168   : > { %2503 = vmatpush3.bf16.msra.mxu0 %v2502_v37  ;;  %v725_v37 = vrot.slane %v4411_v49, %v724_v32 }
 0x169   : > { %2535 = vmatpush3.bf16.msra.mxu1 %v2534_v38  ;;  %2505 = vmatprep.subr.bf16.mxu0 %v2504_v39  ;;  %v733_v38 = vrot.slane %v4411_v49, %v732_v33  ;;  %v729_v39 = vrot.slane %v4411_v49, %v728_v34 }
 0x16a   : > { %2537 = vmatprep.subr.bf16.mxu1 %v2536_v42 }
 0x16c   : > { %2507 = vmatpush3.bf16.msra.mxu0 %v2506_v47 }
 0x16d   : > { %2539 = vmatpush3.bf16.msra.mxu1 %v2538_v48  ;;  %2509 = vmatprep.subr.bf16.mxu0 %v2508_v50 }
 0x16e   : > { %2541 = vmatprep.subr.bf16.mxu1 %v2540_v54 }
 0x170   : > { %2511 = vmatpush3.bf16.msra.mxu0 %v2510_v8 }
 0x171   : > { %2543 = vmatpush3.bf16.msra.mxu1 %v2542_v23  ;;  %2513 = vmatprep.subr.bf16.mxu0 %v2512_v60 }
 0x172   : > { %2545 = vmatprep.subr.bf16.mxu1 %v2544_v63 }
 0x174   : > { %2515 = vmatpush3.bf16.msra.mxu0 %v2514_v5 }
 0x175   : > { %2547 = vmatpush3.bf16.msra.mxu1 %v2546_v36  ;;  %2517 = vmatprep.subr.bf16.mxu0 %v2516_v6 }
 0x176   : > { %2549 = vmatprep.subr.bf16.mxu1 %v2548_v13 }
 0x178   : > { %2519 = vmatpush3.bf16.msra.mxu0 %v2518_v18 }
 0x179   : > { %2551 = vmatpush3.bf16.msra.mxu1 %v2550_v20  ;;  %2521 = vmatprep.subr.bf16.mxu0 %v2520_v24 }
 0x17a   : > { %2553 = vmatprep.subr.bf16.mxu1 %v2552_v27 }
 0x17c   : > { %2523 = vmatpush3.bf16.msra.mxu0 %v2522_v30 }
 0x17d   : > { %2555 = vmatpush3.bf16.msra.mxu1 %v2554_v31 }
 0x1cc   : > { %v1170_v40 = vpop.f32.mrb[2].mxu0 }
 0x1cd   : > { %v2560_v41 = vadd.f32 %v1170_v40, %v725_v37  ;;  %v1312_v42 = vpop.f32.mrb[2].mxu1  ;;  %v1172_v43 = vpop.f32.mrb[3].mxu0 }
 0x1ce   : > { %v2562_v44 = vadd.f32 %v1312_v42, %v733_v38  ;;  %v2561_v45 = vadd.f32 %v1172_v43, %v729_v39  ;;  %v1314_v22 = vpop.f32.mrb[3].mxu1 }
 0x1cf   : > { %v2563_v46 = vadd.f32 %v1314_v22, %v737_v7  ;;  %v1321_v48 = vmax.f32 %v2560_v41, 0.0 }
 0x1d0   : > { %v1322_v47 = vmax.f32 %v2561_v45, 0.0  ;;  %v1323_v50 = vmax.f32 %v2562_v44, 0.0 }
 0x1d1   : > { %v1324_v59 = vmax.f32 %v2563_v46, 0.0 }
 0x1d2   : > { %1666 = vmatprep.mubr.f32.mxu0 %v1322_v47 }
 0x1d3   : > { %1736 = vmatprep.mubr.f32.mxu1 %v1324_v59  ;;  %1667 = vmatmul.mubr.f32.vlgmr.msra.gmra.mrb[6].mxu0 %v1321_v48 }
 0x1d4   : > { %1737 = vmatmul.mubr.f32.vlgmr.msra.gmra.mrb[6].mxu1 %v1323_v50 }
 0x232   : > { %v1856_v51 = vpop.f32.mrb[4].mxu0 }
 0x233   : > { %v1891_v49 = vpop.f32.mrb[4].mxu1  ;;  %v1857_v53 = vpop.f32.mrb[5].mxu0 }
 0x234   : > { %v1858_v54 = vadd.f32 %v1857_v53, %v1856_v51  ;;  %v1892_v55 = vpop.f32.mrb[5].mxu1 }
 0x235   : > { %v1893_v56 = vadd.f32 %v1892_v55, %v1891_v49 }
 0x236   : > { %v1529_v58 = vadd.f32 %v1858_v54, %v1461_v52 }
 0x238   : > { %v1599_v9 = vadd.f32 %v1893_v56, %v1529_v58 }
 0x2a6   : > { %v1926_v57 = vpop.f32.mrb[6].mxu0 }
 0x2a7   : > { %v1961_v8 = vpop.f32.mrb[6].mxu1  ;;  %v1927_v23 = vpop.f32.mrb[7].mxu0 }
 0x2a8   : > { %v1928_v60 = vadd.f32 %v1927_v23, %v1926_v57  ;;  %v1962_v61 = vpop.f32.mrb[7].mxu1 }
 0x2a9   : > { %v1963_v21 = vadd.f32 %v1962_v61, %v1961_v8 }
 0x2aa   : > { %v1669_v62 = vadd.f32 %v1928_v60, %v1599_v9 }
 0x2ac   : > { %v1739_v63 = vadd.f32 %v1963_v21, %v1669_v62 }
 0x2ae   : > { %1743 = vst.msk [vmem:[%s214_s23] sm:$0x1] %vm1742_vm1, %v1739_v63 }
 0x2af   : > { %2624 = shalt.err (!%p2621_p3)
}
 0x2b0   : > { %s2625_s9 = scalar_lea.hbm %s4621_s6, 16  ;;  %s2629_s12 = scalar_lea.hbm %s4668_s5, 32 }
 0x2b1   : > { %p2626_p4 = scmp.ne.s32.totalorder %s4621_s6, %s2625_s9  ;;  %p2630_p9 = scmp.lt.u32.totalorder %s4621_s6, %s4668_s5 }
 0x2b2   : > { %p2631_p10 = scmp.lt.u32.totalorder %s2629_s12, %s2625_s9  ;;  %p2633_p12 = scmp.lt.u32.totalorder %s2625_s9, %s4621_s6 }
 0x2b3   : > { %p2627_p7 = pnand %p2626_p4, %p2744_p5 }
 0x2b4   : > { %p2632_p11 = por %p2631_p10, %p2630_p9 }
 0x2b5   : > { %p2628_p8 = pneg %p2627_p7 }
 0x2b6   : > { %p2634_p13 = por %p2633_p12, %p2632_p11 }
 0x2b8   : > { %p2635_p0 = pnand %p2634_p13, %p2628_p8 }
 0x2ba   : > { %2638 = shalt.err (!%p2635_p0)
}
 0x2bb   : > { %2572 = dma.vmem_to_hbm [thread:$0]  (%p2744_p5), %s4623_s26, 16, %s4621_s6, %s1745_s13  }
 0x2bc PF: > { %p2578_p1 = scmp.ge.s32.totalorder %s2673_s21, 2  ;;  %s1769_s17 = sand.u32 1, %s2661_s18  }
 0x2bd   : > { %s1770_s23 = scalar_lea.sflag [#allocation3], %s1769_s17 }
 0x2be   : > { %p2575_p2 = pnand %p2578_p1, %p2748_p6 }
 0x2c0   : > { %2656 = dma.done.wait (!%p2575_p2), %s1770_s23, 16  }
 0x2c1   : > { %2658 = vsyncadd (!%p2575_p2), %s1770_s23, 4294967280  ;;  %p15_p3 = scmp.ge.s32.totalorder %s2731_s24, 4   ;;  %s4671_s18 = smov %s2665_s19 }
 0x2c2   : > { %s4672_s19 = smov %s2669_s20  ;;  %s4673_s20 = smov %s2742_s27 }
 0x2c3   : > { %s4674_s21 = smov %s2731_s24  ;;  %17 = sbr.rel (!%p15_p3) target bundleno = 3 (0x3), region = 75 }
 0x2ca   :  { %1774 = vsyncpa [#allocation3], 1 }
 0x2cb   :  { %1776 = vsyncpa [#allocation3 + $0x1], 1 }

</bundles_post_ra>
